<compile_context>
chip_gen: v6e
topology: v6e:2x2x1
jax: 0.10.0
libtpu: 0.0.40
codegen_flags: <defaults>
</compile_context>

<pallas_src>
import functools

import jax
import jax.numpy as jnp
from jax.experimental import pallas as pl
from jax.experimental.pallas import tpu as pltpu

_BF16 = jnp.bfloat16


# ----------------------------------------------------------------------------
# Helpers
# ----------------------------------------------------------------------------

def _w16(w):
    """Cast a matmul weight to bf16 once, at the pallas_call boundary."""
    return w.astype(_BF16)


def _mxu(a, b):
    """MXU matmul: bf16 operands, f32 accumulation (casts are no-ops for bf16 weights)."""
    return jnp.dot(a.astype(_BF16), b.astype(_BF16), preferred_element_type=jnp.float32)


def _mxu_t(a, b):
    """a @ b.T on the MXU (contract the last dim of both operands)."""
    return jax.lax.dot_general(a.astype(_BF16), b.astype(_BF16),
                               (((1,), (1,)), ((), ())),
                               preferred_element_type=jnp.float32)


def _ln(x, g, b, eps):
    mu = jnp.mean(x, axis=-1, keepdims=True)
    c = x - mu
    var = jnp.mean(c * c, axis=-1, keepdims=True)
    return c * jax.lax.rsqrt(var + eps) * g + b


def _erf_approx(x):
    # TODO(synk): exact nn.GELU uses erf; Mosaic has no guaranteed erf lowering, so we use
    # the Abramowitz-Stegun 7.1.26 rational approximation.  The 1/(1+p*z) divide goes to
    # the EUP via pl.reciprocal(approx=True) per the perf review (~1e-4 abs deviation).
    a1, a2, a3, a4, a5 = 0.254829592, -0.284496736, 1.421413741, -1.453152027, 1.061405429
    p = 0.3275911
    s = jnp.where(x < 0.0, -1.0, 1.0)
    z = jnp.abs(x)
    t = pl.reciprocal(1.0 + p * z, approx=True)
    poly = ((((a5 * t + a4) * t + a3) * t + a2) * t + a1) * t
    return s * (1.0 - poly * jnp.exp(-z * z))


def _gelu(x):
    return 0.5 * x * (1.0 + _erf_approx(x * 0.7071067811865476))


def _row_tiles(m, pref=256):
    """Row tiling: >=2 grid steps even for small M so both of v7x's TensorCores get work
    (no-op cost on v5e/v6e, which have one TC); 256-row tiles with a cdiv grid for large M."""
    if m > pref:
        return pref, pl.cdiv(m, pref)
    if m >= 16:
        tm = (((m + 1) // 2) + 7) // 8 * 8          # round_up(ceil(m/2), 8)
        return tm, pl.cdiv(m, tm)
    return m, 1


# ----------------------------------------------------------------------------
# Patch embedding: one block-diagonal matmul for all variables
# ----------------------------------------------------------------------------

def _patch_embed_kernel(x_ref, w_ref, b_ref, o_ref):
    o_ref[...] = _mxu(x_ref[...], w_ref[...]) + b_ref[...]


def patch_embed_blockdiag(xp_cat, w_bd, b_cat):
    """(BL, V*pp) @ block_diag(per-var patch weights) + (bias + var_embed) -> (BL, V*D)."""
    M, K = xp_cat.shape
    N = w_bd.shape[1]
    tm, nt = _row_tiles(M)
    return pl.pallas_call(
        _patch_embed_kernel,
        out_shape=jax.ShapeDtypeStruct((M, N), jnp.float32),
        grid=(nt,),
        in_specs=[
            pl.BlockSpec((tm, K), lambda i: (i, 0)),
            pl.BlockSpec((K, N), lambda i: (0, 0)),
            pl.BlockSpec((1, N), lambda i: (0, 0)),
        ],
        out_specs=pl.BlockSpec((tm, N), lambda i: (i, 0)),
        compiler_params=pltpu.CompilerParams(dimension_semantics=("parallel",)),
    )(xp_cat, w_bd, b_cat)


# ----------------------------------------------------------------------------
# Variable-aggregation cross-attention (computed transposed: tokens on lanes)
# ----------------------------------------------------------------------------

def _varagg_kernel(xT_ref, wkT_ref, bk_ref, wvT_ref, bv_ref, qm_ref,
                   woT_ref, bo_ref, addT_ref, o_ref, *, num_heads, num_vars):
    D = xT_ref.shape[1]
    nc = xT_ref.shape[2]
    hd = D // num_heads
    wkT = wkT_ref[...]
    wvT = wvT_ref[...]
    bk = bk_ref[...]
    bv = bv_ref[...]
    qm = qm_ref[...]                                     # (nH, D) pre-scaled, head-masked query

    # Per-variable K/V projections and per-head scores with the token axis on LANES.
    vts, svs = [], []
    for v in range(num_vars):
        xv = xT_ref[v]                                   # (D, nc)
        kT = _mxu(wkT, xv) + bk                          # (D, nc)
        vts.append(_mxu(wvT, xv) + bv)                   # (D, nc)
        svs.append(_mxu(qm, kT))                         # (nH, nc)

    # Softmax over the variable axis: elementwise max/exp/sum on full-width (nc-lane) vregs.
    m = svs[0]
    for v in range(1, num_vars):
        m = jnp.maximum(m, svs[v])
    es = [jnp.exp(sv - m) for sv in svs]
    den = es[0]
    for v in range(1, num_vars):
        den = den + es[v]
    rden = pl.reciprocal(den, approx=True)               # (nH, nc)

    # Weighted sum of values: each head's probability row is broadcast (sublane broadcast
    # from 1 row) over its hd channels -- no K=4 head-expansion matmul.
    attp = [jnp.zeros((hd, nc), jnp.float32) for _ in range(num_heads)]
    for v in range(num_vars):
        pv = es[v] * rden                                # (nH, nc)
        vt = vts[v]                                      # (D, nc)
        for hi in range(num_heads):
            attp[hi] = attp[hi] + pv[hi:hi + 1, :] * vt[hi * hd:(hi + 1) * hd, :]
    attT = jnp.concatenate(attp, axis=0)                 # (D, nc)

    # Out-projection (standard matmul, transposed weights) + fused pos/lead-time add.
    o_ref[...] = _mxu(woT_ref[...], attT) + bo_ref[...] + addT_ref[...]


def var_aggregate(xT, wk, bk, wv, bv, qm, wo, bo, addT, *, num_heads):
    """xT: (V, D, N) tokens (token axis N=B*L on lanes); addT: (D, N) pos + lead-time.
    Returns (D, N) = (MHA(var_query, x, x) @ wo + bo).T + addT."""
    V, D, N = xT.shape
    # Chunk the lane axis so v7x's 2 TensorCores both get work (128-multiple chunks are
    # required by the (8,128) block constraint; single step at this toy config).
    nc = N // 2 if N % 256 == 0 else N
    nt = N // nc
    return pl.pallas_call(
        functools.partial(_varagg_kernel, num_heads=num_heads, num_vars=V),
        out_shape=jax.ShapeDtypeStruct((D, N), jnp.float32),
        grid=(nt,),
        in_specs=[
            pl.BlockSpec((V, D, nc), lambda i: (0, 0, i)),
            pl.BlockSpec((D, D), lambda i: (0, 0)),
            pl.BlockSpec((D, 1), lambda i: (0, 0)),
            pl.BlockSpec((D, D), lambda i: (0, 0)),
            pl.BlockSpec((D, 1), lambda i: (0, 0)),
            pl.BlockSpec((num_heads, D), lambda i: (0, 0)),
            pl.BlockSpec((D, D), lambda i: (0, 0)),
            pl.BlockSpec((D, 1), lambda i: (0, 0)),
            pl.BlockSpec((D, nc), lambda i: (0, i)),
        ],
        out_specs=pl.BlockSpec((D, nc), lambda i: (0, i)),
        compiler_params=pltpu.CompilerParams(dimension_semantics=("parallel",)),
    )(xT, _w16(wk.T), bk.reshape(D, 1), _w16(wv.T), bv.reshape(D, 1),
      qm, _w16(wo.T), bo.reshape(D, 1), addT)


# ----------------------------------------------------------------------------
# Transformer block kernel 1: LN1 + QKV + attention + out-proj + residual
# ----------------------------------------------------------------------------

def _blk_attn_kernel(x_ref, g_ref, b_ref, wq_ref, bq_ref, wk_ref, bk_ref,
                     wv_ref, bv_ref, wo_ref, bo_ref, o_ref, *, num_heads, scale, eps):
    x = x_ref[...]                                       # (L, D)
    h = _ln(x, g_ref[...], b_ref[...], eps)
    q = _mxu(h, wq_ref[...]) + bq_ref[...]
    k = _mxu(h, wk_ref[...]) + bk_ref[...]
    v = _mxu(h, wv_ref[...]) + bv_ref[...]
    D = q.shape[-1]
    hd = D // num_heads
    outs = []
    for hi in range(num_heads):
        sl = slice(hi * hd, (hi + 1) * hd)
        s = _mxu_t(q[:, sl], k[:, sl]) * scale           # (L, L)
        s = s - jnp.max(s, axis=-1, keepdims=True)
        p = jnp.exp(s)
        p = p * pl.reciprocal(jnp.sum(p, axis=-1, keepdims=True), approx=True)
        outs.append(_mxu(p, v[:, sl]))                   # (L, hd)
    att = jnp.concatenate(outs, axis=-1)                 # (L, D)
    # ONE full-width out-projection matmul + residual + bias.
    o_ref[...] = x + _mxu(att, wo_ref[...]) + bo_ref[...]


def block_attention(x3, g, b, qkv_w, qkv_b, proj_w, proj_b, *, num_heads, eps=1e-5):
    """Fused [LN1 + QKV + multi-head self-attention + out-proj + residual]; grid over B."""
    B, L, D = x3.shape
    hd = D // num_heads
    scale = 1.0 / float(hd) ** 0.5
    wq, wk, wv = qkv_w[:, :D], qkv_w[:, D:2 * D], qkv_w[:, 2 * D:]
    bq, bk, bv = qkv_b[:D], qkv_b[D:2 * D], qkv_b[2 * D:]

    def cspec(shape):
        return pl.BlockSpec(shape, lambda i: (0, 0))

    return pl.pallas_call(
        functools.partial(_blk_attn_kernel, num_heads=num_heads, scale=scale, eps=eps),
        out_shape=jax.ShapeDtypeStruct((B, L, D), jnp.float32),
        grid=(B,),
        in_specs=[
            pl.BlockSpec((None, L, D), lambda i: (i, 0, 0)),
            cspec((1, D)), cspec((1, D)),
            cspec((D, D)), cspec((1, D)),
            cspec((D, D)), cspec((1, D)),
            cspec((D, D)), cspec((1, D)),
            cspec((D, D)), cspec((1, D)),
        ],
        out_specs=pl.BlockSpec((None, L, D), lambda i: (i, 0, 0)),
        compiler_params=pltpu.CompilerParams(dimension_semantics=("parallel",)),
    )(x3, g.reshape(1, D), b.reshape(1, D),
      _w16(wq), bq.reshape(1, D), _w16(wk), bk.reshape(1, D), _w16(wv), bv.reshape(1, D),
      _w16(proj_w), proj_b.reshape(1, D))


# ----------------------------------------------------------------------------
# Transformer block kernel 2: LN2 + MLP (GELU) + residual
# ----------------------------------------------------------------------------

def _ln_mlp_kernel(x_ref, g_ref, b_ref, w1_ref, b1_ref, w2_ref, b2_ref, o_ref, *, eps):
    x = x_ref[...]
    h = _ln(x, g_ref[...], b_ref[...], eps)
    h = _gelu(_mxu(h, w1_ref[...]) + b1_ref[...])
    o_ref[...] = x + _mxu(h, w2_ref[...]) + b2_ref[...]


def ln_mlp_residual(x, g, b, w1, b1, w2, b2, eps=1e-5):
    M, D = x.shape
    Hd = w1.shape[1]
    tm, nt = _row_tiles(M)
    return pl.pallas_call(
        functools.partial(_ln_mlp_kernel, eps=eps),
        out_shape=jax.ShapeDtypeStruct((M, D), jnp.float32),
        grid=(nt,),
        in_specs=[
            pl.BlockSpec((tm, D), lambda i: (i, 0)),
            pl.BlockSpec((1, D), lambda i: (0, 0)),
            pl.BlockSpec((1, D), lambda i: (0, 0)),
            pl.BlockSpec((D, Hd), lambda i: (0, 0)),
            pl.BlockSpec((1, Hd), lambda i: (0, 0)),
            pl.BlockSpec((Hd, D), lambda i: (0, 0)),
            pl.BlockSpec((1, D), lambda i: (0, 0)),
        ],
        out_specs=pl.BlockSpec((tm, D), lambda i: (i, 0)),
        compiler_params=pltpu.CompilerParams(dimension_semantics=("parallel",)),
    )(x, g.reshape(1, D), b.reshape(1, D), _w16(w1), b1.reshape(1, Hd),
      _w16(w2), b2.reshape(1, D))


# ----------------------------------------------------------------------------
# Final LayerNorm + decoder head
# ----------------------------------------------------------------------------

def _norm_head_kernel(*refs, eps, n_hidden):
    x_ref, g_ref, b_ref = refs[:3]
    o_ref = refs[-1]
    layer_refs = refs[3:-1]
    h = _ln(x_ref[...], g_ref[...], b_ref[...], eps)
    for li in range(n_hidden):
        w_ref, bb_ref = layer_refs[2 * li], layer_refs[2 * li + 1]
        h = _gelu(_mxu(h, w_ref[...]) + bb_ref[...])
    w_ref, bb_ref = layer_refs[-2], layer_refs[-1]
    o_ref[...] = _mxu(h, w_ref[...]) + bb_ref[...]


def norm_head(x, g, b, head_params, eps=1e-5):
    M, D = x.shape
    n_hidden = len(head_params) - 1
    out_dim = head_params[-1][0].shape[1]
    tm, nt = _row_tiles(M)
    in_specs = [
        pl.BlockSpec((tm, D), lambda i: (i, 0)),
        pl.BlockSpec((1, D), lambda i: (0, 0)),
        pl.BlockSpec((1, D), lambda i: (0, 0)),
    ]
    flat_args = []
    for (w, bb) in head_params:
        in_specs.append(pl.BlockSpec(w.shape, lambda i: (0, 0)))
        in_specs.append(pl.BlockSpec((1, bb.shape[0]), lambda i: (0, 0)))
        flat_args += [_w16(w), bb.reshape(1, -1)]
    return pl.pallas_call(
        functools.partial(_norm_head_kernel, eps=eps, n_hidden=n_hidden),
        out_shape=jax.ShapeDtypeStruct((M, out_dim), jnp.float32),
        grid=(nt,),
        in_specs=in_specs,
        out_specs=pl.BlockSpec((tm, out_dim), lambda i: (i, 0)),
        compiler_params=pltpu.CompilerParams(dimension_semantics=("parallel",)),
    )(x, g.reshape(1, D), b.reshape(1, D), *flat_args)


# ----------------------------------------------------------------------------
# Lat-weighted MSE ("loss" entry of lat_weighted_mse with mask=None)
# ----------------------------------------------------------------------------

def _wmse_kernel(p_ref, y_ref, w_ref, o_ref, *, inv_denom, rows_total, tile_rows):
    i = pl.program_id(0)

    @pl.when(i == 0)
    def _():
        o_ref[...] = jnp.zeros_like(o_ref)

    d = p_ref[...] - y_ref[...]
    e = d * d * w_ref[...]
    # Mask rows past the true row count (partial last tile of the cdiv grid).
    rid = jax.lax.broadcasted_iota(jnp.int32, e.shape, 0) + i * tile_rows
    e = jnp.where(rid < rows_total, e, 0.0)
    part = jnp.sum(jnp.sum(e, axis=1, keepdims=True), axis=0, keepdims=True)
    o_ref[...] = o_ref[...] + part * inv_denom


def lat_weighted_mse_loss(pred, y, lat):
    """mean over (B,V,H,W) of (pred-y)^2 * w_lat[H]; w_lat enters as a (1, H*W) row."""
    B, V, H, W = pred.shape
    w_lat = jnp.cos(jnp.deg2rad(lat))
    w_lat = w_lat / jnp.mean(w_lat)
    w_row = jnp.repeat(w_lat, W).reshape(1, H * W)
    rows = B * V
    p2 = pred.reshape(rows, H * W)
    y2 = y.reshape(rows, H * W)
    tr = rows if rows <= 256 else 256
    nt = pl.cdiv(rows, tr)
    out = pl.pallas_call(
        functools.partial(_wmse_kernel, inv_denom=1.0 / float(B * V * H * W),
                          rows_total=rows, tile_rows=tr),
        out_shape=jax.ShapeDtypeStruct((1, 1), jnp.float32),
        grid=(nt,),
        in_specs=[
            pl.BlockSpec((tr, H * W), lambda i: (i, 0)),
            pl.BlockSpec((tr, H * W), lambda i: (i, 0)),
            pl.BlockSpec((1, H * W), lambda i: (0, 0)),
        ],
        out_specs=pl.BlockSpec((1, 1), lambda i: (0, 0)),
        compiler_params=pltpu.CompilerParams(dimension_semantics=("arbitrary",)),
    )(p2, y2, w_row)
    return out[0, 0]


# ----------------------------------------------------------------------------
# Model glue (parameter setup, reshapes)
# ----------------------------------------------------------------------------

def init_params(key, *, num_vars, embed_dim, patch_size, num_patches, depth,
                num_heads, mlp_ratio, decoder_depth):
    D = embed_dim
    pp = patch_size * patch_size
    keys = iter(jax.random.split(key, 128))

    def nrm(shape, scale=0.02):
        return scale * jax.random.normal(next(keys), shape, dtype=jnp.float32)

    params = {}
    params["patch_w"] = nrm((num_vars, pp, D))
    params["patch_b"] = jnp.zeros((num_vars, D), jnp.float32)
    params["var_embed"] = nrm((1, num_vars, D))
    params["var_query"] = nrm((1, 1, D))
    params["agg"] = dict(
        wq=nrm((D, D)), bq=jnp.zeros((D,), jnp.float32),
        wk=nrm((D, D)), bk=jnp.zeros((D,), jnp.float32),
        wv=nrm((D, D)), bv=jnp.zeros((D,), jnp.float32),
        wo=nrm((D, D)), bo=jnp.zeros((D,), jnp.float32),
    )
    params["pos_embed"] = nrm((1, num_patches, D))
    params["lt_w"] = nrm((1, D))
    params["lt_b"] = jnp.zeros((D,), jnp.float32)

    hidden = int(D * mlp_ratio)
    blocks = []
    for _ in range(depth):
        blocks.append(dict(
            ln1_g=jnp.ones((D,), jnp.float32), ln1_b=jnp.zeros((D,), jnp.float32),
            qkv_w=nrm((D, 3 * D)), qkv_b=jnp.zeros((3 * D,), jnp.float32),
            proj_w=nrm((D, D)), proj_b=jnp.zeros((D,), jnp.float32),
            ln2_g=jnp.ones((D,), jnp.float32), ln2_b=jnp.zeros((D,), jnp.float32),
            fc1_w=nrm((D, hidden)), fc1_b=jnp.zeros((hidden,), jnp.float32),
            fc2_w=nrm((hidden, D)), fc2_b=jnp.zeros((D,), jnp.float32),
        ))
    params["blocks"] = blocks
    params["norm_g"] = jnp.ones((D,), jnp.float32)
    params["norm_b"] = jnp.zeros((D,), jnp.float32)

    head = []
    for _ in range(decoder_depth):
        head.append((nrm((D, D)), jnp.zeros((D,), jnp.float32)))
    head.append((nrm((D, num_vars * pp)), jnp.zeros((num_vars * pp,), jnp.float32)))
    params["head"] = head
    return params


def unpatchify(x, img_size, p, c):
    """x: (B, L, c*p*p) -> (B, c, H, W) (matches torch einsum 'nhwpqc->nchpwq')."""
    B = x.shape[0]
    h, w = img_size[0] // p, img_size[1] // p
    x = x.reshape(B, h, w, p, p, c)
    x = jnp.einsum('nhwpqc->nchpwq', x)
    return x.reshape(B, c, h * p, w * p)


def climax_forward(x, lead_times, y, *, params, cfg, variables, training=True):
    """Mirrors ClimaX.forward((x, lead_times, variables, y)).
    training=True (nn.Module default) -> scalar lat-weighted MSE loss; else preds."""
    B, Vi, H, W = x.shape
    p = cfg["patch_size"]
    D = cfg["embed_dim"]
    nH = cfg["num_heads"]
    hd = D // nH
    var_map = cfg["var_map"]
    ids = jnp.asarray([var_map[v] for v in variables])
    L = (H // p) * (W // p)
    BL = B * L
    pp = p * p

    # --- per-variable patch embedding as ONE block-diagonal matmul ---
    pw = params["patch_w"][ids]                                        # (Vi, pp, D)
    w_bd = jnp.einsum('vpd,vw->vpwd', pw, jnp.eye(Vi, dtype=pw.dtype))
    w_bd = w_bd.reshape(Vi * pp, Vi * D)
    b_cat = (params["patch_b"][ids] + params["var_embed"][0, ids]).reshape(1, Vi * D)
    xp = x.reshape(B, Vi, H // p, p, W // p, p)
    xp = xp.transpose(0, 2, 4, 1, 3, 5).reshape(BL, Vi * pp)           # (BL, Vi*pp)
    tokens = patch_embed_blockdiag(xp, _w16(w_bd), b_cat)              # (BL, Vi*D)

    # --- variable aggregation (fused cross-attention), pos + lead-time add fused ---
    agg = params["agg"]
    scale = 1.0 / float(hd) ** 0.5
    # 1xD query projection and rank-1 lead-time embed: XLA glue (too small for a kernel).
    q_proj = (params["var_query"].reshape(1, D) @ agg["wq"] + agg["bq"]).reshape(D)
    head_mask = (jnp.arange(D)[None, :] // hd ==
                 jnp.arange(nH)[:, None]).astype(jnp.float32)          # (nH, D)
    qm = (scale * q_proj)[None, :] * head_mask                         # (nH, D)
    lt_emb = lead_times[:, None] * params["lt_w"] + params["lt_b"]     # (B, D)
    add = (params["pos_embed"] + lt_emb[:, None, :]).reshape(BL, D)    # (BL, D)
    xT = tokens.reshape(BL, Vi, D).transpose(1, 2, 0)                  # (Vi, D, BL)
    outT = var_aggregate(xT, agg["wk"], agg["bk"], agg["wv"], agg["bv"], qm,
                         agg["wo"], agg["bo"], add.T, num_heads=nH)    # (D, BL)
    xt = outT.T                                                        # (BL, D)

    # --- transformer blocks: 2 fused pallas_calls per block ---
    for blk in params["blocks"]:
        xt = block_attention(xt.reshape(B, L, D), blk["ln1_g"], blk["ln1_b"],
                             blk["qkv_w"], blk["qkv_b"], blk["proj_w"], blk["proj_b"],
                             num_heads=nH).reshape(BL, D)
        xt = ln_mlp_residual(xt, blk["ln2_g"], blk["ln2_b"],
                             blk["fc1_w"], blk["fc1_b"], blk["fc2_w"], blk["fc2_b"])

    # --- final norm + decoder head (fused) ---
    preds_flat = norm_head(xt, params["norm_g"], params["norm_b"], params["head"])
    preds = unpatchify(preds_flat.reshape(B, L, -1), cfg["img_size"], p,
                       cfg["num_default_vars"])
    out_ids = jnp.asarray([var_map[v] for v in cfg["out_variables"]])
    preds = preds[:, out_ids]                                          # (B, Vo, H, W)

    if training:
        return lat_weighted_mse_loss(preds, y, cfg["lat"])
    return preds


# ----------------------------------------------------------------------------
# Main
# ----------------------------------------------------------------------------

if __name__ == "__main__":
    default_vars = [
        '2m_temperature', '10m_u_component_of_wind', '10m_v_component_of_wind',
        'geopotential_500', 'temperature_850', 'specific_humidity_850',
    ]
    out_variables = [
        'geopotential_500', 'temperature_850', '2m_temperature',
        '10m_u_component_of_wind', '10m_v_component_of_wind',
    ]
    img_size = [16, 16]
    patch_size = 2
    embed_dim = 64
    depth = 2
    decoder_depth = 2
    num_heads = 4
    mlp_ratio = 4.0

    H, W = img_size
    num_patches = (H // patch_size) * (W // patch_size)
    var_map = {v: i for i, v in enumerate(default_vars)}
    cfg = dict(
        patch_size=patch_size, embed_dim=embed_dim, num_heads=num_heads,
        img_size=img_size, var_map=var_map, num_default_vars=len(default_vars),
        out_variables=out_variables,
        # Reference module uses np.random.rand(32) for lat; we use a deterministic
        # latitude grid of length H instead.
        lat=jnp.linspace(-80.0, 80.0, H, dtype=jnp.float32),
    )

    key = jax.random.PRNGKey(0)
    kp, kx, ky, kl = jax.random.split(key, 4)
    params = init_params(
        kp, num_vars=len(default_vars), embed_dim=embed_dim, patch_size=patch_size,
        num_patches=num_patches, depth=depth, num_heads=num_heads,
        mlp_ratio=mlp_ratio, decoder_depth=decoder_depth)

    B = 2
    x = jax.random.normal(kx, (B, len(default_vars), H, W), dtype=jnp.float32)
    y = jax.random.normal(ky, (B, len(out_variables), H, W), dtype=jnp.float32)
    lead_times = jax.random.uniform(kl, (B,), dtype=jnp.float32) * 72.0
    variables = tuple(default_vars)

    fwd = jax.jit(
        functools.partial(climax_forward, params=params, cfg=cfg),
        static_argnames=("variables", "training"),
    )
    # nn.Module default is training mode -> forward returns the scalar loss.
    loss = fwd(x, lead_times, y, variables=variables, training=True)
    loss = jax.block_until_ready(loss)
    assert loss.shape == () and bool(jnp.isfinite(loss))
    print("KERNEL_OK")
</pallas_src>

<mosaic_0001>
module attributes {stable_mosaic.version = 11 : i64} {
  func.func @_patch_embed_kernel(%arg0: i32, %arg1: memref<64x24xf32, #tpu.memory_space<vmem>>, %arg2: memref<24x384xbf16, #tpu.memory_space<vmem>>, %arg3: memref<1x384xf32, #tpu.memory_space<vmem>>, %arg4: memref<64x384xf32, #tpu.memory_space<vmem>>) attributes {dimension_semantics = [#tpu.dimension_semantics<parallel>], iteration_bounds = array<i64: 2>, scalar_prefetch = 0 : i64, scratch_operands = 0 : i64, tpu.core_type = #tpu.core_type<tc>, window_params = [{transform_indices = @transform_0, window_bounds = array<i64: 64, 24>}, {pipeline_mode = #tpu.pipeline_mode<synchronous>, transform_indices = @transform_1, window_bounds = array<i64: 24, 384>}, {pipeline_mode = #tpu.pipeline_mode<synchronous>, transform_indices = @transform_2, window_bounds = array<i64: 1, 384>}, {transform_indices = @transform_3, window_bounds = array<i64: 64, 384>}]} {
    %c0 = arith.constant 0 : index
    %c0_0 = arith.constant 0 : index
    %0 = vector.load %arg1[%c0, %c0_0] : memref<64x24xf32, #tpu.memory_space<vmem>>, vector<64x24xf32>
    %c0_1 = arith.constant 0 : index
    %c0_2 = arith.constant 0 : index
    %1 = vector.load %arg2[%c0_1, %c0_2] : memref<24x384xbf16, #tpu.memory_space<vmem>>, vector<24x384xbf16>
    %2 = arith.truncf %0 : vector<64x24xf32> to vector<64x24xbf16>
    %cst = arith.constant dense<0.000000e+00> : vector<64x384xf32>
    %3 = tpu.matmul %2, %1, %cst {dimension_numbers = #tpu.dot_dimension_numbers<[1], [0], [0], [1], [0, 0, 1, 1], [], []>} : vector<64x24xbf16>, vector<24x384xbf16>, vector<64x384xf32> -> vector<64x384xf32>
    %c0_3 = arith.constant 0 : index
    %c0_4 = arith.constant 0 : index
    %4 = vector.load %arg3[%c0_3, %c0_4] : memref<1x384xf32, #tpu.memory_space<vmem>>, vector<1x384xf32>
    %5 = vector.broadcast %4 : vector<1x384xf32> to vector<64x384xf32>
    %6 = arith.addf %3, %5 : vector<64x384xf32>
    %c0_5 = arith.constant 0 : index
    %c0_6 = arith.constant 0 : index
    %7 = vector.load %arg4[%c0_5, %c0_6] : memref<64x384xf32, #tpu.memory_space<vmem>>, vector<64x384xf32>
    tpu.vector_store %arg4[%c0_5, %c0_6], %6 {strides = array<i32>} : memref<64x384xf32, #tpu.memory_space<vmem>>, vector<64x384xf32>,
    return
  }
  func.func @transform_0(%arg0: i32) -> (i32, i32) {
    %c0_i32 = arith.constant 0 : i32
    %c0_i32_0 = arith.constant 0 : i32
    return %arg0, %c0_i32 : i32, i32
  }
  func.func @transform_1(%arg0: i32) -> (i32, i32) {
    %c0_i32 = arith.constant 0 : i32
    %c0_i32_0 = arith.constant 0 : i32
    %c0_i32_1 = arith.constant 0 : i32
    return %c0_i32, %c0_i32_0 : i32, i32
  }
  func.func @transform_2(%arg0: i32) -> (i32, i32) {
    %c0_i32 = arith.constant 0 : i32
    %c0_i32_0 = arith.constant 0 : i32
    %c0_i32_1 = arith.constant 0 : i32
    return %c0_i32, %c0_i32_0 : i32, i32
  }
  func.func @transform_3(%arg0: i32) -> (i32, i32) {
    %c0_i32 = arith.constant 0 : i32
    %c0_i32_0 = arith.constant 0 : i32
    return %arg0, %c0_i32 : i32, i32
  }
}

module attributes {stable_mosaic.version = 11 : i64} {
  func.func @_varagg_kernel(%arg0: i32, %arg1: memref<6x64x128xf32, #tpu.memory_space<vmem>>, %arg2: memref<64x64xbf16, #tpu.memory_space<vmem>>, %arg3: memref<64x1xf32, #tpu.memory_space<vmem>>, %arg4: memref<64x64xbf16, #tpu.memory_space<vmem>>, %arg5: memref<64x1xf32, #tpu.memory_space<vmem>>, %arg6: memref<4x64xf32, #tpu.memory_space<vmem>>, %arg7: memref<64x64xbf16, #tpu.memory_space<vmem>>, %arg8: memref<64x1xf32, #tpu.memory_space<vmem>>, %arg9: memref<64x128xf32, #tpu.memory_space<vmem>>, %arg10: memref<64x128xf32, #tpu.memory_space<vmem>>) attributes {dimension_semantics = [#tpu.dimension_semantics<parallel>], iteration_bounds = array<i64: 1>, scalar_prefetch = 0 : i64, scratch_operands = 0 : i64, tpu.core_type = #tpu.core_type<tc>, window_params = [{transform_indices = @transform_0, window_bounds = array<i64: 6, 64, 128>}, {pipeline_mode = #tpu.pipeline_mode<synchronous>, transform_indices = @transform_1, window_bounds = array<i64: 64, 64>}, {pipeline_mode = #tpu.pipeline_mode<synchronous>, transform_indices = @transform_2, window_bounds = array<i64: 64, 1>}, {pipeline_mode = #tpu.pipeline_mode<synchronous>, transform_indices = @transform_3, window_bounds = array<i64: 64, 64>}, {pipeline_mode = #tpu.pipeline_mode<synchronous>, transform_indices = @transform_4, window_bounds = array<i64: 64, 1>}, {pipeline_mode = #tpu.pipeline_mode<synchronous>, transform_indices = @transform_5, window_bounds = array<i64: 4, 64>}, {pipeline_mode = #tpu.pipeline_mode<synchronous>, transform_indices = @transform_6, window_bounds = array<i64: 64, 64>}, {pipeline_mode = #tpu.pipeline_mode<synchronous>, transform_indices = @transform_7, window_bounds = array<i64: 64, 1>}, {transform_indices = @transform_8, window_bounds = array<i64: 64, 128>}, {transform_indices = @transform_9, window_bounds = array<i64: 64, 128>}]} {
    %c0 = arith.constant 0 : index
    %c0_0 = arith.constant 0 : index
    %0 = vector.load %arg2[%c0, %c0_0] : memref<64x64xbf16, #tpu.memory_space<vmem>>, vector<64x64xbf16>
    %c0_1 = arith.constant 0 : index
    %c0_2 = arith.constant 0 : index
    %1 = vector.load %arg4[%c0_1, %c0_2] : memref<64x64xbf16, #tpu.memory_space<vmem>>, vector<64x64xbf16>
    %c0_3 = arith.constant 0 : index
    %c0_4 = arith.constant 0 : index
    %2 = vector.load %arg3[%c0_3, %c0_4] : memref<64x1xf32, #tpu.memory_space<vmem>>, vector<64x1xf32>
    %c0_5 = arith.constant 0 : index
    %c0_6 = arith.constant 0 : index
    %3 = vector.load %arg5[%c0_5, %c0_6] : memref<64x1xf32, #tpu.memory_space<vmem>>, vector<64x1xf32>
    %c0_7 = arith.constant 0 : index
    %c0_8 = arith.constant 0 : index
    %4 = vector.load %arg6[%c0_7, %c0_8] : memref<4x64xf32, #tpu.memory_space<vmem>>, vector<4x64xf32>
    %c0_9 = arith.constant 0 : index
    %c0_10 = arith.constant 0 : index
    %c0_11 = arith.constant 0 : index
    %5 = vector.load %arg1[%c0_9, %c0_10, %c0_11] : memref<6x64x128xf32, #tpu.memory_space<vmem>>, vector<1x64x128xf32>
    %6 = vector.shape_cast %5 : vector<1x64x128xf32> to vector<64x128xf32>
    %7 = arith.truncf %6 : vector<64x128xf32> to vector<64x128xbf16>
    %cst = arith.constant dense<0.000000e+00> : vector<64x128xf32>
    %8 = tpu.matmul %0, %7, %cst {dimension_numbers = #tpu.dot_dimension_numbers<[1], [0], [0], [1], [0, 0, 1, 1], [], []>} : vector<64x64xbf16>, vector<64x128xbf16>, vector<64x128xf32> -> vector<64x128xf32>
    %9 = vector.broadcast %2 : vector<64x1xf32> to vector<64x128xf32>
    %10 = arith.addf %8, %9 : vector<64x128xf32>
    %11 = arith.truncf %6 : vector<64x128xf32> to vector<64x128xbf16>
    %cst_12 = arith.constant dense<0.000000e+00> : vector<64x128xf32>
    %12 = tpu.matmul %1, %11, %cst_12 {dimension_numbers = #tpu.dot_dimension_numbers<[1], [0], [0], [1], [0, 0, 1, 1], [], []>} : vector<64x64xbf16>, vector<64x128xbf16>, vector<64x128xf32> -> vector<64x128xf32>
    %13 = vector.broadcast %3 : vector<64x1xf32> to vector<64x128xf32>
    %14 = arith.addf %12, %13 : vector<64x128xf32>
    %15 = arith.truncf %4 : vector<4x64xf32> to vector<4x64xbf16>
    %16 = arith.truncf %10 : vector<64x128xf32> to vector<64x128xbf16>
    %cst_13 = arith.constant dense<0.000000e+00> : vector<4x128xf32>
    %17 = tpu.matmul %15, %16, %cst_13 {dimension_numbers = #tpu.dot_dimension_numbers<[1], [0], [0], [1], [0, 0, 1, 1], [], []>} : vector<4x64xbf16>, vector<64x128xbf16>, vector<4x128xf32> -> vector<4x128xf32>
    %c1 = arith.constant 1 : index
    %c0_14 = arith.constant 0 : index
    %c0_15 = arith.constant 0 : index
    %18 = vector.load %arg1[%c1, %c0_14, %c0_15] : memref<6x64x128xf32, #tpu.memory_space<vmem>>, vector<1x64x128xf32>
    %19 = vector.shape_cast %18 : vector<1x64x128xf32> to vector<64x128xf32>
    %20 = arith.truncf %19 : vector<64x128xf32> to vector<64x128xbf16>
    %cst_16 = arith.constant dense<0.000000e+00> : vector<64x128xf32>
    %21 = tpu.matmul %0, %20, %cst_16 {dimension_numbers = #tpu.dot_dimension_numbers<[1], [0], [0], [1], [0, 0, 1, 1], [], []>} : vector<64x64xbf16>, vector<64x128xbf16>, vector<64x128xf32> -> vector<64x128xf32>
    %22 = vector.broadcast %2 : vector<64x1xf32> to vector<64x128xf32>
    %23 = arith.addf %21, %22 : vector<64x128xf32>
    %24 = arith.truncf %19 : vector<64x128xf32> to vector<64x128xbf16>
    %cst_17 = arith.constant dense<0.000000e+00> : vector<64x128xf32>
    %25 = tpu.matmul %1, %24, %cst_17 {dimension_numbers = #tpu.dot_dimension_numbers<[1], [0], [0], [1], [0, 0, 1, 1], [], []>} : vector<64x64xbf16>, vector<64x128xbf16>, vector<64x128xf32> -> vector<64x128xf32>
    %26 = vector.broadcast %3 : vector<64x1xf32> to vector<64x128xf32>
    %27 = arith.addf %25, %26 : vector<64x128xf32>
    %28 = arith.truncf %4 : vector<4x64xf32> to vector<4x64xbf16>
    %29 = arith.truncf %23 : vector<64x128xf32> to vector<64x128xbf16>
    %cst_18 = arith.constant dense<0.000000e+00> : vector<4x128xf32>
    %30 = tpu.matmul %28, %29, %cst_18 {dimension_numbers = #tpu.dot_dimension_numbers<[1], [0], [0], [1], [0, 0, 1, 1], [], []>} : vector<4x64xbf16>, vector<64x128xbf16>, vector<4x128xf32> -> vector<4x128xf32>
    %c2 = arith.constant 2 : index
    %c0_19 = arith.constant 0 : index
    %c0_20 = arith.constant 0 : index
    %31 = vector.load %arg1[%c2, %c0_19, %c0_20] : memref<6x64x128xf32, #tpu.memory_space<vmem>>, vector<1x64x128xf32>
    %32 = vector.shape_cast %31 : vector<1x64x128xf32> to vector<64x128xf32>
    %33 = arith.truncf %32 : vector<64x128xf32> to vector<64x128xbf16>
    %cst_21 = arith.constant dense<0.000000e+00> : vector<64x128xf32>
    %34 = tpu.matmul %0, %33, %cst_21 {dimension_numbers = #tpu.dot_dimension_numbers<[1], [0], [0], [1], [0, 0, 1, 1], [], []>} : vector<64x64xbf16>, vector<64x128xbf16>, vector<64x128xf32> -> vector<64x128xf32>
    %35 = vector.broadcast %2 : vector<64x1xf32> to vector<64x128xf32>
    %36 = arith.addf %34, %35 : vector<64x128xf32>
    %37 = arith.truncf %32 : vector<64x128xf32> to vector<64x128xbf16>
    %cst_22 = arith.constant dense<0.000000e+00> : vector<64x128xf32>
    %38 = tpu.matmul %1, %37, %cst_22 {dimension_numbers = #tpu.dot_dimension_numbers<[1], [0], [0], [1], [0, 0, 1, 1], [], []>} : vector<64x64xbf16>, vector<64x128xbf16>, vector<64x128xf32> -> vector<64x128xf32>
    %39 = vector.broadcast %3 : vector<64x1xf32> to vector<64x128xf32>
    %40 = arith.addf %38, %39 : vector<64x128xf32>
    %41 = arith.truncf %4 : vector<4x64xf32> to vector<4x64xbf16>
    %42 = arith.truncf %36 : vector<64x128xf32> to vector<64x128xbf16>
    %cst_23 = arith.constant dense<0.000000e+00> : vector<4x128xf32>
    %43 = tpu.matmul %41, %42, %cst_23 {dimension_numbers = #tpu.dot_dimension_numbers<[1], [0], [0], [1], [0, 0, 1, 1], [], []>} : vector<4x64xbf16>, vector<64x128xbf16>, vector<4x128xf32> -> vector<4x128xf32>
    %c3 = arith.constant 3 : index
    %c0_24 = arith.constant 0 : index
    %c0_25 = arith.constant 0 : index
    %44 = vector.load %arg1[%c3, %c0_24, %c0_25] : memref<6x64x128xf32, #tpu.memory_space<vmem>>, vector<1x64x128xf32>
    %45 = vector.shape_cast %44 : vector<1x64x128xf32> to vector<64x128xf32>
    %46 = arith.truncf %45 : vector<64x128xf32> to vector<64x128xbf16>
    %cst_26 = arith.constant dense<0.000000e+00> : vector<64x128xf32>
    %47 = tpu.matmul %0, %46, %cst_26 {dimension_numbers = #tpu.dot_dimension_numbers<[1], [0], [0], [1], [0, 0, 1, 1], [], []>} : vector<64x64xbf16>, vector<64x128xbf16>, vector<64x128xf32> -> vector<64x128xf32>
    %48 = vector.broadcast %2 : vector<64x1xf32> to vector<64x128xf32>
    %49 = arith.addf %47, %48 : vector<64x128xf32>
    %50 = arith.truncf %45 : vector<64x128xf32> to vector<64x128xbf16>
    %cst_27 = arith.constant dense<0.000000e+00> : vector<64x128xf32>
    %51 = tpu.matmul %1, %50, %cst_27 {dimension_numbers = #tpu.dot_dimension_numbers<[1], [0], [0], [1], [0, 0, 1, 1], [], []>} : vector<64x64xbf16>, vector<64x128xbf16>, vector<64x128xf32> -> vector<64x128xf32>
    %52 = vector.broadcast %3 : vector<64x1xf32> to vector<64x128xf32>
    %53 = arith.addf %51, %52 : vector<64x128xf32>
    %54 = arith.truncf %4 : vector<4x64xf32> to vector<4x64xbf16>
    %55 = arith.truncf %49 : vector<64x128xf32> to vector<64x128xbf16>
    %cst_28 = arith.constant dense<0.000000e+00> : vector<4x128xf32>
    %56 = tpu.matmul %54, %55, %cst_28 {dimension_numbers = #tpu.dot_dimension_numbers<[1], [0], [0], [1], [0, 0, 1, 1], [], []>} : vector<4x64xbf16>, vector<64x128xbf16>, vector<4x128xf32> -> vector<4x128xf32>
    %c4 = arith.constant 4 : index
    %c0_29 = arith.constant 0 : index
    %c0_30 = arith.constant 0 : index
    %57 = vector.load %arg1[%c4, %c0_29, %c0_30] : memref<6x64x128xf32, #tpu.memory_space<vmem>>, vector<1x64x128xf32>
    %58 = vector.shape_cast %57 : vector<1x64x128xf32> to vector<64x128xf32>
    %59 = arith.truncf %58 : vector<64x128xf32> to vector<64x128xbf16>
    %cst_31 = arith.constant dense<0.000000e+00> : vector<64x128xf32>
    %60 = tpu.matmul %0, %59, %cst_31 {dimension_numbers = #tpu.dot_dimension_numbers<[1], [0], [0], [1], [0, 0, 1, 1], [], []>} : vector<64x64xbf16>, vector<64x128xbf16>, vector<64x128xf32> -> vector<64x128xf32>
    %61 = vector.broadcast %2 : vector<64x1xf32> to vector<64x128xf32>
    %62 = arith.addf %60, %61 : vector<64x128xf32>
    %63 = arith.truncf %58 : vector<64x128xf32> to vector<64x128xbf16>
    %cst_32 = arith.constant dense<0.000000e+00> : vector<64x128xf32>
    %64 = tpu.matmul %1, %63, %cst_32 {dimension_numbers = #tpu.dot_dimension_numbers<[1], [0], [0], [1], [0, 0, 1, 1], [], []>} : vector<64x64xbf16>, vector<64x128xbf16>, vector<64x128xf32> -> vector<64x128xf32>
    %65 = vector.broadcast %3 : vector<64x1xf32> to vector<64x128xf32>
    %66 = arith.addf %64, %65 : vector<64x128xf32>
    %67 = arith.truncf %4 : vector<4x64xf32> to vector<4x64xbf16>
    %68 = arith.truncf %62 : vector<64x128xf32> to vector<64x128xbf16>
    %cst_33 = arith.constant dense<0.000000e+00> : vector<4x128xf32>
    %69 = tpu.matmul %67, %68, %cst_33 {dimension_numbers = #tpu.dot_dimension_numbers<[1], [0], [0], [1], [0, 0, 1, 1], [], []>} : vector<4x64xbf16>, vector<64x128xbf16>, vector<4x128xf32> -> vector<4x128xf32>
    %c5 = arith.constant 5 : index
    %c0_34 = arith.constant 0 : index
    %c0_35 = arith.constant 0 : index
    %70 = vector.load %arg1[%c5, %c0_34, %c0_35] : memref<6x64x128xf32, #tpu.memory_space<vmem>>, vector<1x64x128xf32>
    %71 = vector.shape_cast %70 : vector<1x64x128xf32> to vector<64x128xf32>
    %72 = arith.truncf %71 : vector<64x128xf32> to vector<64x128xbf16>
    %cst_36 = arith.constant dense<0.000000e+00> : vector<64x128xf32>
    %73 = tpu.matmul %0, %72, %cst_36 {dimension_numbers = #tpu.dot_dimension_numbers<[1], [0], [0], [1], [0, 0, 1, 1], [], []>} : vector<64x64xbf16>, vector<64x128xbf16>, vector<64x128xf32> -> vector<64x128xf32>
    %74 = vector.broadcast %2 : vector<64x1xf32> to vector<64x128xf32>
    %75 = arith.addf %73, %74 : vector<64x128xf32>
    %76 = arith.truncf %71 : vector<64x128xf32> to vector<64x128xbf16>
    %cst_37 = arith.constant dense<0.000000e+00> : vector<64x128xf32>
    %77 = tpu.matmul %1, %76, %cst_37 {dimension_numbers = #tpu.dot_dimension_numbers<[1], [0], [0], [1], [0, 0, 1, 1], [], []>} : vector<64x64xbf16>, vector<64x128xbf16>, vector<64x128xf32> -> vector<64x128xf32>
    %78 = vector.broadcast %3 : vector<64x1xf32> to vector<64x128xf32>
    %79 = arith.addf %77, %78 : vector<64x128xf32>
    %80 = arith.truncf %4 : vector<4x64xf32> to vector<4x64xbf16>
    %81 = arith.truncf %75 : vector<64x128xf32> to vector<64x128xbf16>
    %cst_38 = arith.constant dense<0.000000e+00> : vector<4x128xf32>
    %82 = tpu.matmul %80, %81, %cst_38 {dimension_numbers = #tpu.dot_dimension_numbers<[1], [0], [0], [1], [0, 0, 1, 1], [], []>} : vector<4x64xbf16>, vector<64x128xbf16>, vector<4x128xf32> -> vector<4x128xf32>
    %83 = arith.maximumf %17, %30 : vector<4x128xf32>
    %84 = arith.maximumf %83, %43 : vector<4x128xf32>
    %85 = arith.maximumf %84, %56 : vector<4x128xf32>
    %86 = arith.maximumf %85, %69 : vector<4x128xf32>
    %87 = arith.maximumf %86, %82 : vector<4x128xf32>
    %88 = arith.subf %17, %87 : vector<4x128xf32>
    %89 = math.exp %88 : vector<4x128xf32>
    %90 = arith.subf %30, %87 : vector<4x128xf32>
    %91 = math.exp %90 : vector<4x128xf32>
    %92 = arith.subf %43, %87 : vector<4x128xf32>
    %93 = math.exp %92 : vector<4x128xf32>
    %94 = arith.subf %56, %87 : vector<4x128xf32>
    %95 = math.exp %94 : vector<4x128xf32>
    %96 = arith.subf %69, %87 : vector<4x128xf32>
    %97 = math.exp %96 : vector<4x128xf32>
    %98 = arith.subf %82, %87 : vector<4x128xf32>
    %99 = math.exp %98 : vector<4x128xf32>
    %100 = arith.addf %89, %91 : vector<4x128xf32>
    %101 = arith.addf %100, %93 : vector<4x128xf32>
    %102 = arith.addf %101, %95 : vector<4x128xf32>
    %103 = arith.addf %102, %97 : vector<4x128xf32>
    %104 = arith.addf %103, %99 : vector<4x128xf32>
    %105 = tpu.reciprocal %104 {approx = true} : vector<4x128xf32> -> vector<4x128xf32>
    %cst_39 = arith.constant 0.000000e+00 : f32
    %106 = vector.broadcast %cst_39 : f32 to vector<16x128xf32>
    %cst_40 = arith.constant 0.000000e+00 : f32
    %107 = vector.broadcast %cst_40 : f32 to vector<16x128xf32>
    %cst_41 = arith.constant 0.000000e+00 : f32
    %108 = vector.broadcast %cst_41 : f32 to vector<16x128xf32>
    %cst_42 = arith.constant 0.000000e+00 : f32
    %109 = vector.broadcast %cst_42 : f32 to vector<16x128xf32>
    %110 = arith.mulf %89, %105 : vector<4x128xf32>
    %111 = vector.extract_strided_slice %110 {offsets = [0, 0], sizes = [1, 128], strides = [1, 1]} : vector<4x128xf32> to vector<1x128xf32>
    %112 = vector.extract_strided_slice %14 {offsets = [0, 0], sizes = [16, 128], strides = [1, 1]} : vector<64x128xf32> to vector<16x128xf32>
    %113 = vector.broadcast %111 : vector<1x128xf32> to vector<16x128xf32>
    %114 = arith.mulf %113, %112 : vector<16x128xf32>
    %115 = arith.addf %106, %114 : vector<16x128xf32>
    %116 = vector.extract_strided_slice %110 {offsets = [1, 0], sizes = [1, 128], strides = [1, 1]} : vector<4x128xf32> to vector<1x128xf32>
    %117 = vector.extract_strided_slice %14 {offsets = [16, 0], sizes = [16, 128], strides = [1, 1]} : vector<64x128xf32> to vector<16x128xf32>
    %118 = vector.broadcast %116 : vector<1x128xf32> to vector<16x128xf32>
    %119 = arith.mulf %118, %117 : vector<16x128xf32>
    %120 = arith.addf %107, %119 : vector<16x128xf32>
    %121 = vector.extract_strided_slice %110 {offsets = [2, 0], sizes = [1, 128], strides = [1, 1]} : vector<4x128xf32> to vector<1x128xf32>
    %122 = vector.extract_strided_slice %14 {offsets = [32, 0], sizes = [16, 128], strides = [1, 1]} : vector<64x128xf32> to vector<16x128xf32>
    %123 = vector.broadcast %121 : vector<1x128xf32> to vector<16x128xf32>
    %124 = arith.mulf %123, %122 : vector<16x128xf32>
    %125 = arith.addf %108, %124 : vector<16x128xf32>
    %126 = vector.extract_strided_slice %110 {offsets = [3, 0], sizes = [1, 128], strides = [1, 1]} : vector<4x128xf32> to vector<1x128xf32>
    %127 = vector.extract_strided_slice %14 {offsets = [48, 0], sizes = [16, 128], strides = [1, 1]} : vector<64x128xf32> to vector<16x128xf32>
    %128 = vector.broadcast %126 : vector<1x128xf32> to vector<16x128xf32>
    %129 = arith.mulf %128, %127 : vector<16x128xf32>
    %130 = arith.addf %109, %129 : vector<16x128xf32>
    %131 = arith.mulf %91, %105 : vector<4x128xf32>
    %132 = vector.extract_strided_slice %131 {offsets = [0, 0], sizes = [1, 128], strides = [1, 1]} : vector<4x128xf32> to vector<1x128xf32>
    %133 = vector.extract_strided_slice %27 {offsets = [0, 0], sizes = [16, 128], strides = [1, 1]} : vector<64x128xf32> to vector<16x128xf32>
    %134 = vector.broadcast %132 : vector<1x128xf32> to vector<16x128xf32>
    %135 = arith.mulf %134, %133 : vector<16x128xf32>
    %136 = arith.addf %115, %135 : vector<16x128xf32>
    %137 = vector.extract_strided_slice %131 {offsets = [1, 0], sizes = [1, 128], strides = [1, 1]} : vector<4x128xf32> to vector<1x128xf32>
    %138 = vector.extract_strided_slice %27 {offsets = [16, 0], sizes = [16, 128], strides = [1, 1]} : vector<64x128xf32> to vector<16x128xf32>
    %139 = vector.broadcast %137 : vector<1x128xf32> to vector<16x128xf32>
    %140 = arith.mulf %139, %138 : vector<16x128xf32>
    %141 = arith.addf %120, %140 : vector<16x128xf32>
    %142 = vector.extract_strided_slice %131 {offsets = [2, 0], sizes = [1, 128], strides = [1, 1]} : vector<4x128xf32> to vector<1x128xf32>
    %143 = vector.extract_strided_slice %27 {offsets = [32, 0], sizes = [16, 128], strides = [1, 1]} : vector<64x128xf32> to vector<16x128xf32>
    %144 = vector.broadcast %142 : vector<1x128xf32> to vector<16x128xf32>
    %145 = arith.mulf %144, %143 : vector<16x128xf32>
    %146 = arith.addf %125, %145 : vector<16x128xf32>
    %147 = vector.extract_strided_slice %131 {offsets = [3, 0], sizes = [1, 128], strides = [1, 1]} : vector<4x128xf32> to vector<1x128xf32>
    %148 = vector.extract_strided_slice %27 {offsets = [48, 0], sizes = [16, 128], strides = [1, 1]} : vector<64x128xf32> to vector<16x128xf32>
    %149 = vector.broadcast %147 : vector<1x128xf32> to vector<16x128xf32>
    %150 = arith.mulf %149, %148 : vector<16x128xf32>
    %151 = arith.addf %130, %150 : vector<16x128xf32>
    %152 = arith.mulf %93, %105 : vector<4x128xf32>
    %153 = vector.extract_strided_slice %152 {offsets = [0, 0], sizes = [1, 128], strides = [1, 1]} : vector<4x128xf32> to vector<1x128xf32>
    %154 = vector.extract_strided_slice %40 {offsets = [0, 0], sizes = [16, 128], strides = [1, 1]} : vector<64x128xf32> to vector<16x128xf32>
    %155 = vector.broadcast %153 : vector<1x128xf32> to vector<16x128xf32>
    %156 = arith.mulf %155, %154 : vector<16x128xf32>
    %157 = arith.addf %136, %156 : vector<16x128xf32>
    %158 = vector.extract_strided_slice %152 {offsets = [1, 0], sizes = [1, 128], strides = [1, 1]} : vector<4x128xf32> to vector<1x128xf32>
    %159 = vector.extract_strided_slice %40 {offsets = [16, 0], sizes = [16, 128], strides = [1, 1]} : vector<64x128xf32> to vector<16x128xf32>
    %160 = vector.broadcast %158 : vector<1x128xf32> to vector<16x128xf32>
    %161 = arith.mulf %160, %159 : vector<16x128xf32>
    %162 = arith.addf %141, %161 : vector<16x128xf32>
    %163 = vector.extract_strided_slice %152 {offsets = [2, 0], sizes = [1, 128], strides = [1, 1]} : vector<4x128xf32> to vector<1x128xf32>
    %164 = vector.extract_strided_slice %40 {offsets = [32, 0], sizes = [16, 128], strides = [1, 1]} : vector<64x128xf32> to vector<16x128xf32>
    %165 = vector.broadcast %163 : vector<1x128xf32> to vector<16x128xf32>
    %166 = arith.mulf %165, %164 : vector<16x128xf32>
    %167 = arith.addf %146, %166 : vector<16x128xf32>
    %168 = vector.extract_strided_slice %152 {offsets = [3, 0], sizes = [1, 128], strides = [1, 1]} : vector<4x128xf32> to vector<1x128xf32>
    %169 = vector.extract_strided_slice %40 {offsets = [48, 0], sizes = [16, 128], strides = [1, 1]} : vector<64x128xf32> to vector<16x128xf32>
    %170 = vector.broadcast %168 : vector<1x128xf32> to vector<16x128xf32>
    %171 = arith.mulf %170, %169 : vector<16x128xf32>
    %172 = arith.addf %151, %171 : vector<16x128xf32>
    %173 = arith.mulf %95, %105 : vector<4x128xf32>
    %174 = vector.extract_strided_slice %173 {offsets = [0, 0], sizes = [1, 128], strides = [1, 1]} : vector<4x128xf32> to vector<1x128xf32>
    %175 = vector.extract_strided_slice %53 {offsets = [0, 0], sizes = [16, 128], strides = [1, 1]} : vector<64x128xf32> to vector<16x128xf32>
    %176 = vector.broadcast %174 : vector<1x128xf32> to vector<16x128xf32>
    %177 = arith.mulf %176, %175 : vector<16x128xf32>
    %178 = arith.addf %157, %177 : vector<16x128xf32>
    %179 = vector.extract_strided_slice %173 {offsets = [1, 0], sizes = [1, 128], strides = [1, 1]} : vector<4x128xf32> to vector<1x128xf32>
    %180 = vector.extract_strided_slice %53 {offsets = [16, 0], sizes = [16, 128], strides = [1, 1]} : vector<64x128xf32> to vector<16x128xf32>
    %181 = vector.broadcast %179 : vector<1x128xf32> to vector<16x128xf32>
    %182 = arith.mulf %181, %180 : vector<16x128xf32>
    %183 = arith.addf %162, %182 : vector<16x128xf32>
    %184 = vector.extract_strided_slice %173 {offsets = [2, 0], sizes = [1, 128], strides = [1, 1]} : vector<4x128xf32> to vector<1x128xf32>
    %185 = vector.extract_strided_slice %53 {offsets = [32, 0], sizes = [16, 128], strides = [1, 1]} : vector<64x128xf32> to vector<16x128xf32>
    %186 = vector.broadcast %184 : vector<1x128xf32> to vector<16x128xf32>
    %187 = arith.mulf %186, %185 : vector<16x128xf32>
    %188 = arith.addf %167, %187 : vector<16x128xf32>
    %189 = vector.extract_strided_slice %173 {offsets = [3, 0], sizes = [1, 128], strides = [1, 1]} : vector<4x128xf32> to vector<1x128xf32>
    %190 = vector.extract_strided_slice %53 {offsets = [48, 0], sizes = [16, 128], strides = [1, 1]} : vector<64x128xf32> to vector<16x128xf32>
    %191 = vector.broadcast %189 : vector<1x128xf32> to vector<16x128xf32>
    %192 = arith.mulf %191, %190 : vector<16x128xf32>
    %193 = arith.addf %172, %192 : vector<16x128xf32>
    %194 = arith.mulf %97, %105 : vector<4x128xf32>
    %195 = vector.extract_strided_slice %194 {offsets = [0, 0], sizes = [1, 128], strides = [1, 1]} : vector<4x128xf32> to vector<1x128xf32>
    %196 = vector.extract_strided_slice %66 {offsets = [0, 0], sizes = [16, 128], strides = [1, 1]} : vector<64x128xf32> to vector<16x128xf32>
    %197 = vector.broadcast %195 : vector<1x128xf32> to vector<16x128xf32>
    %198 = arith.mulf %197, %196 : vector<16x128xf32>
    %199 = arith.addf %178, %198 : vector<16x128xf32>
    %200 = vector.extract_strided_slice %194 {offsets = [1, 0], sizes = [1, 128], strides = [1, 1]} : vector<4x128xf32> to vector<1x128xf32>
    %201 = vector.extract_strided_slice %66 {offsets = [16, 0], sizes = [16, 128], strides = [1, 1]} : vector<64x128xf32> to vector<16x128xf32>
    %202 = vector.broadcast %200 : vector<1x128xf32> to vector<16x128xf32>
    %203 = arith.mulf %202, %201 : vector<16x128xf32>
    %204 = arith.addf %183, %203 : vector<16x128xf32>
    %205 = vector.extract_strided_slice %194 {offsets = [2, 0], sizes = [1, 128], strides = [1, 1]} : vector<4x128xf32> to vector<1x128xf32>
    %206 = vector.extract_strided_slice %66 {offsets = [32, 0], sizes = [16, 128], strides = [1, 1]} : vector<64x128xf32> to vector<16x128xf32>
    %207 = vector.broadcast %205 : vector<1x128xf32> to vector<16x128xf32>
    %208 = arith.mulf %207, %206 : vector<16x128xf32>
    %209 = arith.addf %188, %208 : vector<16x128xf32>
    %210 = vector.extract_strided_slice %194 {offsets = [3, 0], sizes = [1, 128], strides = [1, 1]} : vector<4x128xf32> to vector<1x128xf32>
    %211 = vector.extract_strided_slice %66 {offsets = [48, 0], sizes = [16, 128], strides = [1, 1]} : vector<64x128xf32> to vector<16x128xf32>
    %212 = vector.broadcast %210 : vector<1x128xf32> to vector<16x128xf32>
    %213 = arith.mulf %212, %211 : vector<16x128xf32>
    %214 = arith.addf %193, %213 : vector<16x128xf32>
    %215 = arith.mulf %99, %105 : vector<4x128xf32>
    %216 = vector.extract_strided_slice %215 {offsets = [0, 0], sizes = [1, 128], strides = [1, 1]} : vector<4x128xf32> to vector<1x128xf32>
    %217 = vector.extract_strided_slice %79 {offsets = [0, 0], sizes = [16, 128], strides = [1, 1]} : vector<64x128xf32> to vector<16x128xf32>
    %218 = vector.broadcast %216 : vector<1x128xf32> to vector<16x128xf32>
    %219 = arith.mulf %218, %217 : vector<16x128xf32>
    %220 = arith.addf %199, %219 : vector<16x128xf32>
    %221 = vector.extract_strided_slice %215 {offsets = [1, 0], sizes = [1, 128], strides = [1, 1]} : vector<4x128xf32> to vector<1x128xf32>
    %222 = vector.extract_strided_slice %79 {offsets = [16, 0], sizes = [16, 128], strides = [1, 1]} : vector<64x128xf32> to vector<16x128xf32>
    %223 = vector.broadcast %221 : vector<1x128xf32> to vector<16x128xf32>
    %224 = arith.mulf %223, %222 : vector<16x128xf32>
    %225 = arith.addf %204, %224 : vector<16x128xf32>
    %226 = vector.extract_strided_slice %215 {offsets = [2, 0], sizes = [1, 128], strides = [1, 1]} : vector<4x128xf32> to vector<1x128xf32>
    %227 = vector.extract_strided_slice %79 {offsets = [32, 0], sizes = [16, 128], strides = [1, 1]} : vector<64x128xf32> to vector<16x128xf32>
    %228 = vector.broadcast %226 : vector<1x128xf32> to vector<16x128xf32>
    %229 = arith.mulf %228, %227 : vector<16x128xf32>
    %230 = arith.addf %209, %229 : vector<16x128xf32>
    %231 = vector.extract_strided_slice %215 {offsets = [3, 0], sizes = [1, 128], strides = [1, 1]} : vector<4x128xf32> to vector<1x128xf32>
    %232 = vector.extract_strided_slice %79 {offsets = [48, 0], sizes = [16, 128], strides = [1, 1]} : vector<64x128xf32> to vector<16x128xf32>
    %233 = vector.broadcast %231 : vector<1x128xf32> to vector<16x128xf32>
    %234 = arith.mulf %233, %232 : vector<16x128xf32>
    %235 = arith.addf %214, %234 : vector<16x128xf32>
    %236 = tpu.concatenate %220, %225, %230, %235 in 0 : vector<16x128xf32>, vector<16x128xf32>, vector<16x128xf32>, vector<16x128xf32> -> vector<64x128xf32>
    %c0_43 = arith.constant 0 : index
    %c0_44 = arith.constant 0 : index
    %237 = vector.load %arg7[%c0_43, %c0_44] : memref<64x64xbf16, #tpu.memory_space<vmem>>, vector<64x64xbf16>
    %238 = arith.truncf %236 : vector<64x128xf32> to vector<64x128xbf16>
    %cst_45 = arith.constant dense<0.000000e+00> : vector<64x128xf32>
    %239 = tpu.matmul %237, %238, %cst_45 {dimension_numbers = #tpu.dot_dimension_numbers<[1], [0], [0], [1], [0, 0, 1, 1], [], []>} : vector<64x64xbf16>, vector<64x128xbf16>, vector<64x128xf32> -> vector<64x128xf32>
    %c0_46 = arith.constant 0 : index
    %c0_47 = arith.constant 0 : index
    %240 = vector.load %arg8[%c0_46, %c0_47] : memref<64x1xf32, #tpu.memory_space<vmem>>, vector<64x1xf32>
    %241 = vector.broadcast %240 : vector<64x1xf32> to vector<64x128xf32>
    %242 = arith.addf %239, %241 : vector<64x128xf32>
    %c0_48 = arith.constant 0 : index
    %c0_49 = arith.constant 0 : index
    %243 = vector.load %arg9[%c0_48, %c0_49] : memref<64x128xf32, #tpu.memory_space<vmem>>, vector<64x128xf32>
    %244 = arith.addf %242, %243 : vector<64x128xf32>
    %c0_50 = arith.constant 0 : index
    %c0_51 = arith.constant 0 : index
    %245 = vector.load %arg10[%c0_50, %c0_51] : memref<64x128xf32, #tpu.memory_space<vmem>>, vector<64x128xf32>
    tpu.vector_store %arg10[%c0_50, %c0_51], %244 {strides = array<i32>} : memref<64x128xf32, #tpu.memory_space<vmem>>, vector<64x128xf32>,
    return
  }
  func.func @transform_0(%arg0: i32) -> (i32, i32, i32) {
    %c0_i32 = arith.constant 0 : i32
    %c0_i32_0 = arith.constant 0 : i32
    %c0_i32_1 = arith.constant 0 : i32
    return %c0_i32, %c0_i32_0, %arg0 : i32, i32, i32
  }
  func.func @transform_1(%arg0: i32) -> (i32, i32) {
    %c0_i32 = arith.constant 0 : i32
    %c0_i32_0 = arith.constant 0 : i32
    %c0_i32_1 = arith.constant 0 : i32
    return %c0_i32, %c0_i32_0 : i32, i32
  }
  func.func @transform_2(%arg0: i32) -> (i32, i32) {
    %c0_i32 = arith.constant 0 : i32
    %c0_i32_0 = arith.constant 0 : i32
    %c0_i32_1 = arith.constant 0 : i32
    return %c0_i32, %c0_i32_0 : i32, i32
  }
  func.func @transform_3(%arg0: i32) -> (i32, i32) {
    %c0_i32 = arith.constant 0 : i32
    %c0_i32_0 = arith.constant 0 : i32
    %c0_i32_1 = arith.constant 0 : i32
    return %c0_i32, %c0_i32_0 : i32, i32
  }
  func.func @transform_4(%arg0: i32) -> (i32, i32) {
    %c0_i32 = arith.constant 0 : i32
    %c0_i32_0 = arith.constant 0 : i32
    %c0_i32_1 = arith.constant 0 : i32
    return %c0_i32, %c0_i32_0 : i32, i32
  }
  func.func @transform_5(%arg0: i32) -> (i32, i32) {
    %c0_i32 = arith.constant 0 : i32
    %c0_i32_0 = arith.constant 0 : i32
    %c0_i32_1 = arith.constant 0 : i32
    return %c0_i32, %c0_i32_0 : i32, i32
  }
  func.func @transform_6(%arg0: i32) -> (i32, i32) {
    %c0_i32 = arith.constant 0 : i32
    %c0_i32_0 = arith.constant 0 : i32
    %c0_i32_1 = arith.constant 0 : i32
    return %c0_i32, %c0_i32_0 : i32, i32
  }
  func.func @transform_7(%arg0: i32) -> (i32, i32) {
    %c0_i32 = arith.constant 0 : i32
    %c0_i32_0 = arith.constant 0 : i32
    %c0_i32_1 = arith.constant 0 : i32
    return %c0_i32, %c0_i32_0 : i32, i32
  }
  func.func @transform_8(%arg0: i32) -> (i32, i32) {
    %c0_i32 = arith.constant 0 : i32
    %c0_i32_0 = arith.constant 0 : i32
    return %c0_i32, %arg0 : i32, i32
  }
  func.func @transform_9(%arg0: i32) -> (i32, i32) {
    %c0_i32 = arith.constant 0 : i32
    %c0_i32_0 = arith.constant 0 : i32
    return %c0_i32, %arg0 : i32, i32
  }
}

module attributes {stable_mosaic.version = 11 : i64} {
  func.func @_blk_attn_kernel(%arg0: i32, %arg1: memref<1x64x64xf32, #tpu.memory_space<vmem>>, %arg2: memref<1x64xf32, #tpu.memory_space<vmem>>, %arg3: memref<1x64xf32, #tpu.memory_space<vmem>>, %arg4: memref<64x64xbf16, #tpu.memory_space<vmem>>, %arg5: memref<1x64xf32, #tpu.memory_space<vmem>>, %arg6: memref<64x64xbf16, #tpu.memory_space<vmem>>, %arg7: memref<1x64xf32, #tpu.memory_space<vmem>>, %arg8: memref<64x64xbf16, #tpu.memory_space<vmem>>, %arg9: memref<1x64xf32, #tpu.memory_space<vmem>>, %arg10: memref<64x64xbf16, #tpu.memory_space<vmem>>, %arg11: memref<1x64xf32, #tpu.memory_space<vmem>>, %arg12: memref<1x64x64xf32, #tpu.memory_space<vmem>>) attributes {dimension_semantics = [#tpu.dimension_semantics<parallel>], iteration_bounds = array<i64: 2>, scalar_prefetch = 0 : i64, scratch_operands = 0 : i64, tpu.core_type = #tpu.core_type<tc>, window_params = [{transform_indices = @transform_0, window_bounds = array<i64: 1, 64, 64>}, {pipeline_mode = #tpu.pipeline_mode<synchronous>, transform_indices = @transform_1, window_bounds = array<i64: 1, 64>}, {pipeline_mode = #tpu.pipeline_mode<synchronous>, transform_indices = @transform_2, window_bounds = array<i64: 1, 64>}, {pipeline_mode = #tpu.pipeline_mode<synchronous>, transform_indices = @transform_3, window_bounds = array<i64: 64, 64>}, {pipeline_mode = #tpu.pipeline_mode<synchronous>, transform_indices = @transform_4, window_bounds = array<i64: 1, 64>}, {pipeline_mode = #tpu.pipeline_mode<synchronous>, transform_indices = @transform_5, window_bounds = array<i64: 64, 64>}, {pipeline_mode = #tpu.pipeline_mode<synchronous>, transform_indices = @transform_6, window_bounds = array<i64: 1, 64>}, {pipeline_mode = #tpu.pipeline_mode<synchronous>, transform_indices = @transform_7, window_bounds = array<i64: 64, 64>}, {pipeline_mode = #tpu.pipeline_mode<synchronous>, transform_indices = @transform_8, window_bounds = array<i64: 1, 64>}, {pipeline_mode = #tpu.pipeline_mode<synchronous>, transform_indices = @transform_9, window_bounds = array<i64: 64, 64>}, {pipeline_mode = #tpu.pipeline_mode<synchronous>, transform_indices = @transform_10, window_bounds = array<i64: 1, 64>}, {transform_indices = @transform_11, window_bounds = array<i64: 1, 64, 64>}]} {
    %c0 = arith.constant 0 : index
    %c0_0 = arith.constant 0 : index
    %c0_1 = arith.constant 0 : index
    %0 = vector.load %arg1[%c0, %c0_0, %c0_1] : memref<1x64x64xf32, #tpu.memory_space<vmem>>, vector<1x64x64xf32>
    %1 = vector.shape_cast %0 : vector<1x64x64xf32> to vector<64x64xf32>
    %c0_2 = arith.constant 0 : index
    %c0_3 = arith.constant 0 : index
    %2 = vector.load %arg2[%c0_2, %c0_3] : memref<1x64xf32, #tpu.memory_space<vmem>>, vector<1x64xf32>
    %c0_4 = arith.constant 0 : index
    %c0_5 = arith.constant 0 : index
    %3 = vector.load %arg3[%c0_4, %c0_5] : memref<1x64xf32, #tpu.memory_space<vmem>>, vector<1x64xf32>
    %cst = arith.constant dense<0.000000e+00> : vector<64xf32>
    %4 = vector.multi_reduction <add>, %1, %cst [1] : vector<64x64xf32> to vector<64xf32>
    %5 = vector.shape_cast %4 : vector<64xf32> to vector<64x1xf32>
    %cst_6 = arith.constant 6.400000e+01 : f32
    %6 = vector.broadcast %cst_6 : f32 to vector<64x1xf32>
    %7 = arith.divf %5, %6 : vector<64x1xf32>
    %8 = vector.broadcast %7 : vector<64x1xf32> to vector<64x64xf32>
    %9 = arith.subf %1, %8 : vector<64x64xf32>
    %10 = arith.mulf %9, %9 : vector<64x64xf32>
    %cst_7 = arith.constant dense<0.000000e+00> : vector<64xf32>
    %11 = vector.multi_reduction <add>, %10, %cst_7 [1] : vector<64x64xf32> to vector<64xf32>
    %12 = vector.shape_cast %11 : vector<64xf32> to vector<64x1xf32>
    %cst_8 = arith.constant 6.400000e+01 : f32
    %13 = vector.broadcast %cst_8 : f32 to vector<64x1xf32>
    %14 = arith.divf %12, %13 : vector<64x1xf32>
    %cst_9 = arith.constant 9.99999974E-6 : f32
    %15 = vector.broadcast %cst_9 : f32 to vector<64x1xf32>
    %16 = arith.addf %14, %15 : vector<64x1xf32>
    %17 = math.rsqrt %16 : vector<64x1xf32>
    %18 = vector.broadcast %17 : vector<64x1xf32> to vector<64x64xf32>
    %19 = arith.mulf %9, %18 : vector<64x64xf32>
    %20 = vector.broadcast %2 : vector<1x64xf32> to vector<64x64xf32>
    %21 = arith.mulf %19, %20 : vector<64x64xf32>
    %22 = vector.broadcast %3 : vector<1x64xf32> to vector<64x64xf32>
    %23 = arith.addf %21, %22 : vector<64x64xf32>
    %c0_10 = arith.constant 0 : index
    %c0_11 = arith.constant 0 : index
    %24 = vector.load %arg4[%c0_10, %c0_11] : memref<64x64xbf16, #tpu.memory_space<vmem>>, vector<64x64xbf16>
    %25 = arith.truncf %23 : vector<64x64xf32> to vector<64x64xbf16>
    %cst_12 = arith.constant dense<0.000000e+00> : vector<64x64xf32>
    %26 = tpu.matmul %25, %24, %cst_12 {dimension_numbers = #tpu.dot_dimension_numbers<[1], [0], [0], [1], [0, 0, 1, 1], [], []>} : vector<64x64xbf16>, vector<64x64xbf16>, vector<64x64xf32> -> vector<64x64xf32>
    %c0_13 = arith.constant 0 : index
    %c0_14 = arith.constant 0 : index
    %27 = vector.load %arg5[%c0_13, %c0_14] : memref<1x64xf32, #tpu.memory_space<vmem>>, vector<1x64xf32>
    %28 = vector.broadcast %27 : vector<1x64xf32> to vector<64x64xf32>
    %29 = arith.addf %26, %28 : vector<64x64xf32>
    %c0_15 = arith.constant 0 : index
    %c0_16 = arith.constant 0 : index
    %30 = vector.load %arg6[%c0_15, %c0_16] : memref<64x64xbf16, #tpu.memory_space<vmem>>, vector<64x64xbf16>
    %31 = arith.truncf %23 : vector<64x64xf32> to vector<64x64xbf16>
    %cst_17 = arith.constant dense<0.000000e+00> : vector<64x64xf32>
    %32 = tpu.matmul %31, %30, %cst_17 {dimension_numbers = #tpu.dot_dimension_numbers<[1], [0], [0], [1], [0, 0, 1, 1], [], []>} : vector<64x64xbf16>, vector<64x64xbf16>, vector<64x64xf32> -> vector<64x64xf32>
    %c0_18 = arith.constant 0 : index
    %c0_19 = arith.constant 0 : index
    %33 = vector.load %arg7[%c0_18, %c0_19] : memref<1x64xf32, #tpu.memory_space<vmem>>, vector<1x64xf32>
    %34 = vector.broadcast %33 : vector<1x64xf32> to vector<64x64xf32>
    %35 = arith.addf %32, %34 : vector<64x64xf32>
    %c0_20 = arith.constant 0 : index
    %c0_21 = arith.constant 0 : index
    %36 = vector.load %arg8[%c0_20, %c0_21] : memref<64x64xbf16, #tpu.memory_space<vmem>>, vector<64x64xbf16>
    %37 = arith.truncf %23 : vector<64x64xf32> to vector<64x64xbf16>
    %cst_22 = arith.constant dense<0.000000e+00> : vector<64x64xf32>
    %38 = tpu.matmul %37, %36, %cst_22 {dimension_numbers = #tpu.dot_dimension_numbers<[1], [0], [0], [1], [0, 0, 1, 1], [], []>} : vector<64x64xbf16>, vector<64x64xbf16>, vector<64x64xf32> -> vector<64x64xf32>
    %c0_23 = arith.constant 0 : index
    %c0_24 = arith.constant 0 : index
    %39 = vector.load %arg9[%c0_23, %c0_24] : memref<1x64xf32, #tpu.memory_space<vmem>>, vector<1x64xf32>
    %40 = vector.broadcast %39 : vector<1x64xf32> to vector<64x64xf32>
    %41 = arith.addf %38, %40 : vector<64x64xf32>
    %42 = vector.extract_strided_slice %29 {offsets = [0, 0], sizes = [64, 16], strides = [1, 1]} : vector<64x64xf32> to vector<64x16xf32>
    %43 = vector.extract_strided_slice %35 {offsets = [0, 0], sizes = [64, 16], strides = [1, 1]} : vector<64x64xf32> to vector<64x16xf32>
    %44 = arith.truncf %42 : vector<64x16xf32> to vector<64x16xbf16>
    %45 = arith.truncf %43 : vector<64x16xf32> to vector<64x16xbf16>
    %cst_25 = arith.constant dense<0.000000e+00> : vector<64x64xf32>
    %46 = tpu.matmul %44, %45, %cst_25 {dimension_numbers = #tpu.dot_dimension_numbers<[1], [1], [0], [0], [0, 0, 1, 0], [], []>} : vector<64x16xbf16>, vector<64x16xbf16>, vector<64x64xf32> -> vector<64x64xf32>
    %cst_26 = arith.constant 2.500000e-01 : f32
    %47 = vector.broadcast %cst_26 : f32 to vector<64x64xf32>
    %48 = arith.mulf %46, %47 : vector<64x64xf32>
    %cst_27 = arith.constant dense<0xFF800000> : vector<64xf32>
    %49 = vector.multi_reduction <maximumf>, %48, %cst_27 [1] : vector<64x64xf32> to vector<64xf32>
    %50 = vector.shape_cast %49 : vector<64xf32> to vector<64x1xf32>
    %51 = vector.broadcast %50 : vector<64x1xf32> to vector<64x64xf32>
    %52 = arith.subf %48, %51 : vector<64x64xf32>
    %53 = math.exp %52 : vector<64x64xf32>
    %cst_28 = arith.constant dense<0.000000e+00> : vector<64xf32>
    %54 = vector.multi_reduction <add>, %53, %cst_28 [1] : vector<64x64xf32> to vector<64xf32>
    %55 = vector.shape_cast %54 : vector<64xf32> to vector<64x1xf32>
    %56 = tpu.reciprocal %55 {approx = true} : vector<64x1xf32> -> vector<64x1xf32>
    %57 = vector.broadcast %56 : vector<64x1xf32> to vector<64x64xf32>
    %58 = arith.mulf %53, %57 : vector<64x64xf32>
    %59 = vector.extract_strided_slice %41 {offsets = [0, 0], sizes = [64, 16], strides = [1, 1]} : vector<64x64xf32> to vector<64x16xf32>
    %60 = arith.truncf %58 : vector<64x64xf32> to vector<64x64xbf16>
    %61 = arith.truncf %59 : vector<64x16xf32> to vector<64x16xbf16>
    %cst_29 = arith.constant dense<0.000000e+00> : vector<64x16xf32>
    %62 = tpu.matmul %60, %61, %cst_29 {dimension_numbers = #tpu.dot_dimension_numbers<[1], [0], [0], [1], [0, 0, 1, 1], [], []>} : vector<64x64xbf16>, vector<64x16xbf16>, vector<64x16xf32> -> vector<64x16xf32>
    %63 = vector.extract_strided_slice %29 {offsets = [0, 16], sizes = [64, 16], strides = [1, 1]} : vector<64x64xf32> to vector<64x16xf32>
    %64 = vector.extract_strided_slice %35 {offsets = [0, 16], sizes = [64, 16], strides = [1, 1]} : vector<64x64xf32> to vector<64x16xf32>
    %65 = arith.truncf %63 : vector<64x16xf32> to vector<64x16xbf16>
    %66 = arith.truncf %64 : vector<64x16xf32> to vector<64x16xbf16>
    %cst_30 = arith.constant dense<0.000000e+00> : vector<64x64xf32>
    %67 = tpu.matmul %65, %66, %cst_30 {dimension_numbers = #tpu.dot_dimension_numbers<[1], [1], [0], [0], [0, 0, 1, 0], [], []>} : vector<64x16xbf16>, vector<64x16xbf16>, vector<64x64xf32> -> vector<64x64xf32>
    %cst_31 = arith.constant 2.500000e-01 : f32
    %68 = vector.broadcast %cst_31 : f32 to vector<64x64xf32>
    %69 = arith.mulf %67, %68 : vector<64x64xf32>
    %cst_32 = arith.constant dense<0xFF800000> : vector<64xf32>
    %70 = vector.multi_reduction <maximumf>, %69, %cst_32 [1] : vector<64x64xf32> to vector<64xf32>
    %71 = vector.shape_cast %70 : vector<64xf32> to vector<64x1xf32>
    %72 = vector.broadcast %71 : vector<64x1xf32> to vector<64x64xf32>
    %73 = arith.subf %69, %72 : vector<64x64xf32>
    %74 = math.exp %73 : vector<64x64xf32>
    %cst_33 = arith.constant dense<0.000000e+00> : vector<64xf32>
    %75 = vector.multi_reduction <add>, %74, %cst_33 [1] : vector<64x64xf32> to vector<64xf32>
    %76 = vector.shape_cast %75 : vector<64xf32> to vector<64x1xf32>
    %77 = tpu.reciprocal %76 {approx = true} : vector<64x1xf32> -> vector<64x1xf32>
    %78 = vector.broadcast %77 : vector<64x1xf32> to vector<64x64xf32>
    %79 = arith.mulf %74, %78 : vector<64x64xf32>
    %80 = vector.extract_strided_slice %41 {offsets = [0, 16], sizes = [64, 16], strides = [1, 1]} : vector<64x64xf32> to vector<64x16xf32>
    %81 = arith.truncf %79 : vector<64x64xf32> to vector<64x64xbf16>
    %82 = arith.truncf %80 : vector<64x16xf32> to vector<64x16xbf16>
    %cst_34 = arith.constant dense<0.000000e+00> : vector<64x16xf32>
    %83 = tpu.matmul %81, %82, %cst_34 {dimension_numbers = #tpu.dot_dimension_numbers<[1], [0], [0], [1], [0, 0, 1, 1], [], []>} : vector<64x64xbf16>, vector<64x16xbf16>, vector<64x16xf32> -> vector<64x16xf32>
    %84 = vector.extract_strided_slice %29 {offsets = [0, 32], sizes = [64, 16], strides = [1, 1]} : vector<64x64xf32> to vector<64x16xf32>
    %85 = vector.extract_strided_slice %35 {offsets = [0, 32], sizes = [64, 16], strides = [1, 1]} : vector<64x64xf32> to vector<64x16xf32>
    %86 = arith.truncf %84 : vector<64x16xf32> to vector<64x16xbf16>
    %87 = arith.truncf %85 : vector<64x16xf32> to vector<64x16xbf16>
    %cst_35 = arith.constant dense<0.000000e+00> : vector<64x64xf32>
    %88 = tpu.matmul %86, %87, %cst_35 {dimension_numbers = #tpu.dot_dimension_numbers<[1], [1], [0], [0], [0, 0, 1, 0], [], []>} : vector<64x16xbf16>, vector<64x16xbf16>, vector<64x64xf32> -> vector<64x64xf32>
    %cst_36 = arith.constant 2.500000e-01 : f32
    %89 = vector.broadcast %cst_36 : f32 to vector<64x64xf32>
    %90 = arith.mulf %88, %89 : vector<64x64xf32>
    %cst_37 = arith.constant dense<0xFF800000> : vector<64xf32>
    %91 = vector.multi_reduction <maximumf>, %90, %cst_37 [1] : vector<64x64xf32> to vector<64xf32>
    %92 = vector.shape_cast %91 : vector<64xf32> to vector<64x1xf32>
    %93 = vector.broadcast %92 : vector<64x1xf32> to vector<64x64xf32>
    %94 = arith.subf %90, %93 : vector<64x64xf32>
    %95 = math.exp %94 : vector<64x64xf32>
    %cst_38 = arith.constant dense<0.000000e+00> : vector<64xf32>
    %96 = vector.multi_reduction <add>, %95, %cst_38 [1] : vector<64x64xf32> to vector<64xf32>
    %97 = vector.shape_cast %96 : vector<64xf32> to vector<64x1xf32>
    %98 = tpu.reciprocal %97 {approx = true} : vector<64x1xf32> -> vector<64x1xf32>
    %99 = vector.broadcast %98 : vector<64x1xf32> to vector<64x64xf32>
    %100 = arith.mulf %95, %99 : vector<64x64xf32>
    %101 = vector.extract_strided_slice %41 {offsets = [0, 32], sizes = [64, 16], strides = [1, 1]} : vector<64x64xf32> to vector<64x16xf32>
    %102 = arith.truncf %100 : vector<64x64xf32> to vector<64x64xbf16>
    %103 = arith.truncf %101 : vector<64x16xf32> to vector<64x16xbf16>
    %cst_39 = arith.constant dense<0.000000e+00> : vector<64x16xf32>
    %104 = tpu.matmul %102, %103, %cst_39 {dimension_numbers = #tpu.dot_dimension_numbers<[1], [0], [0], [1], [0, 0, 1, 1], [], []>} : vector<64x64xbf16>, vector<64x16xbf16>, vector<64x16xf32> -> vector<64x16xf32>
    %105 = vector.extract_strided_slice %29 {offsets = [0, 48], sizes = [64, 16], strides = [1, 1]} : vector<64x64xf32> to vector<64x16xf32>
    %106 = vector.extract_strided_slice %35 {offsets = [0, 48], sizes = [64, 16], strides = [1, 1]} : vector<64x64xf32> to vector<64x16xf32>
    %107 = arith.truncf %105 : vector<64x16xf32> to vector<64x16xbf16>
    %108 = arith.truncf %106 : vector<64x16xf32> to vector<64x16xbf16>
    %cst_40 = arith.constant dense<0.000000e+00> : vector<64x64xf32>
    %109 = tpu.matmul %107, %108, %cst_40 {dimension_numbers = #tpu.dot_dimension_numbers<[1], [1], [0], [0], [0, 0, 1, 0], [], []>} : vector<64x16xbf16>, vector<64x16xbf16>, vector<64x64xf32> -> vector<64x64xf32>
    %cst_41 = arith.constant 2.500000e-01 : f32
    %110 = vector.broadcast %cst_41 : f32 to vector<64x64xf32>
    %111 = arith.mulf %109, %110 : vector<64x64xf32>
    %cst_42 = arith.constant dense<0xFF800000> : vector<64xf32>
    %112 = vector.multi_reduction <maximumf>, %111, %cst_42 [1] : vector<64x64xf32> to vector<64xf32>
    %113 = vector.shape_cast %112 : vector<64xf32> to vector<64x1xf32>
    %114 = vector.broadcast %113 : vector<64x1xf32> to vector<64x64xf32>
    %115 = arith.subf %111, %114 : vector<64x64xf32>
    %116 = math.exp %115 : vector<64x64xf32>
    %cst_43 = arith.constant dense<0.000000e+00> : vector<64xf32>
    %117 = vector.multi_reduction <add>, %116, %cst_43 [1] : vector<64x64xf32> to vector<64xf32>
    %118 = vector.shape_cast %117 : vector<64xf32> to vector<64x1xf32>
    %119 = tpu.reciprocal %118 {approx = true} : vector<64x1xf32> -> vector<64x1xf32>
    %120 = vector.broadcast %119 : vector<64x1xf32> to vector<64x64xf32>
    %121 = arith.mulf %116, %120 : vector<64x64xf32>
    %122 = vector.extract_strided_slice %41 {offsets = [0, 48], sizes = [64, 16], strides = [1, 1]} : vector<64x64xf32> to vector<64x16xf32>
    %123 = arith.truncf %121 : vector<64x64xf32> to vector<64x64xbf16>
    %124 = arith.truncf %122 : vector<64x16xf32> to vector<64x16xbf16>
    %cst_44 = arith.constant dense<0.000000e+00> : vector<64x16xf32>
    %125 = tpu.matmul %123, %124, %cst_44 {dimension_numbers = #tpu.dot_dimension_numbers<[1], [0], [0], [1], [0, 0, 1, 1], [], []>} : vector<64x64xbf16>, vector<64x16xbf16>, vector<64x16xf32> -> vector<64x16xf32>
    %126 = tpu.concatenate %62, %83, %104, %125 in 1 : vector<64x16xf32>, vector<64x16xf32>, vector<64x16xf32>, vector<64x16xf32> -> vector<64x64xf32>
    %c0_45 = arith.constant 0 : index
    %c0_46 = arith.constant 0 : index
    %127 = vector.load %arg10[%c0_45, %c0_46] : memref<64x64xbf16, #tpu.memory_space<vmem>>, vector<64x64xbf16>
    %128 = arith.truncf %126 : vector<64x64xf32> to vector<64x64xbf16>
    %cst_47 = arith.constant dense<0.000000e+00> : vector<64x64xf32>
    %129 = tpu.matmul %128, %127, %cst_47 {dimension_numbers = #tpu.dot_dimension_numbers<[1], [0], [0], [1], [0, 0, 1, 1], [], []>} : vector<64x64xbf16>, vector<64x64xbf16>, vector<64x64xf32> -> vector<64x64xf32>
    %130 = arith.addf %1, %129 : vector<64x64xf32>
    %c0_48 = arith.constant 0 : index
    %c0_49 = arith.constant 0 : index
    %131 = vector.load %arg11[%c0_48, %c0_49] : memref<1x64xf32, #tpu.memory_space<vmem>>, vector<1x64xf32>
    %132 = vector.broadcast %131 : vector<1x64xf32> to vector<64x64xf32>
    %133 = arith.addf %130, %132 : vector<64x64xf32>
    %c0_50 = arith.constant 0 : index
    %c0_51 = arith.constant 0 : index
    %c0_52 = arith.constant 0 : index
    %134 = vector.load %arg12[%c0_50, %c0_51, %c0_52] : memref<1x64x64xf32, #tpu.memory_space<vmem>>, vector<1x64x64xf32>
    %135 = vector.shape_cast %134 : vector<1x64x64xf32> to vector<64x64xf32>
    %136 = vector.shape_cast %133 : vector<64x64xf32> to vector<1x64x64xf32>
    tpu.vector_store %arg12[%c0_50, %c0_51, %c0_52], %136 {strides = array<i32>} : memref<1x64x64xf32, #tpu.memory_space<vmem>>, vector<1x64x64xf32>,
    return
  }
  func.func @transform_0(%arg0: i32) -> (i32, i32, i32) {
    %c0_i32 = arith.constant 0 : i32
    %c0_i32_0 = arith.constant 0 : i32
    %c0_i32_1 = arith.constant 0 : i32
    return %arg0, %c0_i32, %c0_i32_0 : i32, i32, i32
  }
  func.func @transform_1(%arg0: i32) -> (i32, i32) {
    %c0_i32 = arith.constant 0 : i32
    %c0_i32_0 = arith.constant 0 : i32
    %c0_i32_1 = arith.constant 0 : i32
    return %c0_i32, %c0_i32_0 : i32, i32
  }
  func.func @transform_2(%arg0: i32) -> (i32, i32) {
    %c0_i32 = arith.constant 0 : i32
    %c0_i32_0 = arith.constant 0 : i32
    %c0_i32_1 = arith.constant 0 : i32
    return %c0_i32, %c0_i32_0 : i32, i32
  }
  func.func @transform_3(%arg0: i32) -> (i32, i32) {
    %c0_i32 = arith.constant 0 : i32
    %c0_i32_0 = arith.constant 0 : i32
    %c0_i32_1 = arith.constant 0 : i32
    return %c0_i32, %c0_i32_0 : i32, i32
  }
  func.func @transform_4(%arg0: i32) -> (i32, i32) {
    %c0_i32 = arith.constant 0 : i32
    %c0_i32_0 = arith.constant 0 : i32
    %c0_i32_1 = arith.constant 0 : i32
    return %c0_i32, %c0_i32_0 : i32, i32
  }
  func.func @transform_5(%arg0: i32) -> (i32, i32) {
    %c0_i32 = arith.constant 0 : i32
    %c0_i32_0 = arith.constant 0 : i32
    %c0_i32_1 = arith.constant 0 : i32
    return %c0_i32, %c0_i32_0 : i32, i32
  }
  func.func @transform_6(%arg0: i32) -> (i32, i32) {
    %c0_i32 = arith.constant 0 : i32
    %c0_i32_0 = arith.constant 0 : i32
    %c0_i32_1 = arith.constant 0 : i32
    return %c0_i32, %c0_i32_0 : i32, i32
  }
  func.func @transform_7(%arg0: i32) -> (i32, i32) {
    %c0_i32 = arith.constant 0 : i32
    %c0_i32_0 = arith.constant 0 : i32
    %c0_i32_1 = arith.constant 0 : i32
    return %c0_i32, %c0_i32_0 : i32, i32
  }
  func.func @transform_8(%arg0: i32) -> (i32, i32) {
    %c0_i32 = arith.constant 0 : i32
    %c0_i32_0 = arith.constant 0 : i32
    %c0_i32_1 = arith.constant 0 : i32
    return %c0_i32, %c0_i32_0 : i32, i32
  }
  func.func @transform_9(%arg0: i32) -> (i32, i32) {
    %c0_i32 = arith.constant 0 : i32
    %c0_i32_0 = arith.constant 0 : i32
    %c0_i32_1 = arith.constant 0 : i32
    return %c0_i32, %c0_i32_0 : i32, i32
  }
  func.func @transform_10(%arg0: i32) -> (i32, i32) {
    %c0_i32 = arith.constant 0 : i32
    %c0_i32_0 = arith.constant 0 : i32
    %c0_i32_1 = arith.constant 0 : i32
    return %c0_i32, %c0_i32_0 : i32, i32
  }
  func.func @transform_11(%arg0: i32) -> (i32, i32, i32) {
    %c0_i32 = arith.constant 0 : i32
    %c0_i32_0 = arith.constant 0 : i32
    %c0_i32_1 = arith.constant 0 : i32
    return %arg0, %c0_i32, %c0_i32_0 : i32, i32, i32
  }
}

module attributes {stable_mosaic.version = 11 : i64} {
  func.func @_ln_mlp_kernel(%arg0: i32, %arg1: memref<64x64xf32, #tpu.memory_space<vmem>>, %arg2: memref<1x64xf32, #tpu.memory_space<vmem>>, %arg3: memref<1x64xf32, #tpu.memory_space<vmem>>, %arg4: memref<64x256xbf16, #tpu.memory_space<vmem>>, %arg5: memref<1x256xf32, #tpu.memory_space<vmem>>, %arg6: memref<256x64xbf16, #tpu.memory_space<vmem>>, %arg7: memref<1x64xf32, #tpu.memory_space<vmem>>, %arg8: memref<64x64xf32, #tpu.memory_space<vmem>>) attributes {dimension_semantics = [#tpu.dimension_semantics<parallel>], iteration_bounds = array<i64: 2>, scalar_prefetch = 0 : i64, scratch_operands = 0 : i64, tpu.core_type = #tpu.core_type<tc>, window_params = [{transform_indices = @transform_0, window_bounds = array<i64: 64, 64>}, {pipeline_mode = #tpu.pipeline_mode<synchronous>, transform_indices = @transform_1, window_bounds = array<i64: 1, 64>}, {pipeline_mode = #tpu.pipeline_mode<synchronous>, transform_indices = @transform_2, window_bounds = array<i64: 1, 64>}, {pipeline_mode = #tpu.pipeline_mode<synchronous>, transform_indices = @transform_3, window_bounds = array<i64: 64, 256>}, {pipeline_mode = #tpu.pipeline_mode<synchronous>, transform_indices = @transform_4, window_bounds = array<i64: 1, 256>}, {pipeline_mode = #tpu.pipeline_mode<synchronous>, transform_indices = @transform_5, window_bounds = array<i64: 256, 64>}, {pipeline_mode = #tpu.pipeline_mode<synchronous>, transform_indices = @transform_6, window_bounds = array<i64: 1, 64>}, {transform_indices = @transform_7, window_bounds = array<i64: 64, 64>}]} {
    %c0 = arith.constant 0 : index
    %c0_0 = arith.constant 0 : index
    %0 = vector.load %arg1[%c0, %c0_0] : memref<64x64xf32, #tpu.memory_space<vmem>>, vector<64x64xf32>
    %c0_1 = arith.constant 0 : index
    %c0_2 = arith.constant 0 : index
    %1 = vector.load %arg2[%c0_1, %c0_2] : memref<1x64xf32, #tpu.memory_space<vmem>>, vector<1x64xf32>
    %c0_3 = arith.constant 0 : index
    %c0_4 = arith.constant 0 : index
    %2 = vector.load %arg3[%c0_3, %c0_4] : memref<1x64xf32, #tpu.memory_space<vmem>>, vector<1x64xf32>
    %cst = arith.constant dense<0.000000e+00> : vector<64xf32>
    %3 = vector.multi_reduction <add>, %0, %cst [1] : vector<64x64xf32> to vector<64xf32>
    %4 = vector.shape_cast %3 : vector<64xf32> to vector<64x1xf32>
    %cst_5 = arith.constant 6.400000e+01 : f32
    %5 = vector.broadcast %cst_5 : f32 to vector<64x1xf32>
    %6 = arith.divf %4, %5 : vector<64x1xf32>
    %7 = vector.broadcast %6 : vector<64x1xf32> to vector<64x64xf32>
    %8 = arith.subf %0, %7 : vector<64x64xf32>
    %9 = arith.mulf %8, %8 : vector<64x64xf32>
    %cst_6 = arith.constant dense<0.000000e+00> : vector<64xf32>
    %10 = vector.multi_reduction <add>, %9, %cst_6 [1] : vector<64x64xf32> to vector<64xf32>
    %11 = vector.shape_cast %10 : vector<64xf32> to vector<64x1xf32>
    %cst_7 = arith.constant 6.400000e+01 : f32
    %12 = vector.broadcast %cst_7 : f32 to vector<64x1xf32>
    %13 = arith.divf %11, %12 : vector<64x1xf32>
    %cst_8 = arith.constant 9.99999974E-6 : f32
    %14 = vector.broadcast %cst_8 : f32 to vector<64x1xf32>
    %15 = arith.addf %13, %14 : vector<64x1xf32>
    %16 = math.rsqrt %15 : vector<64x1xf32>
    %17 = vector.broadcast %16 : vector<64x1xf32> to vector<64x64xf32>
    %18 = arith.mulf %8, %17 : vector<64x64xf32>
    %19 = vector.broadcast %1 : vector<1x64xf32> to vector<64x64xf32>
    %20 = arith.mulf %18, %19 : vector<64x64xf32>
    %21 = vector.broadcast %2 : vector<1x64xf32> to vector<64x64xf32>
    %22 = arith.addf %20, %21 : vector<64x64xf32>
    %c0_9 = arith.constant 0 : index
    %c0_10 = arith.constant 0 : index
    %23 = vector.load %arg4[%c0_9, %c0_10] : memref<64x256xbf16, #tpu.memory_space<vmem>>, vector<64x256xbf16>
    %24 = arith.truncf %22 : vector<64x64xf32> to vector<64x64xbf16>
    %cst_11 = arith.constant dense<0.000000e+00> : vector<64x256xf32>
    %25 = tpu.matmul %24, %23, %cst_11 {dimension_numbers = #tpu.dot_dimension_numbers<[1], [0], [0], [1], [0, 0, 1, 1], [], []>} : vector<64x64xbf16>, vector<64x256xbf16>, vector<64x256xf32> -> vector<64x256xf32>
    %c0_12 = arith.constant 0 : index
    %c0_13 = arith.constant 0 : index
    %26 = vector.load %arg5[%c0_12, %c0_13] : memref<1x256xf32, #tpu.memory_space<vmem>>, vector<1x256xf32>
    %27 = vector.broadcast %26 : vector<1x256xf32> to vector<64x256xf32>
    %28 = arith.addf %25, %27 : vector<64x256xf32>
    %cst_14 = arith.constant 5.000000e-01 : f32
    %29 = vector.broadcast %cst_14 : f32 to vector<64x256xf32>
    %30 = arith.mulf %29, %28 : vector<64x256xf32>
    %cst_15 = arith.constant 0.707106769 : f32
    %31 = vector.broadcast %cst_15 : f32 to vector<64x256xf32>
    %32 = arith.mulf %28, %31 : vector<64x256xf32>
    %cst_16 = arith.constant 0.000000e+00 : f32
    %33 = vector.broadcast %cst_16 : f32 to vector<64x256xf32>
    %34 = arith.cmpf olt, %32, %33 : vector<64x256xf32>
    %cst_17 = arith.constant -1.000000e+00 : f32
    %cst_18 = arith.constant 1.000000e+00 : f32
    %35 = vector.broadcast %cst_17 : f32 to vector<64x256xf32>
    %36 = vector.broadcast %cst_18 : f32 to vector<64x256xf32>
    %37 = arith.select %34, %35, %36 : vector<64x256xi1>, vector<64x256xf32>
    %38 = math.absf %32 : vector<64x256xf32>
    %cst_19 = arith.constant 0.327591091 : f32
    %39 = vector.broadcast %cst_19 : f32 to vector<64x256xf32>
    %40 = arith.mulf %39, %38 : vector<64x256xf32>
    %cst_20 = arith.constant 1.000000e+00 : f32
    %41 = vector.broadcast %cst_20 : f32 to vector<64x256xf32>
    %42 = arith.addf %41, %40 : vector<64x256xf32>
    %43 = tpu.reciprocal %42 {approx = true} : vector<64x256xf32> -> vector<64x256xf32>
    %cst_21 = arith.constant 1.06140542 : f32
    %44 = vector.broadcast %cst_21 : f32 to vector<64x256xf32>
    %45 = arith.mulf %44, %43 : vector<64x256xf32>
    %cst_22 = arith.constant -1.45315206 : f32
    %46 = vector.broadcast %cst_22 : f32 to vector<64x256xf32>
    %47 = arith.addf %45, %46 : vector<64x256xf32>
    %48 = arith.mulf %47, %43 : vector<64x256xf32>
    %cst_23 = arith.constant 1.42141378 : f32
    %49 = vector.broadcast %cst_23 : f32 to vector<64x256xf32>
    %50 = arith.addf %48, %49 : vector<64x256xf32>
    %51 = arith.mulf %50, %43 : vector<64x256xf32>
    %cst_24 = arith.constant -0.284496725 : f32
    %52 = vector.broadcast %cst_24 : f32 to vector<64x256xf32>
    %53 = arith.addf %51, %52 : vector<64x256xf32>
    %54 = arith.mulf %53, %43 : vector<64x256xf32>
    %cst_25 = arith.constant 0.254829586 : f32
    %55 = vector.broadcast %cst_25 : f32 to vector<64x256xf32>
    %56 = arith.addf %54, %55 : vector<64x256xf32>
    %57 = arith.mulf %56, %43 : vector<64x256xf32>
    %cst_26 = arith.constant 0.000000e+00 : f32
    %58 = vector.broadcast %cst_26 : f32 to vector<64x256xf32>
    %59 = arith.subf %58, %38 : vector<64x256xf32>
    %60 = arith.mulf %59, %38 : vector<64x256xf32>
    %61 = math.exp %60 : vector<64x256xf32>
    %62 = arith.mulf %57, %61 : vector<64x256xf32>
    %cst_27 = arith.constant 1.000000e+00 : f32
    %63 = vector.broadcast %cst_27 : f32 to vector<64x256xf32>
    %64 = arith.subf %63, %62 : vector<64x256xf32>
    %65 = arith.mulf %37, %64 : vector<64x256xf32>
    %cst_28 = arith.constant 1.000000e+00 : f32
    %66 = vector.broadcast %cst_28 : f32 to vector<64x256xf32>
    %67 = arith.addf %66, %65 : vector<64x256xf32>
    %68 = arith.mulf %30, %67 : vector<64x256xf32>
    %c0_29 = arith.constant 0 : index
    %c0_30 = arith.constant 0 : index
    %69 = vector.load %arg6[%c0_29, %c0_30] : memref<256x64xbf16, #tpu.memory_space<vmem>>, vector<256x64xbf16>
    %70 = arith.truncf %68 : vector<64x256xf32> to vector<64x256xbf16>
    %cst_31 = arith.constant dense<0.000000e+00> : vector<64x64xf32>
    %71 = tpu.matmul %70, %69, %cst_31 {dimension_numbers = #tpu.dot_dimension_numbers<[1], [0], [0], [1], [0, 0, 1, 1], [], []>} : vector<64x256xbf16>, vector<256x64xbf16>, vector<64x64xf32> -> vector<64x64xf32>
    %72 = arith.addf %0, %71 : vector<64x64xf32>
    %c0_32 = arith.constant 0 : index
    %c0_33 = arith.constant 0 : index
    %73 = vector.load %arg7[%c0_32, %c0_33] : memref<1x64xf32, #tpu.memory_space<vmem>>, vector<1x64xf32>
    %74 = vector.broadcast %73 : vector<1x64xf32> to vector<64x64xf32>
    %75 = arith.addf %72, %74 : vector<64x64xf32>
    %c0_34 = arith.constant 0 : index
    %c0_35 = arith.constant 0 : index
    %76 = vector.load %arg8[%c0_34, %c0_35] : memref<64x64xf32, #tpu.memory_space<vmem>>, vector<64x64xf32>
    tpu.vector_store %arg8[%c0_34, %c0_35], %75 {strides = array<i32>} : memref<64x64xf32, #tpu.memory_space<vmem>>, vector<64x64xf32>,
    return
  }
  func.func @transform_0(%arg0: i32) -> (i32, i32) {
    %c0_i32 = arith.constant 0 : i32
    %c0_i32_0 = arith.constant 0 : i32
    return %arg0, %c0_i32 : i32, i32
  }
  func.func @transform_1(%arg0: i32) -> (i32, i32) {
    %c0_i32 = arith.constant 0 : i32
    %c0_i32_0 = arith.constant 0 : i32
    %c0_i32_1 = arith.constant 0 : i32
    return %c0_i32, %c0_i32_0 : i32, i32
  }
  func.func @transform_2(%arg0: i32) -> (i32, i32) {
    %c0_i32 = arith.constant 0 : i32
    %c0_i32_0 = arith.constant 0 : i32
    %c0_i32_1 = arith.constant 0 : i32
    return %c0_i32, %c0_i32_0 : i32, i32
  }
  func.func @transform_3(%arg0: i32) -> (i32, i32) {
    %c0_i32 = arith.constant 0 : i32
    %c0_i32_0 = arith.constant 0 : i32
    %c0_i32_1 = arith.constant 0 : i32
    return %c0_i32, %c0_i32_0 : i32, i32
  }
  func.func @transform_4(%arg0: i32) -> (i32, i32) {
    %c0_i32 = arith.constant 0 : i32
    %c0_i32_0 = arith.constant 0 : i32
    %c0_i32_1 = arith.constant 0 : i32
    return %c0_i32, %c0_i32_0 : i32, i32
  }
  func.func @transform_5(%arg0: i32) -> (i32, i32) {
    %c0_i32 = arith.constant 0 : i32
    %c0_i32_0 = arith.constant 0 : i32
    %c0_i32_1 = arith.constant 0 : i32
    return %c0_i32, %c0_i32_0 : i32, i32
  }
  func.func @transform_6(%arg0: i32) -> (i32, i32) {
    %c0_i32 = arith.constant 0 : i32
    %c0_i32_0 = arith.constant 0 : i32
    %c0_i32_1 = arith.constant 0 : i32
    return %c0_i32, %c0_i32_0 : i32, i32
  }
  func.func @transform_7(%arg0: i32) -> (i32, i32) {
    %c0_i32 = arith.constant 0 : i32
    %c0_i32_0 = arith.constant 0 : i32
    return %arg0, %c0_i32 : i32, i32
  }
}

module attributes {stable_mosaic.version = 11 : i64} {
  func.func @_norm_head_kernel(%arg0: i32, %arg1: memref<64x64xf32, #tpu.memory_space<vmem>>, %arg2: memref<1x64xf32, #tpu.memory_space<vmem>>, %arg3: memref<1x64xf32, #tpu.memory_space<vmem>>, %arg4: memref<64x64xbf16, #tpu.memory_space<vmem>>, %arg5: memref<1x64xf32, #tpu.memory_space<vmem>>, %arg6: memref<64x64xbf16, #tpu.memory_space<vmem>>, %arg7: memref<1x64xf32, #tpu.memory_space<vmem>>, %arg8: memref<64x24xbf16, #tpu.memory_space<vmem>>, %arg9: memref<1x24xf32, #tpu.memory_space<vmem>>, %arg10: memref<64x24xf32, #tpu.memory_space<vmem>>) attributes {dimension_semantics = [#tpu.dimension_semantics<parallel>], iteration_bounds = array<i64: 2>, scalar_prefetch = 0 : i64, scratch_operands = 0 : i64, tpu.core_type = #tpu.core_type<tc>, window_params = [{transform_indices = @transform_0, window_bounds = array<i64: 64, 64>}, {pipeline_mode = #tpu.pipeline_mode<synchronous>, transform_indices = @transform_1, window_bounds = array<i64: 1, 64>}, {pipeline_mode = #tpu.pipeline_mode<synchronous>, transform_indices = @transform_2, window_bounds = array<i64: 1, 64>}, {pipeline_mode = #tpu.pipeline_mode<synchronous>, transform_indices = @transform_3, window_bounds = array<i64: 64, 64>}, {pipeline_mode = #tpu.pipeline_mode<synchronous>, transform_indices = @transform_4, window_bounds = array<i64: 1, 64>}, {pipeline_mode = #tpu.pipeline_mode<synchronous>, transform_indices = @transform_5, window_bounds = array<i64: 64, 64>}, {pipeline_mode = #tpu.pipeline_mode<synchronous>, transform_indices = @transform_6, window_bounds = array<i64: 1, 64>}, {pipeline_mode = #tpu.pipeline_mode<synchronous>, transform_indices = @transform_7, window_bounds = array<i64: 64, 24>}, {pipeline_mode = #tpu.pipeline_mode<synchronous>, transform_indices = @transform_8, window_bounds = array<i64: 1, 24>}, {transform_indices = @transform_9, window_bounds = array<i64: 64, 24>}]} {
    %c0 = arith.constant 0 : index
    %c0_0 = arith.constant 0 : index
    %0 = vector.load %arg1[%c0, %c0_0] : memref<64x64xf32, #tpu.memory_space<vmem>>, vector<64x64xf32>
    %c0_1 = arith.constant 0 : index
    %c0_2 = arith.constant 0 : index
    %1 = vector.load %arg2[%c0_1, %c0_2] : memref<1x64xf32, #tpu.memory_space<vmem>>, vector<1x64xf32>
    %c0_3 = arith.constant 0 : index
    %c0_4 = arith.constant 0 : index
    %2 = vector.load %arg3[%c0_3, %c0_4] : memref<1x64xf32, #tpu.memory_space<vmem>>, vector<1x64xf32>
    %cst = arith.constant dense<0.000000e+00> : vector<64xf32>
    %3 = vector.multi_reduction <add>, %0, %cst [1] : vector<64x64xf32> to vector<64xf32>
    %4 = vector.shape_cast %3 : vector<64xf32> to vector<64x1xf32>
    %cst_5 = arith.constant 6.400000e+01 : f32
    %5 = vector.broadcast %cst_5 : f32 to vector<64x1xf32>
    %6 = arith.divf %4, %5 : vector<64x1xf32>
    %7 = vector.broadcast %6 : vector<64x1xf32> to vector<64x64xf32>
    %8 = arith.subf %0, %7 : vector<64x64xf32>
    %9 = arith.mulf %8, %8 : vector<64x64xf32>
    %cst_6 = arith.constant dense<0.000000e+00> : vector<64xf32>
    %10 = vector.multi_reduction <add>, %9, %cst_6 [1] : vector<64x64xf32> to vector<64xf32>
    %11 = vector.shape_cast %10 : vector<64xf32> to vector<64x1xf32>
    %cst_7 = arith.constant 6.400000e+01 : f32
    %12 = vector.broadcast %cst_7 : f32 to vector<64x1xf32>
    %13 = arith.divf %11, %12 : vector<64x1xf32>
    %cst_8 = arith.constant 9.99999974E-6 : f32
    %14 = vector.broadcast %cst_8 : f32 to vector<64x1xf32>
    %15 = arith.addf %13, %14 : vector<64x1xf32>
    %16 = math.rsqrt %15 : vector<64x1xf32>
    %17 = vector.broadcast %16 : vector<64x1xf32> to vector<64x64xf32>
    %18 = arith.mulf %8, %17 : vector<64x64xf32>
    %19 = vector.broadcast %1 : vector<1x64xf32> to vector<64x64xf32>
    %20 = arith.mulf %18, %19 : vector<64x64xf32>
    %21 = vector.broadcast %2 : vector<1x64xf32> to vector<64x64xf32>
    %22 = arith.addf %20, %21 : vector<64x64xf32>
    %c0_9 = arith.constant 0 : index
    %c0_10 = arith.constant 0 : index
    %23 = vector.load %arg4[%c0_9, %c0_10] : memref<64x64xbf16, #tpu.memory_space<vmem>>, vector<64x64xbf16>
    %24 = arith.truncf %22 : vector<64x64xf32> to vector<64x64xbf16>
    %cst_11 = arith.constant dense<0.000000e+00> : vector<64x64xf32>
    %25 = tpu.matmul %24, %23, %cst_11 {dimension_numbers = #tpu.dot_dimension_numbers<[1], [0], [0], [1], [0, 0, 1, 1], [], []>} : vector<64x64xbf16>, vector<64x64xbf16>, vector<64x64xf32> -> vector<64x64xf32>
    %c0_12 = arith.constant 0 : index
    %c0_13 = arith.constant 0 : index
    %26 = vector.load %arg5[%c0_12, %c0_13] : memref<1x64xf32, #tpu.memory_space<vmem>>, vector<1x64xf32>
    %27 = vector.broadcast %26 : vector<1x64xf32> to vector<64x64xf32>
    %28 = arith.addf %25, %27 : vector<64x64xf32>
    %cst_14 = arith.constant 5.000000e-01 : f32
    %29 = vector.broadcast %cst_14 : f32 to vector<64x64xf32>
    %30 = arith.mulf %29, %28 : vector<64x64xf32>
    %cst_15 = arith.constant 0.707106769 : f32
    %31 = vector.broadcast %cst_15 : f32 to vector<64x64xf32>
    %32 = arith.mulf %28, %31 : vector<64x64xf32>
    %cst_16 = arith.constant 0.000000e+00 : f32
    %33 = vector.broadcast %cst_16 : f32 to vector<64x64xf32>
    %34 = arith.cmpf olt, %32, %33 : vector<64x64xf32>
    %cst_17 = arith.constant -1.000000e+00 : f32
    %cst_18 = arith.constant 1.000000e+00 : f32
    %35 = vector.broadcast %cst_17 : f32 to vector<64x64xf32>
    %36 = vector.broadcast %cst_18 : f32 to vector<64x64xf32>
    %37 = arith.select %34, %35, %36 : vector<64x64xi1>, vector<64x64xf32>
    %38 = math.absf %32 : vector<64x64xf32>
    %cst_19 = arith.constant 0.327591091 : f32
    %39 = vector.broadcast %cst_19 : f32 to vector<64x64xf32>
    %40 = arith.mulf %39, %38 : vector<64x64xf32>
    %cst_20 = arith.constant 1.000000e+00 : f32
    %41 = vector.broadcast %cst_20 : f32 to vector<64x64xf32>
    %42 = arith.addf %41, %40 : vector<64x64xf32>
    %43 = tpu.reciprocal %42 {approx = true} : vector<64x64xf32> -> vector<64x64xf32>
    %cst_21 = arith.constant 1.06140542 : f32
    %44 = vector.broadcast %cst_21 : f32 to vector<64x64xf32>
    %45 = arith.mulf %44, %43 : vector<64x64xf32>
    %cst_22 = arith.constant -1.45315206 : f32
    %46 = vector.broadcast %cst_22 : f32 to vector<64x64xf32>
    %47 = arith.addf %45, %46 : vector<64x64xf32>
    %48 = arith.mulf %47, %43 : vector<64x64xf32>
    %cst_23 = arith.constant 1.42141378 : f32
    %49 = vector.broadcast %cst_23 : f32 to vector<64x64xf32>
    %50 = arith.addf %48, %49 : vector<64x64xf32>
    %51 = arith.mulf %50, %43 : vector<64x64xf32>
    %cst_24 = arith.constant -0.284496725 : f32
    %52 = vector.broadcast %cst_24 : f32 to vector<64x64xf32>
    %53 = arith.addf %51, %52 : vector<64x64xf32>
    %54 = arith.mulf %53, %43 : vector<64x64xf32>
    %cst_25 = arith.constant 0.254829586 : f32
    %55 = vector.broadcast %cst_25 : f32 to vector<64x64xf32>
    %56 = arith.addf %54, %55 : vector<64x64xf32>
    %57 = arith.mulf %56, %43 : vector<64x64xf32>
    %cst_26 = arith.constant 0.000000e+00 : f32
    %58 = vector.broadcast %cst_26 : f32 to vector<64x64xf32>
    %59 = arith.subf %58, %38 : vector<64x64xf32>
    %60 = arith.mulf %59, %38 : vector<64x64xf32>
    %61 = math.exp %60 : vector<64x64xf32>
    %62 = arith.mulf %57, %61 : vector<64x64xf32>
    %cst_27 = arith.constant 1.000000e+00 : f32
    %63 = vector.broadcast %cst_27 : f32 to vector<64x64xf32>
    %64 = arith.subf %63, %62 : vector<64x64xf32>
    %65 = arith.mulf %37, %64 : vector<64x64xf32>
    %cst_28 = arith.constant 1.000000e+00 : f32
    %66 = vector.broadcast %cst_28 : f32 to vector<64x64xf32>
    %67 = arith.addf %66, %65 : vector<64x64xf32>
    %68 = arith.mulf %30, %67 : vector<64x64xf32>
    %c0_29 = arith.constant 0 : index
    %c0_30 = arith.constant 0 : index
    %69 = vector.load %arg6[%c0_29, %c0_30] : memref<64x64xbf16, #tpu.memory_space<vmem>>, vector<64x64xbf16>
    %70 = arith.truncf %68 : vector<64x64xf32> to vector<64x64xbf16>
    %cst_31 = arith.constant dense<0.000000e+00> : vector<64x64xf32>
    %71 = tpu.matmul %70, %69, %cst_31 {dimension_numbers = #tpu.dot_dimension_numbers<[1], [0], [0], [1], [0, 0, 1, 1], [], []>} : vector<64x64xbf16>, vector<64x64xbf16>, vector<64x64xf32> -> vector<64x64xf32>
    %c0_32 = arith.constant 0 : index
    %c0_33 = arith.constant 0 : index
    %72 = vector.load %arg7[%c0_32, %c0_33] : memref<1x64xf32, #tpu.memory_space<vmem>>, vector<1x64xf32>
    %73 = vector.broadcast %72 : vector<1x64xf32> to vector<64x64xf32>
    %74 = arith.addf %71, %73 : vector<64x64xf32>
    %cst_34 = arith.constant 5.000000e-01 : f32
    %75 = vector.broadcast %cst_34 : f32 to vector<64x64xf32>
    %76 = arith.mulf %75, %74 : vector<64x64xf32>
    %cst_35 = arith.constant 0.707106769 : f32
    %77 = vector.broadcast %cst_35 : f32 to vector<64x64xf32>
    %78 = arith.mulf %74, %77 : vector<64x64xf32>
    %cst_36 = arith.constant 0.000000e+00 : f32
    %79 = vector.broadcast %cst_36 : f32 to vector<64x64xf32>
    %80 = arith.cmpf olt, %78, %79 : vector<64x64xf32>
    %cst_37 = arith.constant -1.000000e+00 : f32
    %cst_38 = arith.constant 1.000000e+00 : f32
    %81 = vector.broadcast %cst_37 : f32 to vector<64x64xf32>
    %82 = vector.broadcast %cst_38 : f32 to vector<64x64xf32>
    %83 = arith.select %80, %81, %82 : vector<64x64xi1>, vector<64x64xf32>
    %84 = math.absf %78 : vector<64x64xf32>
    %cst_39 = arith.constant 0.327591091 : f32
    %85 = vector.broadcast %cst_39 : f32 to vector<64x64xf32>
    %86 = arith.mulf %85, %84 : vector<64x64xf32>
    %cst_40 = arith.constant 1.000000e+00 : f32
    %87 = vector.broadcast %cst_40 : f32 to vector<64x64xf32>
    %88 = arith.addf %87, %86 : vector<64x64xf32>
    %89 = tpu.reciprocal %88 {approx = true} : vector<64x64xf32> -> vector<64x64xf32>
    %cst_41 = arith.constant 1.06140542 : f32
    %90 = vector.broadcast %cst_41 : f32 to vector<64x64xf32>
    %91 = arith.mulf %90, %89 : vector<64x64xf32>
    %cst_42 = arith.constant -1.45315206 : f32
    %92 = vector.broadcast %cst_42 : f32 to vector<64x64xf32>
    %93 = arith.addf %91, %92 : vector<64x64xf32>
    %94 = arith.mulf %93, %89 : vector<64x64xf32>
    %cst_43 = arith.constant 1.42141378 : f32
    %95 = vector.broadcast %cst_43 : f32 to vector<64x64xf32>
    %96 = arith.addf %94, %95 : vector<64x64xf32>
    %97 = arith.mulf %96, %89 : vector<64x64xf32>
    %cst_44 = arith.constant -0.284496725 : f32
    %98 = vector.broadcast %cst_44 : f32 to vector<64x64xf32>
    %99 = arith.addf %97, %98 : vector<64x64xf32>
    %100 = arith.mulf %99, %89 : vector<64x64xf32>
    %cst_45 = arith.constant 0.254829586 : f32
    %101 = vector.broadcast %cst_45 : f32 to vector<64x64xf32>
    %102 = arith.addf %100, %101 : vector<64x64xf32>
    %103 = arith.mulf %102, %89 : vector<64x64xf32>
    %cst_46 = arith.constant 0.000000e+00 : f32
    %104 = vector.broadcast %cst_46 : f32 to vector<64x64xf32>
    %105 = arith.subf %104, %84 : vector<64x64xf32>
    %106 = arith.mulf %105, %84 : vector<64x64xf32>
    %107 = math.exp %106 : vector<64x64xf32>
    %108 = arith.mulf %103, %107 : vector<64x64xf32>
    %cst_47 = arith.constant 1.000000e+00 : f32
    %109 = vector.broadcast %cst_47 : f32 to vector<64x64xf32>
    %110 = arith.subf %109, %108 : vector<64x64xf32>
    %111 = arith.mulf %83, %110 : vector<64x64xf32>
    %cst_48 = arith.constant 1.000000e+00 : f32
    %112 = vector.broadcast %cst_48 : f32 to vector<64x64xf32>
    %113 = arith.addf %112, %111 : vector<64x64xf32>
    %114 = arith.mulf %76, %113 : vector<64x64xf32>
    %c0_49 = arith.constant 0 : index
    %c0_50 = arith.constant 0 : index
    %115 = vector.load %arg8[%c0_49, %c0_50] : memref<64x24xbf16, #tpu.memory_space<vmem>>, vector<64x24xbf16>
    %116 = arith.truncf %114 : vector<64x64xf32> to vector<64x64xbf16>
    %cst_51 = arith.constant dense<0.000000e+00> : vector<64x24xf32>
    %117 = tpu.matmul %116, %115, %cst_51 {dimension_numbers = #tpu.dot_dimension_numbers<[1], [0], [0], [1], [0, 0, 1, 1], [], []>} : vector<64x64xbf16>, vector<64x24xbf16>, vector<64x24xf32> -> vector<64x24xf32>
    %c0_52 = arith.constant 0 : index
    %c0_53 = arith.constant 0 : index
    %118 = vector.load %arg9[%c0_52, %c0_53] : memref<1x24xf32, #tpu.memory_space<vmem>>, vector<1x24xf32>
    %119 = vector.broadcast %118 : vector<1x24xf32> to vector<64x24xf32>
    %120 = arith.addf %117, %119 : vector<64x24xf32>
    %c0_54 = arith.constant 0 : index
    %c0_55 = arith.constant 0 : index
    %121 = vector.load %arg10[%c0_54, %c0_55] : memref<64x24xf32, #tpu.memory_space<vmem>>, vector<64x24xf32>
    tpu.vector_store %arg10[%c0_54, %c0_55], %120 {strides = array<i32>} : memref<64x24xf32, #tpu.memory_space<vmem>>, vector<64x24xf32>,
    return
  }
  func.func @transform_0(%arg0: i32) -> (i32, i32) {
    %c0_i32 = arith.constant 0 : i32
    %c0_i32_0 = arith.constant 0 : i32
    return %arg0, %c0_i32 : i32, i32
  }
  func.func @transform_1(%arg0: i32) -> (i32, i32) {
    %c0_i32 = arith.constant 0 : i32
    %c0_i32_0 = arith.constant 0 : i32
    %c0_i32_1 = arith.constant 0 : i32
    return %c0_i32, %c0_i32_0 : i32, i32
  }
  func.func @transform_2(%arg0: i32) -> (i32, i32) {
    %c0_i32 = arith.constant 0 : i32
    %c0_i32_0 = arith.constant 0 : i32
    %c0_i32_1 = arith.constant 0 : i32
    return %c0_i32, %c0_i32_0 : i32, i32
  }
  func.func @transform_3(%arg0: i32) -> (i32, i32) {
    %c0_i32 = arith.constant 0 : i32
    %c0_i32_0 = arith.constant 0 : i32
    %c0_i32_1 = arith.constant 0 : i32
    return %c0_i32, %c0_i32_0 : i32, i32
  }
  func.func @transform_4(%arg0: i32) -> (i32, i32) {
    %c0_i32 = arith.constant 0 : i32
    %c0_i32_0 = arith.constant 0 : i32
    %c0_i32_1 = arith.constant 0 : i32
    return %c0_i32, %c0_i32_0 : i32, i32
  }
  func.func @transform_5(%arg0: i32) -> (i32, i32) {
    %c0_i32 = arith.constant 0 : i32
    %c0_i32_0 = arith.constant 0 : i32
    %c0_i32_1 = arith.constant 0 : i32
    return %c0_i32, %c0_i32_0 : i32, i32
  }
  func.func @transform_6(%arg0: i32) -> (i32, i32) {
    %c0_i32 = arith.constant 0 : i32
    %c0_i32_0 = arith.constant 0 : i32
    %c0_i32_1 = arith.constant 0 : i32
    return %c0_i32, %c0_i32_0 : i32, i32
  }
  func.func @transform_7(%arg0: i32) -> (i32, i32) {
    %c0_i32 = arith.constant 0 : i32
    %c0_i32_0 = arith.constant 0 : i32
    %c0_i32_1 = arith.constant 0 : i32
    return %c0_i32, %c0_i32_0 : i32, i32
  }
  func.func @transform_8(%arg0: i32) -> (i32, i32) {
    %c0_i32 = arith.constant 0 : i32
    %c0_i32_0 = arith.constant 0 : i32
    %c0_i32_1 = arith.constant 0 : i32
    return %c0_i32, %c0_i32_0 : i32, i32
  }
  func.func @transform_9(%arg0: i32) -> (i32, i32) {
    %c0_i32 = arith.constant 0 : i32
    %c0_i32_0 = arith.constant 0 : i32
    return %arg0, %c0_i32 : i32, i32
  }
}

module attributes {stable_mosaic.version = 11 : i64} {
  func.func @_wmse_kernel(%arg0: i32, %arg1: memref<10x256xf32, #tpu.memory_space<vmem>>, %arg2: memref<10x256xf32, #tpu.memory_space<vmem>>, %arg3: memref<1x256xf32, #tpu.memory_space<vmem>>, %arg4: memref<1x1xf32, #tpu.memory_space<vmem>>) attributes {dimension_semantics = [#tpu.dimension_semantics<arbitrary>], iteration_bounds = array<i64: 1>, scalar_prefetch = 0 : i64, scratch_operands = 0 : i64, tpu.core_type = #tpu.core_type<tc>, window_params = [{transform_indices = @transform_0, window_bounds = array<i64: 10, 256>}, {transform_indices = @transform_1, window_bounds = array<i64: 10, 256>}, {pipeline_mode = #tpu.pipeline_mode<synchronous>, transform_indices = @transform_2, window_bounds = array<i64: 1, 256>}, {pipeline_mode = #tpu.pipeline_mode<synchronous>, transform_indices = @transform_3, window_bounds = array<i64: 1, 1>}]} {
    %c0_i32 = arith.constant 0 : i32
    %0 = arith.cmpi eq, %arg0, %c0_i32 : i32
    %1 = arith.extui %0 : i1 to i32
    %c0_i32_0 = arith.constant 0 : i32
    %2 = arith.cmpi ne, %1, %c0_i32_0 : i32
    scf.if %2 {
      %cst_14 = arith.constant 0.000000e+00 : f32
      %27 = vector.broadcast %cst_14 : f32 to vector<1x1xf32>
      %c0_15 = arith.constant 0 : index
      %c0_16 = arith.constant 0 : index
      %28 = vector.load %arg4[%c0_15, %c0_16] : memref<1x1xf32, #tpu.memory_space<vmem>>, vector<1x1xf32>
      tpu.vector_store %arg4[%c0_15, %c0_16], %27 {strides = array<i32>} : memref<1x1xf32, #tpu.memory_space<vmem>>, vector<1x1xf32>,
    } else {
    }
    %c0 = arith.constant 0 : index
    %c0_1 = arith.constant 0 : index
    %3 = vector.load %arg1[%c0, %c0_1] : memref<10x256xf32, #tpu.memory_space<vmem>>, vector<10x256xf32>
    %c0_2 = arith.constant 0 : index
    %c0_3 = arith.constant 0 : index
    %4 = vector.load %arg2[%c0_2, %c0_3] : memref<10x256xf32, #tpu.memory_space<vmem>>, vector<10x256xf32>
    %5 = arith.subf %3, %4 : vector<10x256xf32>
    %6 = arith.mulf %5, %5 : vector<10x256xf32>
    %c0_4 = arith.constant 0 : index
    %c0_5 = arith.constant 0 : index
    %7 = vector.load %arg3[%c0_4, %c0_5] : memref<1x256xf32, #tpu.memory_space<vmem>>, vector<1x256xf32>
    %8 = vector.broadcast %7 : vector<1x256xf32> to vector<10x256xf32>
    %9 = arith.mulf %6, %8 : vector<10x256xf32>
    %10 = tpu.iota {dimensions = array<i32: 0>} : vector<10x256xi32>
    %c10_i32 = arith.constant 10 : i32
    %11 = arith.muli %arg0, %c10_i32 : i32
    %12 = vector.broadcast %11 : i32 to vector<10x256xi32>
    %13 = arith.addi %10, %12 : vector<10x256xi32>
    %c10_i32_6 = arith.constant 10 : i32
    %14 = vector.broadcast %c10_i32_6 : i32 to vector<10x256xi32>
    %15 = arith.cmpi slt, %13, %14 : vector<10x256xi32>
    %cst = arith.constant 0.000000e+00 : f32
    %16 = vector.broadcast %cst : f32 to vector<10x256xf32>
    %17 = arith.select %15, %9, %16 : vector<10x256xi1>, vector<10x256xf32>
    %cst_7 = arith.constant dense<0.000000e+00> : vector<10xf32>
    %18 = vector.multi_reduction <add>, %17, %cst_7 [1] : vector<10x256xf32> to vector<10xf32>
    %19 = vector.shape_cast %18 : vector<10xf32> to vector<10x1xf32>
    %cst_8 = arith.constant dense<0.000000e+00> : vector<1xf32>
    %20 = vector.multi_reduction <add>, %19, %cst_8 [0] : vector<10x1xf32> to vector<1xf32>
    %21 = vector.shape_cast %20 : vector<1xf32> to vector<1x1xf32>
    %c0_9 = arith.constant 0 : index
    %c0_10 = arith.constant 0 : index
    %22 = vector.load %arg4[%c0_9, %c0_10] : memref<1x1xf32, #tpu.memory_space<vmem>>, vector<1x1xf32>
    %cst_11 = arith.constant 3.906250e-04 : f32
    %23 = vector.broadcast %cst_11 : f32 to vector<1x1xf32>
    %24 = arith.mulf %21, %23 : vector<1x1xf32>
    %25 = arith.addf %22, %24 : vector<1x1xf32>
    %c0_12 = arith.constant 0 : index
    %c0_13 = arith.constant 0 : index
    %26 = vector.load %arg4[%c0_12, %c0_13] : memref<1x1xf32, #tpu.memory_space<vmem>>, vector<1x1xf32>
    tpu.vector_store %arg4[%c0_12, %c0_13], %25 {strides = array<i32>} : memref<1x1xf32, #tpu.memory_space<vmem>>, vector<1x1xf32>,
    return
  }
  func.func @transform_0(%arg0: i32) -> (i32, i32) {
    %c0_i32 = arith.constant 0 : i32
    %c0_i32_0 = arith.constant 0 : i32
    return %arg0, %c0_i32 : i32, i32
  }
  func.func @transform_1(%arg0: i32) -> (i32, i32) {
    %c0_i32 = arith.constant 0 : i32
    %c0_i32_0 = arith.constant 0 : i32
    return %arg0, %c0_i32 : i32, i32
  }
  func.func @transform_2(%arg0: i32) -> (i32, i32) {
    %c0_i32 = arith.constant 0 : i32
    %c0_i32_0 = arith.constant 0 : i32
    %c0_i32_1 = arith.constant 0 : i32
    return %c0_i32, %c0_i32_0 : i32, i32
  }
  func.func @transform_3(%arg0: i32) -> (i32, i32) {
    %c0_i32 = arith.constant 0 : i32
    %c0_i32_0 = arith.constant 0 : i32
    %c0_i32_1 = arith.constant 0 : i32
    return %c0_i32, %c0_i32_0 : i32, i32
  }
}

</mosaic_0001>

<bundles_post_ra>
// kernel: climax_forward.8
= control target key start
LH: loop header
LB: loop body
LE: loop exit
PB: predicated region body
PF: predicated region fallthrough
CT: control target
= control target key end

     0   :  { %s574_s12 = smov 0   ;;  %s672_s0 = inlined_call_operand.vmem [shape: f32[128,24], index: 0, kind: input, shape index: {}]   ;;  %s673_s1 = inlined_call_operand.vmem [shape: bf16[24,384], index: 1, kind: input, shape index: {}]   ;;  %s674_s2 = inlined_call_operand.vmem [shape: f32[1,384], index: 2, kind: input, shape index: {}]   ;;  %s675_s3 = inlined_call_operand.vmem [shape: f32[128,384], index: 3, kind: output, shape index: {}]  }
   0x1 LB: > { %s479_s13 = sadd.s32 4294967295, %s551_s12   ;;  %p483_p0 = scmp.ge.s32.totalorder %s551_s12, 1  ;;  %s551_s12 = sphi %s574_s12, %s13_s12  }
   0x2   : > { %p138_p1 = scmp.lt.s32.totalorder %s551_s12, 3 }
   0x4   : > { %p139_p2 = pnand %p483_p0, %p138_p1 }
   0x5   : > { %s484_s16 = sshll.u32 (!%p139_p2), %s479_s13, 3 }
   0x6   : > { %142 = sbr.rel (%p139_p2) target bundleno = 240 (0xf0), region = 32  ;;  %p164_p3 = scmp.lt.s32.totalorder (!%p139_p2), %s484_s16, 15 }
   0xb   : > { %v189_v0 = vld [vmem:[%s673_s1 + $0x18] sm:$0xff]  ;;  %vm249_vm0 = vcmask 1043456   ;;  %v540_v3 = vld [vmem:[%s673_s1 + $0x4] ss:$12 sps:$4 sm:$0xff]   ;;  %v553_v4 = vmov 0   ;;  %s677_s16 = smov (!%p164_p3, %s484_s16), 15  ;;  %v197_v22 = vlaneseq }
   0xc   : > { %v492_v1 = vcombine.high %v189_v0, %v189_v0  ;;  %v491_v2 = vcombine.low %v189_v0, %v189_v0  ;;  %291 = vmatprep.mubr.bf16.mxu0 %v553_v4  ;;  %321 = vmatprep.mubr.bf16.mxu1 %v553_v4  ;;  %v542_v6 = vld [vmem:[%s673_s1] ss:$12 sps:$4 sm:$0xff]   ;;  %s485_s21 = sshll.u32 %s677_s16, 3  ;;  %vm236_vm1 = vcmask 195584   ;;  %v544_v15 = vld [vmem:[%s673_s1 + $0x8] ss:$12 sps:$4 sm:$0xff]  }
   0xd   : > { %v543_v7 = vld [vmem:[%s673_s1 + $0x20] ss:$0 sps:$4 sm:$0xff]   ;;  %s167_s26 = scalar_lea.vmem %s672_s0, %s485_s21  ;;  %v198_v23 = vshrl.u32 %v197_v22, 7  ;;  %s528_s4 = smul.u32 24, %s677_s16 }
   0xe   : > { %494 = vmatprep.subr.msk.bf16.mxu0 %vm249_vm0, %v492_v1  ;;  %523 = vmatprep.subr.msk.bf16.mxu1 %vm249_vm0, %v492_v1  ;;  %v251_v5 = vsel %vm249_vm0, %v491_v2, 0  ;;  %v177_v8 = vld [vmem:[%s167_s26] sm:$0xff]  ;;  %v178_v9 = vld [vmem:[%s167_s26 + $0x8] sm:$0xff]  ;;  %v183_v10 = vld [vmem:[%s167_s26 + $0x30] sm:$0xff]  ;;  %v257_v14 = vsel %vm249_vm0, %v543_v7, 0 }
   0xf   : > { %272 = vmatpush1.bf16.msra.mxu0 %v251_v5  ;;  %525 = vmatpush1.bf16.msra.mxu1 %v251_v5  ;;  %v191_v11 = vpack.c.bf16 %v178_v9, %v177_v8  ;;  %v184_v12 = vld [vmem:[%s167_s26 + $0x38] sm:$0xff]  ;;  %v179_v16 = vld [vmem:[%s167_s26 + $0x10] sm:$0xff]  ;;  %v181_v18 = vld [vmem:[%s167_s26 + $0x20] sm:$0xff]  ;;  %v199_v24 = vsub.s32 0, %v198_v23  ;;  %v203_v26 = vsub.s32 1, %v198_v23  ;;  %s627_s7 = scalar_lea.vmem %s675_s3, %s528_s4  ;;  %v207_v33 = vsub.s32 2, %v198_v23 }
  0x10   : > { %273 = vmatprep.subr.bf16.mxu0 %v540_v3  ;;  %524 = vmatprep.subr.bf16.mxu1 %v540_v3  ;;  %v194_v13 = vpack.c.bf16 %v184_v12, %v183_v10  ;;  %v180_v17 = vld [vmem:[%s167_s26 + $0x18] sm:$0xff]  ;;  %v182_v19 = vld [vmem:[%s167_s26 + $0x28] sm:$0xff]  ;;  %v195_v25 = vld [vmem:[%s674_s2] sm:$0x7] }
  0x11   : > { %v192_v20 = vpack.c.bf16 %v180_v17, %v179_v16  ;;  %v193_v21 = vpack.c.bf16 %v182_v19, %v181_v18  ;;  %v620_v27 = vrot.slane %v195_v25, %v199_v24  ;;  %v622_v28 = vrot.slane %v195_v25, %v203_v26 }
  0x12   : > { %v208_v42 = vrot.slane %v195_v25, %v207_v33 }
  0x13   : > { %274 = vmatpush1.bf16.msra.mxu0 %v542_v6  ;;  %526 = vmatpush1.bf16.msra.mxu1 %v542_v6 }
  0x14   : > { %527 = vmatprep.subr.msk.bf16.mxu1 %vm249_vm0, %v543_v7 }
  0x16   : > { %495 = vmatmul.mubr.msk.bf16.vlgmr.msra.gmra.mxu0 %vm236_vm1, %v191_v11  ;;  %498 = vmatmul.mubr.msk.bf16.vlgmr.msra.gmra.mxu1 %vm236_vm1, %v194_v13 }
  0x17   : > { %512 = vmatpush3.bf16.msra.mxu1 %v257_v14  ;;  %301 = vmatprep.mubr.bf16.mxu0 %v553_v4 }
  0x18   : > { %513 = vmatprep.subr.bf16.mxu1 %v544_v15  ;;  %515 = vmatprep.mubr.msk.bf16.mxu1 %vm236_vm1, %v191_v11 }
  0x1b   : > { %514 = vmatpush3.bf16.msra.mxu1 %v544_v15 }
  0x1e   : > { %496 = vmatmul.mubr.msk.bf16.gmra.mxu0 %vm236_vm1, %v192_v20  ;;  %516 = vmatmul.mubr.msk.bf16.vlgmr.msra.gmra.mxu1 %vm236_vm1, %v192_v20 }
  0x1f   : > { %311 = vmatprep.mubr.bf16.mxu0 %v553_v4  ;;  %519 = vmatprep.mubr.msk.bf16.mxu1 %vm236_vm1, %v193_v21 }
  0x26   : > { %497 = vmatmul.mubr.msk.bf16.gmra.mxu0 %vm236_vm1, %v193_v21  ;;  %520 = vmatmul.mubr.msk.bf16.gmra.mxu1 %vm236_vm1, %v194_v13 }
  0xd6   : > { %v293_v29 = vpop.f32.mrf.mxu0  ;;  %v323_v30 = vpop.f32.mrf.mxu1 }
  0xd7   : > { %v294_v31 = vadd.f32 %v293_v29, %v620_v27  ;;  %v324_v32 = vadd.f32 %v323_v30, %v620_v27 }
  0xd8   : > { %v295_v34 = vpop.f32.mrf.mxu0  ;;  %v325_v35 = vpop.f32.mrf.mxu1 }
  0xd9   : > { %397 = vst [vmem:[%s627_s7] sm:$0xff] %v294_v31  ;;  %415 = vst [vmem:[%s627_s7 + $0x90] sm:$0xff] %v324_v32  ;;  %v296_v36 = vadd.f32 %v295_v34, %v622_v28  ;;  %v326_v37 = vadd.f32 %v325_v35, %v622_v28 }
  0xda   : > { %v297_v38 = vpop.f32.mrf.mxu0  ;;  %v327_v39 = vpop.f32.mrf.mxu1 }
  0xdb   : > { %398 = vst [vmem:[%s627_s7 + $0x8] sm:$0xff] %v296_v36  ;;  %416 = vst [vmem:[%s627_s7 + $0x98] sm:$0xff] %v326_v37  ;;  %v298_v40 = vadd.f32 %v297_v38, %v620_v27  ;;  %v328_v41 = vadd.f32 %v327_v39, %v620_v27 }
  0xdc   : > { %v299_v43 = vpop.f32.mrf.mxu0  ;;  %v329_v44 = vpop.f32.mrf.mxu1 }
  0xdd   : > { %400 = vst [vmem:[%s627_s7 + $0x18] sm:$0xff] %v298_v40  ;;  %418 = vst [vmem:[%s627_s7 + $0xa8] sm:$0xff] %v328_v41  ;;  %v300_v45 = vadd.f32 %v299_v43, %v622_v28  ;;  %v330_v46 = vadd.f32 %v329_v44, %v622_v28 }
  0xde   : > { %v303_v47 = vpop.f32.mrf.mxu0  ;;  %v517_v48 = vpop.f32.mrf.mxu1 }
  0xdf   : > { %401 = vst [vmem:[%s627_s7 + $0x20] sm:$0xff] %v300_v45  ;;  %419 = vst [vmem:[%s627_s7 + $0xb0] sm:$0xff] %v330_v46  ;;  %v304_v49 = vadd.f32 %v303_v47, %v620_v27  ;;  %v375_v50 = vadd.f32 %v517_v48, %v208_v42 }
  0xe0   : > { %v305_v51 = vpop.f32.mrf.mxu0  ;;  %v366_v52 = vpop.f32.mrf.mxu1 }
  0xe1   : > { %403 = vst [vmem:[%s627_s7 + $0x30] sm:$0xff] %v304_v49  ;;  %405 = vst [vmem:[%s627_s7 + $0x40] sm:$0xff] %v375_v50  ;;  %v306_v53 = vadd.f32 %v305_v51, %v622_v28  ;;  %v367_v54 = vadd.f32 %v366_v52, %v208_v42 }
  0xe2   : > { %v307_v55 = vpop.f32.mrf.mxu0  ;;  %v518_v56 = vpop.f32.mrf.mxu1 }
  0xe3   : > { %404 = vst [vmem:[%s627_s7 + $0x38] sm:$0xff] %v306_v53  ;;  %399 = vst [vmem:[%s627_s7 + $0x10] sm:$0xff] %v367_v54  ;;  %v308_v57 = vadd.f32 %v307_v55, %v620_v27  ;;  %v378_v58 = vadd.f32 %v518_v56, %v208_v42 }
  0xe4   : > { %v309_v59 = vpop.f32.mrf.mxu0  ;;  %v369_v60 = vpop.f32.mrf.mxu1 }
  0xe5   : > { %406 = vst [vmem:[%s627_s7 + $0x48] sm:$0xff] %v308_v57  ;;  %408 = vst [vmem:[%s627_s7 + $0x58] sm:$0xff] %v378_v58  ;;  %v310_v61 = vadd.f32 %v309_v59, %v622_v28  ;;  %v370_v62 = vadd.f32 %v369_v60, %v208_v42 }
  0xe6   : > { %v313_v63 = vpop.f32.mrf.mxu0  ;;  %v521_v0 = vpop.f32.mrf.mxu1 }
  0xe7   : > { %407 = vst [vmem:[%s627_s7 + $0x50] sm:$0xff] %v310_v61  ;;  %402 = vst [vmem:[%s627_s7 + $0x28] sm:$0xff] %v370_v62  ;;  %v314_v1 = vadd.f32 %v313_v63, %v620_v27  ;;  %v391_v2 = vadd.f32 %v521_v0, %v208_v42 }
  0xe8   : > { %v315_v3 = vpop.f32.mrf.mxu0  ;;  %v382_v4 = vpop.f32.mrf.mxu1 }
  0xe9   : > { %409 = vst [vmem:[%s627_s7 + $0x60] sm:$0xff] %v314_v1  ;;  %417 = vst [vmem:[%s627_s7 + $0xa0] sm:$0xff] %v391_v2  ;;  %v316_v5 = vadd.f32 %v315_v3, %v622_v28  ;;  %v383_v6 = vadd.f32 %v382_v4, %v208_v42 }
  0xea   : > { %v317_v7 = vpop.f32.mrf.mxu0  ;;  %v522_v8 = vpop.f32.mrf.mxu1 }
  0xeb   : > { %410 = vst [vmem:[%s627_s7 + $0x68] sm:$0xff] %v316_v5  ;;  %411 = vst [vmem:[%s627_s7 + $0x70] sm:$0xff] %v383_v6  ;;  %v318_v9 = vadd.f32 %v317_v7, %v620_v27  ;;  %v394_v10 = vadd.f32 %v522_v8, %v208_v42 }
  0xec   : > { %v319_v11 = vpop.f32.mrf.mxu0  ;;  %v385_v12 = vpop.f32.mrf.mxu1 }
  0xed   : > { %412 = vst [vmem:[%s627_s7 + $0x78] sm:$0xff] %v318_v9  ;;  %420 = vst [vmem:[%s627_s7 + $0xb8] sm:$0xff] %v394_v10  ;;  %v320_v13 = vadd.f32 %v319_v11, %v622_v28  ;;  %v386_v14 = vadd.f32 %v385_v12, %v208_v42 }
  0xef   : > { %413 = vst [vmem:[%s627_s7 + $0x80] sm:$0xff] %v320_v13  ;;  %414 = vst [vmem:[%s627_s7 + $0x88] sm:$0xff] %v386_v14 }
  0xf0 PF: > { %s13_s12 = sadd.s32 1, %s551_s12  }
  0xf1   : > { %p10_p4 = scmp.ge.s32.totalorder %s13_s12, 4  }
  0xf3   :  { %12 = sbr.rel (!%p10_p4) target bundleno = 1 (0x1), region = 62 }

// kernel: climax_forward.11
= control target key start
LH: loop header
LB: loop body
LE: loop exit
PB: predicated region body
PF: predicated region fallthrough
CT: control target
= control target key end

     0   :  { %s1554_s24 = smov 0   ;;  %s2156_s0 = inlined_call_operand.vmem [shape: f32[128,64], index: 0, kind: input, shape index: {}]   ;;  %s2157_s1 = inlined_call_operand.vmem [shape: f32[1,64], index: 1, kind: input, shape index: {}]   ;;  %s2158_s2 = inlined_call_operand.vmem [shape: f32[1,64], index: 2, kind: input, shape index: {}, may-alias: {2,6}]   ;;  %s2159_s3 = inlined_call_operand.vmem [shape: bf16[64,256], index: 3, kind: input, shape index: {}]   ;;  %s2160_s4 = inlined_call_operand.vmem [shape: f32[1,256], index: 4, kind: input, shape index: {}]   ;;  %s2161_s5 = inlined_call_operand.vmem [shape: bf16[256,64], index: 5, kind: input, shape index: {}]   ;;  %s2162_s6 = inlined_call_operand.vmem [shape: f32[1,64], index: 6, kind: input, shape index: {}, may-alias: {2,6}]   ;;  %s2163_s7 = inlined_call_operand.vmem [shape: f32[128,64], index: 7, kind: output, shape index: {}]  }
   0x1 LB: > { %s1280_s25 = sadd.s32 4294967295, %s1510_s24   ;;  %p1284_p0 = scmp.ge.s32.totalorder %s1510_s24, 1  ;;  %s1510_s24 = sphi %s1554_s24, %s17_s24  }
   0x2   : > { %p238_p1 = scmp.lt.s32.totalorder %s1510_s24, 3 }
   0x4   : > { %p239_p2 = pnand %p1284_p0, %p238_p1 }
   0x5   : > { %s1285_s26 = sshll.u32 (!%p239_p2), %s1280_s25, 3 }
   0x6   : > { %242 = sbr.rel (%p239_p2) target bundleno = 855 (0x357), region = 48  ;;  %p271_p3 = scmp.lt.s32.totalorder (!%p239_p2), %s1285_s26, 15 }
   0xb   : > { %s2165_s26 = smov (!%p271_p3, %s1285_s26), 15  ;;  %vm293_vm0 = vcmask 523264   ;;  %v1388_v56 = vld [vmem:[%s2159_s3 + $0x34] ss:$8 sps:$4 sm:$0xff]   ;;  %v1390_v57 = vld [vmem:[%s2159_s3 + $0x30] ss:$8 sps:$4 sm:$0xff]  }
   0xc   : > { %s1286_s27 = sshll.u32 %s2165_s26, 3  ;;  %511 = vmatprep.subr.bf16.mxu0 %v1388_v56  ;;  %v1391_v58 = vld [vmem:[%s2159_s3 + $0x24] ss:$8 sps:$4 sm:$0xff]   ;;  %v1393_v59 = vld [vmem:[%s2159_s3 + $0x20] ss:$8 sps:$4 sm:$0xff]   ;;  %v1512_v63 = vmov 0  }
   0xd   : > { %s1570_s30 = scalar_lea.vmem %s2156_s0, %s1286_s27  ;;  %512 = vmatpush1.bf16.msra.mxu0 %v1390_v57  ;;  %v1394_v60 = vld [vmem:[%s2159_s3 + $0x14] ss:$8 sps:$4 sm:$0xff]   ;;  %v1396_v61 = vld [vmem:[%s2159_s3 + $0x10] ss:$8 sps:$4 sm:$0xff]   ;;  %v1397_v62 = vld [vmem:[%s2159_s3 + $0x4] ss:$8 sps:$4 sm:$0xff]   ;;  %535 = vmatprep.mubr.bf16.mxu0 %v1512_v63  ;;  %s2128_s9 = scalar_lea.vmem %s2163_s7, %s1286_s27 }
   0xe   : > { %v283_v0 = vld [vmem:[%s1570_s30] sm:$0xff]  ;;  %v285_v1 = vld [vmem:[%s1570_s30 + $0x10] sm:$0xff]  ;;  %v284_v2 = vld [vmem:[%s1570_s30 + $0x8] sm:$0xff]  ;;  %513 = vmatprep.subr.bf16.mxu0 %v1391_v58 }
   0xf   : > { %v294_v3 = vsel %vm293_vm0, %v283_v0, 0.0  ;;  %v300_v4 = vsel %vm293_vm0, %v285_v1, 0.0  ;;  %v286_v5 = vld [vmem:[%s1570_s30 + $0x18] sm:$0xff]  ;;  %v287_v6 = vld [vmem:[%s1570_s30 + $0x20] sm:$0xff]  ;;  %v288_v7 = vld [vmem:[%s1570_s30 + $0x28] sm:$0xff]  ;;  %v297_v8 = vsel %vm293_vm0, %v284_v2, 0.0 }
  0x10   : > { %295 = vadd.xlane.f32.xlu0 %v294_v3  ;;  %301 = vadd.xlane.f32.xlu1 %v300_v4  ;;  %v303_v9 = vsel %vm293_vm0, %v286_v5, 0.0  ;;  %v306_v10 = vsel %vm293_vm0, %v287_v6, 0.0  ;;  %v309_v11 = vsel %vm293_vm0, %v288_v7, 0.0  ;;  %v289_v12 = vld [vmem:[%s1570_s30 + $0x30] sm:$0xff]  ;;  %v290_v13 = vld [vmem:[%s1570_s30 + $0x38] sm:$0xff] }
  0x11   : > { %v312_v14 = vsel %vm293_vm0, %v289_v12, 0.0  ;;  %v315_v15 = vsel %vm293_vm0, %v290_v13, 0.0  ;;  %514 = vmatpush1.bf16.msra.mxu0 %v1393_v59 }
  0x12   : > { %515 = vmatprep.subr.bf16.mxu0 %v1394_v60 }
  0x14   : > { %298 = vadd.xlane.f32.xlu0 %v297_v8  ;;  %304 = vadd.xlane.f32.xlu1 %v303_v9 }
  0x15   : > { %516 = vmatpush1.bf16.msra.mxu0 %v1396_v61 }
  0x16   : > { %517 = vmatprep.subr.bf16.mxu0 %v1397_v62 }
  0x18   : > { %307 = vadd.xlane.f32.xlu0 %v306_v10  ;;  %310 = vadd.xlane.f32.xlu1 %v309_v11 }
  0x1c   : > { %313 = vadd.xlane.f32.xlu0 %v312_v14  ;;  %316 = vadd.xlane.f32.xlu1 %v315_v15 }
  0x99   : > { %v296_v16 = vpop.xlane.xlu0 %295  ;;  %v302_v17 = vpop.xlane.xlu1 %301 }
  0x9a   : > { %v319_v18 = vmul.f32 0.015625, %v296_v16  ;;  %v321_v19 = vmul.f32 0.015625, %v302_v17 }
  0x9c   : > { %v1588_v20 = vsub.f32 %v283_v0, %v319_v18  ;;  %v1590_v21 = vsub.f32 %v285_v1, %v321_v19  ;;  %v1399_v0 = vld [vmem:[%s2159_s3] ss:$8 sps:$4 sm:$0xff]  }
  0x9d   : > { %v299_v22 = vpop.xlane.xlu0 %298  ;;  %v305_v23 = vpop.xlane.xlu1 %304  ;;  %518 = vmatpush1.bf16.msra.mxu0 %v1399_v0 }
  0x9e   : > { %v320_v24 = vmul.f32 0.015625, %v299_v22  ;;  %v322_v25 = vmul.f32 0.015625, %v305_v23  ;;  %v335_v26 = vmul.f32 %v1588_v20, %v1588_v20  ;;  %v337_v27 = vmul.f32 %v1590_v21, %v1590_v21 }
  0xa0   : > { %v1596_v28 = vsub.f32 %v284_v2, %v320_v24  ;;  %v1598_v29 = vsub.f32 %v286_v5, %v322_v25  ;;  %v343_v30 = vsel %vm293_vm0, %v335_v26, 0.0  ;;  %v349_v33 = vsel %vm293_vm0, %v337_v27, 0.0  ;;  %v1289_v27 = vld [vmem:[%s2157_s1] ss:$0 sm:$0xff] }
  0xa1   : > { %344 = vadd.xlane.f32.xlu0 %v343_v30  ;;  %v308_v31 = vpop.xlane.xlu0 %307  ;;  %v311_v32 = vpop.xlane.xlu1 %310 }
  0xa2   : > { %v323_v34 = vmul.f32 0.015625, %v308_v31  ;;  %v324_v35 = vmul.f32 0.015625, %v311_v32  ;;  %v336_v36 = vmul.f32 %v1596_v28, %v1596_v28  ;;  %v338_v37 = vmul.f32 %v1598_v29, %v1598_v29 }
  0xa4   : > { %v1606_v38 = vsub.f32 %v287_v6, %v323_v34  ;;  %v1608_v39 = vsub.f32 %v288_v7, %v324_v35  ;;  %v346_v40 = vsel %vm293_vm0, %v336_v36, 0.0  ;;  %v352_v43 = vsel %vm293_vm0, %v338_v37, 0.0  ;;  %v1290_v36 = vld [vmem:[%s2158_s2] ss:$0 sm:$0xff] }
  0xa5   : > { %350 = vadd.xlane.f32.xlu0 %v349_v33  ;;  %347 = vadd.xlane.f32.xlu1 %v346_v40  ;;  %v314_v41 = vpop.xlane.xlu0 %313  ;;  %v317_v42 = vpop.xlane.xlu1 %316 }
  0xa6   : > { %v325_v44 = vmul.f32 0.015625, %v314_v41  ;;  %v326_v45 = vmul.f32 0.015625, %v317_v42  ;;  %v339_v46 = vmul.f32 %v1606_v38, %v1606_v38  ;;  %v340_v47 = vmul.f32 %v1608_v39, %v1608_v39 }
  0xa8   : > { %v1616_v48 = vsub.f32 %v289_v12, %v325_v44  ;;  %v1618_v49 = vsub.f32 %v290_v13, %v326_v45  ;;  %v355_v50 = vsel %vm293_vm0, %v339_v46, 0.0  ;;  %v358_v51 = vsel %vm293_vm0, %v340_v47, 0.0 }
  0xa9   : > { %353 = vadd.xlane.f32.xlu1 %v352_v43  ;;  %356 = vadd.xlane.f32.xlu0 %v355_v50 }
  0xaa   : > { %v341_v52 = vmul.f32 %v1616_v48, %v1616_v48  ;;  %v342_v53 = vmul.f32 %v1618_v49, %v1618_v49 }
  0xac   : > { %v361_v54 = vsel %vm293_vm0, %v341_v52, 0.0  ;;  %v364_v55 = vsel %vm293_vm0, %v342_v53, 0.0 }
  0xad   : > { %359 = vadd.xlane.f32.xlu1 %v358_v51  ;;  %362 = vadd.xlane.f32.xlu0 %v361_v54 }
  0xb1   : > { %365 = vadd.xlane.f32.xlu1 %v364_v55 }
 0x12a   : > { %v345_v1 = vpop.xlane.xlu0 %344 }
 0x12b   : > { %v367_v2 = vmul.f32 0.015625, %v345_v1 }
 0x12d   : > { %v375_v3 = vadd.f32 1e-05, %v367_v2  ;;  %v1400_v2 = vld [vmem:[%s2161_s5 + $0x78] sm:$0xff]  }
 0x12e   : > { %v348_v4 = vpop.xlane.xlu1 %347  ;;  %v351_v5 = vpop.xlane.xlu0 %350  ;;  %1322 = vmatprep.subr.bf16.mxu0 %v1400_v2  ;;  %1362 = vmatprep.subr.bf16.mxu1 %v1400_v2 }
 0x12f   : > { %1416 = vrsqrt.f32 %v375_v3  ;;  %v368_v6 = vmul.f32 0.015625, %v348_v4  ;;  %v369_v7 = vmul.f32 0.015625, %v351_v5  ;;  %v1404_v3 = vld [vmem:[%s2161_s5 + $0x68] sm:$0xff]   ;;  %v1406_v5 = vld [vmem:[%s2161_s5 + $0x60] sm:$0xff]  }
 0x130   : > { %v1405_v4 = vld [vmem:[%s2161_s5 + $0x28] sm:$0xff]  }
 0x131   : > { %v376_v8 = vadd.f32 1e-05, %v368_v6  ;;  %v377_v9 = vadd.f32 1e-05, %v369_v7  ;;  %v1407_v6 = vld [vmem:[%s2161_s5 + $0x20] sm:$0xff]   ;;  %v1408_v7 = vld [vmem:[%s2161_s5 + $0x58] sm:$0xff]  }
 0x132   : > { %v354_v10 = vpop.xlane.xlu1 %353  ;;  %v357_v11 = vpop.xlane.xlu0 %356 }
 0x133   : > { %1418 = vrsqrt.f32 %v376_v8  ;;  %v370_v12 = vmul.f32 0.015625, %v354_v10  ;;  %v371_v14 = vmul.f32 0.015625, %v357_v11  ;;  %v1409_v8 = vld [vmem:[%s2161_s5 + $0x18] sm:$0xff]   ;;  %v1411_v10 = vld [vmem:[%s2161_s5 + $0x10] sm:$0xff]   ;;  %v1412_v11 = vld [vmem:[%s2161_s5 + $0x48] sm:$0xff]  }
 0x134   : > { %1420 = vrsqrt.f32 %v377_v9  ;;  %v1410_v9 = vld [vmem:[%s2161_s5 + $0x50] sm:$0xff]  }
 0x135   : > { %v378_v13 = vadd.f32 1e-05, %v370_v12  ;;  %v379_v17 = vadd.f32 1e-05, %v371_v14  ;;  %v1413_v12 = vld [vmem:[%s2161_s5 + $0x8] sm:$0xff]   ;;  %v1415_v14 = vld [vmem:[%s2161_s5] sm:$0xff]  }
 0x136   : > { %v360_v15 = vpop.xlane.xlu1 %359  ;;  %v363_v19 = vpop.xlane.xlu0 %362 }
 0x137   : > { %1422 = vrsqrt.f32 %v378_v13  ;;  %v372_v16 = vmul.f32 0.015625, %v360_v15  ;;  %v373_v25 = vmul.f32 0.015625, %v363_v19  ;;  %v1414_v13 = vld [vmem:[%s2161_s5 + $0x40] sm:$0xff]   ;;  %v441_v15 = vlaneseq }
 0x139   : > { %v380_v18 = vadd.f32 1e-05, %v372_v16  ;;  %v381_v32 = vadd.f32 1e-05, %v373_v25  ;;  %v442_v16 = vshrl.u32 %v441_v15, 7 }
 0x13a   : > { %v366_v22 = vpop.xlane.xlu1 %365 }
 0x13b   : > { %1424 = vrsqrt.f32 %v380_v18  ;;  %v374_v23 = vmul.f32 0.015625, %v366_v22  ;;  %v439_v18 = vld [vmem:[%s2160_s4] sm:$0x3]  ;;  %v447_v19 = vsub.s32 1, %v442_v16 }
 0x13c   : > { %v1417_v24 = vpop.eup %1416  ;;  %1426 = vrsqrt.f32 %v379_v17  ;;  %v443_v17 = vsub.s32 0, %v442_v16 }
 0x13d   : > { %v391_v26 = vmul.f32 %v1417_v24, %v1588_v20  ;;  %v382_v30 = vadd.f32 1e-05, %v374_v23  ;;  %v1727_v23 = vrot.slane %v439_v18, %v447_v19 }
 0x13e   : > { %v1725_v22 = vrot.slane %v439_v18, %v443_v17 }
 0x13f   : > { %v405_v34 = vmul.f32 %v1289_v27, %v391_v26  ;;  %1428 = vrsqrt.f32 %v382_v30 }
 0x140   : > { %v1419_v31 = vpop.eup %1418  ;;  %1430 = vrsqrt.f32 %v381_v32 }
 0x141   : > { %v392_v33 = vmul.f32 %v1419_v31, %v1596_v28  ;;  %v1421_v35 = vpop.eup %1420  ;;  %v419_v20 = vadd.f32 %v1290_v36, %v405_v34 }
 0x142   : > { %v393_v42 = vmul.f32 %v1421_v35, %v1590_v21 }
 0x143   : > { %v406_v37 = vmul.f32 %v1289_v27, %v392_v33 }
 0x144   : > { %v1423_v40 = vpop.eup %1422  ;;  %v407_v28 = vmul.f32 %v1289_v27, %v393_v42 }
 0x145   : > { %v420_v41 = vadd.f32 %v1290_v36, %v406_v37  ;;  %v394_v43 = vmul.f32 %v1423_v40, %v1598_v29 }
 0x146   : > { %v421_v52 = vadd.f32 %v1290_v36, %v407_v28 }
 0x147   : > { %v435_v44 = vpack.c.bf16 %v420_v41, %v419_v20  ;;  %v408_v45 = vmul.f32 %v1289_v27, %v394_v43 }
 0x148   : > { %v1425_v46 = vpop.eup %1424 }
 0x149   : > { %1299 = vmatmul.mubr.msk.bf16.vlgmr.msra.gmra.mxu0 %vm293_vm0, %v435_v44  ;;  %v1427_v47 = vpop.eup %1426  ;;  %v422_v50 = vadd.f32 %v1290_v36, %v408_v45  ;;  %v396_v51 = vmul.f32 %v1425_v46, %v1608_v39 }
 0x14a   : > { %545 = vmatprep.mubr.bf16.mxu0 %v1512_v63  ;;  %v395_v53 = vmul.f32 %v1427_v47, %v1606_v38 }
 0x14b   : > { %v436_v54 = vpack.c.bf16 %v422_v50, %v421_v52  ;;  %v410_v55 = vmul.f32 %v1289_v27, %v396_v51 }
 0x14c   : > { %v1429_v21 = vpop.eup %1428  ;;  %v409_v29 = vmul.f32 %v1289_v27, %v395_v53 }
 0x14d   : > { %v1431_v56 = vpop.eup %1430  ;;  %v424_v57 = vadd.f32 %v1290_v36, %v410_v55  ;;  %v398_v58 = vmul.f32 %v1429_v21, %v1618_v49  ;;  %v1402_v49 = vld [vmem:[%s2161_s5 + $0x70] sm:$0xff]  }
 0x14e   : > { %v423_v59 = vadd.f32 %v1290_v36, %v409_v29  ;;  %v397_v60 = vmul.f32 %v1431_v56, %v1616_v48  ;;  %v1401_v48 = vld [vmem:[%s2161_s5 + $0x38] sm:$0xff]  }
 0x14f   : > { %v412_v39 = vmul.f32 %v1289_v27, %v398_v58  ;;  %1323 = vmatpush3.bf16.msra.mxu0 %v1401_v48  ;;  %1370 = vmatpush3.bf16.msra.mxu1 %v1401_v48 }
 0x150   : > { %v437_v61 = vpack.c.bf16 %v424_v57, %v423_v59  ;;  %v411_v38 = vmul.f32 %v1289_v27, %v397_v60  ;;  %1324 = vmatprep.subr.bf16.mxu0 %v1402_v49  ;;  %1363 = vmatprep.subr.bf16.mxu1 %v1402_v49 }
 0x151   : > { %1300 = vmatmul.mubr.msk.bf16.gmra.mxu0 %vm293_vm0, %v436_v54  ;;  %v426_v62 = vadd.f32 %v1290_v36, %v412_v39 }
 0x152   : > { %555 = vmatprep.mubr.bf16.mxu0 %v1512_v63  ;;  %v425_v0 = vadd.f32 %v1290_v36, %v411_v38 }
 0x154   : > { %v438_v1 = vpack.c.bf16 %v426_v62, %v425_v0 }
 0x159   : > { %1301 = vmatmul.mubr.msk.bf16.gmra.mxu0 %vm293_vm0, %v437_v61 }
 0x15a   : > { %565 = vmatprep.mubr.bf16.mxu0 %v1512_v63  ;;  %v1403_v63 = vld [vmem:[%s2161_s5 + $0x30] sm:$0xff]  }
 0x15b   : > { %1325 = vmatpush3.bf16.msra.mxu0 %v1403_v63  ;;  %1371 = vmatpush3.bf16.msra.mxu1 %v1403_v63 }
 0x15c   : > { %1326 = vmatprep.subr.bf16.mxu0 %v1404_v3  ;;  %1364 = vmatprep.subr.bf16.mxu1 %v1404_v3 }
 0x15f   : > { %1327 = vmatpush3.bf16.msra.mxu0 %v1405_v4  ;;  %1372 = vmatpush3.bf16.msra.mxu1 %v1405_v4 }
 0x160   : > { %1328 = vmatprep.subr.bf16.mxu0 %v1406_v5  ;;  %1365 = vmatprep.subr.bf16.mxu1 %v1406_v5  ;;  %v1513_v5 = vmov 1.0  }
 0x161   : > { %1302 = vmatmul.mubr.msk.bf16.gmra.mxu0 %vm293_vm0, %v438_v1 }
 0x163   : > { %1329 = vmatpush3.bf16.msra.mxu0 %v1407_v6  ;;  %1373 = vmatpush3.bf16.msra.mxu1 %v1407_v6 }
 0x164   : > { %1330 = vmatprep.subr.bf16.mxu0 %v1408_v7  ;;  %1366 = vmatprep.subr.bf16.mxu1 %v1408_v7 }
 0x167   : > { %1331 = vmatpush3.bf16.msra.mxu0 %v1409_v8  ;;  %1374 = vmatpush3.bf16.msra.mxu1 %v1409_v8 }
 0x168   : > { %1332 = vmatprep.subr.bf16.mxu0 %v1410_v9  ;;  %1367 = vmatprep.subr.bf16.mxu1 %v1410_v9 }
 0x16b   : > { %1333 = vmatpush3.bf16.msra.mxu0 %v1411_v10  ;;  %1375 = vmatpush3.bf16.msra.mxu1 %v1411_v10 }
 0x16c   : > { %1334 = vmatprep.subr.bf16.mxu0 %v1412_v11  ;;  %1368 = vmatprep.subr.bf16.mxu1 %v1412_v11 }
 0x16f   : > { %1335 = vmatpush3.bf16.msra.mxu0 %v1413_v12  ;;  %1376 = vmatpush3.bf16.msra.mxu1 %v1413_v12 }
 0x170   : > { %1336 = vmatprep.subr.bf16.mxu0 %v1414_v13  ;;  %1369 = vmatprep.subr.bf16.mxu1 %v1414_v13 }
 0x173   : > { %1337 = vmatpush3.bf16.msra.mxu0 %v1415_v14  ;;  %1377 = vmatpush3.bf16.msra.mxu1 %v1415_v14 }
 0x209   : > { %v537_v24 = vpop.f32.mrf.mxu0 }
 0x20a   : > { %v538_v25 = vadd.f32 %v537_v24, %v1725_v22 }
 0x20b   : > { %v539_v26 = vpop.f32.mrf.mxu0 }
 0x20c   : > { %v592_v27 = vmul.f32 0.70710677, %v538_v25  ;;  %v540_v30 = vadd.f32 %v539_v26, %v1727_v23  ;;  %v1769_v49 = vmul.f32 0.5, %v538_v25 }
 0x20d   : > { %v541_v31 = vpop.f32.mrf.mxu0 }
 0x20e   : > { %v640_v32 = vand.u32 2147483647, %v592_v27  ;;  %v593_v33 = vmul.f32 0.70710677, %v540_v30  ;;  %v542_v34 = vadd.f32 %v541_v31, %v1725_v22  ;;  %vm608_vm1 = vcmp.lt.f32.partialorder %v592_v27, 0.0 }
 0x20f   : > { %v543_v35 = vpop.f32.mrf.mxu0  ;;  %v1772_v6 = vsel %vm608_vm1, -1.0, %v1513_v5  ;;  %v1774_v7 = vmul.f32 0.5, %v540_v30 }
 0x210   : > { %v656_v36 = vmul.f32 0.3275911, %v640_v32  ;;  %v641_v37 = vand.u32 2147483647, %v593_v33  ;;  %v1732_v40 = vmul.f32 0.70710677, %v542_v34  ;;  %v544_v20 = vadd.f32 %v543_v35, %v1727_v23 }
 0x211   : > { %v547_v41 = vpop.f32.mrf.mxu0  ;;  %v848_v61 = vsub.f32 0.0, %v640_v32  ;;  %vm609_vm2 = vcmp.lt.f32.partialorder %v593_v33, 0.0  ;;  %v1783_v15 = vmul.f32 0.5, %v542_v34 }
 0x212   : > { %v672_v42 = vadd.f32 1.0, %v656_v36  ;;  %v657_v43 = vmul.f32 0.3275911, %v641_v37  ;;  %v642_v44 = vand.u32 2147483647, %v1732_v40  ;;  %v1742_v52 = vadd.f32 %v547_v41, %v1725_v22 }
 0x213   : > { %v1736_v45 = vmul.f32 0.70710677, %v544_v20  ;;  %v549_v28 = vpop.f32.mrf.mxu0  ;;  %v849_v62 = vsub.f32 0.0, %v641_v37  ;;  %v864_v3 = vmul.f32 %v848_v61, %v640_v32  ;;  %v1781_v12 = vsel %vm609_vm2, -1.0, %v1513_v5 }
 0x214   : > { %1432 = vrcp.f32 %v672_v42  ;;  %v673_v46 = vadd.f32 1.0, %v657_v43  ;;  %v658_v47 = vmul.f32 0.3275911, %v642_v44  ;;  %v1746_v55 = vmul.f32 0.70710677, %v1742_v52 }
 0x215   : > { %v1739_v50 = vand.u32 2147483647, %v1736_v45  ;;  %v551_v54 = vpop.f32.mrf.mxu0  ;;  %v865_v9 = vmul.f32 %v849_v62, %v641_v37  ;;  %v850_v13 = vsub.f32 0.0, %v642_v44  ;;  %v880_v24 = vmul.f32 1.442695, %v864_v3 }
 0x216   : > { %1434 = vrcp.f32 %v673_v46  ;;  %v674_v51 = vadd.f32 1.0, %v658_v47  ;;  %v1749_v56 = vand.u32 2147483647, %v1746_v55  ;;  %v1752_v29 = vadd.f32 %v551_v54, %v1725_v22 }
 0x217   : > { %v659_v53 = vmul.f32 0.3275911, %v1739_v50  ;;  %v1758_v60 = vpop.f32.mrf.mxu0  ;;  %vm610_vm3 = vcmp.lt.f32.partialorder %v1732_v40, 0.0  ;;  %v1790_v25 = vmul.f32 0.5, %v544_v20  ;;  %v882_v30 = vmul.f32 1.442695, %v865_v9 }
 0x218   : > { %1436 = vrcp.f32 %v674_v51  ;;  %v660_v57 = vmul.f32 0.3275911, %v1749_v56  ;;  %v1756_v58 = vmul.f32 0.70710677, %v1752_v29  ;;  %v550_v32 = vadd.f32 %v549_v28, %v1727_v23 }
 0x219   : > { %v675_v21 = vadd.f32 1.0, %v659_v53  ;;  %v557_v2 = vpop.f32.mrf.mxu0  ;;  %v866_v33 = vmul.f32 %v850_v13, %v642_v44  ;;  %vm611_vm4 = vcmp.lt.f32.partialorder %v1736_v45, 0.0  ;;  %v851_v20 = vsub.f32 0.0, %v1739_v50 }
 0x21a   : > { %v676_v59 = vadd.f32 1.0, %v660_v57  ;;  %v1761_v39 = vand.u32 2147483647, %v1756_v58  ;;  %v1787_v17 = vadd.f32 %v557_v2, %v1725_v22  ;;  %v1810_v43 = vsel %vm610_vm3, -1.0, %v1513_v5 }
 0x21b   : > { %1438 = vrcp.f32 %v675_v21  ;;  %v559_v18 = vpop.f32.mrf.mxu0  ;;  %v1813_v46 = vsel %vm611_vm4, -1.0, %v1513_v5  ;;  %v1815_v28 = vmul.f32 0.70710677, %v550_v32  ;;  %v884_v53 = vmul.f32 1.442695, %v866_v33 }
 0x21c   : > { %1440 = vrcp.f32 %v676_v59  ;;  %v662_v1 = vmul.f32 0.3275911, %v1761_v39  ;;  %v1799_v35 = vadd.f32 %v559_v18, %v1727_v23  ;;  %v1804_v41 = vmul.f32 0.70710677, %v1787_v17 }
 0x21d   : > { %v867_v40 = vmul.f32 %v851_v20, %v1739_v50  ;;  %v554_v59 = vadd.f32 %v1758_v60, %v1727_v23  ;;  %v1833_v2 = vmul.f32 0.5, %v1742_v52  ;;  %vm612_vm5 = vcmp.lt.f32.partialorder %v1746_v55, 0.0 }
 0x21e   : > { %v678_v4 = vadd.f32 1.0, %v662_v1  ;;  %v1822_v21 = vmul.f32 0.70710677, %v1799_v35  ;;  %v1829_v61 = vand.u32 2147483647, %v1804_v41  ;;  %v1837_v50 = vmul.f32 0.5, %v550_v32 }
 0x21f   : > { %v645_v3 = vand.u32 2147483647, %v1815_v28  ;;  %v886_v52 = vmul.f32 1.442695, %v867_v40  ;;  %v1846_v13 = vmul.f32 0.70710677, %v554_v59 }
 0x220   : > { %1442 = vrcp.f32 %v678_v4  ;;  %vm614_vm6 = vcmp.lt.f32.partialorder %v1756_v58, 0.0  ;;  %vm616_vm7 = vcmp.lt.f32.partialorder %v1804_v41, 0.0  ;;  %vm617_vm8 = vcmp.lt.f32.partialorder %v1822_v21, 0.0 }
 0x221   : > { %v1763_v38 = vpop.eup %1432  ;;  %1444 = vpow2.f32 %v880_v24  ;;  %v661_v32 = vmul.f32 0.3275911, %v645_v3  ;;  %v853_v33 = vsub.f32 0.0, %v645_v3  ;;  %v1878_v58 = vsel %vm614_vm6, -1.0, %v1513_v5 }
 0x222   : > { %v704_v0 = vmul.f32 1.0614054, %v1763_v38  ;;  %1446 = vpow2.f32 %v882_v30  ;;  %v1855_v30 = vsel %vm612_vm5, -1.0, %v1513_v5  ;;  %vm613_vm11 = vcmp.lt.f32.partialorder %v1815_v28, 0.0 }
 0x223   : > { %v1767_v48 = vpop.eup %1434  ;;  %1448 = vpow2.f32 %v884_v53  ;;  %vm615_vm12 = vcmp.lt.f32.partialorder %v1846_v13, 0.0 }
 0x224   : > { %v720_v63 = vadd.f32 -1.4531521, %v704_v0  ;;  %v705_v8 = vmul.f32 1.0614054, %v1767_v48 }
 0x225   : > { %v1777_v10 = vpop.eup %1436 }
 0x226   : > { %v736_v11 = vmul.f32 %v1763_v38, %v720_v63  ;;  %v721_v14 = vadd.f32 -1.4531521, %v705_v8  ;;  %v706_v16 = vmul.f32 1.0614054, %v1777_v10  ;;  %v852_v63 = vsub.f32 0.0, %v1749_v56 }
 0x227   : > { %v1841_v8 = vand.u32 2147483647, %v1822_v21 }
 0x228   : > { %v752_v19 = vadd.f32 1.4214138, %v736_v11  ;;  %v1792_v26 = vpop.eup %1438  ;;  %v737_v27 = vmul.f32 %v1767_v48, %v721_v14  ;;  %v722_v31 = vadd.f32 -1.4531521, %v706_v16  ;;  %v664_v14 = vmul.f32 0.3275911, %v1829_v61 }
 0x229   : > { %v707_v34 = vmul.f32 1.0614054, %v1792_v26  ;;  %v1817_v47 = vpop.eup %1440  ;;  %v665_v24 = vmul.f32 0.3275911, %v1841_v8 }
 0x22a   : > { %v753_v36 = vadd.f32 1.4214138, %v737_v27  ;;  %v738_v37 = vmul.f32 %v1777_v10, %v722_v31  ;;  %v768_v42 = vmul.f32 %v1763_v38, %v752_v19  ;;  %v708_v57 = vmul.f32 1.0614054, %v1817_v47  ;;  %v561_v27 = vpop.f32.mrf.mxu0 }
 0x22b   : > { %v723_v44 = vadd.f32 -1.4531521, %v707_v34  ;;  %v868_v31 = vmul.f32 %v852_v63, %v1749_v56  ;;  %v681_v20 = vadd.f32 1.0, %v665_v24  ;;  %v677_v63 = vadd.f32 1.0, %v661_v32 }
 0x22c   : > { %v754_v45 = vadd.f32 1.4214138, %v738_v37  ;;  %v769_v51 = vmul.f32 %v1767_v48, %v753_v36  ;;  %v784_v62 = vadd.f32 -0.28449672, %v768_v42  ;;  %v724_v60 = vadd.f32 -1.4531521, %v708_v57 }
 0x22d   : > { %v739_v54 = vmul.f32 %v1792_v26, %v723_v44  ;;  %v1843_v9 = vpop.eup %1442  ;;  %v854_v37 = vsub.f32 0.0, %v1761_v39  ;;  %v647_v44 = vand.u32 2147483647, %v1846_v13  ;;  %1450 = vrcp.f32 %v681_v20 }
 0x22e   : > { %v770_v0 = vmul.f32 %v1777_v10, %v754_v45  ;;  %v785_v4 = vadd.f32 -0.28449672, %v769_v51  ;;  %v800_v16 = vmul.f32 %v1763_v38, %v784_v62  ;;  %v710_v19 = vmul.f32 1.0614054, %v1843_v9 }
 0x22f   : > { %v755_v1 = vadd.f32 1.4214138, %v739_v54  ;;  %v740_v36 = vmul.f32 %v1817_v47, %v724_v60  ;;  %v680_v45 = vadd.f32 1.0, %v664_v14  ;;  %v1863_v51 = vadd.f32 %v561_v27, %v1725_v22  ;;  %v1445_v54 = vpop.eup %1444  ;;  %v563_v60 = vpop.f32.mrf.mxu0 }
 0x230   : > { %v786_v18 = vadd.f32 -0.28449672, %v770_v0  ;;  %v801_v34 = vmul.f32 %v1767_v48, %v785_v4  ;;  %v816_v55 = vadd.f32 0.2548296, %v800_v16  ;;  %v726_v56 = vadd.f32 -1.4531521, %v710_v19  ;;  %v1447_v62 = vpop.eup %1446 }
 0x231   : > { %v771_v11 = vmul.f32 %v1792_v26, %v755_v1  ;;  %1452 = vpow2.f32 %v886_v52  ;;  %v888_v40 = vmul.f32 1.442695, %v868_v31  ;;  %v1867_v57 = vmul.f32 0.5, %v1752_v29  ;;  %v1449_v32 = vpop.eup %1448 }
 0x232   : > { %v802_v53 = vmul.f32 %v1777_v10, %v786_v18  ;;  %v817_v0 = vadd.f32 0.2548296, %v801_v34  ;;  %v756_v1 = vadd.f32 1.4214138, %v740_v36  ;;  %v869_v4 = vmul.f32 %v853_v33, %v645_v3 }
 0x233   : > { %v787_v42 = vadd.f32 -0.28449672, %v771_v11  ;;  %v870_v14 = vmul.f32 %v854_v37, %v1761_v39  ;;  %v855_v16 = vsub.f32 0.0, %v647_v44  ;;  %1454 = vrcp.f32 %v680_v45 }
 0x234   : > { %v832_v52 = vmul.f32 %v1763_v38, %v816_v55  ;;  %v818_v18 = vadd.f32 0.2548296, %v802_v53  ;;  %v742_v29 = vmul.f32 %v1843_v9, %v726_v56  ;;  %v1875_v19 = vmul.f32 0.70710677, %v1863_v51 }
 0x235   : > { %v803_v11 = vmul.f32 %v1792_v26, %v787_v42  ;;  %v1880_v24 = vmul.f32 0.5, %v554_v59  ;;  %v663_v3 = vmul.f32 0.3275911, %v647_v44  ;;  %v1883_v27 = vadd.f32 %v563_v60, %v1727_v23 }
 0x236   : > { %v833_v39 = vmul.f32 %v1767_v48, %v817_v0  ;;  %v772_v31 = vmul.f32 %v1817_v47, %v756_v1  ;;  %1456 = vpow2.f32 %v888_v40  ;;  %v890_v38 = vmul.f32 1.442695, %v869_v4 }
 0x237   : > { %v819_v33 = vadd.f32 0.2548296, %v803_v11  ;;  %1458 = vrcp.f32 %v677_v63  ;;  %v892_v34 = vmul.f32 1.442695, %v870_v14  ;;  %v871_v36 = vmul.f32 %v855_v16, %v647_v44 }
 0x238   : > { %v912_v37 = vmul.f32 %v1445_v54, %v832_v52  ;;  %v834_v20 = vmul.f32 %v1777_v10, %v818_v18  ;;  %v758_v59 = vadd.f32 1.4214138, %v742_v29  ;;  %v1889_v42 = vand.u32 2147483647, %v1875_v19  ;;  %v567_v54 = vpop.f32.mrf.mxu0 }
 0x239   : > { %v679_v45 = vadd.f32 1.0, %v663_v3  ;;  %v856_v55 = vsub.f32 0.0, %v1829_v61  ;;  %v857_v48 = vsub.f32 0.0, %v1841_v8  ;;  %v1894_v53 = vmul.f32 0.70710677, %v1883_v27 }
 0x23a   : > { %v913_v56 = vmul.f32 %v1447_v62, %v833_v39  ;;  %v788_v40 = vadd.f32 -0.28449672, %v772_v31  ;;  %1460 = vpow2.f32 %v890_v38  ;;  %v666_v44 = vmul.f32 0.3275911, %v1889_v42  ;;  %v1900_v11 = vpop.eup %1450  ;;  %v569_v3 = vpop.f32.mrf.mxu0 }
 0x23b   : > { %v835_v10 = vmul.f32 %v1792_v26, %v819_v33  ;;  %1462 = vpow2.f32 %v892_v34  ;;  %v894_v0 = vmul.f32 1.442695, %v871_v36  ;;  %v928_v1 = vsub.f32 1.0, %v912_v37 }
 0x23c   : > { %v914_v63 = vmul.f32 %v1449_v32, %v834_v20  ;;  %v774_v4 = vmul.f32 %v1843_v9, %v758_v59  ;;  %v682_v60 = vadd.f32 1.0, %v666_v44  ;;  %1464 = vrcp.f32 %v679_v45 }
 0x23d   : > { %v872_v62 = vmul.f32 %v856_v55, %v1829_v61  ;;  %v873_v14 = vmul.f32 %v857_v48, %v1841_v8  ;;  %v1905_v16 = vand.u32 2147483647, %v1894_v53  ;;  %v929_v52 = vsub.f32 1.0, %v913_v56  ;;  %v571_v48 = vpop.f32.mrf.mxu0 }
 0x23e   : > { %v1453_v26 = vpop.eup %1452  ;;  %v804_v18 = vmul.f32 %v1817_v47, %v788_v40  ;;  %v713_v29 = vmul.f32 1.0614054, %v1900_v11  ;;  %1466 = vrcp.f32 %v682_v60  ;;  %v1912_v31 = vsel %vm616_vm7, -1.0, %v1513_v5 }
 0x23f   : > { %v915_v39 = vmul.f32 %v1453_v26, %v835_v10  ;;  %1468 = vpow2.f32 %v894_v0  ;;  %v667_v61 = vmul.f32 0.3275911, %v1905_v16  ;;  %v944_v38 = vmul.f32 %v928_v1, %v1772_v6 }
 0x240   : > { %v1915_v8 = vpop.eup %1454  ;;  %v930_v32 = vsub.f32 1.0, %v914_v63  ;;  %v790_v33 = vadd.f32 -0.28449672, %v774_v4  ;;  %v1919_v34 = vadd.f32 %v567_v54, %v1725_v22  ;;  %v896_v36 = vmul.f32 1.442695, %v872_v62 }
 0x241   : > { %v1922_v37 = vmul.f32 0.5, %v1799_v35  ;;  %v683_v41 = vadd.f32 1.0, %v667_v61  ;;  %v945_v20 = vmul.f32 %v929_v52, %v1781_v12  ;;  %v820_v59 = vadd.f32 0.2548296, %v804_v18 }
 0x242   : > { %v729_v45 = vadd.f32 -1.4531521, %v713_v29  ;;  %v898_v55 = vmul.f32 1.442695, %v873_v14  ;;  %v931_v6 = vsub.f32 1.0, %v915_v39  ;;  %v1930_v44 = vadd.f32 %v569_v3, %v1727_v23 }
 0x243   : > { %v1457_v56 = vpop.eup %1456  ;;  %1470 = vrcp.f32 %v683_v41  ;;  %v1927_v40 = vmul.f32 0.70710677, %v1919_v34  ;;  %v960_v54 = vadd.f32 1.0, %v944_v38  ;;  %v946_v10 = vmul.f32 %v930_v32, %v1810_v43  ;;  %v573_v32 = vpop.f32.mrf.mxu0 }
 0x244   : > { %v1932_v35 = vpop.eup %1458  ;;  %v806_v12 = vmul.f32 %v1843_v9, %v790_v33  ;;  %v712_v0 = vmul.f32 1.0614054, %v1915_v8  ;;  %1472 = vpow2.f32 %v896_v36  ;;  %v1940_v1 = vsel %vm617_vm8, -1.0, %v1513_v5 }
 0x245   : > { %v1943_v63 = vand.u32 2147483647, %v1927_v40  ;;  %v1946_v4 = vadd.f32 %v571_v48, %v1725_v22  ;;  %v961_v60 = vadd.f32 1.0, %v945_v20  ;;  %v836_v62 = vmul.f32 %v1817_v47, %v820_v59 }
 0x246   : > { %v745_v43 = vmul.f32 %v1900_v11, %v729_v45  ;;  %1474 = vpow2.f32 %v898_v55  ;;  %v947_v26 = vmul.f32 %v931_v6, %v1813_v46  ;;  %vm618_vm9 = vcmp.lt.f32.partialorder %v1875_v19, 0.0 }
 0x247   : > { %v1950_v14 = vpop.eup %1460  ;;  %v668_v21 = vmul.f32 0.3275911, %v1943_v63  ;;  %v1956_v52 = vmul.f32 0.70710677, %v1930_v44  ;;  %v1959_v22 = vmul.f32 %v960_v54, %v1769_v49  ;;  %v962_v29 = vadd.f32 1.0, %v946_v10 }
 0x248   : > { %v1463_v18 = vpop.eup %1462  ;;  %v822_v47 = vadd.f32 0.2548296, %v806_v12  ;;  %v728_v3 = vadd.f32 -1.4531521, %v712_v0  ;;  %v859_v39 = vsub.f32 0.0, %v1905_v16  ;;  %v977_v36 = vmul.f32 %v961_v60, %v1774_v7 }
 0x249   : > { %v684_v61 = vadd.f32 1.0, %v668_v21  ;;  %v1963_v38 = vand.u32 2147483647, %v1956_v52  ;;  %v1966_v46 = vmul.f32 0.70710677, %v1946_v4  ;;  %v1968_v33 = vpop.eup %1464  ;;  %v916_v41 = vmul.f32 %v1457_v56, %v836_v62 }
 0x24a   : > { %v761_v49 = vadd.f32 1.4214138, %v745_v43  ;;  %v1974_v20 = vsel %vm618_vm9, -1.0, %v1513_v5  ;;  %v963_v45 = vadd.f32 1.0, %v947_v26  ;;  %v858_v55 = vsub.f32 0.0, %v1889_v42 }
 0x24b   : > { %v1976_v59 = vpop.eup %1466  ;;  %1476 = vrcp.f32 %v684_v61  ;;  %v669_v48 = vmul.f32 0.3275911, %v1963_v38  ;;  %v838_v54 = vmul.f32 %v1843_v9, %v822_v47  ;;  %v744_v7 = vmul.f32 %v1915_v8, %v728_v3 }
 0x24c   : > { %v1980_v6 = vpop.eup %1468  ;;  %v714_v56 = vmul.f32 1.0614054, %v1976_v59  ;;  %v1986_v19 = vadd.f32 %v573_v32, %v1727_v23  ;;  %v978_v10 = vmul.f32 %v962_v29, %v1783_v15  ;;  %v875_v12 = vmul.f32 %v859_v39, %v1905_v16 }
 0x24d   : > { %v685_v0 = vadd.f32 1.0, %v669_v48  ;;  %v1991_v60 = vand.u32 2147483647, %v1966_v46  ;;  %v932_v62 = vsub.f32 1.0, %v916_v41  ;;  %v777_v43 = vmul.f32 %v1900_v11, %v761_v49 }
 0x24e   : > { %v730_v26 = vadd.f32 -1.4531521, %v714_v56  ;;  %v1995_v9 = vmul.f32 0.5, %v1883_v27  ;;  %v979_v21 = vmul.f32 %v963_v45, %v1790_v25  ;;  %v874_v23 = vmul.f32 %v858_v55, %v1889_v42 }
 0x24f   : > { %1478 = vrcp.f32 %v685_v0  ;;  %v670_v15 = vmul.f32 0.3275911, %v1991_v60  ;;  %v918_v16 = vmul.f32 %v1463_v18, %v838_v54  ;;  %v760_v47 = vadd.f32 1.4214138, %v744_v7 }
 0x250   : > { %v2000_v29 = vpop.eup %1470  ;;  %v746_v3 = vmul.f32 %v1976_v59, %v730_v26  ;;  %v2004_v39 = vmul.f32 0.70710677, %v1986_v19  ;;  %v902_v27 = vmul.f32 1.442695, %v875_v12  ;;  %v860_v32 = vsub.f32 0.0, %v1943_v63 }
 0x251   : > { %v715_v61 = vmul.f32 1.0614054, %v2000_v29  ;;  %v686_v25 = vadd.f32 1.0, %v670_v15  ;;  %v2008_v41 = vpop.eup %1472  ;;  %v1024_v42 = vpack.c.bf16 %v978_v10, %v1959_v22  ;;  %v793_v49 = vadd.f32 -0.28449672, %v777_v43 }
 0x252   : > { %v762_v45 = vadd.f32 1.4214138, %v746_v3  ;;  %v655_v18 = vand.u32 2147483647, %v2004_v39  ;;  %v900_v48 = vmul.f32 1.442695, %v874_v23  ;;  %v2016_v7 = vmul.f32 %v932_v62, %v1855_v30 }
 0x253   : > { %v2012_v55 = vpop.eup %1474  ;;  %vm619_vm10 = vcmp.lt.f32.partialorder %v1894_v53, 0.0  ;;  %v731_v54 = vadd.f32 -1.4531521, %v715_v61  ;;  %1480 = vrcp.f32 %v686_v25  ;;  %v934_v56 = vsub.f32 1.0, %v918_v16 }
 0x254   : > { %v776_v12 = vmul.f32 %v1915_v8, %v760_v47  ;;  %v671_v0 = vmul.f32 0.3275911, %v655_v18  ;;  %1482 = vpow2.f32 %v902_v27  ;;  %v876_v10 = vmul.f32 %v860_v32, %v1943_v63 }
 0x255   : > { %v747_v22 = vmul.f32 %v2000_v29, %v731_v54  ;;  %v1025_v43 = vpack.c.bf16 %v979_v21, %v977_v36  ;;  %v809_v26 = vmul.f32 %v1900_v11, %v793_v49  ;;  %v778_v23 = vmul.f32 %v1976_v59, %v762_v45 }
 0x256   : > { %v861_v15 = vsub.f32 0.0, %v1963_v38  ;;  %v687_v3 = vadd.f32 1.0, %v671_v0  ;;  %1484 = vpow2.f32 %v900_v48  ;;  %v2027_v30 = vsel %vm619_vm10, -1.0, %v1513_v5 }
 0x257   : > { %v763_v62 = vadd.f32 1.4214138, %v747_v22  ;;  %1160 = vmatprep.mubr.bf16.mxu0 %v1025_v43  ;;  %v709_v16 = vmul.f32 1.0614054, %v1932_v35  ;;  %v950_v63 = vmul.f32 %v934_v56, %v1878_v58  ;;  %v792_v36 = vadd.f32 -0.28449672, %v776_v12 }
 0x258   : > { %v2030_v47 = vpop.eup %1476  ;;  %v862_v21 = vsub.f32 0.0, %v1991_v60  ;;  %1486 = vrcp.f32 %v687_v3  ;;  %1161 = vmatmul.mubr.bf16.vlgmr.msra.gmra.mxu0 %v1024_v42  ;;  %v711_v53 = vmul.f32 1.0614054, %v1968_v33  ;;  %v825_v25 = vadd.f32 0.2548296, %v809_v26 }
 0x259   : > { %v779_v61 = vmul.f32 %v2000_v29, %v763_v62  ;;  %v716_v27 = vmul.f32 1.0614054, %v2030_v47  ;;  %v725_v32 = vadd.f32 -1.4531521, %v709_v16  ;;  %v794_v49 = vadd.f32 -0.28449672, %v778_v23 }
 0x25a   : > { %v904_v45 = vmul.f32 1.442695, %v876_v10  ;;  %v877_v48 = vmul.f32 %v861_v15, %v1963_v38  ;;  %v727_v58 = vadd.f32 -1.4531521, %v711_v53  ;;  %v2041_v42 = vadd.f32 1.0, %v950_v63 }
 0x25b   : > { %v795_v54 = vadd.f32 -0.28449672, %v779_v61  ;;  %v732_v0 = vadd.f32 -1.4531521, %v716_v27  ;;  %v741_v56 = vmul.f32 %v1932_v35, %v725_v32  ;;  %v808_v22 = vmul.f32 %v1915_v8, %v792_v36 }
 0x25c   : > { %v2039_v12 = vpop.eup %1478  ;;  %v878_v43 = vmul.f32 %v862_v21, %v1991_v60  ;;  %v863_v3 = vsub.f32 0.0, %v655_v18  ;;  %v743_v23 = vmul.f32 %v1968_v33, %v727_v58  ;;  %v841_v15 = vmul.f32 %v1900_v11, %v825_v25 }
 0x25d   : > { %v811_v26 = vmul.f32 %v2000_v29, %v795_v54  ;;  %v748_v10 = vmul.f32 %v2030_v47, %v732_v0  ;;  %v717_v38 = vmul.f32 1.0614054, %v2039_v12  ;;  %1488 = vpow2.f32 %v904_v45 }
 0x25e   : > { %v906_v62 = vmul.f32 1.442695, %v877_v48  ;;  %v757_v16 = vadd.f32 1.4214138, %v741_v56  ;;  %v810_v63 = vmul.f32 %v1976_v59, %v794_v49  ;;  %v908_v21 = vmul.f32 1.442695, %v878_v43 }
 0x25f   : > { %v827_v61 = vadd.f32 0.2548296, %v811_v26  ;;  %v764_v36 = vadd.f32 1.4214138, %v748_v10  ;;  %v733_v27 = vadd.f32 -1.4531521, %v717_v38  ;;  %v879_v53 = vmul.f32 %v863_v3, %v655_v18 }
 0x260   : > { %v2051_v60 = vpop.eup %1480  ;;  %v759_v32 = vadd.f32 1.4214138, %v743_v23  ;;  %v773_v54 = vmul.f32 %v1932_v35, %v757_v16  ;;  %v921_v49 = vmul.f32 %v2012_v55, %v841_v15  ;;  %1490 = vpow2.f32 %v906_v62 }
 0x261   : > { %v843_v0 = vmul.f32 %v2000_v29, %v827_v61  ;;  %v780_v58 = vmul.f32 %v2030_v47, %v764_v36  ;;  %v749_v11 = vmul.f32 %v2039_v12, %v733_v27  ;;  %v718_v25 = vmul.f32 1.0614054, %v2051_v60  ;;  %v1483_v45 = vpop.eup %1482 }
 0x262   : > { %v775_v48 = vmul.f32 %v1968_v33, %v759_v32  ;;  %v789_v18 = vadd.f32 -0.28449672, %v773_v54  ;;  %v826_v56 = vadd.f32 0.2548296, %v810_v63  ;;  %v824_v10 = vadd.f32 0.2548296, %v808_v22 }
 0x263   : > { %v923_v43 = vmul.f32 %v1483_v45, %v843_v0  ;;  %v765_v3 = vadd.f32 1.4214138, %v749_v11  ;;  %v734_v26 = vadd.f32 -1.4531521, %v718_v25  ;;  %v1485_v29 = vpop.eup %1484  ;;  %1492 = vpow2.f32 %v908_v21 }
 0x264   : > { %v791_v38 = vadd.f32 -0.28449672, %v775_v48  ;;  %v805_v23 = vmul.f32 %v1932_v35, %v789_v18  ;;  %v796_v61 = vadd.f32 -0.28449672, %v780_v58  ;;  %v910_v62 = vmul.f32 1.442695, %v879_v53 }
 0x265   : > { %v2063_v16 = vpop.eup %1486  ;;  %v781_v55 = vmul.f32 %v2039_v12, %v765_v3  ;;  %v750_v15 = vmul.f32 %v2051_v60, %v734_v26  ;;  %v939_v63 = vsub.f32 1.0, %v923_v43  ;;  %v937_v54 = vsub.f32 1.0, %v921_v49 }
 0x266   : > { %v719_v36 = vmul.f32 1.0614054, %v2063_v16  ;;  %v807_v27 = vmul.f32 %v1968_v33, %v791_v38  ;;  %v821_v32 = vadd.f32 0.2548296, %v805_v23  ;;  %v842_v22 = vmul.f32 %v1976_v59, %v826_v56 }
 0x267   : > { %v797_v21 = vadd.f32 -0.28449672, %v781_v55  ;;  %v766_v0 = vadd.f32 1.4214138, %v750_v15  ;;  %v840_v11 = vmul.f32 %v1915_v8, %v824_v10  ;;  %v812_v48 = vmul.f32 %v2030_v47, %v796_v61 }
 0x268   : > { %v735_v25 = vadd.f32 -1.4531521, %v719_v36  ;;  %v823_v58 = vadd.f32 0.2548296, %v807_v27  ;;  %v837_v45 = vmul.f32 %v1932_v35, %v821_v32  ;;  %1494 = vpow2.f32 %v910_v62 }
 0x269   : > { %v813_v53 = vmul.f32 %v2039_v12, %v797_v21  ;;  %v782_v18 = vmul.f32 %v2051_v60, %v766_v0  ;;  %v955_v43 = vmul.f32 %v939_v63, %v2027_v30  ;;  %v953_v3 = vmul.f32 %v937_v54, %v1940_v1 }
 0x26a   : > { %v751_v49 = vmul.f32 %v2063_v16, %v735_v25  ;;  %v839_v59 = vmul.f32 %v1968_v33, %v823_v58  ;;  %v917_v56 = vmul.f32 %v1950_v14, %v837_v45  ;;  %v1489_v8 = vpop.eup %1488  ;;  %v922_v26 = vmul.f32 %v1485_v29, %v842_v22 }
 0x26b   : > { %v829_v35 = vadd.f32 0.2548296, %v813_v53  ;;  %v798_v10 = vadd.f32 -0.28449672, %v782_v18  ;;  %v920_v38 = vmul.f32 %v2008_v41, %v840_v11  ;;  %v828_v15 = vadd.f32 0.2548296, %v812_v48 }
 0x26c   : > { %v767_v23 = vadd.f32 1.4214138, %v751_v49  ;;  %v919_v61 = vmul.f32 %v1980_v6, %v839_v59  ;;  %v933_v55 = vsub.f32 1.0, %v917_v56  ;;  %v629_v14 = vsel %vm613_vm11, -1.0, %v1513_v5 }
 0x26d   : > { %v845_v30 = vmul.f32 %v2039_v12, %v829_v35  ;;  %v814_v62 = vmul.f32 %v2051_v60, %v798_v10  ;;  %v971_v33 = vadd.f32 1.0, %v955_v43  ;;  %v1491_v36 = vpop.eup %1490  ;;  %v969_v41 = vadd.f32 1.0, %v953_v3 }
 0x26e   : > { %v783_v1 = vmul.f32 %v2063_v16, %v767_v23  ;;  %v935_v29 = vsub.f32 1.0, %v919_v61  ;;  %v949_v63 = vmul.f32 %v933_v55, %v629_v14  ;;  %v938_v27 = vsub.f32 1.0, %v922_v26 }
 0x26f   : > { %v830_v32 = vadd.f32 0.2548296, %v814_v62  ;;  %v631_v6 = vsel %vm615_vm12, -1.0, %v1513_v5  ;;  %v925_v12 = vmul.f32 %v1491_v36, %v845_v30  ;;  %v964_v28 = vadd.f32 1.0, %v2016_v7 }
 0x270   : > { %v799_v54 = vadd.f32 -0.28449672, %v783_v1  ;;  %v951_v22 = vmul.f32 %v935_v29, %v631_v6  ;;  %v965_v21 = vadd.f32 1.0, %v949_v63  ;;  %v1493_v0 = vpop.eup %1492  ;;  %v936_v11 = vsub.f32 1.0, %v920_v38 }
 0x271   : > { %v844_v25 = vmul.f32 %v2030_v47, %v828_v15  ;;  %v846_v58 = vmul.f32 %v2051_v60, %v830_v32  ;;  %v982_v45 = vmul.f32 %v2041_v42, %v1867_v57  ;;  %v987_v48 = vmul.f32 %v971_v33, %v1995_v9 }
 0x272   : > { %v815_v13 = vmul.f32 %v2063_v16, %v799_v54  ;;  %v967_v53 = vadd.f32 1.0, %v951_v22  ;;  %v985_v18 = vmul.f32 %v969_v41, %v1922_v37  ;;  %v954_v43 = vmul.f32 %v938_v27, %v1974_v20  ;;  %v1319_v22 = vld [vmem:[%s2162_s6] ss:$0 sm:$0xff] }
 0x273   : > { %vm621_vm13 = vcmp.lt.f32.partialorder %v1956_v52, 0.0  ;;  %v926_v7 = vmul.f32 %v1493_v0, %v846_v58  ;;  %v941_v49 = vsub.f32 1.0, %v925_v12  ;;  %v981_v47 = vmul.f32 %v965_v21, %v1837_v50 }
 0x274   : > { %v831_v59 = vadd.f32 0.2548296, %v815_v13  ;;  %v983_v60 = vmul.f32 %v967_v53, %v1880_v24  ;;  %v980_v57 = vmul.f32 %v964_v28, %v1833_v2  ;;  %v952_v9 = vmul.f32 %v936_v11, %v1912_v31 }
 0x275   : > { %v924_v42 = vmul.f32 %v1489_v8, %v844_v25  ;;  %v1495_v56 = vpop.eup %1494  ;;  %v637_v3 = vsel %vm621_vm13, -1.0, %v1513_v5  ;;  %v1029_v26 = vpack.c.bf16 %v987_v48, %v985_v18  ;;  %v970_v52 = vadd.f32 1.0, %v954_v43  ;;  %v1497_v25 = vld [vmem:[%s1570_s30 + $0x8] sm:$0xff]  ;;  %v1498_v43 = vld [vmem:[%s1570_s30 + $0x10] sm:$0xff] }
 0x276   : > { %v847_v37 = vmul.f32 %v2063_v16, %v831_v59  ;;  %v1027_v20 = vpack.c.bf16 %v983_v60, %v981_v47  ;;  %vm622_vm14 = vcmp.lt.f32.partialorder %v1966_v46, 0.0  ;;  %v942_v35 = vsub.f32 1.0, %v926_v7 }
 0x277   : > { %v1026_v10 = vpack.c.bf16 %v982_v45, %v980_v57  ;;  %v957_v50 = vmul.f32 %v941_v49, %v637_v3  ;;  %vm623_vm15 = vcmp.lt.f32.partialorder %v2004_v39, 0.0  ;;  %v968_v2 = vadd.f32 1.0, %v952_v9  ;;  %v1499_v57 = vld [vmem:[%s1570_s30 + $0x18] sm:$0xff] }
 0x278   : > { %v927_v24 = vmul.f32 %v1495_v56, %v847_v37  ;;  %1168 = vmatprep.mubr.bf16.mxu1 %v1027_v20  ;;  %v586_v31 = vmul.f32 0.5, %v1863_v51  ;;  %vm620_vm1 = vcmp.lt.f32.partialorder %v1927_v40, 0.0  ;;  %v940_v8 = vsub.f32 1.0, %v924_v42  ;;  %v1500_v20 = vld [vmem:[%s1570_s30 + $0x20] sm:$0xff] }
 0x279   : > { %1169 = vmatmul.mubr.bf16.vlgmr.msra.gmra.mxu1 %v1026_v10  ;;  %v638_v16 = vsel %vm622_vm14, -1.0, %v1513_v5  ;;  %v584_v46 = vmul.f32 0.5, %v1787_v17  ;;  %v639_v55 = vsel %vm623_vm15, -1.0, %v1513_v5  ;;  %v636_v39 = vsel %vm620_vm1, -1.0, %v1513_v5 }
 0x27a   : > { %v943_v38 = vsub.f32 1.0, %v927_v24  ;;  %1176 = vmatprep.mubr.bf16.mxu1 %v1029_v26  ;;  %v986_v23 = vmul.f32 %v970_v52, %v586_v31  ;;  %v958_v61 = vmul.f32 %v942_v35, %v638_v16  ;;  %v973_v15 = vadd.f32 1.0, %v957_v50  ;;  %v1501_v24 = vld [vmem:[%s1570_s30 + $0x28] sm:$0xff] }
 0x27b   : > { %v984_v62 = vmul.f32 %v968_v2, %v584_v46  ;;  %v956_v51 = vmul.f32 %v940_v8, %v636_v39  ;;  %v589_v40 = vmul.f32 0.5, %v1930_v44  ;;  %v591_v14 = vmul.f32 0.5, %v1986_v19  ;;  %v1502_v46 = vld [vmem:[%s1570_s30 + $0x30] sm:$0xff] }
 0x27c   : > { %v959_v30 = vmul.f32 %v943_v38, %v639_v55  ;;  %v974_v1 = vadd.f32 1.0, %v958_v61  ;;  %v590_v41 = vmul.f32 0.5, %v1946_v4  ;;  %v588_v27 = vmul.f32 0.5, %v1919_v34  ;;  %v1496_v4 = vld [vmem:[%s1570_s30] sm:$0xff] }
 0x27d   : > { %v1028_v29 = vpack.c.bf16 %v986_v23, %v984_v62  ;;  %v989_v63 = vmul.f32 %v973_v15, %v589_v40  ;;  %v972_v17 = vadd.f32 1.0, %v956_v51  ;;  %v1503_v15 = vld [vmem:[%s1570_s30 + $0x38] sm:$0xff] }
 0x27e   : > { %v975_v33 = vadd.f32 1.0, %v959_v30  ;;  %v990_v32 = vmul.f32 %v974_v1, %v590_v41 }
 0x27f   : > { %v988_v44 = vmul.f32 %v972_v17, %v588_v27 }
 0x280   : > { %v991_v36 = vmul.f32 %v975_v33, %v591_v14 }
 0x281   : > { %1177 = vmatmul.mubr.bf16.gmra.mxu1 %v1028_v29  ;;  %v1030_v6 = vpack.c.bf16 %v990_v32, %v988_v44 }
 0x282   : > { %v1031_v5 = vpack.c.bf16 %v991_v36, %v989_v63 }
 0x284   : > { %1184 = vmatprep.mubr.bf16.mxu1 %v1031_v5 }
 0x289   : > { %1185 = vmatmul.mubr.bf16.gmra.mxu1 %v1030_v6 }
 0x318   : > { %v1338_v19 = vpop.f32.mrf.mxu0 }
 0x31a   : > { %v1339_v12 = vpop.f32.mrf.mxu0 }
 0x31b   : > { %v1340_v54 = vadd.f32 %v1339_v12, %v1338_v19 }
 0x31c   : > { %v1341_v21 = vpop.f32.mrf.mxu0 }
 0x31d   : > { %v1193_v0 = vadd.f32 %v1496_v4, %v1340_v54 }
 0x31e   : > { %v1342_v34 = vpop.f32.mrf.mxu0 }
 0x31f   : > { %v1208_v28 = vadd.f32 %v1319_v22, %v1193_v0  ;;  %v1343_v11 = vadd.f32 %v1342_v34, %v1341_v21 }
 0x321   : > { %1216 = vst.msk [vmem:[%s2128_s9] sm:$0xff] %vm293_vm0, %v1208_v28  ;;  %v1194_v58 = vadd.f32 %v1497_v25, %v1343_v11 }
 0x323   : > { %v1209_v45 = vadd.f32 %v1319_v22, %v1194_v58 }
 0x325   : > { %1217 = vst.msk [vmem:[%s2128_s9 + $0x8] sm:$0xff] %vm293_vm0, %v1209_v45 }
 0x339   : > { %v1344_v48 = vpop.f32.mrf.mxu1 }
 0x33b   : > { %v1345_v13 = vpop.f32.mrf.mxu1 }
 0x33c   : > { %v1346_v53 = vadd.f32 %v1345_v13, %v1344_v48 }
 0x33d   : > { %v1347_v18 = vpop.f32.mrf.mxu1 }
 0x33e   : > { %v1195_v7 = vadd.f32 %v1498_v43, %v1346_v53 }
 0x33f   : > { %v1348_v49 = vpop.f32.mrf.mxu1 }
 0x340   : > { %v1210_v59 = vadd.f32 %v1319_v22, %v1195_v7  ;;  %v1349_v47 = vadd.f32 %v1348_v49, %v1347_v18 }
 0x341   : > { %v1350_v60 = vpop.f32.mrf.mxu1 }
 0x342   : > { %1218 = vst.msk [vmem:[%s2128_s9 + $0x10] sm:$0xff] %vm293_vm0, %v1210_v59  ;;  %v1196_v9 = vadd.f32 %v1499_v57, %v1349_v47 }
 0x343   : > { %v1351_v42 = vpop.f32.mrf.mxu1 }
 0x344   : > { %v1211_v56 = vadd.f32 %v1319_v22, %v1196_v9  ;;  %v1352_v3 = vadd.f32 %v1351_v42, %v1350_v60 }
 0x345   : > { %v1353_v37 = vpop.f32.mrf.mxu1 }
 0x346   : > { %1219 = vst.msk [vmem:[%s2128_s9 + $0x18] sm:$0xff] %vm293_vm0, %v1211_v56  ;;  %v1197_v26 = vadd.f32 %v1500_v20, %v1352_v3 }
 0x347   : > { %v1354_v52 = vpop.f32.mrf.mxu1 }
 0x348   : > { %v1212_v35 = vadd.f32 %v1319_v22, %v1197_v26  ;;  %v1355_v10 = vadd.f32 %v1354_v52, %v1353_v37 }
 0x349   : > { %v1356_v50 = vpop.f32.mrf.mxu1 }
 0x34a   : > { %1220 = vst.msk [vmem:[%s2128_s9 + $0x20] sm:$0xff] %vm293_vm0, %v1212_v35  ;;  %v1198_v2 = vadd.f32 %v1501_v24, %v1355_v10 }
 0x34b   : > { %v1357_v31 = vpop.f32.mrf.mxu1 }
 0x34c   : > { %v1213_v8 = vadd.f32 %v1319_v22, %v1198_v2  ;;  %v1358_v16 = vadd.f32 %v1357_v31, %v1356_v50 }
 0x34d   : > { %v1359_v38 = vpop.f32.mrf.mxu1 }
 0x34e   : > { %1221 = vst.msk [vmem:[%s2128_s9 + $0x28] sm:$0xff] %vm293_vm0, %v1213_v8  ;;  %v1199_v23 = vadd.f32 %v1502_v46, %v1358_v16 }
 0x34f   : > { %v1360_v61 = vpop.f32.mrf.mxu1 }
 0x350   : > { %v1214_v55 = vadd.f32 %v1319_v22, %v1199_v23  ;;  %v1361_v39 = vadd.f32 %v1360_v61, %v1359_v38 }
 0x352   : > { %1222 = vst.msk [vmem:[%s2128_s9 + $0x30] sm:$0xff] %vm293_vm0, %v1214_v55  ;;  %v1200_v30 = vadd.f32 %v1503_v15, %v1361_v39 }
 0x354   : > { %v1215_v62 = vadd.f32 %v1319_v22, %v1200_v30 }
 0x356   : > { %1223 = vst.msk [vmem:[%s2128_s9 + $0x38] sm:$0xff] %vm293_vm0, %v1215_v62 }
 0x357 PF: > { %s17_s24 = sadd.s32 1, %s1510_s24  }
 0x358   : > { %p14_p4 = scmp.ge.s32.totalorder %s17_s24, 4  }
 0x35a   :  { %16 = sbr.rel (!%p14_p4) target bundleno = 1 (0x1), region = 78 }

// kernel: climax_forward.9
= control target key start
LH: loop header
LB: loop body
LE: loop exit
PB: predicated region body
PF: predicated region fallthrough
CT: control target
= control target key end

     0   :  { %v2303_v3 = vmov 0   ;;  %vm138_vm0 = vcmask 523264   ;;  %v3337_v57 = vmov 0.0   ;;  %vm2305_vm1 = vmmov 0   ;;  %s3327_s0 = inlined_call_operand.vmem [shape: f32[6,64,128], index: 0, kind: input, shape index: {}]   ;;  %s3328_s1 = inlined_call_operand.vmem [shape: bf16[64,64], index: 1, kind: input, shape index: {}]   ;;  %s3329_s3 = inlined_call_operand.vmem [shape: bf16[64,64], index: 3, kind: input, shape index: {}]   ;;  %s3330_s2 = inlined_call_operand.vmem [shape: f32[64,1], index: 2, kind: input, shape index: {}, may-alias: {2,4,7}]   ;;  %s3331_s4 = inlined_call_operand.vmem [shape: f32[64,1], index: 4, kind: input, shape index: {}, may-alias: {2,4,7}]   ;;  %s3332_s7 = inlined_call_operand.vmem [shape: f32[64,1], index: 7, kind: input, shape index: {}, may-alias: {2,4,7}]   ;;  %s3333_s5 = inlined_call_operand.vmem [shape: f32[4,64], index: 5, kind: input, shape index: {}]   ;;  %s3334_s6 = inlined_call_operand.vmem [shape: bf16[64,64], index: 6, kind: input, shape index: {}]   ;;  %s3335_s8 = inlined_call_operand.vmem [shape: f32[64,128], index: 8, kind: input, shape index: {}]   ;;  %s3336_s9 = inlined_call_operand.vmem [shape: f32[64,128], index: 9, kind: output, shape index: {}]  }
   0x1   :  { %v72_v0 = vld [vmem:[%s3327_s0 + $0x30] sm:$0xff]  ;;  %v73_v1 = vld [vmem:[%s3327_s0 + $0x38] sm:$0xff]  ;;  %v70_v2 = vld [vmem:[%s3327_s0 + $0x20] sm:$0xff]  ;;  %2275 = vset.pattern.permute.xlu0 %v2303_v3  ;;  %2276 = vset.pattern.permute.xlu1 %v2303_v3 }
   0x2   :  { %v77_v4 = vpack.c.bf16 %v73_v1, %v72_v0  ;;  %v71_v5 = vld [vmem:[%s3327_s0 + $0x28] sm:$0xff]  ;;  %v68_v7 = vld [vmem:[%s3327_s0 + $0x10] sm:$0xff]  ;;  %v69_v8 = vld [vmem:[%s3327_s0 + $0x18] sm:$0xff]  ;;  %2024 = vmatprep.subr.bf16.mxu0 %v3337_v57  ;;  %2032 = vmatprep.mubr.msk.bf16.mxu0 %vm2305_vm1, %v3337_v57 }
   0x3   :  { %v76_v6 = vpack.c.bf16 %v71_v5, %v70_v2  ;;  %v2377_v9 = vld [vmem:[%s3328_s1] sm:$0xff]   ;;  %v75_v10 = vpack.c.bf16 %v69_v8, %v68_v7  ;;  %v67_v12 = vld [vmem:[%s3327_s0 + $0x8] sm:$0xff]  ;;  %v55_v14 = vld [vmem:[%s3330_s2 + $0x30] sm:$0xff] }
   0x4   :  { %1992 = vmatprep.subr.bf16.mxu1 %v77_v4  ;;  %v66_v11 = vld [vmem:[%s3327_s0] sm:$0xff]  ;;  %2000 = vmatprep.mubr.msk.bf16.mxu1 %vm138_vm0, %v2377_v9  ;;  %v2396_v16 = vld [vmem:[%s3328_s1 + $0x8] sm:$0xff]   ;;  %v56_v17 = vld [vmem:[%s3330_s2 + $0x38] sm:$0xff] }
   0x5   :  { %1993 = vmatpush3.bf16.msra.mxu1 %v77_v4  ;;  %v74_v13 = vpack.c.bf16 %v67_v12, %v66_v11  ;;  %110 = vperm.xlu0 %2275, %v55_v14   ;;  %v53_v15 = vld [vmem:[%s3330_s2 + $0x20] sm:$0xff]  ;;  %v2404_v18 = vld [vmem:[%s3328_s1 + $0x10] sm:$0xff]   ;;  %v54_v19 = vld [vmem:[%s3330_s2 + $0x28] sm:$0xff] }
   0x6   :  { %1994 = vmatprep.subr.bf16.mxu1 %v76_v6  ;;  %100 = vperm.xlu1 %2276, %v53_v15   ;;  %v51_v20 = vld [vmem:[%s3330_s2 + $0x10] sm:$0xff]  ;;  %v52_v21 = vld [vmem:[%s3330_s2 + $0x18] sm:$0xff]  ;;  %v49_v23 = vld [vmem:[%s3330_s2] sm:$0xff] }
   0x7   :  { %v2422_v22 = vld [vmem:[%s3328_s1 + $0x18] sm:$0xff]   ;;  %v2430_v24 = vld [vmem:[%s3329_s3] sm:$0xff]   ;;  %v50_v25 = vld [vmem:[%s3330_s2 + $0x8] sm:$0xff] }
   0x8   :  { %v1771_v26 = vld [vmem:[%s3327_s0 + $0x70] sm:$0xff]  ;;  %v1772_v27 = vld [vmem:[%s3327_s0 + $0x78] sm:$0xff]  ;;  %v1769_v31 = vld [vmem:[%s3327_s0 + $0x60] sm:$0xff] }
   0x9   :  { %1995 = vmatpush3.bf16.msra.mxu1 %v76_v6  ;;  %115 = vperm.xlu0 %2275, %v56_v17   ;;  %v63_v28 = vld [vmem:[%s3331_s4 + $0x30] sm:$0xff]  ;;  %v64_v29 = vld [vmem:[%s3331_s4 + $0x38] sm:$0xff]  ;;  %v2451_v30 = vpack.c.bf16 %v1772_v27, %v1771_v26  ;;  %v1770_v32 = vld [vmem:[%s3327_s0 + $0x68] sm:$0xff] }
   0xa   :  { %1996 = vmatprep.subr.bf16.mxu1 %v75_v10  ;;  %105 = vperm.xlu1 %2276, %v54_v19   ;;  %v2462_v33 = vld [vmem:[%s3329_s3 + $0x8] sm:$0xff]   ;;  %v61_v34 = vld [vmem:[%s3331_s4 + $0x20] sm:$0xff]  ;;  %v2470_v35 = vld [vmem:[%s3329_s3 + $0x10] sm:$0xff]   ;;  %v2476_v37 = vpack.c.bf16 %v1770_v32, %v1769_v31 }
   0xb   :  { %v62_v36 = vld [vmem:[%s3331_s4 + $0x28] sm:$0xff]  ;;  %v1767_v38 = vld [vmem:[%s3327_s0 + $0x50] sm:$0xff]  ;;  %v1768_v39 = vld [vmem:[%s3327_s0 + $0x58] sm:$0xff] }
   0xc   :  { %v59_v40 = vld [vmem:[%s3331_s4 + $0x10] sm:$0xff]  ;;  %v60_v41 = vld [vmem:[%s3331_s4 + $0x18] sm:$0xff]  ;;  %v2496_v42 = vpack.c.bf16 %v1768_v39, %v1767_v38  ;;  %v1765_v43 = vld [vmem:[%s3327_s0 + $0x40] sm:$0xff] }
   0xd   :  { %1997 = vmatpush3.bf16.msra.mxu1 %v75_v10  ;;  %90 = vperm.xlu0 %2275, %v51_v20   ;;  %v1766_v44 = vld [vmem:[%s3327_s0 + $0x48] sm:$0xff]  ;;  %v2507_v45 = vld [vmem:[%s3329_s3 + $0x18] sm:$0xff]   ;;  %v57_v46 = vld [vmem:[%s3331_s4] sm:$0xff] }
   0xe   :  { %1998 = vmatprep.subr.bf16.mxu1 %v74_v13  ;;  %95 = vperm.xlu1 %2276, %v52_v21   ;;  %v58_v47 = vld [vmem:[%s3331_s4 + $0x8] sm:$0xff]  ;;  %v2517_v48 = vpack.c.bf16 %v1766_v44, %v1765_v43  ;;  %v1575_v49 = vld [vmem:[%s3332_s7] sm:$0xff]  ;;  %v1577_v51 = vld [vmem:[%s3332_s7 + $0x10] sm:$0xff] }
   0xf   :  { %v1576_v50 = vld [vmem:[%s3332_s7 + $0x8] sm:$0xff]  ;;  %v1578_v52 = vld [vmem:[%s3332_s7 + $0x18] sm:$0xff]  ;;  %v1579_v53 = vld [vmem:[%s3332_s7 + $0x20] sm:$0xff] }
  0x10   :  { %v1580_v54 = vld [vmem:[%s3332_s7 + $0x28] sm:$0xff]  ;;  %v1581_v55 = vld [vmem:[%s3332_s7 + $0x30] sm:$0xff]  ;;  %v1582_v56 = vld [vmem:[%s3332_s7 + $0x38] sm:$0xff] }
  0x11   :  { %1999 = vmatpush3.bf16.msra.mxu1 %v74_v13  ;;  %80 = vperm.xlu0 %2275, %v49_v23   ;;  %v65_v32 = vld [vmem:[%s3333_s5] sm:$0xf] }
  0x12   :  { %2008 = vmatprep.subr.bf16.mxu1 %v77_v4  ;;  %85 = vperm.xlu1 %2276, %v50_v25   ;;  %v2606_v39 = vpack.c.bf16 %v65_v32, %v65_v32  ;;  %v1804_v32 = vld [vmem:[%s3327_s0 + $0xe8] sm:$0xff] }
  0x14   :  { %2001 = vmatmul.mubr.msk.bf16.vlgmr.msra.gmra.mxu1 %vm138_vm0, %v2396_v16 }
  0x15   :  { %2009 = vmatpush3.bf16.msra.mxu1 %v77_v4  ;;  %2004 = vmatprep.mubr.msk.bf16.mxu1 %vm138_vm0, %v2404_v18 }
  0x16   :  { %2010 = vmatprep.subr.bf16.mxu1 %v76_v6  ;;  %248 = vperm.xlu0 %2275, %v63_v28  }
  0x17   :  { %253 = vperm.xlu1 %2276, %v64_v29  }
  0x19   :  { %2011 = vmatpush3.bf16.msra.mxu1 %v76_v6 }
  0x1a   :  { %2012 = vmatprep.subr.bf16.mxu1 %v75_v10  ;;  %238 = vperm.xlu0 %2275, %v61_v34  }
  0x1b   :  { %243 = vperm.xlu1 %2276, %v62_v36  }
  0x1c   :  { %2005 = vmatmul.mubr.msk.bf16.gmra.mxu1 %vm138_vm0, %v2422_v22 }
  0x1d   :  { %2013 = vmatpush3.bf16.msra.mxu1 %v75_v10  ;;  %2016 = vmatprep.mubr.msk.bf16.mxu1 %vm138_vm0, %v2430_v24 }
  0x1e   :  { %2014 = vmatprep.subr.bf16.mxu1 %v74_v13  ;;  %228 = vperm.xlu0 %2275, %v59_v40  }
  0x1f   :  { %233 = vperm.xlu1 %2276, %v60_v41  }
  0x21   :  { %2015 = vmatpush3.bf16.msra.mxu1 %v74_v13 }
  0x22   :  { %2036 = vmatprep.subr.bf16.mxu1 %v2451_v30  ;;  %218 = vperm.xlu0 %2275, %v57_v46  }
  0x23   :  { %223 = vperm.xlu1 %2276, %v58_v47   ;;  %v1788_v47 = vld [vmem:[%s3327_s0 + $0xb0] sm:$0xff] }
  0x24   :  { %2017 = vmatmul.mubr.msk.bf16.vlgmr.msra.gmra.mxu1 %vm138_vm0, %v2462_v33 }
  0x25   :  { %2037 = vmatpush3.bf16.msra.mxu1 %v2451_v30  ;;  %2020 = vmatprep.mubr.msk.bf16.mxu1 %vm138_vm0, %v2470_v35 }
  0x26   :  { %2038 = vmatprep.subr.bf16.mxu1 %v2476_v37  ;;  %1585 = vperm.xlu0 %2275, %v1575_v49  }
  0x27   :  { %1590 = vperm.xlu1 %2276, %v1576_v50  }
  0x29   :  { %2039 = vmatpush3.bf16.msra.mxu1 %v2476_v37 }
  0x2a   :  { %2040 = vmatprep.subr.bf16.mxu1 %v2496_v42  ;;  %1595 = vperm.xlu0 %2275, %v1577_v51  }
  0x2b   :  { %1600 = vperm.xlu1 %2276, %v1578_v52   ;;  %v1787_v52 = vld [vmem:[%s3327_s0 + $0xa8] sm:$0xff] }
  0x2c   :  { %2021 = vmatmul.mubr.msk.bf16.gmra.mxu1 %vm138_vm0, %v2507_v45 }
  0x2d   :  { %2041 = vmatpush3.bf16.msra.mxu1 %v2496_v42  ;;  %2044 = vmatprep.mubr.msk.bf16.mxu1 %vm138_vm0, %v2377_v9 }
  0x2e   :  { %2042 = vmatprep.subr.bf16.mxu1 %v2517_v48  ;;  %1605 = vperm.xlu0 %2275, %v1579_v53  }
  0x2f   :  { %1610 = vperm.xlu1 %2276, %v1580_v54  }
  0x31   :  { %2043 = vmatpush3.bf16.msra.mxu1 %v2517_v48 }
  0x32   :  { %1615 = vperm.xlu0 %2275, %v1581_v55   ;;  %2068 = vmatprep.subr.bf16.mxu1 %v3337_v57 }
  0x33   :  { %1620 = vperm.xlu1 %2276, %v1582_v56  }
  0x34   :  { %2045 = vmatmul.mubr.msk.bf16.vlgmr.msra.gmra.mxu1 %vm138_vm0, %v2396_v16 }
  0x35   :  { %2048 = vmatprep.mubr.msk.bf16.mxu1 %vm138_vm0, %v2404_v18 }
  0x3c   :  { %2049 = vmatmul.mubr.msk.bf16.gmra.mxu1 %vm138_vm0, %v2422_v22 }
  0x3d   :  { %2076 = vmatprep.mubr.msk.bf16.mxu1 %vm2305_vm1, %v3337_v57 }
  0x80   :  { %v2564_v61 = vpop.permute.xlu0 %110 }
  0x81   :  { %v2562_v59 = vpop.permute.xlu1 %100 }
  0x84   :  { %v2568_v2 = vpop.permute.xlu0 %115 }
  0x85   :  { %v2566_v0 = vpop.permute.xlu1 %105 }
  0x88   :  { %v2575_v12 = vpop.permute.xlu0 %90 }
  0x89   :  { %v2572_v7 = vpop.permute.xlu1 %95 }
  0x8c   :  { %v2589_v25 = vpop.permute.xlu0 %80 }
  0x8d   :  { %v2584_v20 = vpop.permute.xlu1 %85 }
  0xd4   :  { %v2002_v58 = vpop.f32.mrf.mxu1 }
  0xd5   :  { %v194_v23 = vadd.f32 %v2002_v58, %v2575_v12 }
  0xd6   :  { %v185_v60 = vpop.f32.mrf.mxu1 }
  0xd7   :  { %v186_v31 = vadd.f32 %v185_v60, %v2589_v25 }
  0xd8   :  { %v2003_v62 = vpop.f32.mrf.mxu1 }
  0xd9   :  { %v197_v17 = vadd.f32 %v2003_v62, %v2572_v7  ;;  %v1784_v62 = vld [vmem:[%s3327_s0 + $0x90] sm:$0xff] }
  0xda   :  { %v188_v63 = vpop.f32.mrf.mxu1 }
  0xdb   :  { %v355_v27 = vpack.c.bf16 %v197_v17, %v194_v23  ;;  %v189_v28 = vadd.f32 %v188_v63, %v2584_v20  ;;  %v1785_v63 = vld [vmem:[%s3327_s0 + $0x98] sm:$0xff]  ;;  %v1805_v23 = vld [vmem:[%s3327_s0 + $0xf0] sm:$0xff] }
  0xdc   :  { %v2006_v1 = vpop.f32.mrf.mxu1 }
  0xdd   :  { %v210_v5 = vadd.f32 %v2006_v1, %v2564_v61  ;;  %v354_v36 = vpack.c.bf16 %v189_v28, %v186_v31  ;;  %v1803_v31 = vld [vmem:[%s3327_s0 + $0xe0] sm:$0xff] }
  0xde   :  { %v201_v3 = vpop.f32.mrf.mxu1 }
  0xdf   :  { %v202_v14 = vadd.f32 %v201_v3, %v2562_v59 }
  0xe0   :  { %v2007_v4 = vpop.f32.mrf.mxu1 }
  0xe1   :  { %v213_v6 = vadd.f32 %v2007_v4, %v2568_v2 }
  0xe2   :  { %v204_v8 = vpop.f32.mrf.mxu1 }
  0xe3   :  { %v205_v10 = vadd.f32 %v204_v8, %v2566_v0  ;;  %v357_v11 = vpack.c.bf16 %v213_v6, %v210_v5  ;;  %v1782_v5 = vld [vmem:[%s3327_s0 + $0x80] sm:$0xff]  ;;  %v1783_v6 = vld [vmem:[%s3327_s0 + $0x88] sm:$0xff] }
  0xe4   :  { %v2577_v13 = vpop.f32.mrf.mxu1 }
  0xe5   :  { %2025 = vmatpush3.bf16.msra.mxu0 %v357_v11  ;;  %v356_v19 = vpack.c.bf16 %v205_v10, %v202_v14  ;;  %v597_v10 = vpack.c.bf16 %v1783_v6, %v1782_v5 }
  0xe6   :  { %v2580_v15 = vpop.f32.mrf.mxu1  ;;  %2026 = vmatprep.subr.bf16.mxu0 %v3337_v57 }
  0xe8   :  { %v2586_v21 = vpop.f32.mrf.mxu1 }
  0xe9   :  { %2027 = vmatpush3.bf16.msra.mxu0 %v356_v19 }
  0xea   :  { %v2591_v26 = vpop.f32.mrf.mxu1  ;;  %2028 = vmatprep.subr.bf16.mxu0 %v3337_v57 }
  0xec   :  { %v2595_v29 = vpop.f32.mrf.mxu1 }
  0xed   :  { %2029 = vmatpush3.bf16.msra.mxu0 %v355_v27  ;;  %v1806_v27 = vld [vmem:[%s3327_s0 + $0xf8] sm:$0xff] }
  0xee   :  { %v2601_v34 = vpop.f32.mrf.mxu1  ;;  %2030 = vmatprep.subr.bf16.mxu0 %v3337_v57  ;;  %v2684_v28 = vpack.c.bf16 %v1806_v27, %v1805_v23 }
  0xf0   :  { %v2604_v38 = vpop.f32.mrf.mxu1 }
  0xf1   :  { %2031 = vmatpush3.bf16.msra.mxu0 %v354_v36  ;;  %v2693_v36 = vpack.c.bf16 %v1804_v32, %v1803_v31 }
  0xf2   :  { %v2608_v40 = vpop.f32.mrf.mxu1  ;;  %2052 = vmatprep.subr.bf16.mxu0 %v2451_v30 }
  0xf4   :  { %v2046_v41 = vpop.f32.mrf.mxu1  ;;  %2033 = vmatmul.mubr.msk.bf16.vlgmr.msra.gmra.mxu0 %vm138_vm0, %v2606_v39 }
  0xf5   :  { %2053 = vmatpush3.bf16.msra.mxu0 %v2451_v30  ;;  %2060 = vmatprep.mubr.msk.bf16.mxu0 %vm138_vm0, %v2430_v24  ;;  %v1789_v30 = vld [vmem:[%s3327_s0 + $0xb8] sm:$0xff]  ;;  %v457_v8 = vadd.f32 %v2046_v41, %v2575_v12  ;;  %v1801_v41 = vld [vmem:[%s3327_s0 + $0xd0] sm:$0xff] }
  0xf6   :  { %v448_v43 = vpop.f32.mrf.mxu1  ;;  %2054 = vmatprep.subr.bf16.mxu0 %v2476_v37  ;;  %v600_v51 = vpack.c.bf16 %v1789_v30, %v1788_v47  ;;  %v1800_v47 = vld [vmem:[%s3327_s0 + $0xc8] sm:$0xff] }
  0xf7   :  { %v449_v17 = vadd.f32 %v448_v43, %v2589_v25  ;;  %v1802_v43 = vld [vmem:[%s3327_s0 + $0xd8] sm:$0xff] }
  0xf8   :  { %v2047_v44 = vpop.f32.mrf.mxu1 }
  0xf9   :  { %2055 = vmatpush3.bf16.msra.mxu0 %v2476_v37  ;;  %v1786_v37 = vld [vmem:[%s3327_s0 + $0xa0] sm:$0xff]  ;;  %v460_v3 = vadd.f32 %v2047_v44, %v2572_v7  ;;  %v2707_v44 = vpack.c.bf16 %v1802_v43, %v1801_v41 }
  0xfa   :  { %v451_v46 = vpop.f32.mrf.mxu1  ;;  %2056 = vmatprep.subr.bf16.mxu0 %v2496_v42  ;;  %v599_v56 = vpack.c.bf16 %v1787_v52, %v1786_v37 }
  0xfb   :  { %v545_v11 = vpack.c.bf16 %v460_v3, %v457_v8  ;;  %v452_v14 = vadd.f32 %v451_v46, %v2584_v20  ;;  %v1799_v46 = vld [vmem:[%s3327_s0 + $0xc0] sm:$0xff] }
  0xfc   :  { %v2050_v49 = vpop.f32.mrf.mxu1  ;;  %v2717_v30 = vpack.c.bf16 %v1800_v47, %v1799_v46 }
  0xfd   :  { %2057 = vmatpush3.bf16.msra.mxu0 %v2496_v42  ;;  %v473_v54 = vadd.f32 %v2050_v49, %v2564_v61  ;;  %v544_v19 = vpack.c.bf16 %v452_v14, %v449_v17 }
  0xfe   :  { %v464_v50 = vpop.f32.mrf.mxu1  ;;  %2058 = vmatprep.subr.bf16.mxu0 %v2517_v48 }
  0xff   :  { %v465_v1 = vadd.f32 %v464_v50, %v2562_v59 }
 0x100   :  { %v2051_v53 = vpop.f32.mrf.mxu1 }
 0x101   :  { %v476_v55 = vadd.f32 %v2051_v53, %v2568_v2  ;;  %2059 = vmatpush3.bf16.msra.mxu0 %v2517_v48  ;;  %v598_v48 = vpack.c.bf16 %v1785_v63, %v1784_v62 }
 0x102   :  { %v467_v42 = vpop.f32.mrf.mxu1  ;;  %2080 = vmatprep.subr.bf16.mxu0 %v600_v51 }
 0x103   :  { %v547_v58 = vpack.c.bf16 %v476_v55, %v473_v54  ;;  %v468_v60 = vadd.f32 %v467_v42, %v2566_v0 }
 0x104   :  { %2061 = vmatmul.mubr.msk.bf16.vlgmr.msra.gmra.mxu0 %vm138_vm0, %v2462_v33 }
 0x105   :  { %2069 = vmatpush3.bf16.msra.mxu1 %v547_v58  ;;  %2081 = vmatpush3.bf16.msra.mxu0 %v600_v51  ;;  %v546_v4 = vpack.c.bf16 %v468_v60, %v465_v1 }
 0x106   :  { %2070 = vmatprep.subr.bf16.mxu1 %v3337_v57  ;;  %2082 = vmatprep.subr.bf16.mxu0 %v599_v56 }
 0x107   :  { %2064 = vmatprep.mubr.msk.bf16.mxu0 %vm138_vm0, %v2470_v35 }
 0x109   :  { %2071 = vmatpush3.bf16.msra.mxu1 %v546_v4  ;;  %2083 = vmatpush3.bf16.msra.mxu0 %v599_v56 }
 0x10a   :  { %2072 = vmatprep.subr.bf16.mxu1 %v3337_v57  ;;  %2084 = vmatprep.subr.bf16.mxu0 %v598_v48 }
 0x10c   :  { %2065 = vmatmul.mubr.msk.bf16.gmra.mxu0 %vm138_vm0, %v2507_v45 }
 0x10d   :  { %2073 = vmatpush3.bf16.msra.mxu1 %v545_v11  ;;  %2085 = vmatpush3.bf16.msra.mxu0 %v598_v48 }
 0x10e   :  { %2074 = vmatprep.subr.bf16.mxu1 %v3337_v57  ;;  %2086 = vmatprep.subr.bf16.mxu0 %v597_v10 }
 0x10f   :  { %2088 = vmatprep.mubr.msk.bf16.mxu0 %vm138_vm0, %v2377_v9 }
 0x111   :  { %2075 = vmatpush3.bf16.msra.mxu1 %v544_v19  ;;  %2087 = vmatpush3.bf16.msra.mxu0 %v597_v10 }
 0x112   :  { %2096 = vmatprep.subr.bf16.mxu1 %v600_v51  ;;  %2112 = vmatprep.subr.bf16.mxu0 %v3337_v57 }
 0x114   :  { %2077 = vmatmul.mubr.msk.bf16.vlgmr.msra.gmra.mxu1 %vm138_vm0, %v2606_v39  ;;  %2089 = vmatmul.mubr.msk.bf16.vlgmr.msra.gmra.mxu0 %vm138_vm0, %v2396_v16 }
 0x115   :  { %2097 = vmatpush3.bf16.msra.mxu1 %v600_v51  ;;  %2092 = vmatprep.mubr.msk.bf16.mxu0 %vm138_vm0, %v2404_v18 }
 0x116   :  { %2098 = vmatprep.subr.bf16.mxu1 %v599_v56  ;;  %2104 = vmatprep.mubr.msk.bf16.mxu1 %vm138_vm0, %v2430_v24 }
 0x119   :  { %2099 = vmatpush3.bf16.msra.mxu1 %v599_v56 }
 0x11a   :  { %2100 = vmatprep.subr.bf16.mxu1 %v598_v48 }
 0x11c   :  { %2093 = vmatmul.mubr.msk.bf16.gmra.mxu0 %vm138_vm0, %v2422_v22 }
 0x11d   :  { %2101 = vmatpush3.bf16.msra.mxu1 %v598_v48  ;;  %2120 = vmatprep.mubr.msk.bf16.mxu0 %vm2305_vm1, %v3337_v57 }
 0x11e   :  { %2102 = vmatprep.subr.bf16.mxu1 %v597_v10 }
 0x121   :  { %2103 = vmatpush3.bf16.msra.mxu1 %v597_v10 }
 0x122   :  { %2124 = vmatprep.subr.bf16.mxu1 %v2684_v28 }
 0x124   :  { %2105 = vmatmul.mubr.msk.bf16.vlgmr.msra.gmra.mxu1 %vm138_vm0, %v2462_v33 }
 0x125   :  { %2125 = vmatpush3.bf16.msra.mxu1 %v2684_v28  ;;  %2108 = vmatprep.mubr.msk.bf16.mxu1 %vm138_vm0, %v2470_v35 }
 0x126   :  { %2126 = vmatprep.subr.bf16.mxu1 %v2693_v36 }
 0x129   :  { %2127 = vmatpush3.bf16.msra.mxu1 %v2693_v36 }
 0x12a   :  { %2128 = vmatprep.subr.bf16.mxu1 %v2707_v44 }
 0x12c   :  { %2109 = vmatmul.mubr.msk.bf16.gmra.mxu1 %vm138_vm0, %v2507_v45 }
 0x12d   :  { %2129 = vmatpush3.bf16.msra.mxu1 %v2707_v44  ;;  %2132 = vmatprep.mubr.msk.bf16.mxu1 %vm138_vm0, %v2377_v9 }
 0x12e   :  { %2130 = vmatprep.subr.bf16.mxu1 %v2717_v30 }
 0x131   :  { %2131 = vmatpush3.bf16.msra.mxu1 %v2717_v30 }
 0x132   :  { %2156 = vmatprep.subr.bf16.mxu1 %v3337_v57 }
 0x134   :  { %2133 = vmatmul.mubr.msk.bf16.vlgmr.msra.gmra.mxu1 %vm138_vm0, %v2396_v16 }
 0x135   :  { %2136 = vmatprep.mubr.msk.bf16.mxu1 %vm138_vm0, %v2404_v18 }
 0x13c   :  { %2137 = vmatmul.mubr.msk.bf16.gmra.mxu1 %vm138_vm0, %v2422_v22 }
 0x13d   :  { %2164 = vmatprep.mubr.msk.bf16.mxu1 %vm2305_vm1, %v3337_v57 }
 0x1b4   :  { %v2735_v49 = vpop.f32.mrf.mxu0 }
 0x1b6   :  { %v2034_v50 = vpop.f32.mrf.mxu0 }
 0x1b8   :  { %v398_v51 = vpop.f32.mrf.mxu0 }
 0x1ba   :  { %v2035_v37 = vpop.f32.mrf.mxu0 }
 0x1c4   :  { %v2737_v52 = vpop.f32.mrf.mxu0 }
 0x1c6   :  { %v2739_v53 = vpop.f32.mrf.mxu0 }
 0x1c8   :  { %v2741_v54 = vpop.f32.mrf.mxu0 }
 0x1ca   :  { %v2743_v55 = vpop.f32.mrf.mxu0 }
 0x1cc   :  { %v2745_v42 = vpop.f32.mrf.mxu0 }
 0x1ce   :  { %v2747_v56 = vpop.f32.mrf.mxu0 }
 0x1d0   :  { %v2749_v58 = vpop.f32.mrf.mxu0 }
 0x1d2   :  { %v2751_v60 = vpop.f32.mrf.mxu0 }
 0x1d4   :  { %v2753_v62 = vpop.f32.mrf.mxu1  ;;  %v2090_v63 = vpop.f32.mrf.mxu0 }
 0x1d5   :  { %v644_v50 = vadd.f32 %v2090_v63, %v2575_v12 }
 0x1d6   :  { %v2078_v1 = vpop.f32.mrf.mxu1  ;;  %v635_v48 = vpop.f32.mrf.mxu0 }
 0x1d8   :  { %v585_v3 = vpop.f32.mrf.mxu1  ;;  %v2091_v4 = vpop.f32.mrf.mxu0 }
 0x1d9   :  { %v647_v43 = vadd.f32 %v2091_v4, %v2572_v7 }
 0x1da   :  { %v2079_v5 = vpop.f32.mrf.mxu1  ;;  %v638_v6 = vpop.f32.mrf.mxu0 }
 0x1db   :  { %v732_v37 = vpack.c.bf16 %v647_v43, %v644_v50  ;;  %v639_v1 = vadd.f32 %v638_v6, %v2584_v20  ;;  %v636_v5 = vadd.f32 %v635_v48, %v2589_v25 }
 0x1dc   :  { %v2094_v8 = vpop.f32.mrf.mxu0 }
 0x1dd   :  { %v660_v14 = vadd.f32 %v2094_v8, %v2564_v61  ;;  %v731_v4 = vpack.c.bf16 %v639_v1, %v636_v5 }
 0x1de   :  { %v651_v10 = vpop.f32.mrf.mxu0 }
 0x1df   :  { %v652_v32 = vadd.f32 %v651_v10, %v2562_v59 }
 0x1e0   :  { %v2095_v11 = vpop.f32.mrf.mxu0 }
 0x1e1   :  { %v663_v17 = vadd.f32 %v2095_v11, %v2568_v2 }
 0x1e2   :  { %v654_v19 = vpop.f32.mrf.mxu0 }
 0x1e3   :  { %v734_v23 = vpack.c.bf16 %v663_v17, %v660_v14  ;;  %v655_v27 = vadd.f32 %v654_v19, %v2566_v0  ;;  %v1822_v17 = vld [vmem:[%s3327_s0 + $0x130] sm:$0xff] }
 0x1e4   :  { %v2758_v31 = vpop.f32.mrf.mxu1 }
 0x1e5   :  { %2113 = vmatpush3.bf16.msra.mxu0 %v734_v23  ;;  %v733_v46 = vpack.c.bf16 %v655_v27, %v652_v32  ;;  %v1821_v32 = vld [vmem:[%s3327_s0 + $0x128] sm:$0xff] }
 0x1e6   :  { %v2761_v41 = vpop.f32.mrf.mxu1  ;;  %2114 = vmatprep.subr.bf16.mxu0 %v3337_v57 }
 0x1e8   :  { %v2765_v47 = vpop.f32.mrf.mxu1 }
 0x1e9   :  { %2115 = vmatpush3.bf16.msra.mxu0 %v733_v46 }
 0x1ea   :  { %v2768_v51 = vpop.f32.mrf.mxu1  ;;  %2116 = vmatprep.subr.bf16.mxu0 %v3337_v57 }
 0x1ec   :  { %v2772_v3 = vpop.f32.mrf.mxu1 }
 0x1ed   :  { %2117 = vmatpush3.bf16.msra.mxu0 %v732_v37 }
 0x1ee   :  { %v2775_v8 = vpop.f32.mrf.mxu1  ;;  %2118 = vmatprep.subr.bf16.mxu0 %v3337_v57 }
 0x1f0   :  { %v2778_v10 = vpop.f32.mrf.mxu1 }
 0x1f1   :  { %2119 = vmatpush3.bf16.msra.mxu0 %v731_v4  ;;  %v1818_v4 = vld [vmem:[%s3327_s0 + $0x110] sm:$0xff] }
 0x1f2   :  { %v2780_v63 = vpop.f32.mrf.mxu1  ;;  %2140 = vmatprep.subr.bf16.mxu0 %v2684_v28 }
 0x1f4   :  { %2121 = vmatmul.mubr.msk.bf16.vlgmr.msra.gmra.mxu0 %vm138_vm0, %v2606_v39  ;;  %v2134_v6 = vpop.f32.mrf.mxu1 }
 0x1f5   :  { %2141 = vmatpush3.bf16.msra.mxu0 %v2684_v28  ;;  %2148 = vmatprep.mubr.msk.bf16.mxu0 %vm138_vm0, %v2430_v24  ;;  %v1823_v28 = vld [vmem:[%s3327_s0 + $0x138] sm:$0xff] }
 0x1f6   :  { %v822_v48 = vpop.f32.mrf.mxu1  ;;  %2142 = vmatprep.subr.bf16.mxu0 %v2693_v36  ;;  %v974_v27 = vpack.c.bf16 %v1823_v28, %v1822_v17  ;;  %v1819_v17 = vld [vmem:[%s3327_s0 + $0x118] sm:$0xff] }
 0x1f8   :  { %v2135_v11 = vpop.f32.mrf.mxu1 }
 0x1f9   :  { %2143 = vmatpush3.bf16.msra.mxu0 %v2693_v36  ;;  %v1820_v36 = vld [vmem:[%s3327_s0 + $0x120] sm:$0xff] }
 0x1fa   :  { %v825_v14 = vpop.f32.mrf.mxu1  ;;  %2144 = vmatprep.subr.bf16.mxu0 %v2707_v44  ;;  %v973_v37 = vpack.c.bf16 %v1821_v32, %v1820_v36  ;;  %v1816_v32 = vld [vmem:[%s3327_s0 + $0x100] sm:$0xff] }
 0x1fc   :  { %v2138_v19 = vpop.f32.mrf.mxu1 }
 0x1fd   :  { %2145 = vmatpush3.bf16.msra.mxu0 %v2707_v44  ;;  %v847_v46 = vadd.f32 %v2138_v19, %v2564_v61  ;;  %v834_v19 = vadd.f32 %v2135_v11, %v2572_v7 }
 0x1fe   :  { %v838_v23 = vpop.f32.mrf.mxu1  ;;  %2146 = vmatprep.subr.bf16.mxu0 %v2717_v30 }
 0x1ff   :  { %v839_v28 = vadd.f32 %v838_v23, %v2562_v59  ;;  %v1817_v23 = vld [vmem:[%s3327_s0 + $0x108] sm:$0xff] }
 0x200   :  { %v2139_v43 = vpop.f32.mrf.mxu1  ;;  %v971_v11 = vpack.c.bf16 %v1817_v23, %v1816_v32 }
 0x201   :  { %v850_v50 = vadd.f32 %v2139_v43, %v2568_v2  ;;  %2147 = vmatpush3.bf16.msra.mxu0 %v2717_v30  ;;  %v972_v30 = vpack.c.bf16 %v1819_v17, %v1818_v4  ;;  %v831_v43 = vadd.f32 %v2134_v6, %v2575_v12  ;;  %v1835_v4 = vld [vmem:[%s3327_s0 + $0x150] sm:$0xff]  ;;  %v1836_v17 = vld [vmem:[%s3327_s0 + $0x158] sm:$0xff] }
 0x202   :  { %v841_v44 = vpop.f32.mrf.mxu1  ;;  %2168 = vmatprep.subr.bf16.mxu0 %v974_v27 }
 0x203   :  { %v921_v1 = vpack.c.bf16 %v850_v50, %v847_v46  ;;  %v842_v5 = vadd.f32 %v841_v44, %v2566_v0  ;;  %v919_v46 = vpack.c.bf16 %v834_v19, %v831_v43  ;;  %v826_v50 = vadd.f32 %v825_v14, %v2584_v20  ;;  %v1840_v14 = vld [vmem:[%s3327_s0 + $0x178] sm:$0xff]  ;;  %v1834_v19 = vld [vmem:[%s3327_s0 + $0x148] sm:$0xff] }
 0x204   :  { %2149 = vmatmul.mubr.msk.bf16.vlgmr.msra.gmra.mxu0 %vm138_vm0, %v2462_v33  ;;  %v823_v44 = vadd.f32 %v822_v48, %v2589_v25  ;;  %v1839_v48 = vld [vmem:[%s3327_s0 + $0x170] sm:$0xff] }
 0x205   :  { %2157 = vmatpush3.bf16.msra.mxu1 %v921_v1  ;;  %2169 = vmatpush3.bf16.msra.mxu0 %v974_v27  ;;  %v920_v36 = vpack.c.bf16 %v842_v5, %v839_v28  ;;  %v1838_v1 = vld [vmem:[%s3327_s0 + $0x168] sm:$0xff]  ;;  %v2879_v28 = vpack.c.bf16 %v1836_v17, %v1835_v4 }
 0x206   :  { %2158 = vmatprep.subr.bf16.mxu1 %v3337_v57  ;;  %2170 = vmatprep.subr.bf16.mxu0 %v973_v37  ;;  %v918_v6 = vpack.c.bf16 %v826_v50, %v823_v44 }
 0x207   :  { %2152 = vmatprep.mubr.msk.bf16.mxu0 %vm138_vm0, %v2470_v35 }
 0x209   :  { %2159 = vmatpush3.bf16.msra.mxu1 %v920_v36  ;;  %2171 = vmatpush3.bf16.msra.mxu0 %v973_v37 }
 0x20a   :  { %2160 = vmatprep.subr.bf16.mxu1 %v3337_v57  ;;  %2172 = vmatprep.subr.bf16.mxu0 %v972_v30 }
 0x20c   :  { %2153 = vmatmul.mubr.msk.bf16.gmra.mxu0 %vm138_vm0, %v2507_v45 }
 0x20d   :  { %2161 = vmatpush3.bf16.msra.mxu1 %v919_v46  ;;  %2173 = vmatpush3.bf16.msra.mxu0 %v972_v30 }
 0x20e   :  { %2162 = vmatprep.subr.bf16.mxu1 %v3337_v57  ;;  %2174 = vmatprep.subr.bf16.mxu0 %v971_v11 }
 0x20f   :  { %2176 = vmatprep.mubr.msk.bf16.mxu0 %vm138_vm0, %v2377_v9 }
 0x211   :  { %2163 = vmatpush3.bf16.msra.mxu1 %v918_v6  ;;  %2175 = vmatpush3.bf16.msra.mxu0 %v971_v11 }
 0x212   :  { %2184 = vmatprep.subr.bf16.mxu1 %v974_v27  ;;  %2200 = vmatprep.subr.bf16.mxu0 %v3337_v57 }
 0x214   :  { %2165 = vmatmul.mubr.msk.bf16.vlgmr.msra.gmra.mxu1 %vm138_vm0, %v2606_v39  ;;  %2177 = vmatmul.mubr.msk.bf16.vlgmr.msra.gmra.mxu0 %vm138_vm0, %v2396_v16 }
 0x215   :  { %2185 = vmatpush3.bf16.msra.mxu1 %v974_v27  ;;  %2180 = vmatprep.mubr.msk.bf16.mxu0 %vm138_vm0, %v2404_v18  ;;  %v2856_v27 = vpack.c.bf16 %v1840_v14, %v1839_v48 }
 0x216   :  { %2186 = vmatprep.subr.bf16.mxu1 %v973_v37  ;;  %2192 = vmatprep.mubr.msk.bf16.mxu1 %vm138_vm0, %v2430_v24 }
 0x219   :  { %2187 = vmatpush3.bf16.msra.mxu1 %v973_v37  ;;  %v1837_v37 = vld [vmem:[%s3327_s0 + $0x160] sm:$0xff] }
 0x21a   :  { %2188 = vmatprep.subr.bf16.mxu1 %v972_v30  ;;  %v2865_v5 = vpack.c.bf16 %v1838_v1, %v1837_v37 }
 0x21c   :  { %2181 = vmatmul.mubr.msk.bf16.gmra.mxu0 %vm138_vm0, %v2422_v22 }
 0x21d   :  { %2189 = vmatpush3.bf16.msra.mxu1 %v972_v30  ;;  %2208 = vmatprep.mubr.msk.bf16.mxu0 %vm2305_vm1, %v3337_v57  ;;  %v1833_v30 = vld [vmem:[%s3327_s0 + $0x140] sm:$0xff] }
 0x21e   :  { %2190 = vmatprep.subr.bf16.mxu1 %v971_v11  ;;  %v2889_v36 = vpack.c.bf16 %v1834_v19, %v1833_v30 }
 0x221   :  { %2191 = vmatpush3.bf16.msra.mxu1 %v971_v11 }
 0x222   :  { %2212 = vmatprep.subr.bf16.mxu1 %v2856_v27 }
 0x224   :  { %2193 = vmatmul.mubr.msk.bf16.vlgmr.msra.gmra.mxu1 %vm138_vm0, %v2462_v33 }
 0x225   :  { %2213 = vmatpush3.bf16.msra.mxu1 %v2856_v27  ;;  %2196 = vmatprep.mubr.msk.bf16.mxu1 %vm138_vm0, %v2470_v35 }
 0x226   :  { %2214 = vmatprep.subr.bf16.mxu1 %v2865_v5 }
 0x229   :  { %2215 = vmatpush3.bf16.msra.mxu1 %v2865_v5 }
 0x22a   :  { %2216 = vmatprep.subr.bf16.mxu1 %v2879_v28 }
 0x22c   :  { %2197 = vmatmul.mubr.msk.bf16.gmra.mxu1 %vm138_vm0, %v2507_v45 }
 0x22d   :  { %2217 = vmatpush3.bf16.msra.mxu1 %v2879_v28  ;;  %2220 = vmatprep.mubr.msk.bf16.mxu1 %vm138_vm0, %v2377_v9 }
 0x22e   :  { %2218 = vmatprep.subr.bf16.mxu1 %v2889_v36 }
 0x231   :  { %2219 = vmatpush3.bf16.msra.mxu1 %v2889_v36 }
 0x232   :  { %2244 = vmatprep.subr.bf16.mxu1 %v3337_v57 }
 0x234   :  { %2221 = vmatmul.mubr.msk.bf16.vlgmr.msra.gmra.mxu1 %vm138_vm0, %v2396_v16 }
 0x235   :  { %2224 = vmatprep.mubr.msk.bf16.mxu1 %vm138_vm0, %v2404_v18 }
 0x23c   :  { %2225 = vmatmul.mubr.msk.bf16.gmra.mxu1 %vm138_vm0, %v2422_v22 }
 0x23d   :  { %2252 = vmatprep.mubr.msk.bf16.mxu1 %vm2305_vm1, %v3337_v57 }
 0x2b4   :  { %v2907_v32 = vpop.f32.mrf.mxu0 }
 0x2b6   :  { %v2122_v9 = vpop.f32.mrf.mxu0 }
 0x2b8   :  { %v772_v23 = vpop.f32.mrf.mxu0 }
 0x2ba   :  { %v2123_v43 = vpop.f32.mrf.mxu0 }
 0x2c4   :  { %v2909_v11 = vpop.f32.mrf.mxu0 }
 0x2c5   :  { %3345 = vst [vmem:[#allocation2_spill] sm:$0xff] %v2909_v11 }
 0x2c6   :  { %v2911_v46 = vpop.f32.mrf.mxu0 }
 0x2c7   :  { %3346 = vst [vmem:[#allocation3_spill] sm:$0xff] %v2911_v46 }
 0x2c8   :  { %v2913_v50 = vpop.f32.mrf.mxu0 }
 0x2c9   :  { %3347 = vst [vmem:[#allocation4_spill] sm:$0xff] %v2913_v50 }
 0x2ca   :  { %v2915_v16 = vpop.f32.mrf.mxu0 }
 0x2cb   :  { %3348 = vst [vmem:[#allocation5_spill] sm:$0xff] %v2915_v16 }
 0x2cc   :  { %v2917_v18 = vpop.f32.mrf.mxu0 }
 0x2cd   :  { %3349 = vst [vmem:[#allocation6_spill] sm:$0xff] %v2917_v18 }
 0x2ce   :  { %v2919_v44 = vpop.f32.mrf.mxu0 }
 0x2cf   :  { %3350 = vst [vmem:[#allocation7_spill] sm:$0xff] %v2919_v44 }
 0x2d0   :  { %v2921_v22 = vpop.f32.mrf.mxu0 }
 0x2d1   :  { %3351 = vst [vmem:[#allocation8_spill] sm:$0xff] %v2921_v22 }
 0x2d2   :  { %v2923_v6 = vpop.f32.mrf.mxu0 }
 0x2d3   :  { %3352 = vst [vmem:[#allocation9_spill] sm:$0xff] %v2923_v6 }
 0x2d4   :  { %v2925_v48 = vpop.f32.mrf.mxu1  ;;  %v2178_v14 = vpop.f32.mrf.mxu0 }
 0x2d6   :  { %v2166_v37 = vpop.f32.mrf.mxu1  ;;  %v1009_v1 = vpop.f32.mrf.mxu0 }
 0x2d8   :  { %v959_v4 = vpop.f32.mrf.mxu1  ;;  %v2179_v17 = vpop.f32.mrf.mxu0 }
 0x2d9   :  { %v1021_v50 = vadd.f32 %v2179_v17, %v2572_v7 }
 0x2da   :  { %v2167_v30 = vpop.f32.mrf.mxu1  ;;  %v1012_v19 = vpop.f32.mrf.mxu0 }
 0x2db   :  { %v3354_v30 = vmov 0.0  }
 0x2dc   :  { %v2182_v9 = vpop.f32.mrf.mxu0 }
 0x2dd   :  { %v1034_v57 = vadd.f32 %v2182_v9, %v2564_v61  ;;  %v1018_v9 = vadd.f32 %v2178_v14, %v2575_v12 }
 0x2de   :  { %v1025_v23 = vpop.f32.mrf.mxu0 }
 0x2df   :  { %v1026_v37 = vadd.f32 %v1025_v23, %v2562_v59  ;;  %v1010_v23 = vadd.f32 %v1009_v1, %v2589_v25 }
 0x2e0   :  { %v2183_v43 = vpop.f32.mrf.mxu0 }
 0x2e1   :  { %v1037_v44 = vadd.f32 %v2183_v43, %v2568_v2 }
 0x2e2   :  { %v1028_v18 = vpop.f32.mrf.mxu0 }
 0x2e3   :  { %v1108_v22 = vpack.c.bf16 %v1037_v44, %v1034_v57  ;;  %v1029_v6 = vadd.f32 %v1028_v18, %v2566_v0  ;;  %v1106_v18 = vpack.c.bf16 %v1021_v50, %v1018_v9  ;;  %v1013_v44 = vadd.f32 %v1012_v19, %v2584_v20 }
 0x2e4   :  { %v2930_v16 = vpop.f32.mrf.mxu1 }
 0x2e5   :  { %2201 = vmatpush3.bf16.msra.mxu0 %v1108_v22  ;;  %v1107_v46 = vpack.c.bf16 %v1029_v6, %v1026_v37  ;;  %v1105_v6 = vpack.c.bf16 %v1013_v44, %v1010_v23 }
 0x2e6   :  { %v2933_v4 = vpop.f32.mrf.mxu1  ;;  %2202 = vmatprep.subr.bf16.mxu0 %v3354_v30 }
 0x2e7   :  { %3353 = vst [vmem:[#allocation10_spill] sm:$0xff] %v2933_v4 }
 0x2e8   :  { %v2937_v11 = vpop.f32.mrf.mxu1 }
 0x2e9   :  { %2203 = vmatpush3.bf16.msra.mxu0 %v1107_v46 }
 0x2ea   :  { %v2940_v57 = vpop.f32.mrf.mxu1  ;;  %2204 = vmatprep.subr.bf16.mxu0 %v3354_v30 }
 0x2eb   :  { %3355 = vst [vmem:[#allocation11_spill] sm:$0xff] %v2940_v57 }
 0x2ec   :  { %v2944_v22 = vpop.f32.mrf.mxu1 }
 0x2ed   :  { %2205 = vmatpush3.bf16.msra.mxu0 %v1106_v18 }
 0x2ee   :  { %v2947_v43 = vpop.f32.mrf.mxu1  ;;  %2206 = vmatprep.subr.bf16.mxu0 %v3354_v30 }
 0x2f0   :  { %v2950_v17 = vpop.f32.mrf.mxu1 }
 0x2f1   :  { %2207 = vmatpush3.bf16.msra.mxu0 %v1105_v6 }
 0x2f2   :  { %v2952_v46 = vpop.f32.mrf.mxu1  ;;  %2228 = vmatprep.subr.bf16.mxu0 %v2856_v27 }
 0x2f4   :  { %2209 = vmatmul.mubr.msk.bf16.vlgmr.msra.gmra.mxu0 %vm138_vm0, %v2606_v39  ;;  %v2222_v50 = vpop.f32.mrf.mxu1 }
 0x2f5   :  { %2229 = vmatpush3.bf16.msra.mxu0 %v2856_v27  ;;  %2236 = vmatprep.mubr.msk.bf16.mxu0 %vm138_vm0, %v2430_v24 }
 0x2f6   :  { %v1196_v14 = vpop.f32.mrf.mxu1  ;;  %2230 = vmatprep.subr.bf16.mxu0 %v2865_v5 }
 0x2f8   :  { %v2223_v1 = vpop.f32.mrf.mxu1 }
 0x2f9   :  { %2231 = vmatpush3.bf16.msra.mxu0 %v2865_v5 }
 0x2fa   :  { %v1199_v19 = vpop.f32.mrf.mxu1  ;;  %2232 = vmatprep.subr.bf16.mxu0 %v2879_v28 }
 0x2fc   :  { %v2226_v37 = vpop.f32.mrf.mxu1 }
 0x2fd   :  { %2233 = vmatpush3.bf16.msra.mxu0 %v2879_v28  ;;  %v1221_v27 = vadd.f32 %v2226_v37, %v2564_v61  ;;  %v1208_v61 = vadd.f32 %v2223_v1, %v2572_v7  ;;  %v1205_v28 = vadd.f32 %v2222_v50, %v2575_v12 }
 0x2fe   :  { %v1212_v9 = vpop.f32.mrf.mxu1  ;;  %2234 = vmatprep.subr.bf16.mxu0 %v2889_v36 }
 0x2ff   :  { %v1213_v6 = vadd.f32 %v1212_v9, %v2562_v59  ;;  %v2285_v59 = vld [vmem:[%s3334_s6] sm:$0xff]  }
 0x300   :  { %v2227_v18 = vpop.f32.mrf.mxu1 }
 0x301   :  { %v1224_v24 = vadd.f32 %v2227_v18, %v2568_v2  ;;  %2235 = vmatpush3.bf16.msra.mxu0 %v2889_v36  ;;  %v1200_v36 = vadd.f32 %v1199_v19, %v2584_v20 }
 0x302   :  { %v1215_v44 = vpop.f32.mrf.mxu1 }
 0x303   :  { %v1295_v23 = vpack.c.bf16 %v1224_v24, %v1221_v27  ;;  %v1216_v5 = vadd.f32 %v1215_v44, %v2566_v0  ;;  %v1293_v0 = vpack.c.bf16 %v1208_v61, %v1205_v28 }
 0x304   :  { %2237 = vmatmul.mubr.msk.bf16.vlgmr.msra.gmra.mxu0 %vm138_vm0, %v2462_v33  ;;  %v1197_v33 = vadd.f32 %v1196_v14, %v2589_v25  ;;  %v1336_v25 = vmax.f32 %v2735_v49, %v2753_v62 }
 0x305   :  { %2245 = vmatpush3.bf16.msra.mxu1 %v1295_v23  ;;  %2240 = vmatprep.mubr.msk.bf16.mxu0 %vm138_vm0, %v2470_v35  ;;  %v1294_v2 = vpack.c.bf16 %v1216_v5, %v1213_v6 }
 0x306   :  { %2246 = vmatprep.subr.bf16.mxu1 %v3354_v30  ;;  %v1292_v35 = vpack.c.bf16 %v1200_v36, %v1197_v33  ;;  %v2997_v36 = vpop.permute.xlu0 %248 }
 0x309   :  { %2247 = vmatpush3.bf16.msra.mxu1 %v1294_v2 }
 0x30a   :  { %2248 = vmatprep.subr.bf16.mxu1 %v3354_v30 }
 0x30c   :  { %2241 = vmatmul.mubr.msk.bf16.gmra.mxu0 %vm138_vm0, %v2507_v45 }
 0x30d   :  { %2249 = vmatpush3.bf16.msra.mxu1 %v1293_v0  ;;  %2264 = vmatprep.mubr.msk.bf16.mxu0 %vm138_vm0, %v2285_v59 }
 0x30e   :  { %2250 = vmatprep.subr.bf16.mxu1 %v3354_v30  ;;  %v1337_v30 = vmax.f32 %v1336_v25, %v2907_v32 }
 0x310   :  { %v1338_v50 = vmax.f32 %v1337_v30, %v2925_v48 }
 0x311   :  { %2251 = vmatpush3.bf16.msra.mxu1 %v1292_v35 }
 0x314   :  { %2253 = vmatmul.mubr.msk.bf16.vlgmr.msra.gmra.mxu1 %vm138_vm0, %v2606_v39 }
 0x3b4   :  { %v1143_v7 = vpop.f32.mrf.mxu0 }
 0x3b5   :  { %v1339_v14 = vmax.f32 %v1338_v50, %v1143_v7 }
 0x3b6   :  { %v2210_v12 = vpop.f32.mrf.mxu0 }
 0x3b8   :  { %v1146_v20 = vpop.f32.mrf.mxu0 }
 0x3ba   :  { %v2211_v45 = vpop.f32.mrf.mxu0 }
 0x3c4   :  { %v3007_v35 = vpop.f32.mrf.mxu0 }
 0x3c6   :  { %v3015_v20 = vpop.f32.mrf.mxu0 }
 0x3c7   :  { %3356 = vst [vmem:[#allocation12_spill] sm:$0xff] %v3015_v20 }
 0x3d4   :  { %v1330_v1 = vpop.f32.mrf.mxu1 }
 0x3d5   :  { %v1340_v39 = vmax.f32 %v1339_v14, %v1330_v1 }
 0x3d6   :  { %v2254_v19 = vpop.f32.mrf.mxu1 }
 0x3d7   :  { %v1341_v37 = vsub.f32 %v2735_v49, %v1340_v39  ;;  %v1344_v9 = vsub.f32 %v2753_v62, %v1340_v39  ;;  %v1347_v18 = vsub.f32 %v2907_v32, %v1340_v39  ;;  %v1350_v27 = vsub.f32 %v2925_v48, %v1340_v39  ;;  %v2999_v62 = vpop.permute.xlu1 %253  ;;  %v3001_v32 = vpop.permute.xlu0 %238 }
 0x3d8   :  { %v1333_v24 = vpop.f32.mrf.mxu1  ;;  %v1353_v6 = vsub.f32 %v1143_v7, %v1340_v39  ;;  %v1356_v28 = vsub.f32 %v1330_v1, %v1340_v39  ;;  %v3025_v39 = vpop.f32.mrf.mxu0 }
 0x3d9   :  { %v1342_v44 = vmul.f32 1.442695, %v1341_v37  ;;  %v1345_v23 = vmul.f32 1.442695, %v1344_v9  ;;  %v1348_v5 = vmul.f32 1.442695, %v1347_v18 }
 0x3da   :  { %v2255_v61 = vpop.f32.mrf.mxu1  ;;  %v1351_v2 = vmul.f32 1.442695, %v1350_v27  ;;  %v1354_v0 = vmul.f32 1.442695, %v1353_v6  ;;  %v1357_v49 = vmul.f32 1.442695, %v1356_v28  ;;  %v3032_v24 = vpop.f32.mrf.mxu0  ;;  %v1366_v28 = vlaneseq }
 0x3db   :  { %2289 = vpow2.f32 %v1342_v44  ;;  %v3005_v33 = vpop.permute.xlu1 %243  ;;  %v229_v30 = vpop.permute.xlu0 %228  ;;  %3358 = vst [vmem:[#allocation14_spill] sm:$0xff] %v3025_v39  ;;  %3361 = vst [vmem:[#allocation17_spill] sm:$0xff] %v3032_v24  ;;  %v3051_v61 = vadd.f32 %v2595_v29, %v2997_v36 }
 0x3dc   :  { %2291 = vpow2.f32 %v1345_v23  ;;  %v3035_v44 = vadd.f32 %v2577_v13, %v229_v30  ;;  %v3055_v13 = vadd.f32 %v2601_v34, %v3001_v32 }
 0x3dd   :  { %2293 = vpow2.f32 %v1348_v5 }
 0x3de   :  { %2295 = vpow2.f32 %v1351_v2  ;;  %v3061_v2 = vadd.f32 %v2608_v40, %v3005_v33  ;;  %v538_v40 = vadd.f32 %v2745_v42, %v2997_v36 }
 0x3df   :  { %2297 = vpow2.f32 %v1354_v0  ;;  %v3020_v50 = vpop.permute.xlu1 %233  ;;  %v3028_v18 = vpop.permute.xlu0 %218  ;;  %v541_v0 = vadd.f32 %v2749_v58, %v2999_v62  ;;  %v725_v58 = vadd.f32 %v2772_v3, %v2997_v36  ;;  %v3372_v3 = vld [vmem:[#allocation4_spill] sm:$0xff] }
 0x3e0   :  { %2299 = vpow2.f32 %v1357_v49  ;;  %3357 = vst [vmem:[#allocation13_spill] sm:$0xff] %v3020_v50  ;;  %3359 = vst [vmem:[#allocation15_spill] sm:$0xff] %v3028_v18  ;;  %v3039_v23 = vadd.f32 %v2580_v15, %v3028_v18  ;;  %v3043_v5 = vadd.f32 %v2586_v21, %v3020_v50  ;;  %v350_v15 = vadd.f32 %v2604_v38, %v2999_v62 }
 0x3e1   :  { %v3064_v21 = vadd.f32 %v2737_v52, %v229_v30  ;;  %v3068_v29 = vadd.f32 %v2739_v53, %v3028_v18  ;;  %v3072_v34 = vadd.f32 %v2741_v54, %v3020_v50  ;;  %v3082_v52 = vadd.f32 %v2747_v56, %v3001_v32 }
 0x3e2   :  { %3362 = vst [vmem:[#allocation18_spill] sm:$0xff] %v3039_v23  ;;  %v3088_v53 = vadd.f32 %v2751_v60, %v3005_v33  ;;  %v3091_v54 = vadd.f32 %v2758_v31, %v229_v30  ;;  %v3099_v42 = vadd.f32 %v2765_v47, %v3020_v50  ;;  %v3109_v60 = vadd.f32 %v2775_v8, %v3001_v32 }
 0x3e3   :  { %v3030_v27 = vpop.permute.xlu1 %223  ;;  %3364 = vst [vmem:[#allocation20_spill] sm:$0xff] %v3068_v29  ;;  %v728_v31 = vadd.f32 %v2778_v10, %v2999_v62  ;;  %v1367_v49 = vshrl.u32 %v1366_v28, 7  ;;  %v3126_v8 = vadd.f32 %v3372_v3, %v3020_v50  ;;  %v3377_v28 = vld [vmem:[#allocation7_spill] sm:$0xff]  ;;  %v3145_v3 = vadd.f32 %v2930_v16, %v229_v30 }
 0x3e4   :  { %3360 = vst [vmem:[#allocation16_spill] sm:$0xff] %v3030_v27  ;;  %v3047_v6 = vadd.f32 %v2591_v26, %v3030_v27  ;;  %v2242_v26 = vpop.f32.mrf.mxu0  ;;  %v3076_v38 = vadd.f32 %v2743_v55, %v3030_v27  ;;  %v3095_v55 = vadd.f32 %v2761_v41, %v3028_v18  ;;  %v3103_v56 = vadd.f32 %v2768_v51, %v3030_v27  ;;  %v3370_v51 = vld [vmem:[#allocation3_spill] sm:$0xff] }
 0x3e5   :  { %v3115_v41 = vadd.f32 %v2780_v63, %v3005_v33  ;;  %3373 = vst [vmem:[#allocation4_spill] sm:$0xff] %v3126_v8  ;;  %v3376_v63 = vld [vmem:[#allocation6_spill] sm:$0xff]  ;;  %v3136_v24 = vadd.f32 %v3377_v28, %v3001_v32  ;;  %v3155_v28 = vadd.f32 %v2947_v43, %v3001_v32  ;;  %v1384_v57 = vsub.s32 2, %v1367_v49 }
 0x3e6   :  { %3363 = vst [vmem:[#allocation19_spill] sm:$0xff] %v3047_v6  ;;  %3365 = vst [vmem:[#allocation21_spill] sm:$0xff] %v3076_v38  ;;  %v1277_v47 = vpop.f32.mrf.mxu0  ;;  %v3167_v4 = vsub.s32 1, %v1367_v49  ;;  %v3169_v43 = vsub.s32 0, %v1367_v49 }
 0x3e7   :  { %3366 = vst [vmem:[#allocation22_spill] sm:$0xff] %v3095_v55  ;;  %3367 = vst [vmem:[#allocation23_spill] sm:$0xff] %v3103_v56 }
 0x3e8   :  { %v3003_v48 = vpop.eup %2289  ;;  %3380 = vst [vmem:[#allocation6_spill] sm:$0xff] %v3145_v3  ;;  %v2243_v16 = vpop.f32.mrf.mxu0 }
 0x3e9   :  { %v3009_v59 = vpop.eup %2291 }
 0x3ea   :  { %v1359_v7 = vadd.f32 %v3009_v59, %v3003_v48  ;;  %v3013_v12 = vpop.eup %2293 }
 0x3eb   :  { %v3018_v25 = vpop.eup %2295 }
 0x3ec   :  { %v1360_v45 = vadd.f32 %v3013_v12, %v1359_v7  ;;  %v3023_v1 = vpop.eup %2297  ;;  %v3368_v7 = vld [vmem:[#allocation2_spill] sm:$0xff] }
 0x3ed   :  { %v2300_v37 = vpop.eup %2299 }
 0x3ee   :  { %v1361_v14 = vadd.f32 %v3018_v25, %v1360_v45  ;;  %v3118_v45 = vadd.f32 %v3368_v7, %v229_v30  ;;  %v3378_v7 = vld [vmem:[#allocation8_spill] sm:$0xff] }
 0x3ef   :  { %v915_v20 = vadd.f32 %v3378_v7, %v2999_v62  ;;  %v1102_v7 = vadd.f32 %v2950_v17, %v2999_v62 }
 0x3f0   :  { %v1362_v19 = vadd.f32 %v3023_v1, %v1361_v14  ;;  %3369 = vst [vmem:[#allocation2_spill] sm:$0xff] %v3118_v45  ;;  %v3122_v14 = vadd.f32 %v3370_v51, %v3028_v18  ;;  %v3379_v51 = vld [vmem:[#allocation9_spill] sm:$0xff] }
 0x3f1   :  { %3383 = vst [vmem:[#allocation9_spill] sm:$0xff] %v3169_v43 }
 0x3f2   :  { %v1363_v9 = vadd.f32 %v2300_v37, %v1362_v19  ;;  %3371 = vst [vmem:[#allocation3_spill] sm:$0xff] %v3122_v14  ;;  %v3374_v19 = vld [vmem:[#allocation5_spill] sm:$0xff]  ;;  %v3142_v14 = vadd.f32 %v3379_v51, %v3005_v33  ;;  %v3161_v51 = vadd.f32 %v2952_v46, %v3005_v33 }
 0x3f3   :  { %v3130_v10 = vadd.f32 %v3374_v19, %v3030_v27  ;;  %v3149_v19 = vadd.f32 %v2937_v11, %v3020_v50  ;;  %v3164_v11 = vadd.f32 %v3007_v35, %v229_v30  ;;  %v1278_v35 = vadd.f32 %v1277_v47, %v3001_v32 }
 0x3f4   :  { %2301 = vrcp.f32 %v1363_v9  ;;  %v912_v9 = vadd.f32 %v3376_v63, %v2997_v36  ;;  %v1099_v63 = vadd.f32 %v2944_v22, %v2997_v36  ;;  %v1286_v22 = vadd.f32 %v2242_v26, %v2997_v36 }
 0x3f5   :  { %3375 = vst [vmem:[#allocation5_spill] sm:$0xff] %v3130_v10  ;;  %3381 = vst [vmem:[#allocation7_spill] sm:$0xff] %v3149_v19  ;;  %v1392_v10 = vsub.s32 3, %v1367_v49  ;;  %v1289_v30 = vadd.f32 %v2243_v16, %v2999_v62 }
 0x3f6   :  { %3382 = vst [vmem:[#allocation8_spill] sm:$0xff] %v3164_v11 }
 0x401   :  { %v2302_v27 = vpop.eup %2301 }
 0x402   :  { %v3171_v18 = vmul.f32 %v2302_v27, %v2300_v37  ;;  %v3174_v17 = vmul.f32 %v2302_v27, %v3003_v48  ;;  %v3177_v46 = vmul.f32 %v2302_v27, %v3009_v59  ;;  %v3180_v56 = vmul.f32 %v2302_v27, %v3013_v12  ;;  %v1280_v37 = vpop.f32.mrf.mxu0 }
 0x403   :  { %v3185_v36 = vmul.f32 %v2302_v27, %v3018_v25  ;;  %v3188_v26 = vmul.f32 %v2302_v27, %v3023_v1  ;;  %v1281_v11 = vadd.f32 %v1280_v37, %v3005_v33 }
 0x404   :  { %v1393_v48 = vrot.slane %v3174_v17, %v1392_v10  ;;  %v1426_v49 = vrot.slane %v3177_v46, %v1392_v10  ;;  %v1459_v59 = vrot.slane %v3180_v56, %v1392_v10  ;;  %v1558_v12 = vrot.slane %v3171_v18, %v1392_v10 }
 0x405   :  { %v1492_v55 = vrot.slane %v3185_v36, %v1392_v10  ;;  %v1525_v32 = vrot.slane %v3188_v26, %v1392_v10  ;;  %v1385_v62 = vrot.slane %v3174_v17, %v1384_v57  ;;  %v1418_v25 = vrot.slane %v3177_v46, %v1384_v57 }
 0x406   :  { %v1394_v1 = vmul.f32 %v1393_v48, %v3051_v61  ;;  %v1395_v27 = vmul.f32 %v1393_v48, %v350_v15  ;;  %v1427_v47 = vmul.f32 %v1426_v49, %v538_v40  ;;  %v1428_v16 = vmul.f32 %v1426_v49, %v541_v0 }
 0x407   :  { %v1460_v38 = vmul.f32 %v1459_v59, %v725_v58  ;;  %v1461_v29 = vmul.f32 %v1459_v59, %v728_v31  ;;  %v1493_v6 = vmul.f32 %v1492_v55, %v912_v9  ;;  %v1494_v3 = vmul.f32 %v1492_v55, %v915_v20 }
 0x408   :  { %v1429_v23 = vadd.f32 %v1427_v47, %v1394_v1  ;;  %v1430_v19 = vadd.f32 %v1428_v16, %v1395_v27  ;;  %v1526_v8 = vmul.f32 %v1525_v32, %v1099_v63  ;;  %v1527_v39 = vmul.f32 %v1525_v32, %v1102_v7  ;;  %v3384_v32 = vld [vmem:[#allocation2_spill] sm:$0xff] }
 0x409   :  { %v1559_v10 = vmul.f32 %v1558_v12, %v1286_v22  ;;  %v1386_v50 = vmul.f32 %v1385_v62, %v3055_v13  ;;  %v1387_v43 = vmul.f32 %v1385_v62, %v3061_v2  ;;  %v1419_v15 = vmul.f32 %v1418_v25, %v3082_v52  ;;  %v3387_v47 = vld [vmem:[#allocation14_spill] sm:$0xff] }
 0x40a   :  { %v1462_v45 = vadd.f32 %v1460_v38, %v1429_v23  ;;  %v1463_v61 = vadd.f32 %v1461_v29, %v1430_v19  ;;  %v1420_v40 = vmul.f32 %v1418_v25, %v3088_v53  ;;  %v1451_v33 = vrot.slane %v3180_v56, %v1384_v57 }
 0x40b   :  { %v1484_v0 = vrot.slane %v3185_v36, %v1384_v57  ;;  %v1517_v58 = vrot.slane %v3188_v26, %v1384_v57  ;;  %v1550_v20 = vrot.slane %v3171_v18, %v1384_v57  ;;  %v1421_v9 = vadd.f32 %v1419_v15, %v1386_v50  ;;  %v3388_v15 = vld [vmem:[#allocation4_spill] sm:$0xff] }
 0x40c   :  { %v1495_v55 = vadd.f32 %v1493_v6, %v1462_v45  ;;  %v1496_v31 = vadd.f32 %v1494_v3, %v1463_v61  ;;  %v1422_v13 = vadd.f32 %v1420_v40, %v1387_v43  ;;  %v1560_v63 = vmul.f32 %v1558_v12, %v1289_v30 }
 0x40d   :  { %v1452_v23 = vmul.f32 %v1451_v33, %v3109_v60  ;;  %v1453_v2 = vmul.f32 %v1451_v33, %v3115_v41  ;;  %v1485_v29 = vmul.f32 %v1484_v0, %v3136_v24  ;;  %v1486_v53 = vmul.f32 %v1484_v0, %v3142_v14  ;;  %v3389_v0 = vld [vmem:[#allocation6_spill] sm:$0xff] }
 0x40e   :  { %v1528_v38 = vadd.f32 %v1526_v8, %v1495_v55  ;;  %v1529_v52 = vadd.f32 %v1527_v39, %v1496_v31  ;;  %v1518_v19 = vmul.f32 %v1517_v58, %v3155_v28  ;;  %v1519_v57 = vmul.f32 %v1517_v58, %v3161_v51  ;;  %v3391_v31 = vld [vmem:[#allocation18_spill] sm:$0xff] }
 0x40f   :  { %v1454_v7 = vadd.f32 %v1452_v23, %v1421_v9  ;;  %v1455_v22 = vadd.f32 %v1453_v2, %v1422_v13  ;;  %v1551_v6 = vmul.f32 %v1550_v20, %v1278_v35  ;;  %v1377_v60 = vrot.slane %v3174_v17, %v3167_v4  ;;  %v3394_v23 = vld [vmem:[#allocation21_spill] sm:$0xff] }
 0x410   :  { %v1561_v50 = vadd.f32 %v1559_v10, %v1528_v38  ;;  %v1562_v45 = vadd.f32 %v1560_v63, %v1529_v52  ;;  %v1410_v41 = vrot.slane %v3177_v46, %v3167_v4  ;;  %v1443_v39 = vrot.slane %v3180_v56, %v3167_v4  ;;  %v3393_v63 = vld [vmem:[#allocation20_spill] sm:$0xff] }
 0x411   :  { %v1487_v24 = vadd.f32 %v1485_v29, %v1454_v7  ;;  %v1488_v8 = vadd.f32 %v1486_v53, %v1455_v22  ;;  %v1476_v14 = vrot.slane %v3185_v36, %v3167_v4  ;;  %v1378_v28 = vmul.f32 %v1377_v60, %v3035_v44  ;;  %v3395_v38 = vld [vmem:[#allocation8_spill] sm:$0xff] }
 0x412   :  { %v1574_v3 = vpack.c.bf16 %v1562_v45, %v1561_v50  ;;  %v1379_v51 = vmul.f32 %v1377_v60, %v3043_v5  ;;  %v1411_v43 = vmul.f32 %v1410_v41, %v3064_v21  ;;  %v1552_v37 = vmul.f32 %v1550_v20, %v1281_v11  ;;  %v3390_v20 = vld [vmem:[#allocation7_spill] sm:$0xff]  ;;  %v3396_v45 = vld [vmem:[#allocation22_spill] sm:$0xff] }
 0x413   :  { %v1520_v35 = vadd.f32 %v1518_v19, %v1487_v24  ;;  %v1521_v30 = vadd.f32 %v1519_v57, %v1488_v8  ;;  %v1412_v48 = vmul.f32 %v1410_v41, %v3072_v34  ;;  %v1444_v59 = vmul.f32 %v1443_v39, %v3091_v54  ;;  %v3385_v34 = vld [vmem:[#allocation9_spill] sm:$0xff]  ;;  %v3397_v41 = vld [vmem:[#allocation23_spill] sm:$0xff] }
 0x414   :  { %2256 = vmatprep.subr.bf16.mxu0 %v1574_v3  ;;  %v1413_v49 = vadd.f32 %v1411_v43, %v1378_v28  ;;  %v1445_v12 = vmul.f32 %v1443_v39, %v3099_v42  ;;  %v1477_v62 = vmul.f32 %v1476_v14, %v3384_v32  ;;  %v1509_v5 = vrot.slane %v3188_v26, %v3167_v4  ;;  %v3386_v42 = vld [vmem:[#allocation13_spill] sm:$0xff]  ;;  %v3398_v39 = vld [vmem:[#allocation15_spill] sm:$0xff]  ;;  %v3400_v28 = vld [vmem:[#allocation16_spill] sm:$0xff] }
 0x415   :  { %2257 = vmatpush3.bf16.msra.mxu0 %v1574_v3  ;;  %v1553_v25 = vadd.f32 %v1551_v6, %v1520_v35  ;;  %v1554_v44 = vadd.f32 %v1552_v37, %v1521_v30  ;;  %v1414_v1 = vadd.f32 %v1412_v48, %v1379_v51  ;;  %v1542_v11 = vrot.slane %v3171_v18, %v3167_v4  ;;  %v3402_v37 = vld [vmem:[#allocation3_spill] sm:$0xff] }
 0x416   :  { %v1446_v21 = vadd.f32 %v1444_v59, %v1413_v49  ;;  %v1369_v27 = vrot.slane %v3174_v17, %v3385_v34  ;;  %v1402_v54 = vrot.slane %v3177_v46, %v3385_v34  ;;  %v1273_v16 = vadd.f32 %v3387_v47, %v3386_v42  ;;  %v3392_v17 = vld [vmem:[#allocation19_spill] sm:$0xff]  ;;  %v3403_v49 = vld [vmem:[#allocation5_spill] sm:$0xff] }
 0x417   :  { %v1573_v10 = vpack.c.bf16 %v1554_v44, %v1553_v25  ;;  %v1447_v61 = vadd.f32 %v1445_v12, %v1414_v1  ;;  %v1478_v40 = vmul.f32 %v1476_v14, %v3388_v15  ;;  %v1510_v58 = vmul.f32 %v1509_v5, %v3389_v0  ;;  %v3399_v14 = vld [vmem:[#allocation10_spill] sm:$0xff]  ;;  %v3404_v12 = vld [vmem:[#allocation12_spill] sm:$0xff]  ;;  %v1586_v15 = vpop.permute.xlu0 %1585 }
 0x418   :  { %v1479_v33 = vadd.f32 %v1477_v62, %v1446_v21  ;;  %v1511_v55 = vmul.f32 %v1509_v5, %v3390_v20  ;;  %v1370_v4 = vmul.f32 %v1369_v27, %v3391_v31  ;;  %v1371_v13 = vmul.f32 %v1369_v27, %v3392_v17  ;;  %v1722_v20 = vld [vmem:[%s3335_s8 + $0x10] sm:$0xff] }
 0x419   :  { %2258 = vmatprep.subr.bf16.mxu0 %v1573_v10  ;;  %v1480_v9 = vadd.f32 %v1478_v40, %v1447_v61  ;;  %v1403_v46 = vmul.f32 %v1402_v54, %v3393_v63  ;;  %v1404_v2 = vmul.f32 %v1402_v54, %v3394_v23  ;;  %v1543_v52 = vmul.f32 %v1542_v11, %v3395_v38  ;;  %v2288_v61 = vld [vmem:[%s3334_s6 + $0x18] sm:$0xff]   ;;  %v1591_v40 = vpop.permute.xlu1 %1590 }
 0x41a   :  { %2259 = vmatpush3.bf16.msra.mxu0 %v1573_v10  ;;  %v1512_v29 = vadd.f32 %v1510_v58, %v1479_v33  ;;  %v1435_v53 = vrot.slane %v3180_v56, %v3385_v34  ;;  %v1468_v19 = vrot.slane %v3185_v36, %v3385_v34  ;;  %v1544_v22 = vmul.f32 %v1542_v11, %v1273_v16  ;;  %v3401_v56 = vld [vmem:[#allocation11_spill] sm:$0xff]  ;;  %v2287_v10 = vld [vmem:[%s3334_s6 + $0x10] sm:$0xff]  }
 0x41b   :  { %v1513_v7 = vadd.f32 %v1511_v55, %v1480_v9  ;;  %v1405_v57 = vadd.f32 %v1403_v46, %v1370_v4  ;;  %v1406_v6 = vadd.f32 %v1404_v2, %v1371_v13  ;;  %v1501_v8 = vrot.slane %v3188_v26, %v3385_v34  ;;  %v3405_v26 = vld [vmem:[#allocation17_spill] sm:$0xff]  ;;  %v2286_v16 = vld [vmem:[%s3334_s6 + $0x8] sm:$0xff]   ;;  %v1596_v33 = vpop.permute.xlu0 %1595  ;;  %v1720_v9 = vld [vmem:[%s3335_s8] sm:$0xff] }
 0x41c   :  { %v1545_v50 = vadd.f32 %v1543_v52, %v1512_v29  ;;  %v1436_v60 = vmul.f32 %v1435_v53, %v3396_v45  ;;  %v1437_v24 = vmul.f32 %v1435_v53, %v3397_v41  ;;  %v1075_v3 = vadd.f32 %v3399_v14, %v3398_v39  ;;  %v1723_v46 = vld [vmem:[%s3335_s8 + $0x18] sm:$0xff]  ;;  %v1721_v52 = vld [vmem:[%s3335_s8 + $0x8] sm:$0xff] }
 0x41d   :  { %v1078_v51 = vadd.f32 %v3401_v56, %v3400_v28  ;;  %v1546_v43 = vadd.f32 %v1544_v22, %v1513_v7  ;;  %v1534_v36 = vrot.slane %v3171_v18, %v3385_v34  ;;  %v1469_v48 = vmul.f32 %v1468_v19, %v3402_v37  ;;  %v1601_v0 = vpop.permute.xlu1 %1600  ;;  %v1727_v14 = vld [vmem:[%s3335_s8 + $0x38] sm:$0xff] }
 0x41e   :  { %v1438_v35 = vadd.f32 %v1436_v60, %v1405_v57  ;;  %v1439_v30 = vadd.f32 %v1437_v24, %v1406_v6  ;;  %v1470_v59 = vmul.f32 %v1468_v19, %v3403_v49  ;;  %v1262_v32 = vadd.f32 %v3404_v12, %v3398_v39  ;;  %v1726_v57 = vld [vmem:[%s3335_s8 + $0x30] sm:$0xff]  ;;  %v1724_v60 = vld [vmem:[%s3335_s8 + $0x20] sm:$0xff] }
 0x41f   :  { %v1265_v62 = vadd.f32 %v3405_v26, %v3400_v28  ;;  %v1572_v25 = vpack.c.bf16 %v1546_v43, %v1545_v50  ;;  %v1502_v5 = vmul.f32 %v1501_v8, %v1075_v3  ;;  %v1503_v21 = vmul.f32 %v1501_v8, %v1078_v51  ;;  %v1606_v31 = vpop.permute.xlu0 %1605  ;;  %v1725_v51 = vld [vmem:[%s3335_s8 + $0x28] sm:$0xff] }
 0x420   :  { %v1471_v44 = vadd.f32 %v1469_v48, %v1438_v35  ;;  %v1472_v1 = vadd.f32 %v1470_v59, %v1439_v30  ;;  %v1535_v34 = vmul.f32 %v1534_v36, %v1262_v32 }
 0x421   :  { %2260 = vmatprep.subr.bf16.mxu0 %v1572_v25  ;;  %v1536_v27 = vmul.f32 %v1534_v36, %v1265_v62  ;;  %v1611_v29 = vpop.permute.xlu1 %1610 }
 0x422   :  { %2261 = vmatpush3.bf16.msra.mxu0 %v1572_v25  ;;  %v1504_v18 = vadd.f32 %v1502_v5, %v1471_v44  ;;  %v1505_v11 = vadd.f32 %v1503_v21, %v1472_v1 }
 0x423   :  { %v1616_v7 = vpop.permute.xlu0 %1615 }
 0x424   :  { %v1537_v54 = vadd.f32 %v1535_v34, %v1504_v18  ;;  %v1538_v42 = vadd.f32 %v1536_v27, %v1505_v11 }
 0x425   :  { %v1621_v8 = vpop.permute.xlu1 %1620 }
 0x426   :  { %v1571_v47 = vpack.c.bf16 %v1538_v42, %v1537_v54 }
 0x428   :  { %2262 = vmatprep.subr.bf16.mxu0 %v1571_v47 }
 0x429   :  { %2263 = vmatpush3.bf16.msra.mxu0 %v1571_v47 }
 0x42c   :  { %2265 = vmatmul.mubr.msk.bf16.vlgmr.msra.gmra.mxu0 %vm138_vm0, %v2286_v16 }
 0x42d   :  { %2268 = vmatprep.mubr.msk.bf16.mxu0 %vm138_vm0, %v2287_v10 }
 0x434   :  { %2269 = vmatmul.mubr.msk.bf16.gmra.mxu0 %vm138_vm0, %v2288_v61 }
 0x4ec   :  { %v2266_v58 = vpop.f32.mrf.mxu0 }
 0x4ed   :  { %v1698_v55 = vadd.f32 %v2266_v58, %v1596_v33 }
 0x4ee   :  { %v1689_v4 = vpop.f32.mrf.mxu0 }
 0x4ef   :  { %v1730_v17 = vadd.f32 %v1722_v20, %v1698_v55  ;;  %v1690_v13 = vadd.f32 %v1689_v4, %v1586_v15 }
 0x4f0   :  { %v2267_v63 = vpop.f32.mrf.mxu0 }
 0x4f1   :  { %1738 = vst [vmem:[%s3336_s9 + $0x10] sm:$0xff] %v1730_v17  ;;  %v1728_v23 = vadd.f32 %v1720_v9, %v1690_v13  ;;  %v1701_v2 = vadd.f32 %v2267_v63, %v1601_v0 }
 0x4f2   :  { %v1692_v38 = vpop.f32.mrf.mxu0 }
 0x4f3   :  { %1736 = vst [vmem:[%s3336_s9] sm:$0xff] %v1728_v23  ;;  %v1731_v53 = vadd.f32 %v1723_v46, %v1701_v2  ;;  %v1693_v19 = vadd.f32 %v1692_v38, %v1591_v40 }
 0x4f4   :  { %v2270_v22 = vpop.f32.mrf.mxu0 }
 0x4f5   :  { %1739 = vst [vmem:[%s3336_s9 + $0x18] sm:$0xff] %v1731_v53  ;;  %v1729_v6 = vadd.f32 %v1721_v52, %v1693_v19  ;;  %v1714_v50 = vadd.f32 %v2270_v22, %v1616_v7 }
 0x4f6   :  { %v1705_v45 = vpop.f32.mrf.mxu0 }
 0x4f7   :  { %1737 = vst [vmem:[%s3336_s9 + $0x8] sm:$0xff] %v1729_v6  ;;  %v1734_v41 = vadd.f32 %v1726_v57, %v1714_v50  ;;  %v1706_v24 = vadd.f32 %v1705_v45, %v1606_v31 }
 0x4f8   :  { %v2271_v39 = vpop.f32.mrf.mxu0 }
 0x4f9   :  { %1742 = vst [vmem:[%s3336_s9 + $0x30] sm:$0xff] %v1734_v41  ;;  %v1732_v3 = vadd.f32 %v1724_v60, %v1706_v24  ;;  %v1717_v28 = vadd.f32 %v2271_v39, %v1621_v8 }
 0x4fa   :  { %v1708_v56 = vpop.f32.mrf.mxu0 }
 0x4fb   :  { %1740 = vst [vmem:[%s3336_s9 + $0x20] sm:$0xff] %v1732_v3  ;;  %v1735_v43 = vadd.f32 %v1727_v14, %v1717_v28  ;;  %v1709_v36 = vadd.f32 %v1708_v56, %v1611_v29 }
 0x4fd   :  { %1743 = vst [vmem:[%s3336_s9 + $0x38] sm:$0xff] %v1735_v43  ;;  %v1733_v35 = vadd.f32 %v1725_v51, %v1709_v36 }
 0x4ff   :  { %1741 = vst [vmem:[%s3336_s9 + $0x28] sm:$0xff] %v1733_v35 }

// kernel: climax_forward.14
= control target key start
LH: loop header
LB: loop body
LE: loop exit
PB: predicated region body
PF: predicated region fallthrough
CT: control target
= control target key end

     0   :  { %s1602_s30 = smov 0   ;;  %s2038_s0 = inlined_call_operand.vmem [shape: f32[128,64], index: 0, kind: input, shape index: {}]   ;;  %s2039_s1 = inlined_call_operand.vmem [shape: f32[1,64], index: 1, kind: input, shape index: {}]   ;;  %s2040_s2 = inlined_call_operand.vmem [shape: f32[1,64], index: 2, kind: input, shape index: {}, may-alias: {2,4,6}]   ;;  %s2041_s3 = inlined_call_operand.vmem [shape: bf16[64,64], index: 3, kind: input, shape index: {}]   ;;  %s2042_s4 = inlined_call_operand.vmem [shape: f32[1,64], index: 4, kind: input, shape index: {}, may-alias: {2,4,6}]   ;;  %s2043_s5 = inlined_call_operand.vmem [shape: bf16[64,64], index: 5, kind: input, shape index: {}]   ;;  %s2044_s6 = inlined_call_operand.vmem [shape: f32[1,64], index: 6, kind: input, shape index: {}, may-alias: {2,4,6}]   ;;  %s2045_s7 = inlined_call_operand.vmem [shape: bf16[64,24], index: 7, kind: input, shape index: {}]   ;;  %s2046_s8 = inlined_call_operand.vmem [shape: f32[1,24], index: 8, kind: input, shape index: {}]   ;;  %s2047_s9 = inlined_call_operand.vmem [shape: f32[128,24], index: 9, kind: output, shape index: {}]  }
   0x1 LB: > { %s1322_s10 = sadd.s32 4294967295, %s1549_s30   ;;  %p1326_p0 = scmp.ge.s32.totalorder %s1549_s30, 1  ;;  %s1549_s30 = sphi %s1602_s30, %s19_s30  }
   0x2   : > { %p288_p1 = scmp.lt.s32.totalorder %s1549_s30, 3 }
   0x4   : > { %p289_p2 = pnand %p1326_p0, %p288_p1 }
   0x5   : > { %s1327_s11 = sshll.u32 (!%p289_p2), %s1322_s10, 3 }
   0x6   : > { %292 = sbr.rel (%p289_p2) target bundleno = 1060 (0x424), region = 56  ;;  %p325_p3 = scmp.lt.s32.totalorder (!%p289_p2), %s1327_s11, 15 }
   0xb   : > { %s2049_s11 = smov (!%p325_p3, %s1327_s11), 15  ;;  %vm347_vm0 = vcmask 523264   ;;  %v1451_v56 = vld [vmem:[%s2041_s3 + $0x18] sm:$0xff]   ;;  %v1452_v57 = vld [vmem:[%s2041_s3 + $0x10] sm:$0xff]   ;;  %v1453_v58 = vld [vmem:[%s2041_s3 + $0x8] sm:$0xff]  }
   0xc   : > { %s1328_s12 = sshll.u32 %s2049_s11, 3  ;;  %1386 = vmatprep.subr.bf16.mxu0 %v1451_v56  ;;  %v1454_v59 = vld [vmem:[%s2041_s3] sm:$0xff]  }
   0xd   : > { %s328_s15 = scalar_lea.vmem %s2038_s0, %s1328_s12  ;;  %1387 = vmatpush3.bf16.msra.mxu0 %v1451_v56  ;;  %s334_s16 = scalar_lea.vmem %s2047_s9, %s1328_s12 }
   0xe   : > { %v337_v0 = vld [vmem:[%s328_s15] sm:$0xff]  ;;  %v339_v1 = vld [vmem:[%s328_s15 + $0x10] sm:$0xff]  ;;  %v338_v2 = vld [vmem:[%s328_s15 + $0x8] sm:$0xff]  ;;  %1388 = vmatprep.subr.bf16.mxu0 %v1452_v57 }
   0xf   : > { %v348_v3 = vsel %vm347_vm0, %v337_v0, 0.0  ;;  %v354_v4 = vsel %vm347_vm0, %v339_v1, 0.0  ;;  %v340_v5 = vld [vmem:[%s328_s15 + $0x18] sm:$0xff]  ;;  %v351_v6 = vsel %vm347_vm0, %v338_v2, 0.0  ;;  %v341_v7 = vld [vmem:[%s328_s15 + $0x20] sm:$0xff]  ;;  %v342_v9 = vld [vmem:[%s328_s15 + $0x28] sm:$0xff] }
  0x10   : > { %349 = vadd.xlane.f32.xlu0 %v348_v3  ;;  %355 = vadd.xlane.f32.xlu1 %v354_v4  ;;  %v357_v8 = vsel %vm347_vm0, %v340_v5, 0.0  ;;  %v360_v10 = vsel %vm347_vm0, %v341_v7, 0.0  ;;  %v363_v11 = vsel %vm347_vm0, %v342_v9, 0.0  ;;  %v343_v12 = vld [vmem:[%s328_s15 + $0x30] sm:$0xff]  ;;  %v344_v13 = vld [vmem:[%s328_s15 + $0x38] sm:$0xff] }
  0x11   : > { %v366_v14 = vsel %vm347_vm0, %v343_v12, 0.0  ;;  %v369_v15 = vsel %vm347_vm0, %v344_v13, 0.0  ;;  %1389 = vmatpush3.bf16.msra.mxu0 %v1452_v57 }
  0x12   : > { %1390 = vmatprep.subr.bf16.mxu0 %v1453_v58 }
  0x14   : > { %352 = vadd.xlane.f32.xlu0 %v351_v6  ;;  %358 = vadd.xlane.f32.xlu1 %v357_v8 }
  0x15   : > { %1391 = vmatpush3.bf16.msra.mxu0 %v1453_v58 }
  0x16   : > { %1392 = vmatprep.subr.bf16.mxu0 %v1454_v59 }
  0x18   : > { %361 = vadd.xlane.f32.xlu0 %v360_v10  ;;  %364 = vadd.xlane.f32.xlu1 %v363_v11 }
  0x19   : > { %1393 = vmatpush3.bf16.msra.mxu0 %v1454_v59 }
  0x1c   : > { %367 = vadd.xlane.f32.xlu0 %v366_v14  ;;  %370 = vadd.xlane.f32.xlu1 %v369_v15 }
  0x99   : > { %v350_v16 = vpop.xlane.xlu0 %349  ;;  %v356_v17 = vpop.xlane.xlu1 %355 }
  0x9a   : > { %v373_v18 = vmul.f32 0.015625, %v350_v16  ;;  %v375_v19 = vmul.f32 0.015625, %v356_v17 }
  0x9c   : > { %v1626_v20 = vsub.f32 %v337_v0, %v373_v18  ;;  %v1628_v21 = vsub.f32 %v339_v1, %v375_v19 }
  0x9d   : > { %v353_v22 = vpop.xlane.xlu0 %352  ;;  %v359_v23 = vpop.xlane.xlu1 %358 }
  0x9e   : > { %v374_v24 = vmul.f32 0.015625, %v353_v22  ;;  %v376_v25 = vmul.f32 0.015625, %v359_v23  ;;  %v389_v26 = vmul.f32 %v1626_v20, %v1626_v20  ;;  %v391_v27 = vmul.f32 %v1628_v21, %v1628_v21 }
  0xa0   : > { %v1634_v28 = vsub.f32 %v338_v2, %v374_v24  ;;  %v1636_v29 = vsub.f32 %v340_v5, %v376_v25  ;;  %v397_v30 = vsel %vm347_vm0, %v389_v26, 0.0  ;;  %v403_v33 = vsel %vm347_vm0, %v391_v27, 0.0  ;;  %v1331_v24 = vld [vmem:[%s2039_s1] ss:$0 sm:$0xff] }
  0xa1   : > { %398 = vadd.xlane.f32.xlu0 %v397_v30  ;;  %v362_v31 = vpop.xlane.xlu0 %361  ;;  %v365_v32 = vpop.xlane.xlu1 %364 }
  0xa2   : > { %v377_v34 = vmul.f32 0.015625, %v362_v31  ;;  %v378_v35 = vmul.f32 0.015625, %v365_v32  ;;  %v390_v36 = vmul.f32 %v1634_v28, %v1634_v28  ;;  %v392_v37 = vmul.f32 %v1636_v29, %v1636_v29  ;;  %v1332_v31 = vld [vmem:[%s2040_s2] ss:$0 sm:$0xff] }
  0xa4   : > { %v1644_v38 = vsub.f32 %v341_v7, %v377_v34  ;;  %v1646_v39 = vsub.f32 %v342_v9, %v378_v35  ;;  %v400_v40 = vsel %vm347_vm0, %v390_v36, 0.0  ;;  %v406_v43 = vsel %vm347_vm0, %v392_v37, 0.0 }
  0xa5   : > { %404 = vadd.xlane.f32.xlu0 %v403_v33  ;;  %401 = vadd.xlane.f32.xlu1 %v400_v40  ;;  %v368_v41 = vpop.xlane.xlu0 %367  ;;  %v371_v42 = vpop.xlane.xlu1 %370 }
  0xa6   : > { %v379_v44 = vmul.f32 0.015625, %v368_v41  ;;  %v380_v45 = vmul.f32 0.015625, %v371_v42  ;;  %v393_v46 = vmul.f32 %v1644_v38, %v1644_v38  ;;  %v394_v47 = vmul.f32 %v1646_v39, %v1646_v39 }
  0xa8   : > { %v1654_v48 = vsub.f32 %v343_v12, %v379_v44  ;;  %v1656_v49 = vsub.f32 %v344_v13, %v380_v45  ;;  %v409_v50 = vsel %vm347_vm0, %v393_v46, 0.0  ;;  %v412_v51 = vsel %vm347_vm0, %v394_v47, 0.0 }
  0xa9   : > { %407 = vadd.xlane.f32.xlu1 %v406_v43  ;;  %410 = vadd.xlane.f32.xlu0 %v409_v50 }
  0xaa   : > { %v395_v52 = vmul.f32 %v1654_v48, %v1654_v48  ;;  %v396_v53 = vmul.f32 %v1656_v49, %v1656_v49 }
  0xac   : > { %v415_v54 = vsel %vm347_vm0, %v395_v52, 0.0  ;;  %v418_v55 = vsel %vm347_vm0, %v396_v53, 0.0 }
  0xad   : > { %413 = vadd.xlane.f32.xlu1 %v412_v51  ;;  %416 = vadd.xlane.f32.xlu0 %v415_v54 }
  0xb1   : > { %419 = vadd.xlane.f32.xlu1 %v418_v55 }
 0x12a   : > { %v399_v60 = vpop.xlane.xlu0 %398 }
 0x12b   : > { %v421_v61 = vmul.f32 0.015625, %v399_v60  ;;  %v1457_v60 = vld [vmem:[%s2043_s5 + $0x8] sm:$0xff]  }
 0x12d   : > { %v429_v62 = vadd.f32 1e-05, %v421_v61  ;;  %v1458_v61 = vld [vmem:[%s2043_s5] sm:$0xff]  }
 0x12e   : > { %v402_v63 = vpop.xlane.xlu1 %401  ;;  %v405_v0 = vpop.xlane.xlu0 %404 }
 0x12f   : > { %1463 = vrsqrt.f32 %v429_v62  ;;  %v422_v1 = vmul.f32 0.015625, %v402_v63  ;;  %v423_v2 = vmul.f32 0.015625, %v405_v0  ;;  %v1333_v62 = vld [vmem:[%s2042_s4] ss:$0 sm:$0xff] }
 0x131   : > { %v430_v3 = vadd.f32 1e-05, %v422_v1  ;;  %v431_v4 = vadd.f32 1e-05, %v423_v2 }
 0x132   : > { %v408_v5 = vpop.xlane.xlu1 %407  ;;  %v411_v6 = vpop.xlane.xlu0 %410 }
 0x133   : > { %1465 = vrsqrt.f32 %v430_v3  ;;  %v424_v7 = vmul.f32 0.015625, %v408_v5  ;;  %v425_v8 = vmul.f32 0.015625, %v411_v6 }
 0x134   : > { %1467 = vrsqrt.f32 %v431_v4 }
 0x135   : > { %v432_v9 = vadd.f32 1e-05, %v424_v7  ;;  %v433_v10 = vadd.f32 1e-05, %v425_v8 }
 0x136   : > { %v414_v11 = vpop.xlane.xlu1 %413  ;;  %v417_v12 = vpop.xlane.xlu0 %416 }
 0x137   : > { %1469 = vrsqrt.f32 %v432_v9  ;;  %v426_v13 = vmul.f32 0.015625, %v414_v11  ;;  %v427_v14 = vmul.f32 0.015625, %v417_v12 }
 0x138   : > { %1471 = vrsqrt.f32 %v433_v10 }
 0x139   : > { %v434_v15 = vadd.f32 1e-05, %v426_v13  ;;  %v435_v16 = vadd.f32 1e-05, %v427_v14 }
 0x13a   : > { %v420_v17 = vpop.xlane.xlu1 %419 }
 0x13b   : > { %1473 = vrsqrt.f32 %v434_v15  ;;  %v428_v18 = vmul.f32 0.015625, %v420_v17 }
 0x13c   : > { %v1464_v19 = vpop.eup %1463  ;;  %1475 = vrsqrt.f32 %v435_v16 }
 0x13d   : > { %v436_v22 = vadd.f32 1e-05, %v428_v18  ;;  %v445_v23 = vmul.f32 %v1464_v19, %v1626_v20 }
 0x13f   : > { %1477 = vrsqrt.f32 %v436_v22  ;;  %v459_v30 = vmul.f32 %v1331_v24, %v445_v23 }
 0x140   : > { %v1466_v25 = vpop.eup %1465 }
 0x141   : > { %v1468_v26 = vpop.eup %1467  ;;  %v446_v27 = vmul.f32 %v1466_v25, %v1634_v28  ;;  %v473_v20 = vadd.f32 %v1332_v31, %v459_v30 }
 0x142   : > { %v447_v32 = vmul.f32 %v1468_v26, %v1628_v21 }
 0x143   : > { %v460_v33 = vmul.f32 %v1331_v24, %v446_v27 }
 0x144   : > { %v1470_v34 = vpop.eup %1469  ;;  %v461_v40 = vmul.f32 %v1331_v24, %v447_v32 }
 0x145   : > { %v1472_v35 = vpop.eup %1471  ;;  %v474_v36 = vadd.f32 %v1332_v31, %v460_v33  ;;  %v448_v37 = vmul.f32 %v1470_v34, %v1636_v29 }
 0x146   : > { %v449_v41 = vmul.f32 %v1472_v35, %v1644_v38  ;;  %v475_v45 = vadd.f32 %v1332_v31, %v461_v40 }
 0x147   : > { %v489_v42 = vpack.c.bf16 %v474_v36, %v473_v20  ;;  %v462_v43 = vmul.f32 %v1331_v24, %v448_v37 }
 0x148   : > { %v1474_v28 = vpop.eup %1473  ;;  %v463_v47 = vmul.f32 %v1331_v24, %v449_v41 }
 0x149   : > { %v1476_v44 = vpop.eup %1475  ;;  %1394 = vmatprep.mubr.msk.bf16.mxu0 %vm347_vm0, %v489_v42  ;;  %v476_v46 = vadd.f32 %v1332_v31, %v462_v43  ;;  %v450_v21 = vmul.f32 %v1474_v28, %v1646_v39 }
 0x14a   : > { %v451_v50 = vmul.f32 %v1476_v44, %v1654_v48  ;;  %v477_v29 = vadd.f32 %v1332_v31, %v463_v47  ;;  %v1455_v48 = vld [vmem:[%s2043_s5 + $0x18] sm:$0xff]  }
 0x14b   : > { %v490_v51 = vpack.c.bf16 %v476_v46, %v475_v45  ;;  %v464_v52 = vmul.f32 %v1331_v24, %v450_v21  ;;  %1402 = vmatprep.subr.bf16.mxu1 %v1455_v48 }
 0x14c   : > { %v1478_v53 = vpop.eup %1477  ;;  %v465_v55 = vmul.f32 %v1331_v24, %v451_v50  ;;  %1403 = vmatpush3.bf16.msra.mxu1 %v1455_v48 }
 0x14d   : > { %1395 = vmatmul.mubr.msk.bf16.vlgmr.msra.gmra.mxu0 %vm347_vm0, %v490_v51  ;;  %v478_v38 = vadd.f32 %v1332_v31, %v464_v52  ;;  %v452_v54 = vmul.f32 %v1478_v53, %v1656_v49  ;;  %v1456_v49 = vld [vmem:[%s2043_s5 + $0x10] sm:$0xff]  }
 0x14e   : > { %v479_v58 = vadd.f32 %v1332_v31, %v465_v55  ;;  %1404 = vmatprep.subr.bf16.mxu1 %v1456_v49 }
 0x14f   : > { %v491_v56 = vpack.c.bf16 %v478_v38, %v477_v29  ;;  %v466_v57 = vmul.f32 %v1331_v24, %v452_v54 }
 0x150   : > { %1405 = vmatpush3.bf16.msra.mxu1 %v1456_v49 }
 0x151   : > { %1398 = vmatprep.mubr.msk.bf16.mxu0 %vm347_vm0, %v491_v56  ;;  %v480_v59 = vadd.f32 %v1332_v31, %v466_v57  ;;  %1406 = vmatprep.subr.bf16.mxu1 %v1457_v60 }
 0x153   : > { %v492_v39 = vpack.c.bf16 %v480_v59, %v479_v58 }
 0x154   : > { %1407 = vmatpush3.bf16.msra.mxu1 %v1457_v60 }
 0x155   : > { %1399 = vmatmul.mubr.msk.bf16.gmra.mxu0 %vm347_vm0, %v492_v39  ;;  %1408 = vmatprep.subr.bf16.mxu1 %v1458_v61 }
 0x158   : > { %1409 = vmatpush3.bf16.msra.mxu1 %v1458_v61 }
 0x20d   : > { %v1396_v63 = vpop.f32.mrf.mxu0 }
 0x20e   : > { %v1711_v0 = vadd.f32 %v1396_v63, %v1333_v62 }
 0x20f   : > { %v570_v1 = vpop.f32.mrf.mxu0 }
 0x210   : > { %v1714_v2 = vmul.f32 0.70710677, %v1711_v0  ;;  %v1716_v3 = vadd.f32 %v1333_v62, %v570_v1 }
 0x211   : > { %v1397_v4 = vpop.f32.mrf.mxu0 }
 0x212   : > { %v635_v5 = vand.u32 2147483647, %v1714_v2  ;;  %v1720_v6 = vmul.f32 0.70710677, %v1716_v3  ;;  %v1722_v7 = vadd.f32 %v1397_v4, %v1333_v62  ;;  %vm619_vm1 = vcmp.lt.f32.partialorder %v1714_v2, 0.0 }
 0x213   : > { %v573_v8 = vpop.f32.mrf.mxu0 }
 0x214   : > { %v643_v9 = vmul.f32 0.3275911, %v635_v5  ;;  %v633_v10 = vand.u32 2147483647, %v1720_v6  ;;  %v1726_v11 = vmul.f32 0.70710677, %v1722_v7  ;;  %v1728_v12 = vadd.f32 %v1333_v62, %v573_v8 }
 0x215   : > { %v1400_v13 = vpop.f32.mrf.mxu0  ;;  %v739_v31 = vsub.f32 0.0, %v635_v5  ;;  %vm617_vm2 = vcmp.lt.f32.partialorder %v1720_v6, 0.0 }
 0x216   : > { %v651_v14 = vadd.f32 1.0, %v643_v9  ;;  %v641_v15 = vmul.f32 0.3275911, %v633_v10  ;;  %v636_v16 = vand.u32 2147483647, %v1726_v11  ;;  %v1735_v25 = vadd.f32 %v1400_v13, %v1333_v62 }
 0x217   : > { %v1732_v17 = vmul.f32 0.70710677, %v1728_v12  ;;  %v586_v18 = vpop.f32.mrf.mxu0  ;;  %v737_v37 = vsub.f32 0.0, %v633_v10  ;;  %v747_v40 = vmul.f32 %v739_v31, %v635_v5  ;;  %vm620_vm3 = vcmp.lt.f32.partialorder %v1726_v11, 0.0 }
 0x218   : > { %1479 = vrcp.f32 %v651_v14  ;;  %v649_v19 = vadd.f32 1.0, %v641_v15  ;;  %v644_v22 = vmul.f32 0.3275911, %v636_v16  ;;  %v1737_v30 = vadd.f32 %v1333_v62, %v586_v18 }
 0x219   : > { %v634_v23 = vand.u32 2147483647, %v1732_v17  ;;  %v1401_v26 = vpop.f32.mrf.mxu0  ;;  %v1740_v32 = vmul.f32 0.70710677, %v1735_v25  ;;  %v740_v41 = vsub.f32 0.0, %v636_v16  ;;  %v745_v21 = vmul.f32 %v737_v37, %v633_v10 }
 0x21a   : > { %1481 = vrcp.f32 %v649_v19  ;;  %v652_v24 = vadd.f32 1.0, %v644_v22  ;;  %v1743_v34 = vmul.f32 0.70710677, %v1737_v30  ;;  %v1746_v20 = vadd.f32 %v1401_v26, %v1333_v62 }
 0x21b   : > { %v642_v27 = vmul.f32 0.3275911, %v634_v23  ;;  %v639_v35 = vand.u32 2147483647, %v1740_v32  ;;  %v589_v36 = vpop.f32.mrf.mxu0  ;;  %v757_v52 = vmul.f32 1.442695, %v747_v40  ;;  %v748_v53 = vmul.f32 %v740_v41, %v636_v16 }
 0x21c   : > { %1483 = vrcp.f32 %v652_v24  ;;  %v637_v43 = vand.u32 2147483647, %v1743_v34  ;;  %v1750_v28 = vmul.f32 0.70710677, %v1746_v20  ;;  %v1752_v44 = vadd.f32 %v1333_v62, %v589_v36 }
 0x21d   : > { %v650_v33 = vadd.f32 1.0, %v642_v27  ;;  %v647_v42 = vmul.f32 0.3275911, %v639_v35  ;;  %v738_v54 = vsub.f32 0.0, %v634_v23  ;;  %v743_v56 = vsub.f32 0.0, %v639_v35 }
 0x21e   : > { %v645_v46 = vmul.f32 0.3275911, %v637_v43  ;;  %v640_v47 = vand.u32 2147483647, %v1750_v28  ;;  %v1756_v50 = vmul.f32 0.70710677, %v1752_v44 }
 0x21f   : > { %1485 = vrcp.f32 %v650_v33  ;;  %v655_v45 = vadd.f32 1.0, %v647_v42  ;;  %v753_v39 = vmul.f32 1.442695, %v745_v21  ;;  %v759_v49 = vmul.f32 1.442695, %v748_v53 }
 0x220   : > { %v653_v29 = vadd.f32 1.0, %v645_v46  ;;  %v648_v55 = vmul.f32 0.3275911, %v640_v47  ;;  %v638_v57 = vand.u32 2147483647, %v1756_v50  ;;  %v746_v63 = vmul.f32 %v738_v54, %v634_v23 }
 0x221   : > { %1487 = vrcp.f32 %v655_v45  ;;  %v751_v5 = vmul.f32 %v743_v56, %v639_v35  ;;  %v741_v8 = vsub.f32 0.0, %v637_v43  ;;  %v1551_v10 = vmov 1.0  }
 0x222   : > { %1489 = vrcp.f32 %v653_v29  ;;  %v656_v48 = vadd.f32 1.0, %v648_v55  ;;  %v646_v60 = vmul.f32 0.3275911, %v638_v57  ;;  %v1771_v13 = vsel %vm619_vm1, -1.0, %v1551_v10 }
 0x223   : > { %1491 = vpow2.f32 %v757_v52  ;;  %v744_v18 = vsub.f32 0.0, %v640_v47  ;;  %v755_v22 = vmul.f32 1.442695, %v746_v63  ;;  %v765_v27 = vmul.f32 1.442695, %v751_v5 }
 0x224   : > { %1493 = vrcp.f32 %v656_v48  ;;  %v654_v9 = vadd.f32 1.0, %v646_v60  ;;  %v749_v31 = vmul.f32 %v741_v8, %v637_v43  ;;  %v1781_v6 = vsel %vm617_vm2, -1.0, %v1551_v10 }
 0x225   : > { %v1758_v51 = vpop.eup %1479  ;;  %1495 = vpow2.f32 %v753_v39  ;;  %v752_v40 = vmul.f32 %v744_v18, %v640_v47  ;;  %v742_v41 = vsub.f32 0.0, %v638_v57  ;;  %vm618_vm4 = vcmp.lt.f32.partialorder %v1732_v17, 0.0 }
 0x226   : > { %v667_v38 = vmul.f32 1.0614054, %v1758_v51  ;;  %1497 = vrcp.f32 %v654_v9  ;;  %v761_v53 = vmul.f32 1.442695, %v749_v31  ;;  %vm623_vm5 = vcmp.lt.f32.partialorder %v1740_v32, 0.0 }
 0x227   : > { %v1762_v58 = vpop.eup %1481  ;;  %1499 = vpow2.f32 %v759_v49  ;;  %v750_v39 = vmul.f32 %v742_v41, %v638_v57  ;;  %vm621_vm6 = vcmp.lt.f32.partialorder %v1743_v34, 0.0  ;;  %vm624_vm7 = vcmp.lt.f32.partialorder %v1750_v28, 0.0 }
 0x228   : > { %v675_v59 = vadd.f32 -1.4531521, %v667_v38  ;;  %v665_v1 = vmul.f32 1.0614054, %v1762_v58  ;;  %1501 = vpow2.f32 %v755_v22  ;;  %v632_v28 = vsel %vm624_vm7, -1.0, %v1551_v10 }
 0x229   : > { %v1765_v61 = vpop.eup %1483  ;;  %1503 = vpow2.f32 %v765_v27  ;;  %vm622_vm8 = vcmp.lt.f32.partialorder %v1756_v50, 0.0  ;;  %v607_v50 = vmul.f32 0.5, %v1735_v25  ;;  %v1460_v25 = vld [vmem:[%s2045_s7 + $0x10] sm:$0xff]   ;;  %vm1257_vm2 = vcmask 195584  }
 0x22a   : > { %v683_v62 = vmul.f32 %v1758_v51, %v675_v59  ;;  %v668_v4 = vmul.f32 1.0614054, %v1765_v61  ;;  %v673_v14 = vadd.f32 -1.4531521, %v665_v1  ;;  %v767_v59 = vmul.f32 1.442695, %v752_v40 }
 0x22b   : > { %1505 = vpow2.f32 %v761_v53  ;;  %v630_v32 = vsel %vm622_vm8, -1.0, %v1551_v10 }
 0x22c   : > { %v691_v2 = vadd.f32 1.4214138, %v683_v62  ;;  %v1773_v15 = vpop.eup %1485  ;;  %v676_v16 = vadd.f32 -1.4531521, %v668_v4  ;;  %v681_v24 = vmul.f32 %v1762_v58, %v673_v14  ;;  %v628_v4 = vsel %vm620_vm3, -1.0, %v1551_v10 }
 0x22d   : > { %v666_v23 = vmul.f32 1.0614054, %v1773_v15  ;;  %1507 = vpow2.f32 %v767_v59 }
 0x22e   : > { %v699_v19 = vmul.f32 %v1758_v51, %v691_v2  ;;  %v684_v26 = vmul.f32 %v1765_v61, %v676_v16  ;;  %v689_v36 = vadd.f32 1.4214138, %v681_v24  ;;  %v1783_v42 = vpop.eup %1487  ;;  %v763_v24 = vmul.f32 1.442695, %v750_v39 }
 0x22f   : > { %v674_v35 = vadd.f32 -1.4531521, %v666_v23  ;;  %v671_v52 = vmul.f32 1.0614054, %v1783_v42  ;;  %v1791_v54 = vpop.eup %1489 }
 0x230   : > { %v707_v33 = vadd.f32 -0.28449672, %v699_v19  ;;  %v692_v37 = vadd.f32 1.4214138, %v684_v26  ;;  %v697_v21 = vmul.f32 %v1762_v58, %v689_v36  ;;  %v1492_v48 = vpop.eup %1491  ;;  %v669_v60 = vmul.f32 1.0614054, %v1791_v54 }
 0x231   : > { %v682_v46 = vmul.f32 %v1773_v15, %v674_v35  ;;  %v679_v56 = vadd.f32 -1.4531521, %v671_v52  ;;  %v1797_v1 = vpop.eup %1493  ;;  %1509 = vpow2.f32 %v763_v24  ;;  %v602_v24 = vmul.f32 0.5, %v1728_v12 }
 0x232   : > { %v715_v45 = vmul.f32 %v1758_v51, %v707_v33  ;;  %v700_v43 = vmul.f32 %v1765_v61, %v692_v37  ;;  %v705_v38 = vadd.f32 -0.28449672, %v697_v21  ;;  %v672_v9 = vmul.f32 1.0614054, %v1797_v1  ;;  %v1496_v14 = vpop.eup %1495 }
 0x233   : > { %v690_v47 = vadd.f32 1.4214138, %v682_v46  ;;  %v687_v8 = vmul.f32 %v1783_v42, %v679_v56  ;;  %v1806_v22 = vpop.eup %1497 }
 0x234   : > { %v723_v29 = vadd.f32 0.2548296, %v715_v45  ;;  %v708_v55 = vadd.f32 -0.28449672, %v700_v43  ;;  %v713_v63 = vmul.f32 %v1762_v58, %v705_v38  ;;  %v680_v23 = vadd.f32 -1.4531521, %v672_v9  ;;  %v1500_v36 = vpop.eup %1499 }
 0x235   : > { %v698_v62 = vmul.f32 %v1773_v15, %v690_v47  ;;  %v695_v18 = vadd.f32 1.4214138, %v687_v8  ;;  %v670_v33 = vmul.f32 1.0614054, %v1806_v22  ;;  %v1502_v47 = vpop.eup %1501 }
 0x236   : > { %v731_v49 = vmul.f32 %v1758_v51, %v723_v29  ;;  %v716_v5 = vmul.f32 %v1765_v61, %v708_v55  ;;  %v677_v51 = vadd.f32 -1.4531521, %v669_v60  ;;  %v721_v19 = vadd.f32 0.2548296, %v713_v63  ;;  %v1504_v60 = vpop.eup %1503 }
 0x237   : > { %v706_v2 = vadd.f32 -0.28449672, %v698_v62  ;;  %v703_v31 = vmul.f32 %v1783_v42, %v695_v18  ;;  %v688_v41 = vmul.f32 %v1797_v1, %v680_v23  ;;  %v678_v43 = vadd.f32 -1.4531521, %v670_v33 }
 0x238   : > { %v771_v57 = vmul.f32 %v1492_v48, %v731_v49  ;;  %v724_v16 = vadd.f32 0.2548296, %v716_v5  ;;  %v685_v11 = vmul.f32 %v1791_v54, %v677_v51  ;;  %v729_v35 = vmul.f32 %v1762_v58, %v721_v19 }
 0x239   : > { %v714_v26 = vmul.f32 %v1773_v15, %v706_v2  ;;  %v711_v21 = vadd.f32 -0.28449672, %v703_v31  ;;  %v696_v29 = vadd.f32 1.4214138, %v688_v41  ;;  %v686_v55 = vmul.f32 %v1806_v22, %v678_v43 }
 0x23a   : > { %v732_v27 = vmul.f32 %v1765_v61, %v724_v16  ;;  %v779_v37 = vsub.f32 1.0, %v771_v57  ;;  %v693_v40 = vadd.f32 1.4214138, %v685_v11  ;;  %v769_v52 = vmul.f32 %v1496_v14, %v729_v35 }
 0x23b   : > { %v722_v45 = vadd.f32 0.2548296, %v714_v26  ;;  %v719_v58 = vmul.f32 %v1783_v42, %v711_v21  ;;  %v704_v48 = vmul.f32 %v1797_v1, %v696_v29  ;;  %v694_v5 = vadd.f32 1.4214138, %v686_v55 }
 0x23c   : > { %v772_v46 = vmul.f32 %v1500_v36, %v732_v27  ;;  %v701_v53 = vmul.f32 %v1791_v54, %v693_v40  ;;  %v777_v56 = vsub.f32 1.0, %v769_v52  ;;  %v787_v59 = vmul.f32 %v779_v37, %v1771_v13 }
 0x23d   : > { %v730_v61 = vmul.f32 %v1773_v15, %v722_v45  ;;  %v727_v63 = vadd.f32 0.2548296, %v719_v58  ;;  %v601_v15 = vmul.f32 0.5, %v1716_v3  ;;  %v712_v51 = vadd.f32 -0.28449672, %v704_v48 }
 0x23e   : > { %v780_v38 = vsub.f32 1.0, %v772_v46  ;;  %v709_v39 = vadd.f32 -0.28449672, %v701_v53  ;;  %v785_v8 = vmul.f32 %v777_v56, %v1781_v6  ;;  %v626_v13 = vsel %vm618_vm4, -1.0, %v1551_v10 }
 0x23f   : > { %v770_v49 = vmul.f32 %v1502_v47, %v730_v61  ;;  %v735_v14 = vmul.f32 %v1783_v42, %v727_v63  ;;  %v702_v16 = vmul.f32 %v1806_v22, %v694_v5  ;;  %v720_v19 = vmul.f32 %v1797_v1, %v712_v51 }
 0x240   : > { %v788_v62 = vmul.f32 %v780_v38, %v628_v4  ;;  %v717_v57 = vmul.f32 %v1791_v54, %v709_v39  ;;  %v1506_v4 = vpop.eup %1505  ;;  %v793_v11 = vadd.f32 1.0, %v785_v8  ;;  %v795_v3 = vadd.f32 1.0, %v787_v59 }
 0x241   : > { %v778_v9 = vsub.f32 1.0, %v770_v49  ;;  %v604_v23 = vmul.f32 0.5, %v1722_v7  ;;  %v710_v26 = vadd.f32 -0.28449672, %v702_v16  ;;  %v1508_v27 = vpop.eup %1507  ;;  %v775_v31 = vmul.f32 %v1504_v60, %v735_v14 }
 0x242   : > { %v796_v2 = vadd.f32 1.0, %v788_v62  ;;  %v725_v18 = vadd.f32 0.2548296, %v717_v57  ;;  %v728_v33 = vadd.f32 0.2548296, %v720_v19  ;;  %v603_v35 = vmul.f32 0.5, %v1711_v0  ;;  %v1510_v52 = vpop.eup %1509 }
 0x243   : > { %v786_v6 = vmul.f32 %v778_v9, %v626_v13  ;;  %v718_v37 = vmul.f32 %v1806_v22, %v710_v26  ;;  %v801_v7 = vmul.f32 %v793_v11, %v601_v15  ;;  %v783_v46 = vsub.f32 1.0, %v775_v31 }
 0x244   : > { %v733_v17 = vmul.f32 %v1791_v54, %v725_v18  ;;  %v804_v36 = vmul.f32 %v796_v2, %v604_v23  ;;  %v736_v41 = vmul.f32 %v1797_v1, %v728_v33  ;;  %v803_v12 = vmul.f32 %v795_v3, %v603_v35  ;;  %v1342_v2 = vld [vmem:[%s2044_s6] ss:$0 sm:$0xff] }
 0x245   : > { %v794_v42 = vadd.f32 1.0, %v786_v6  ;;  %v726_v54 = vadd.f32 0.2548296, %v718_v37  ;;  %v631_v1 = vsel %vm623_vm5, -1.0, %v1551_v10  ;;  %v629_v61 = vsel %vm621_vm6, -1.0, %v1551_v10 }
 0x246   : > { %v773_v40 = vmul.f32 %v1506_v4, %v733_v17  ;;  %v776_v43 = vmul.f32 %v1508_v27, %v736_v41  ;;  %v818_v53 = vpack.c.bf16 %v804_v36, %v803_v12  ;;  %v791_v58 = vmul.f32 %v783_v46, %v631_v1 }
 0x247   : > { %v802_v45 = vmul.f32 %v794_v42, %v602_v24  ;;  %v734_v29 = vmul.f32 %v1806_v22, %v726_v54  ;;  %v608_v49 = vmul.f32 0.5, %v1746_v20  ;;  %v605_v60 = vmul.f32 0.5, %v1737_v30  ;;  %v1459_v20 = vld [vmem:[%s2045_s7 + $0x18] sm:$0xff]   ;;  %v1461_v30 = vld [vmem:[%s2045_s7 + $0x8] sm:$0xff]  }
 0x248   : > { %v781_v21 = vsub.f32 1.0, %v773_v40  ;;  %v784_v47 = vsub.f32 1.0, %v776_v43  ;;  %v799_v48 = vadd.f32 1.0, %v791_v58  ;;  %v606_v62 = vmul.f32 0.5, %v1752_v44  ;;  %1418 = vmatprep.subr.bf16.mxu0 %v1459_v20  ;;  %1434 = vmatprep.subr.bf16.mxu1 %v1459_v20  ;;  %v1462_v44 = vld [vmem:[%s2045_s7] sm:$0xff]  }
 0x249   : > { %v817_v0 = vpack.c.bf16 %v802_v45, %v801_v7  ;;  %v774_v38 = vmul.f32 %v1510_v52, %v734_v29  ;;  %1419 = vmatpush3.bf16.msra.mxu0 %v1459_v20 }
 0x24a   : > { %v789_v34 = vmul.f32 %v781_v21, %v629_v61  ;;  %v792_v55 = vmul.f32 %v784_v47, %v632_v28  ;;  %v807_v57 = vmul.f32 %v799_v48, %v607_v50  ;;  %1420 = vmatprep.subr.bf16.mxu0 %v1460_v25 }
 0x24b   : > { %1410 = vmatprep.mubr.msk.bf16.mxu1 %vm347_vm0, %v817_v0  ;;  %v782_v22 = vsub.f32 1.0, %v774_v38 }
 0x24c   : > { %1411 = vmatmul.mubr.msk.bf16.vlgmr.msra.gmra.mxu1 %vm347_vm0, %v818_v53  ;;  %v800_v56 = vadd.f32 1.0, %v792_v55  ;;  %v797_v59 = vadd.f32 1.0, %v789_v34 }
 0x24d   : > { %v790_v39 = vmul.f32 %v782_v22, %v630_v32  ;;  %1438 = vmatpush3.bf16.msra.mxu1 %v1459_v20  ;;  %1421 = vmatpush3.bf16.msra.mxu0 %v1460_v25 }
 0x24e   : > { %v808_v5 = vmul.f32 %v800_v56, %v608_v49  ;;  %v805_v8 = vmul.f32 %v797_v59, %v605_v60  ;;  %1435 = vmatprep.subr.bf16.mxu1 %v1460_v25  ;;  %1422 = vmatprep.subr.bf16.mxu0 %v1461_v30 }
 0x24f   : > { %v798_v63 = vadd.f32 1.0, %v790_v39 }
 0x250   : > { %v820_v9 = vpack.c.bf16 %v808_v5, %v807_v57 }
 0x251   : > { %v806_v15 = vmul.f32 %v798_v63, %v606_v62  ;;  %1439 = vmatpush3.bf16.msra.mxu1 %v1460_v25  ;;  %1423 = vmatpush3.bf16.msra.mxu0 %v1461_v30 }
 0x252   : > { %1436 = vmatprep.subr.bf16.mxu1 %v1461_v30  ;;  %1424 = vmatprep.subr.bf16.mxu0 %v1462_v44 }
 0x253   : > { %v819_v51 = vpack.c.bf16 %v806_v15, %v805_v8 }
 0x255   : > { %1414 = vmatprep.mubr.msk.bf16.mxu1 %vm347_vm0, %v819_v51  ;;  %1440 = vmatpush3.bf16.msra.mxu1 %v1461_v30 }
 0x256   : > { %1415 = vmatmul.mubr.msk.bf16.gmra.mxu1 %vm347_vm0, %v820_v9  ;;  %1437 = vmatprep.subr.bf16.mxu1 %v1462_v44 }
 0x257   : > { %1425 = vmatpush3.bf16.msra.mxu0 %v1462_v44 }
 0x259   : > { %1441 = vmatpush3.bf16.msra.mxu1 %v1462_v44 }
 0x30c   : > { %v1412_v13 = vpop.f32.mrf.mxu1 }
 0x30d   : > { %v1870_v14 = vadd.f32 %v1412_v13, %v1342_v2 }
 0x30e   : > { %v898_v16 = vpop.f32.mrf.mxu1 }
 0x30f   : > { %v1873_v4 = vmul.f32 0.70710677, %v1870_v14  ;;  %v1875_v18 = vadd.f32 %v1342_v2, %v898_v16 }
 0x310   : > { %v1413_v19 = vpop.f32.mrf.mxu1 }
 0x311   : > { %v963_v6 = vand.u32 2147483647, %v1873_v4  ;;  %v1879_v11 = vmul.f32 0.70710677, %v1875_v18  ;;  %v1881_v3 = vadd.f32 %v1413_v19, %v1342_v2  ;;  %vm947_vm9 = vcmp.lt.f32.partialorder %v1873_v4, 0.0 }
 0x312   : > { %v901_v23 = vpop.f32.mrf.mxu1 }
 0x313   : > { %v971_v24 = vmul.f32 0.3275911, %v963_v6  ;;  %v961_v26 = vand.u32 2147483647, %v1879_v11  ;;  %v1885_v27 = vmul.f32 0.70710677, %v1881_v3  ;;  %v1887_v31 = vadd.f32 %v1342_v2, %v901_v23 }
 0x314   : > { %v1067_v12 = vsub.f32 0.0, %v963_v6  ;;  %v1935_v23 = vsel %vm947_vm9, -1.0, %v1551_v10  ;;  %vm945_vm10 = vcmp.lt.f32.partialorder %v1879_v11, 0.0 }
 0x315   : > { %v979_v17 = vadd.f32 1.0, %v971_v24  ;;  %v969_v33 = vmul.f32 0.3275911, %v961_v26  ;;  %v964_v42 = vand.u32 2147483647, %v1885_v27  ;;  %v1065_v61 = vsub.f32 0.0, %v961_v26 }
 0x316   : > { %v1891_v35 = vmul.f32 0.70710677, %v1887_v31  ;;  %v1416_v41 = vpop.f32.mrf.mxu1  ;;  %v1075_v1 = vmul.f32 %v1067_v12, %v963_v6  ;;  %vm948_vm11 = vcmp.lt.f32.partialorder %v1885_v27, 0.0 }
 0x317   : > { %1511 = vrcp.f32 %v979_v17  ;;  %v977_v36 = vadd.f32 1.0, %v969_v33  ;;  %v972_v37 = vmul.f32 0.3275911, %v964_v42  ;;  %v1894_v45 = vadd.f32 %v1416_v41, %v1342_v2 }
 0x318   : > { %v962_v40 = vand.u32 2147483647, %v1891_v35  ;;  %v914_v46 = vpop.f32.mrf.mxu1  ;;  %v1068_v38 = vsub.f32 0.0, %v964_v42  ;;  %v1085_v32 = vmul.f32 1.442695, %v1075_v1  ;;  %v1073_v59 = vmul.f32 %v1065_v61, %v961_v26 }
 0x319   : > { %1513 = vrcp.f32 %v977_v36  ;;  %v980_v7 = vadd.f32 1.0, %v972_v37  ;;  %v1897_v21 = vmul.f32 0.70710677, %v1894_v45  ;;  %v1899_v0 = vadd.f32 %v1342_v2, %v914_v46 }
 0x31a   : > { %v970_v54 = vmul.f32 0.3275911, %v962_v40  ;;  %v1417_v52 = vpop.f32.mrf.mxu1  ;;  %v1076_v62 = vmul.f32 %v1068_v38, %v964_v42  ;;  %v1066_v63 = vsub.f32 0.0, %v962_v40  ;;  %v1081_v51 = vmul.f32 1.442695, %v1073_v59 }
 0x31b   : > { %1515 = vrcp.f32 %v980_v7  ;;  %v967_v53 = vand.u32 2147483647, %v1897_v21  ;;  %v1902_v29 = vadd.f32 %v1417_v52, %v1342_v2  ;;  %v1905_v28 = vmul.f32 0.70710677, %v1899_v0 }
 0x31c   : > { %v978_v43 = vadd.f32 1.0, %v970_v54  ;;  %v917_v47 = vpop.f32.mrf.mxu1  ;;  %v1074_v13 = vmul.f32 %v1066_v63, %v962_v40  ;;  %vm946_vm12 = vcmp.lt.f32.partialorder %v1891_v35, 0.0  ;;  %v932_v35 = vmul.f32 0.5, %v1881_v3 }
 0x31d   : > { %v975_v34 = vmul.f32 0.3275911, %v967_v53  ;;  %v1908_v58 = vmul.f32 0.70710677, %v1902_v29  ;;  %v965_v22 = vand.u32 2147483647, %v1905_v28  ;;  %v1911_v56 = vadd.f32 %v1342_v2, %v917_v47 }
 0x31e   : > { %1517 = vrcp.f32 %v978_v43  ;;  %v1071_v25 = vsub.f32 0.0, %v967_v53  ;;  %v1087_v2 = vmul.f32 1.442695, %v1076_v62  ;;  %v1083_v40 = vmul.f32 1.442695, %v1074_v13 }
 0x31f   : > { %v983_v55 = vadd.f32 1.0, %v975_v34  ;;  %v1914_v39 = vand.u32 2147483647, %v1908_v58  ;;  %v973_v49 = vmul.f32 0.3275911, %v965_v22  ;;  %v1069_v41 = vsub.f32 0.0, %v965_v22 }
 0x320   : > { %v1921_v8 = vmul.f32 0.70710677, %v1911_v56  ;;  %v1079_v33 = vmul.f32 %v1071_v25, %v967_v53  ;;  %vm952_vm13 = vcmp.lt.f32.partialorder %v1908_v58, 0.0  ;;  %vm949_vm14 = vcmp.lt.f32.partialorder %v1905_v28, 0.0 }
 0x321   : > { %1519 = vrcp.f32 %v983_v55  ;;  %v976_v50 = vmul.f32 0.3275911, %v1914_v39  ;;  %v981_v5 = vadd.f32 1.0, %v973_v49  ;;  %v1072_v52 = vsub.f32 0.0, %v1914_v39 }
 0x322   : > { %1521 = vpow2.f32 %v1085_v32  ;;  %v1932_v6 = vand.u32 2147483647, %v1921_v8  ;;  %v1093_v61 = vmul.f32 1.442695, %v1079_v33  ;;  %v1077_v55 = vmul.f32 %v1069_v41, %v965_v22 }
 0x323   : > { %v984_v9 = vadd.f32 1.0, %v976_v50  ;;  %1523 = vrcp.f32 %v981_v5  ;;  %v953_v32 = vsel %vm945_vm10, -1.0, %v1551_v10  ;;  %v1080_v63 = vmul.f32 %v1072_v52, %v1914_v39 }
 0x324   : > { %v1916_v48 = vpop.eup %1511  ;;  %v974_v42 = vmul.f32 0.3275911, %v1932_v6  ;;  %v1089_v25 = vmul.f32 1.442695, %v1077_v55  ;;  %vm951_vm15 = vcmp.lt.f32.partialorder %v1897_v21, 0.0  ;;  %vm950_vm1 = vcmp.lt.f32.partialorder %v1921_v8, 0.0 }
 0x325   : > { %v995_v60 = vmul.f32 1.0614054, %v1916_v48  ;;  %1525 = vrcp.f32 %v984_v9  ;;  %v1095_v33 = vmul.f32 1.442695, %v1080_v63  ;;  %v959_v58 = vsel %vm951_vm15, -1.0, %v1551_v10 }
 0x326   : > { %v1923_v15 = vpop.eup %1513  ;;  %1527 = vpow2.f32 %v1081_v51  ;;  %v982_v54 = vadd.f32 1.0, %v974_v42  ;;  %v958_v21 = vsel %vm950_vm1, -1.0, %v1551_v10 }
 0x327   : > { %v1003_v57 = vadd.f32 -1.4531521, %v995_v60  ;;  %v993_v20 = vmul.f32 1.0614054, %v1923_v15  ;;  %1529 = vpow2.f32 %v1087_v2 }
 0x328   : > { %v1927_v30 = vpop.eup %1515  ;;  %1531 = vrcp.f32 %v982_v54 }
 0x329   : > { %v1011_v44 = vmul.f32 %v1916_v48, %v1003_v57  ;;  %v1001_v16 = vadd.f32 -1.4531521, %v993_v20  ;;  %v996_v19 = vmul.f32 1.0614054, %v1927_v30  ;;  %1533 = vpow2.f32 %v1083_v40 }
 0x32a   : > { %1535 = vpow2.f32 %v1093_v61 }
 0x32b   : > { %v1019_v4 = vadd.f32 1.4214138, %v1011_v44  ;;  %v1937_v24 = vpop.eup %1517  ;;  %v1009_v26 = vmul.f32 %v1923_v15, %v1001_v16  ;;  %v1004_v17 = vadd.f32 -1.4531521, %v996_v19  ;;  %v1070_v44 = vsub.f32 0.0, %v1932_v6 }
 0x32c   : > { %v994_v37 = vmul.f32 1.0614054, %v1937_v24  ;;  %1537 = vpow2.f32 %v1089_v25 }
 0x32d   : > { %v1027_v36 = vmul.f32 %v1916_v48, %v1019_v4  ;;  %v1017_v7 = vadd.f32 1.4214138, %v1009_v26  ;;  %v1012_v12 = vmul.f32 %v1927_v30, %v1004_v17  ;;  %1539 = vpow2.f32 %v1095_v33 }
 0x32e   : > { %v1002_v43 = vadd.f32 -1.4531521, %v994_v37  ;;  %v1947_v47 = vpop.eup %1519 }
 0x32f   : > { %v1035_v46 = vadd.f32 -0.28449672, %v1027_v36  ;;  %v1025_v53 = vmul.f32 %v1923_v15, %v1017_v7  ;;  %v1020_v1 = vadd.f32 1.4214138, %v1012_v12  ;;  %v999_v49 = vmul.f32 1.0614054, %v1947_v47  ;;  %v1522_v50 = vpop.eup %1521 }
 0x330   : > { %v1010_v38 = vmul.f32 %v1937_v24, %v1002_v43  ;;  %v1957_v22 = vpop.eup %1523  ;;  %v1078_v12 = vmul.f32 %v1070_v44, %v1932_v6 }
 0x331   : > { %v1043_v34 = vmul.f32 %v1916_v48, %v1035_v46  ;;  %v1033_v59 = vadd.f32 -0.28449672, %v1025_v53  ;;  %v1028_v11 = vmul.f32 %v1927_v30, %v1020_v1  ;;  %v1007_v51 = vadd.f32 -1.4531521, %v999_v49 }
 0x332   : > { %v1018_v62 = vadd.f32 1.4214138, %v1010_v38  ;;  %v1962_v2 = vpop.eup %1525  ;;  %v997_v19 = vmul.f32 1.0614054, %v1957_v22 }
 0x333   : > { %v1051_v60 = vadd.f32 0.2548296, %v1043_v34  ;;  %v1041_v5 = vmul.f32 %v1923_v15, %v1033_v59  ;;  %v1036_v57 = vadd.f32 -0.28449672, %v1028_v11  ;;  %v1015_v16 = vmul.f32 %v1947_v47, %v1007_v51 }
 0x334   : > { %v1026_v20 = vmul.f32 %v1937_v24, %v1018_v62  ;;  %v1000_v17 = vmul.f32 1.0614054, %v1962_v2  ;;  %v1005_v40 = vadd.f32 -1.4531521, %v997_v19 }
 0x335   : > { %v1059_v9 = vmul.f32 %v1916_v48, %v1051_v60  ;;  %v1049_v13 = vadd.f32 0.2548296, %v1041_v5  ;;  %v1044_v39 = vmul.f32 %v1927_v30, %v1036_v57  ;;  %v1528_v48 = vpop.eup %1527  ;;  %v1023_v37 = vadd.f32 1.4214138, %v1015_v16 }
 0x336   : > { %v1034_v26 = vadd.f32 -0.28449672, %v1026_v20  ;;  %v1008_v7 = vadd.f32 -1.4531521, %v1000_v17  ;;  %v1013_v52 = vmul.f32 %v1957_v22, %v1005_v40  ;;  %v1530_v53 = vpop.eup %1529  ;;  %v1091_v5 = vmul.f32 1.442695, %v1078_v12 }
 0x337   : > { %v1099_v4 = vmul.f32 %v1522_v50, %v1059_v9  ;;  %v1057_v42 = vmul.f32 %v1923_v15, %v1049_v13  ;;  %v1052_v36 = vadd.f32 0.2548296, %v1044_v39  ;;  %v1031_v43 = vmul.f32 %v1947_v47, %v1023_v37  ;;  %v1975_v11 = vpop.eup %1531 }
 0x338   : > { %v1042_v41 = vmul.f32 %v1937_v24, %v1034_v26  ;;  %v1016_v15 = vmul.f32 %v1962_v2, %v1008_v7  ;;  %v1021_v59 = vadd.f32 1.4214138, %v1013_v52  ;;  %v1534_v60 = vpop.eup %1533  ;;  %v998_v20 = vmul.f32 1.0614054, %v1975_v11 }
 0x339   : > { %v1097_v54 = vmul.f32 %v1528_v48, %v1057_v42  ;;  %v1060_v46 = vmul.f32 %v1927_v30, %v1052_v36  ;;  %v1107_v1 = vsub.f32 1.0, %v1099_v4  ;;  %v1039_v55 = vadd.f32 -0.28449672, %v1031_v43  ;;  %v1536_v13 = vpop.eup %1535 }
 0x33a   : > { %v1050_v61 = vadd.f32 0.2548296, %v1042_v41  ;;  %v956_v30 = vsel %vm948_vm11, -1.0, %v1551_v10  ;;  %v1024_v49 = vadd.f32 1.4214138, %v1016_v15  ;;  %v1029_v50 = vmul.f32 %v1957_v22, %v1021_v59 }
 0x33b   : > { %v1105_v34 = vsub.f32 1.0, %v1097_v54  ;;  %v1100_v38 = vmul.f32 %v1530_v53, %v1060_v46  ;;  %v1047_v63 = vmul.f32 %v1947_v47, %v1039_v55  ;;  %v1115_v27 = vmul.f32 %v1107_v1, %v1935_v23  ;;  %v1538_v54 = vpop.eup %1537 }
 0x33c   : > { %v1058_v6 = vmul.f32 %v1937_v24, %v1050_v61  ;;  %v1032_v9 = vmul.f32 %v1962_v2, %v1024_v49  ;;  %v1037_v44 = vadd.f32 -0.28449672, %v1029_v50  ;;  %v954_v24 = vsel %vm946_vm12, -1.0, %v1551_v10  ;;  %v1540_v15 = vpop.eup %1539 }
 0x33d   : > { %v1108_v62 = vsub.f32 1.0, %v1100_v38  ;;  %v1113_v57 = vmul.f32 %v1105_v34, %v953_v32  ;;  %v1006_v19 = vadd.f32 -1.4531521, %v998_v20  ;;  %v1055_v26 = vadd.f32 0.2548296, %v1047_v63 }
 0x33e   : > { %v1098_v51 = vmul.f32 %v1534_v60, %v1058_v6  ;;  %v1040_v16 = vadd.f32 -0.28449672, %v1032_v9  ;;  %v1045_v32 = vmul.f32 %v1957_v22, %v1037_v44  ;;  %1541 = vpow2.f32 %v1091_v5 }
 0x33f   : > { %v1116_v25 = vmul.f32 %v1108_v62, %v956_v30  ;;  %v1121_v17 = vadd.f32 1.0, %v1113_v57  ;;  %v1014_v23 = vmul.f32 %v1975_v11, %v1006_v19  ;;  %v1123_v42 = vadd.f32 1.0, %v1115_v27 }
 0x340   : > { %v1106_v39 = vsub.f32 1.0, %v1098_v51  ;;  %v1048_v48 = vmul.f32 %v1962_v2, %v1040_v16  ;;  %v929_v36 = vmul.f32 0.5, %v1875_v18  ;;  %v1053_v37 = vadd.f32 0.2548296, %v1045_v32 }
 0x341   : > { %v1124_v4 = vadd.f32 1.0, %v1116_v25  ;;  %v930_v40 = vmul.f32 0.5, %v1887_v31  ;;  %v1022_v12 = vadd.f32 1.4214138, %v1014_v23  ;;  %v931_v46 = vmul.f32 0.5, %v1870_v14 }
 0x342   : > { %v1114_v33 = vmul.f32 %v1106_v39, %v954_v24  ;;  %v1056_v7 = vadd.f32 0.2548296, %v1048_v48  ;;  %v1063_v52 = vmul.f32 %v1947_v47, %v1055_v26  ;;  %v1061_v53 = vmul.f32 %v1957_v22, %v1053_v37 }
 0x343   : > { %v1132_v43 = vmul.f32 %v1124_v4, %v932_v35  ;;  %v1129_v1 = vmul.f32 %v1121_v17, %v929_v36  ;;  %v1030_v3 = vmul.f32 %v1975_v11, %v1022_v12  ;;  %v1131_v34 = vmul.f32 %v1123_v42, %v931_v46 }
 0x344   : > { %v1122_v41 = vadd.f32 1.0, %v1114_v33  ;;  %v1064_v18 = vmul.f32 %v1962_v2, %v1056_v7  ;;  %v1101_v38 = vmul.f32 %v1538_v54, %v1061_v53  ;;  %v1103_v6 = vmul.f32 %v1536_v13, %v1063_v52 }
 0x345   : > { %v1038_v59 = vadd.f32 -0.28449672, %v1030_v3  ;;  %v1146_v30 = vpack.c.bf16 %v1132_v43, %v1131_v34  ;;  %v960_v62 = vsel %vm952_vm13, -1.0, %v1551_v10  ;;  %v957_v50 = vsel %vm949_vm14, -1.0, %v1551_v10  ;;  %v1351_v10 = vld [vmem:[%s2046_s8] ss:$0 sm:$0xff] }
 0x346   : > { %v1130_v61 = vmul.f32 %v1122_v41, %v930_v40  ;;  %v1104_v55 = vmul.f32 %v1540_v15, %v1064_v18  ;;  %v1109_v22 = vsub.f32 1.0, %v1101_v38  ;;  %v1111_v49 = vsub.f32 1.0, %v1103_v6 }
 0x347   : > { %v1046_v14 = vmul.f32 %v1975_v11, %v1038_v59  ;;  %v933_v13 = vmul.f32 0.5, %v1899_v0  ;;  %v934_v24 = vmul.f32 0.5, %v1911_v56  ;;  %v935_v16 = vmul.f32 0.5, %v1894_v45 }
 0x348   : > { %v1145_v31 = vpack.c.bf16 %v1130_v61, %v1129_v1  ;;  %v1112_v47 = vsub.f32 1.0, %v1104_v55  ;;  %v1117_v57 = vmul.f32 %v1109_v22, %v957_v50  ;;  %v1119_v28 = vmul.f32 %v1111_v49, %v959_v58 }
 0x349   : > { %v1054_v2 = vadd.f32 0.2548296, %v1046_v14 }
 0x34a   : > { %1426 = vmatprep.mubr.msk.bf16.mxu0 %vm347_vm0, %v1145_v31  ;;  %v1120_v5 = vmul.f32 %v1112_v47, %v960_v62  ;;  %v1125_v27 = vadd.f32 1.0, %v1117_v57  ;;  %v1127_v44 = vadd.f32 1.0, %v1119_v28 }
 0x34b   : > { %1427 = vmatmul.mubr.msk.bf16.vlgmr.msra.gmra.mxu0 %vm347_vm0, %v1146_v30  ;;  %v1542_v60 = vpop.eup %1541  ;;  %v1062_v63 = vmul.f32 %v1975_v11, %v1054_v2  ;;  %v936_v11 = vmul.f32 0.5, %v1902_v29 }
 0x34c   : > { %v1128_v20 = vadd.f32 1.0, %v1120_v5  ;;  %v1133_v19 = vmul.f32 %v1125_v27, %v933_v13  ;;  %v1135_v26 = vmul.f32 %v1127_v44, %v935_v16 }
 0x34d   : > { %v1102_v51 = vmul.f32 %v1542_v60, %v1062_v63 }
 0x34e   : > { %v1136_v8 = vmul.f32 %v1128_v20, %v936_v11 }
 0x34f   : > { %v1110_v9 = vsub.f32 1.0, %v1102_v51 }
 0x350   : > { %v1148_v17 = vpack.c.bf16 %v1136_v8, %v1135_v26 }
 0x351   : > { %v1118_v25 = vmul.f32 %v1110_v9, %v958_v21 }
 0x353   : > { %v1126_v39 = vadd.f32 1.0, %v1118_v25 }
 0x355   : > { %v1134_v4 = vmul.f32 %v1126_v39, %v934_v24 }
 0x357   : > { %v1147_v32 = vpack.c.bf16 %v1134_v4, %v1133_v19 }
 0x359   : > { %1430 = vmatprep.mubr.msk.bf16.mxu1 %vm347_vm0, %v1147_v32 }
 0x35a   : > { %1431 = vmatmul.mubr.msk.bf16.vlgmr.msra.gmra.mxu1 %vm347_vm0, %v1148_v17 }
 0x40b   : > { %v1428_v45 = vpop.f32.mrf.mxu0 }
 0x40c   : > { %v1235_v0 = vadd.f32 %v1428_v45, %v1351_v10 }
 0x40d   : > { %v1226_v29 = vpop.f32.mrf.mxu0 }
 0x40e   : > { %1260 = vst.msk [vmem:[%s334_s16 + $0x10] sm:$0xff] %vm1257_vm2, %v1235_v0  ;;  %v1227_v56 = vadd.f32 %v1351_v10, %v1226_v29 }
 0x40f   : > { %v1429_v33 = vpop.f32.mrf.mxu0 }
 0x410   : > { %1258 = vst.msk [vmem:[%s334_s16] sm:$0xff] %vm1257_vm2, %v1227_v56  ;;  %v1238_v48 = vadd.f32 %v1429_v33, %v1351_v10 }
 0x411   : > { %v1229_v23 = vpop.f32.mrf.mxu0 }
 0x412   : > { %1261 = vst.msk [vmem:[%s334_s16 + $0x18] sm:$0xff] %vm1257_vm2, %v1238_v48  ;;  %v1230_v42 = vadd.f32 %v1351_v10, %v1229_v23 }
 0x414   : > { %1259 = vst.msk [vmem:[%s334_s16 + $0x8] sm:$0xff] %vm1257_vm2, %v1230_v42 }
 0x41a   : > { %v1432_v36 = vpop.f32.mrf.mxu1 }
 0x41b   : > { %v1251_v35 = vadd.f32 %v1432_v36, %v1351_v10 }
 0x41c   : > { %v1242_v37 = vpop.f32.mrf.mxu1 }
 0x41d   : > { %1264 = vst.msk [vmem:[%s334_s16 + $0x30] sm:$0xff] %vm1257_vm2, %v1251_v35  ;;  %v1243_v40 = vadd.f32 %v1351_v10, %v1242_v37 }
 0x41e   : > { %v1433_v41 = vpop.f32.mrf.mxu1 }
 0x41f   : > { %1262 = vst.msk [vmem:[%s334_s16 + $0x20] sm:$0xff] %vm1257_vm2, %v1243_v40  ;;  %v1254_v7 = vadd.f32 %v1433_v41, %v1351_v10 }
 0x420   : > { %v1245_v12 = vpop.f32.mrf.mxu1 }
 0x421   : > { %1265 = vst.msk [vmem:[%s334_s16 + $0x38] sm:$0xff] %vm1257_vm2, %v1254_v7  ;;  %v1246_v54 = vadd.f32 %v1351_v10, %v1245_v12 }
 0x423   : > { %1263 = vst.msk [vmem:[%s334_s16 + $0x28] sm:$0xff] %vm1257_vm2, %v1246_v54 }
 0x424 PF: > { %s19_s30 = sadd.s32 1, %s1549_s30  }
 0x425   : > { %p16_p4 = scmp.ge.s32.totalorder %s19_s30, 4  }
 0x427   :  { %18 = sbr.rel (!%p16_p4) target bundleno = 1 (0x1), region = 86 }

// kernel: climax_forward.10
= control target key start
LH: loop header
LB: loop body
LE: loop exit
PB: predicated region body
PF: predicated region fallthrough
CT: control target
= control target key end

     0   :  { %s3057_s17 = smov 0   ;;  %s3696_s0 = inlined_call_operand.vmem [shape: f32[2,64,64], index: 0, kind: input, shape index: {}]   ;;  %s3697_s1 = inlined_call_operand.vmem [shape: f32[1,64], index: 1, kind: input, shape index: {}]   ;;  %s3698_s2 = inlined_call_operand.vmem [shape: f32[1,64], index: 2, kind: input, shape index: {}, may-alias: {2,4,6,8,10}]   ;;  %s3699_s3 = inlined_call_operand.vmem [shape: bf16[64,64], index: 3, kind: input, shape index: {}]   ;;  %s3700_s4 = inlined_call_operand.vmem [shape: f32[1,64], index: 4, kind: input, shape index: {}, may-alias: {2,4,6,8,10}]   ;;  %s3701_s5 = inlined_call_operand.vmem [shape: bf16[64,64], index: 5, kind: input, shape index: {}]   ;;  %s3702_s6 = inlined_call_operand.vmem [shape: f32[1,64], index: 6, kind: input, shape index: {}, may-alias: {2,4,6,8,10}]   ;;  %s3703_s7 = inlined_call_operand.vmem [shape: bf16[64,64], index: 7, kind: input, shape index: {}]   ;;  %s3704_s8 = inlined_call_operand.vmem [shape: f32[1,64], index: 8, kind: input, shape index: {}, may-alias: {2,4,6,8,10}]   ;;  %s3705_s9 = inlined_call_operand.vmem [shape: bf16[64,64], index: 9, kind: input, shape index: {}]   ;;  %s3706_s10 = inlined_call_operand.vmem [shape: f32[1,64], index: 10, kind: input, shape index: {}, may-alias: {2,4,6,8,10}]   ;;  %s3707_s11 = inlined_call_operand.vmem [shape: f32[2,64,64], index: 11, kind: output, shape index: {}]  }
   0x1 LB: > { %s2354_s18 = sadd.s32 4294967295, %s2989_s17   ;;  %p2358_p0 = scmp.ge.s32.totalorder %s2989_s17, 1  ;;  %s2989_s17 = sphi %s3057_s17, %s21_s17  }
   0x2   : > { %p337_p1 = scmp.lt.s32.totalorder %s2989_s17, 3 }
   0x4   : > { %p338_p2 = pnand %p2358_p0, %p337_p1 }
   0x5   : > { %p377_p3 = scmp.lt.s32.totalorder (!%p338_p2), %s2354_s18, 1  ;;  %s2991_s27 = smov (!%p338_p2), 112  }
   0x6   : > { %341 = sbr.rel (%p338_p2) target bundleno = 3390 (0xd3e), region = 64  ;;  %s2992_s28 = smov (!%p338_p2), 96  }
   0x7   : > { %s2993_s29 = smov (!%p338_p2), 80   ;;  %s2994_s30 = smov (!%p338_p2), 16  }
   0x8   : > { %s2995_s12 = smov (!%p338_p2), 32   ;;  %s2996_s25 = smov (!%p338_p2), 48  }
   0xb   : > { %s3709_s18 = smov (!%p377_p3, %s2354_s18), 1  ;;  %vm398_vm0 = vcmask 523264   ;;  %v2815_v56 = vld [vmem:[%s3699_s3 + $0x18] sm:$0xff]   ;;  %v2817_v58 = vld [vmem:[%s3699_s3 + $0x10] sm:$0xff]   ;;  %v2819_v60 = vld [vmem:[%s3699_s3 + $0x8] sm:$0xff]   ;;  %vm868_vm1 = vcmask 130048  }
   0xc   : > { %s2435_s19 = sshll.u32 %s3709_s18, 6  ;;  %v2816_v57 = vld [vmem:[%s3701_s5 + $0x18] sm:$0xff]   ;;  %2533 = vmatprep.subr.bf16.mxu0 %v2815_v56  ;;  %v2818_v59 = vld [vmem:[%s3701_s5 + $0x10] sm:$0xff]   ;;  %v2820_v61 = vld [vmem:[%s3701_s5 + $0x8] sm:$0xff]   ;;  %vm2137_vm2 = vcmask 261120   ;;  %vm2146_vm3 = vcmask 392192  }
   0xd   : > { %s3073_s22 = scalar_lea.vmem %s3696_s0, %s2435_s19  ;;  %2549 = vmatprep.subr.bf16.mxu1 %v2816_v57  ;;  %2534 = vmatpush3.bf16.msra.mxu0 %v2815_v56  ;;  %v2821_v62 = vld [vmem:[%s3699_s3] sm:$0xff]  }
   0xe   : > { %v388_v0 = vld [vmem:[%s3073_s22] sm:$0xff]  ;;  %v390_v1 = vld [vmem:[%s3073_s22 + $0x10] sm:$0xff]  ;;  %v389_v2 = vld [vmem:[%s3073_s22 + $0x8] sm:$0xff]  ;;  %2550 = vmatpush3.bf16.msra.mxu1 %v2816_v57  ;;  %2535 = vmatprep.subr.bf16.mxu0 %v2817_v58 }
   0xf   : > { %v399_v3 = vsel %vm398_vm0, %v388_v0, 0.0  ;;  %v405_v4 = vsel %vm398_vm0, %v390_v1, 0.0  ;;  %v391_v5 = vld [vmem:[%s3073_s22 + $0x18] sm:$0xff]  ;;  %v392_v6 = vld [vmem:[%s3073_s22 + $0x20] sm:$0xff]  ;;  %v393_v7 = vld [vmem:[%s3073_s22 + $0x28] sm:$0xff]  ;;  %v402_v8 = vsel %vm398_vm0, %v389_v2, 0.0  ;;  %2551 = vmatprep.subr.bf16.mxu1 %v2818_v59 }
  0x10   : > { %400 = vadd.xlane.f32.xlu0 %v399_v3  ;;  %406 = vadd.xlane.f32.xlu1 %v405_v4  ;;  %v408_v9 = vsel %vm398_vm0, %v391_v5, 0.0  ;;  %v411_v10 = vsel %vm398_vm0, %v392_v6, 0.0  ;;  %v414_v11 = vsel %vm398_vm0, %v393_v7, 0.0  ;;  %v394_v12 = vld [vmem:[%s3073_s22 + $0x30] sm:$0xff]  ;;  %v395_v13 = vld [vmem:[%s3073_s22 + $0x38] sm:$0xff]  ;;  %v2822_v63 = vld [vmem:[%s3701_s5] sm:$0xff]  }
  0x11   : > { %v417_v14 = vsel %vm398_vm0, %v394_v12, 0.0  ;;  %v420_v15 = vsel %vm398_vm0, %v395_v13, 0.0  ;;  %2536 = vmatpush3.bf16.msra.mxu0 %v2817_v58 }
  0x12   : > { %2552 = vmatpush3.bf16.msra.mxu1 %v2818_v59  ;;  %2537 = vmatprep.subr.bf16.mxu0 %v2819_v60 }
  0x13   : > { %2553 = vmatprep.subr.bf16.mxu1 %v2820_v61 }
  0x14   : > { %403 = vadd.xlane.f32.xlu0 %v402_v8  ;;  %409 = vadd.xlane.f32.xlu1 %v408_v9 }
  0x15   : > { %2538 = vmatpush3.bf16.msra.mxu0 %v2819_v60 }
  0x16   : > { %2554 = vmatpush3.bf16.msra.mxu1 %v2820_v61  ;;  %2539 = vmatprep.subr.bf16.mxu0 %v2821_v62 }
  0x17   : > { %2555 = vmatprep.subr.bf16.mxu1 %v2822_v63 }
  0x18   : > { %412 = vadd.xlane.f32.xlu0 %v411_v10  ;;  %415 = vadd.xlane.f32.xlu1 %v414_v11 }
  0x19   : > { %2540 = vmatpush3.bf16.msra.mxu0 %v2821_v62  ;;  %v2825_v62 = vld [vmem:[%s3703_s7 + $0x8] sm:$0xff]  }
  0x1a   : > { %2556 = vmatpush3.bf16.msra.mxu1 %v2822_v63 }
  0x1c   : > { %418 = vadd.xlane.f32.xlu0 %v417_v14  ;;  %421 = vadd.xlane.f32.xlu1 %v420_v15 }
  0x99   : > { %v401_v16 = vpop.xlane.xlu0 %400  ;;  %v407_v17 = vpop.xlane.xlu1 %406 }
  0x9a   : > { %v424_v18 = vmul.f32 0.015625, %v401_v16  ;;  %v426_v19 = vmul.f32 0.015625, %v407_v17 }
  0x9c   : > { %v3091_v20 = vsub.f32 %v388_v0, %v424_v18  ;;  %v3093_v21 = vsub.f32 %v390_v1, %v426_v19  ;;  %v3158_v0 = vld [vmem:[%s3703_s7 + $0x18] sm:$0xff]  }
  0x9d   : > { %v404_v22 = vpop.xlane.xlu0 %403  ;;  %v410_v23 = vpop.xlane.xlu1 %409  ;;  %2565 = vmatprep.subr.bf16.mxu0 %v3158_v0 }
  0x9e   : > { %v425_v24 = vmul.f32 0.015625, %v404_v22  ;;  %v427_v25 = vmul.f32 0.015625, %v410_v23  ;;  %v440_v26 = vmul.f32 %v3091_v20, %v3091_v20  ;;  %v442_v27 = vmul.f32 %v3093_v21, %v3093_v21 }
  0xa0   : > { %v3099_v28 = vsub.f32 %v389_v2, %v425_v24  ;;  %v3101_v29 = vsub.f32 %v391_v5, %v427_v25  ;;  %v448_v30 = vsel %vm398_vm0, %v440_v26, 0.0  ;;  %v454_v33 = vsel %vm398_vm0, %v442_v27, 0.0 }
  0xa1   : > { %449 = vadd.xlane.f32.xlu0 %v448_v30  ;;  %v413_v31 = vpop.xlane.xlu0 %412  ;;  %v416_v32 = vpop.xlane.xlu1 %415 }
  0xa2   : > { %v428_v34 = vmul.f32 0.015625, %v413_v31  ;;  %v429_v35 = vmul.f32 0.015625, %v416_v32  ;;  %v441_v36 = vmul.f32 %v3099_v28, %v3099_v28  ;;  %v443_v37 = vmul.f32 %v3101_v29, %v3101_v29  ;;  %v2363_v31 = vld [vmem:[%s3697_s1] ss:$0 sm:$0xff] }
  0xa4   : > { %v3109_v38 = vsub.f32 %v392_v6, %v428_v34  ;;  %v3111_v39 = vsub.f32 %v393_v7, %v429_v35  ;;  %v451_v40 = vsel %vm398_vm0, %v441_v36, 0.0  ;;  %v457_v43 = vsel %vm398_vm0, %v443_v37, 0.0  ;;  %v2364_v36 = vld [vmem:[%s3698_s2] ss:$0 sm:$0xff] }
  0xa5   : > { %455 = vadd.xlane.f32.xlu0 %v454_v33  ;;  %452 = vadd.xlane.f32.xlu1 %v451_v40  ;;  %v419_v41 = vpop.xlane.xlu0 %418  ;;  %v422_v42 = vpop.xlane.xlu1 %421 }
  0xa6   : > { %v430_v44 = vmul.f32 0.015625, %v419_v41  ;;  %v431_v45 = vmul.f32 0.015625, %v422_v42  ;;  %v444_v46 = vmul.f32 %v3109_v38, %v3109_v38  ;;  %v445_v47 = vmul.f32 %v3111_v39, %v3111_v39 }
  0xa8   : > { %v3119_v48 = vsub.f32 %v394_v12, %v430_v44  ;;  %v3121_v49 = vsub.f32 %v395_v13, %v431_v45  ;;  %v460_v50 = vsel %vm398_vm0, %v444_v46, 0.0  ;;  %v463_v51 = vsel %vm398_vm0, %v445_v47, 0.0 }
  0xa9   : > { %458 = vadd.xlane.f32.xlu1 %v457_v43  ;;  %461 = vadd.xlane.f32.xlu0 %v460_v50 }
  0xaa   : > { %v446_v52 = vmul.f32 %v3119_v48, %v3119_v48  ;;  %v447_v53 = vmul.f32 %v3121_v49, %v3121_v49 }
  0xac   : > { %v466_v54 = vsel %vm398_vm0, %v446_v52, 0.0  ;;  %v469_v55 = vsel %vm398_vm0, %v447_v53, 0.0 }
  0xad   : > { %464 = vadd.xlane.f32.xlu1 %v463_v51  ;;  %467 = vadd.xlane.f32.xlu0 %v466_v54 }
  0xb1   : > { %470 = vadd.xlane.f32.xlu1 %v469_v55 }
 0x12a   : > { %v450_v1 = vpop.xlane.xlu0 %449 }
 0x12b   : > { %v472_v2 = vmul.f32 0.015625, %v450_v1 }
 0x12d   : > { %v480_v3 = vadd.f32 1e-05, %v472_v2 }
 0x12e   : > { %v453_v4 = vpop.xlane.xlu1 %452  ;;  %v456_v5 = vpop.xlane.xlu0 %455 }
 0x12f   : > { %2831 = vrsqrt.f32 %v480_v3  ;;  %v473_v6 = vmul.f32 0.015625, %v453_v4  ;;  %v474_v7 = vmul.f32 0.015625, %v456_v5 }
 0x131   : > { %v481_v8 = vadd.f32 1e-05, %v473_v6  ;;  %v482_v9 = vadd.f32 1e-05, %v474_v7 }
 0x132   : > { %v459_v10 = vpop.xlane.xlu1 %458  ;;  %v462_v11 = vpop.xlane.xlu0 %461 }
 0x133   : > { %2833 = vrsqrt.f32 %v481_v8  ;;  %v475_v12 = vmul.f32 0.015625, %v459_v10  ;;  %v476_v13 = vmul.f32 0.015625, %v462_v11  ;;  %v3204_v8 = vld [vmem:[%s3700_s4] ss:$0 sm:$0xff] }
 0x134   : > { %2835 = vrsqrt.f32 %v482_v9 }
 0x135   : > { %v483_v14 = vadd.f32 1e-05, %v475_v12  ;;  %v484_v15 = vadd.f32 1e-05, %v476_v13 }
 0x136   : > { %v465_v16 = vpop.xlane.xlu1 %464  ;;  %v468_v17 = vpop.xlane.xlu0 %467 }
 0x137   : > { %2837 = vrsqrt.f32 %v483_v14  ;;  %v477_v18 = vmul.f32 0.015625, %v465_v16  ;;  %v478_v19 = vmul.f32 0.015625, %v468_v17 }
 0x138   : > { %2839 = vrsqrt.f32 %v484_v15 }
 0x139   : > { %v485_v22 = vadd.f32 1e-05, %v477_v18  ;;  %v486_v23 = vadd.f32 1e-05, %v478_v19  ;;  %v2374_v18 = vld [vmem:[%s3702_s6] ss:$0 sm:$0xff] }
 0x13a   : > { %v471_v24 = vpop.xlane.xlu1 %470 }
 0x13b   : > { %2841 = vrsqrt.f32 %v485_v22  ;;  %v479_v25 = vmul.f32 0.015625, %v471_v24 }
 0x13c   : > { %v2832_v26 = vpop.eup %2831  ;;  %2843 = vrsqrt.f32 %v486_v23 }
 0x13d   : > { %v487_v27 = vadd.f32 1e-05, %v479_v25  ;;  %v496_v30 = vmul.f32 %v2832_v26, %v3091_v20 }
 0x13f   : > { %2845 = vrsqrt.f32 %v487_v27  ;;  %v510_v35 = vmul.f32 %v2363_v31, %v496_v30 }
 0x140   : > { %v2834_v32 = vpop.eup %2833 }
 0x141   : > { %v2836_v33 = vpop.eup %2835  ;;  %v497_v34 = vmul.f32 %v2834_v32, %v3099_v28  ;;  %v524_v20 = vadd.f32 %v2364_v36, %v510_v35 }
 0x142   : > { %v498_v37 = vmul.f32 %v2836_v33, %v3093_v21 }
 0x143   : > { %v511_v40 = vmul.f32 %v2363_v31, %v497_v34 }
 0x144   : > { %v2838_v41 = vpop.eup %2837  ;;  %v512_v45 = vmul.f32 %v2363_v31, %v498_v37 }
 0x145   : > { %v2840_v42 = vpop.eup %2839  ;;  %v525_v43 = vadd.f32 %v2364_v36, %v511_v40  ;;  %v499_v44 = vmul.f32 %v2838_v41, %v3101_v29 }
 0x146   : > { %v500_v46 = vmul.f32 %v2840_v42, %v3109_v38  ;;  %v526_v21 = vadd.f32 %v2364_v36, %v512_v45  ;;  %v2824_v38 = vld [vmem:[%s3703_s7 + $0x10] sm:$0xff]   ;;  %v2383_v45 = vld [vmem:[%s3704_s8] ss:$0 sm:$0xff] }
 0x147   : > { %v540_v47 = vpack.c.bf16 %v525_v43, %v524_v20  ;;  %v513_v50 = vmul.f32 %v2363_v31, %v499_v44 }
 0x148   : > { %v2842_v28 = vpop.eup %2841  ;;  %v514_v51 = vmul.f32 %v2363_v31, %v500_v46 }
 0x149   : > { %v2844_v52 = vpop.eup %2843  ;;  %2541 = vmatprep.mubr.msk.bf16.mxu0 %vm398_vm0, %v540_v47  ;;  %2557 = vmatprep.mubr.msk.bf16.mxu1 %vm398_vm0, %v540_v47  ;;  %v527_v53 = vadd.f32 %v2364_v36, %v513_v50  ;;  %v501_v54 = vmul.f32 %v2842_v28, %v3111_v39 }
 0x14a   : > { %v502_v55 = vmul.f32 %v2844_v52, %v3119_v48  ;;  %v528_v58 = vadd.f32 %v2364_v36, %v514_v51 }
 0x14b   : > { %v541_v56 = vpack.c.bf16 %v527_v53, %v526_v21  ;;  %v515_v29 = vmul.f32 %v2363_v31, %v501_v54 }
 0x14c   : > { %v2846_v57 = vpop.eup %2845  ;;  %v516_v61 = vmul.f32 %v2363_v31, %v502_v55 }
 0x14d   : > { %2542 = vmatmul.mubr.msk.bf16.vlgmr.msra.gmra.mxu0 %vm398_vm0, %v541_v56  ;;  %2558 = vmatmul.mubr.msk.bf16.vlgmr.msra.gmra.mxu1 %vm398_vm0, %v541_v56  ;;  %v529_v59 = vadd.f32 %v2364_v36, %v515_v29  ;;  %v503_v60 = vmul.f32 %v2846_v57, %v3121_v49  ;;  %v2826_v49 = vld [vmem:[%s3703_s7] sm:$0xff]  }
 0x14e   : > { %2566 = vmatpush3.bf16.msra.mxu0 %v3158_v0  ;;  %v530_v63 = vadd.f32 %v2364_v36, %v516_v61 }
 0x14f   : > { %v542_v39 = vpack.c.bf16 %v529_v59, %v528_v58  ;;  %2567 = vmatprep.subr.bf16.mxu0 %v2824_v38  ;;  %v517_v48 = vmul.f32 %v2363_v31, %v503_v60 }
 0x151   : > { %2545 = vmatprep.mubr.msk.bf16.mxu0 %vm398_vm0, %v542_v39  ;;  %2561 = vmatprep.mubr.msk.bf16.mxu1 %vm398_vm0, %v542_v39  ;;  %v531_v1 = vadd.f32 %v2364_v36, %v517_v48 }
 0x152   : > { %2568 = vmatpush3.bf16.msra.mxu0 %v2824_v38 }
 0x153   : > { %v543_v2 = vpack.c.bf16 %v531_v1, %v530_v63  ;;  %2569 = vmatprep.subr.bf16.mxu0 %v2825_v62 }
 0x155   : > { %2546 = vmatmul.mubr.msk.bf16.gmra.mxu0 %vm398_vm0, %v543_v2  ;;  %2562 = vmatmul.mubr.msk.bf16.gmra.mxu1 %vm398_vm0, %v543_v2 }
 0x156   : > { %2570 = vmatpush3.bf16.msra.mxu0 %v2825_v62  ;;  %2573 = vmatprep.mubr.msk.bf16.mxu0 %vm398_vm0, %v540_v47 }
 0x157   : > { %2571 = vmatprep.subr.bf16.mxu0 %v2826_v49 }
 0x15a   : > { %2572 = vmatpush3.bf16.msra.mxu0 %v2826_v49 }
 0x15d   : > { %2574 = vmatmul.mubr.msk.bf16.vlgmr.msra.gmra.mxu0 %vm398_vm0, %v541_v56 }
 0x15e   : > { %2577 = vmatprep.mubr.msk.bf16.mxu0 %vm398_vm0, %v542_v39 }
 0x165   : > { %2578 = vmatmul.mubr.msk.bf16.gmra.mxu0 %vm398_vm0, %v543_v2 }
 0x20d   : > { %v3197_v0 = vpop.f32.mrf.mxu0  ;;  %v2559_v3 = vpop.f32.mrf.mxu1 }
 0x20e   : > { %v734_v41 = vadd.f32 %v2559_v3, %v2374_v18  ;;  %v630_v63 = vadd.f32 %v3197_v0, %v3204_v8 }
 0x20f   : > { %v621_v4 = vpop.f32.mrf.mxu0  ;;  %v725_v5 = vpop.f32.mrf.mxu1 }
 0x210   : > { %v622_v11 = vadd.f32 %v3204_v8, %v621_v4  ;;  %v726_v52 = vadd.f32 %v2374_v18, %v725_v5 }
 0x211   : > { %v3199_v6 = vpop.f32.mrf.mxu0  ;;  %v2560_v7 = vpop.f32.mrf.mxu1 }
 0x212   : > { %v737_v37 = vadd.f32 %v2560_v7, %v2374_v18  ;;  %v633_v48 = vadd.f32 %v3199_v6, %v3204_v8 }
 0x213   : > { %v624_v9 = vpop.f32.mrf.mxu0  ;;  %v728_v10 = vpop.f32.mrf.mxu1 }
 0x214   : > { %v625_v12 = vadd.f32 %v3204_v8, %v624_v9  ;;  %v3231_v20 = vpack.c.bf16 %v737_v37, %v734_v41  ;;  %v729_v47 = vadd.f32 %v2374_v18, %v728_v10  ;;  %v3271_v2 = vpack.c.bf16 %v633_v48, %v630_v63 }
 0x215   : > { %v3208_v13 = vpop.f32.mrf.mxu0  ;;  %v2563_v14 = vpop.f32.mrf.mxu1 }
 0x216   : > { %v3210_v15 = vpack.c.bf16 %v625_v12, %v622_v11  ;;  %v750_v23 = vadd.f32 %v2563_v14, %v2374_v18  ;;  %v3242_v55 = vpack.c.bf16 %v729_v47, %v726_v52  ;;  %v885_v38 = vsel %vm868_vm1, %v3231_v20, 0 }
 0x217   : > { %v3212_v16 = vpop.f32.mrf.mxu0  ;;  %v741_v17 = vpop.f32.mrf.mxu1  ;;  %v646_v0 = vadd.f32 %v3208_v13, %v3204_v8 }
 0x218   : > { %2589 = vmatprep.mubr.msk.bf16.mxu1 %vm868_vm1, %v3210_v15  ;;  %v742_v27 = vadd.f32 %v2374_v18, %v741_v17  ;;  %v882_v39 = vsel %vm868_vm1, %v3242_v55, 0  ;;  %v638_v1 = vadd.f32 %v3204_v8, %v3212_v16 }
 0x219   : > { %v3219_v19 = vpop.f32.mrf.mxu0  ;;  %v2564_v22 = vpop.f32.mrf.mxu1 }
 0x21a   : > { %v753_v24 = vadd.f32 %v2564_v22, %v2374_v18  ;;  %v649_v3 = vadd.f32 %v3219_v19, %v3204_v8 }
 0x21b   : > { %v640_v25 = vpop.f32.mrf.mxu0  ;;  %v744_v26 = vpop.f32.mrf.mxu1 }
 0x21c   : > { %v3221_v30 = vpack.c.bf16 %v753_v24, %v750_v23  ;;  %v745_v31 = vadd.f32 %v2374_v18, %v744_v26  ;;  %v641_v62 = vadd.f32 %v3204_v8, %v640_v25  ;;  %v3283_v4 = vpack.c.bf16 %v649_v3, %v646_v0 }
 0x21d   : > { %v2575_v32 = vpop.f32.mrf.mxu0 }
 0x21e   : > { %v3223_v33 = vpack.c.bf16 %v745_v31, %v742_v27  ;;  %2725 = vmatprep.subr.msk.bf16.mxu1 %vm868_vm1, %v3221_v30  ;;  %v891_v34 = vsel %vm868_vm1, %v3221_v30, 0  ;;  %v838_v57 = vadd.f32 %v2575_v32, %v2383_v45  ;;  %v3273_v49 = vpack.c.bf16 %v641_v62, %v638_v1 }
 0x21f   : > { %v829_v35 = vpop.f32.mrf.mxu0  ;;  %2582 = vmatpush3.bf16.xpose.msra.mxu1 %v891_v34 }
 0x220   : > { %2726 = vmatprep.subr.msk.bf16.mxu1 %vm868_vm1, %v3223_v33  ;;  %v888_v43 = vsel %vm868_vm1, %v3223_v33, 0  ;;  %v830_v60 = vadd.f32 %v2383_v45, %v829_v35 }
 0x221   : > { %v2576_v36 = vpop.f32.mrf.mxu0 }
 0x222   : > { %v841_v56 = vadd.f32 %v2576_v36, %v2383_v45 }
 0x223   : > { %v832_v40 = vpop.f32.mrf.mxu0 }
 0x224   : > { %v3253_v58 = vpack.c.bf16 %v841_v56, %v838_v57  ;;  %v833_v59 = vadd.f32 %v2383_v45, %v832_v40 }
 0x225   : > { %v2579_v42 = vpop.f32.mrf.mxu0 }
 0x226   : > { %v854_v50 = vadd.f32 %v2579_v42, %v2383_v45  ;;  %v3257_v61 = vpack.c.bf16 %v833_v59, %v830_v60 }
 0x227   : > { %v845_v44 = vpop.f32.mrf.mxu0  ;;  %2584 = vmatpush3.bf16.xpose.msra.mxu1 %v888_v43 }
 0x228   : > { %2727 = vmatprep.subr.msk.bf16.mxu1 %vm868_vm1, %v3231_v20  ;;  %v846_v21 = vadd.f32 %v2383_v45, %v845_v44 }
 0x229   : > { %v2580_v46 = vpop.f32.mrf.mxu0 }
 0x22a   : > { %v857_v28 = vadd.f32 %v2580_v46, %v2383_v45 }
 0x22b   : > { %v848_v51 = vpop.f32.mrf.mxu0 }
 0x22c   : > { %v3240_v53 = vpack.c.bf16 %v857_v28, %v854_v50  ;;  %v849_v54 = vadd.f32 %v2383_v45, %v848_v51 }
 0x22e   : > { %v3244_v29 = vpack.c.bf16 %v849_v54, %v846_v21  ;;  %2597 = vmatprep.subr.bf16.mxu0 %v3240_v53 }
 0x22f   : > { %2586 = vmatpush3.bf16.xpose.msra.mxu1 %v885_v38  ;;  %2598 = vmatpush3.bf16.msra.mxu0 %v3240_v53 }
 0x230   : > { %2728 = vmatprep.subr.msk.bf16.mxu1 %vm868_vm1, %v3242_v55  ;;  %2599 = vmatprep.subr.bf16.mxu0 %v3244_v29 }
 0x233   : > { %2600 = vmatpush3.bf16.msra.mxu0 %v3244_v29 }
 0x234   : > { %2601 = vmatprep.subr.bf16.mxu0 %v3253_v58 }
 0x237   : > { %2588 = vmatpush3.bf16.xpose.msra.mxu1 %v882_v39  ;;  %2602 = vmatpush3.bf16.msra.mxu0 %v3253_v58 }
 0x238   : > { %2603 = vmatprep.subr.bf16.mxu0 %v3257_v61 }
 0x23b   : > { %2604 = vmatpush3.bf16.msra.mxu0 %v3257_v61 }
 0x23e   : > { %2590 = vmatmul.mubr.msk.bf16.vlgmr.msra.gmra.mxu1 %vm868_vm1, %v3271_v2 }
 0x23f   : > { %2593 = vmatprep.mubr.msk.bf16.mxu1 %vm868_vm1, %v3273_v49 }
 0x246   : > { %2594 = vmatmul.mubr.msk.bf16.gmra.mxu1 %vm868_vm1, %v3283_v4 }
 0x2fe   : > { %v2591_v5 = vpop.f32.mrf.mxu1 }
 0x2ff   : > { %v960_v10 = vmul.f32 0.25, %v2591_v5 }
 0x300   : > { %v927_v6 = vpop.f32.mrf.mxu1 }
 0x301   : > { %v958_v7 = vmul.f32 0.25, %v927_v6  ;;  %v972_v18 = vsel %vm398_vm0, %v960_v10, -inf }
 0x302   : > { %v2592_v9 = vpop.f32.mrf.mxu1 }
 0x303   : > { %v966_v11 = vsel %vm398_vm0, %v958_v7, -inf  ;;  %v961_v17 = vmul.f32 0.25, %v2592_v9 }
 0x304   : > { %967 = vmax.xlane.f32.xlu0 %v966_v11  ;;  %v930_v12 = vpop.f32.mrf.mxu1 }
 0x305   : > { %v959_v14 = vmul.f32 0.25, %v930_v12  ;;  %v975_v24 = vsel %vm398_vm0, %v961_v17, -inf }
 0x306   : > { %v2595_v16 = vpop.f32.mrf.mxu1 }
 0x307   : > { %v969_v8 = vsel %vm398_vm0, %v959_v14, -inf  ;;  %v964_v23 = vmul.f32 0.25, %v2595_v16 }
 0x308   : > { %973 = vmax.xlane.f32.xlu0 %v972_v18  ;;  %970 = vmax.xlane.f32.xlu1 %v969_v8  ;;  %v943_v13 = vpop.f32.mrf.mxu1 }
 0x309   : > { %v962_v19 = vmul.f32 0.25, %v943_v13  ;;  %v984_v32 = vsel %vm398_vm0, %v964_v23, -inf }
 0x30a   : > { %v2596_v22 = vpop.f32.mrf.mxu1 }
 0x30b   : > { %v978_v25 = vsel %vm398_vm0, %v962_v19, -inf  ;;  %v965_v31 = vmul.f32 0.25, %v2596_v22 }
 0x30c   : > { %976 = vmax.xlane.f32.xlu1 %v975_v24  ;;  %979 = vmax.xlane.f32.xlu0 %v978_v25  ;;  %v946_v26 = vpop.f32.mrf.mxu1 }
 0x30d   : > { %v963_v27 = vmul.f32 0.25, %v946_v26  ;;  %v987_v35 = vsel %vm398_vm0, %v965_v31, -inf }
 0x30f   : > { %v981_v34 = vsel %vm398_vm0, %v963_v27, -inf }
 0x310   : > { %985 = vmax.xlane.f32.xlu0 %v984_v32  ;;  %982 = vmax.xlane.f32.xlu1 %v981_v34 }
 0x314   : > { %988 = vmax.xlane.f32.xlu1 %v987_v35 }
 0x38d   : > { %v968_v36 = vpop.xlane.xlu0 %967 }
 0x38e   : > { %v990_v37 = vsub.f32 %v958_v7, %v968_v36 }
 0x390   : > { %v998_v43 = vmul.f32 1.442695, %v990_v37 }
 0x391   : > { %v974_v40 = vpop.xlane.xlu0 %973  ;;  %v971_v41 = vpop.xlane.xlu1 %970 }
 0x392   : > { %v992_v42 = vsub.f32 %v960_v10, %v974_v40  ;;  %v991_v45 = vsub.f32 %v959_v14, %v971_v41 }
 0x394   : > { %v1002_v44 = vmul.f32 1.442695, %v992_v42  ;;  %v1000_v28 = vmul.f32 1.442695, %v991_v45 }
 0x395   : > { %v977_v46 = vpop.xlane.xlu1 %976  ;;  %v980_v47 = vpop.xlane.xlu0 %979 }
 0x396   : > { %2847 = vpow2.f32 %v1002_v44  ;;  %v993_v50 = vsub.f32 %v961_v17, %v977_v46  ;;  %v994_v52 = vsub.f32 %v962_v19, %v980_v47 }
 0x397   : > { %2849 = vpow2.f32 %v998_v43 }
 0x398   : > { %v1004_v51 = vmul.f32 1.442695, %v993_v50  ;;  %v1006_v56 = vmul.f32 1.442695, %v994_v52 }
 0x399   : > { %v986_v21 = vpop.xlane.xlu0 %985  ;;  %v983_v7 = vpop.xlane.xlu1 %982 }
 0x39a   : > { %2851 = vpow2.f32 %v1004_v51  ;;  %v996_v54 = vsub.f32 %v964_v23, %v986_v21  ;;  %v995_v11 = vsub.f32 %v963_v27, %v983_v7 }
 0x39b   : > { %2853 = vpow2.f32 %v1000_v28 }
 0x39c   : > { %v1010_v38 = vmul.f32 1.442695, %v996_v54  ;;  %v1008_v14 = vmul.f32 1.442695, %v995_v11 }
 0x39d   : > { %v989_v9 = vpop.xlane.xlu1 %988 }
 0x39e   : > { %2855 = vpow2.f32 %v1010_v38  ;;  %v997_v10 = vsub.f32 %v965_v31, %v989_v9 }
 0x39f   : > { %2857 = vpow2.f32 %v1006_v56 }
 0x3a0   : > { %v1012_v12 = vmul.f32 1.442695, %v997_v10 }
 0x3a2   : > { %2859 = vpow2.f32 %v1012_v12 }
 0x3a3   : > { %v2848_v57 = vpop.eup %2847  ;;  %2861 = vpow2.f32 %v1008_v14 }
 0x3a4   : > { %v1020_v59 = vsel %vm398_vm0, %v2848_v57, 0.0  ;;  %v2850_v60 = vpop.eup %2849 }
 0x3a5   : > { %1021 = vadd.xlane.f32.xlu0 %v1020_v59  ;;  %v1014_v48 = vsel %vm398_vm0, %v2850_v60, 0.0 }
 0x3a7   : > { %v2852_v39 = vpop.eup %2851 }
 0x3a8   : > { %v1023_v62 = vsel %vm398_vm0, %v2852_v39, 0.0  ;;  %v2854_v63 = vpop.eup %2853 }
 0x3a9   : > { %1015 = vadd.xlane.f32.xlu0 %v1014_v48  ;;  %1024 = vadd.xlane.f32.xlu1 %v1023_v62  ;;  %v1017_v0 = vsel %vm398_vm0, %v2854_v63, 0.0 }
 0x3ab   : > { %v3298_v1 = vpop.eup %2855 }
 0x3ac   : > { %v1032_v3 = vsel %vm398_vm0, %v3298_v1, 0.0  ;;  %v3303_v5 = vpop.eup %2857 }
 0x3ad   : > { %1033 = vadd.xlane.f32.xlu0 %v1032_v3  ;;  %1018 = vadd.xlane.f32.xlu1 %v1017_v0  ;;  %v1026_v6 = vsel %vm398_vm0, %v3303_v5, 0.0 }
 0x3af   : > { %v2860_v16 = vpop.eup %2859 }
 0x3b0   : > { %v1035_v17 = vsel %vm398_vm0, %v2860_v16, 0.0  ;;  %v2862_v18 = vpop.eup %2861 }
 0x3b1   : > { %1027 = vadd.xlane.f32.xlu0 %v1026_v6  ;;  %v1029_v8 = vsel %vm398_vm0, %v2862_v18, 0.0 }
 0x3be   : > { %1159 = vrot.lane.b32.xlu1 %v3223_v33, %s2991_s27 }
 0x3c2   : > { %1157 = vrot.lane.b32.xlu1 %v3231_v20, %s2991_s27 }
 0x3c7   : > { %1161 = vrot.lane.b32.xlu0 %v3221_v30, %s2991_s27 }
 0x3cb   : > { %1143 = vrot.lane.b32.xlu0 %v3210_v15, %s2991_s27 }
 0x3cf   : > { %1147 = vrot.lane.b32.xlu0 %v3273_v49, %s2991_s27 }
 0x3e6   : > { %1036 = vadd.xlane.f32.xlu1 %v1035_v17 }
 0x3ea   : > { %1030 = vadd.xlane.f32.xlu1 %v1029_v8 }
 0x3fb   : > { %1155 = vrot.lane.b32.xlu1 %v3242_v55, %s2991_s27 }
 0x3ff   : > { %1145 = vrot.lane.b32.xlu1 %v3271_v2, %s2991_s27 }
 0x403   : > { %1149 = vrot.lane.b32.xlu1 %v3283_v4, %s2991_s27 }
 0x42e   : > { %v1022_v13 = vpop.xlane.xlu0 %1021 }
 0x432   : > { %v1016_v19 = vpop.xlane.xlu0 %1015  ;;  %v1025_v22 = vpop.xlane.xlu1 %1024 }
 0x433   : > { %2863 = vrcp.f32 %v1025_v22 }
 0x434   : > { %2865 = vrcp.f32 %v1016_v19 }
 0x435   : > { %2867 = vrcp.f32 %v1022_v13 }
 0x436   : > { %v1034_v23 = vpop.xlane.xlu0 %1033  ;;  %v1019_v24 = vpop.xlane.xlu1 %1018 }
 0x437   : > { %2869 = vrcp.f32 %v1019_v24 }
 0x43a   : > { %v1028_v25 = vpop.xlane.xlu0 %1027  ;;  %v1160_v44 = vpop.permute.xlu1 %1159 }
 0x43b   : > { %v1182_v45 = vsel %vm868_vm1, %v1160_v44, 0 }
 0x43e   : > { %v1162_v26 = vpop.permute.xlu0 %1161  ;;  %v1158_v46 = vpop.permute.xlu1 %1157 }
 0x43f   : > { %2729 = vmatprep.subr.msk.bf16.mxu0 %vm868_vm1, %v1162_v26  ;;  %v1185_v43 = vsel %vm868_vm1, %v1162_v26, 0  ;;  %v1179_v47 = vsel %vm868_vm1, %v1158_v46, 0 }
 0x440   : > { %v2864_v27 = vpop.eup %2863 }
 0x441   : > { %v2866_v31 = vpop.eup %2865  ;;  %v1049_v35 = vmul.f32 %v2864_v27, %v2852_v39 }
 0x442   : > { %v2868_v32 = vpop.eup %2867  ;;  %v1046_v36 = vmul.f32 %v2866_v31, %v2850_v60 }
 0x443   : > { %v1048_v40 = vmul.f32 %v2868_v32, %v2848_v57 }
 0x444   : > { %v2870_v34 = vpop.eup %2869 }
 0x445   : > { %v1047_v37 = vmul.f32 %v2870_v34, %v2854_v63  ;;  %v1055_v42 = vpack.c.bf16 %v1049_v35, %v1048_v40  ;;  %v1144_v63 = vpop.permute.xlu0 %1143 }
 0x447   : > { %v1054_v41 = vpack.c.bf16 %v1047_v37, %v1046_v36 }
 0x449   : > { %2605 = vmatprep.mubr.msk.bf16.mxu0 %vm398_vm0, %v1054_v41  ;;  %v1148_v0 = vpop.permute.xlu0 %1147 }
 0x44a   : > { %2606 = vmatmul.mubr.msk.bf16.vlgmr.msra.gmra.mxu0 %vm398_vm0, %v1055_v42 }
 0x44b   : > { %2614 = vmatpush3.bf16.xpose.msra.mxu0 %v1185_v43 }
 0x44c   : > { %2730 = vmatprep.subr.msk.bf16.mxu0 %vm868_vm1, %v1160_v44 }
 0x453   : > { %2616 = vmatpush3.bf16.xpose.msra.mxu0 %v1182_v45 }
 0x454   : > { %2731 = vmatprep.subr.msk.bf16.mxu0 %vm868_vm1, %v1158_v46 }
 0x45b   : > { %2618 = vmatpush3.bf16.xpose.msra.mxu0 %v1179_v47 }
 0x46f   : > { %v1037_v50 = vpop.xlane.xlu1 %1036 }
 0x470   : > { %2871 = vrcp.f32 %v1037_v50 }
 0x471   : > { %2873 = vrcp.f32 %v1028_v25 }
 0x472   : > { %2875 = vrcp.f32 %v1034_v23 }
 0x473   : > { %v1031_v28 = vpop.xlane.xlu1 %1030 }
 0x474   : > { %2877 = vrcp.f32 %v1031_v28 }
 0x477   : > { %v1156_v51 = vpop.permute.xlu1 %1155 }
 0x478   : > { %v1176_v52 = vsel %vm868_vm1, %v1156_v51, 0  ;;  %2732 = vmatprep.subr.msk.bf16.mxu0 %vm868_vm1, %v1156_v51 }
 0x479   : > { %2620 = vmatpush3.bf16.xpose.msra.mxu0 %v1176_v52 }
 0x47b   : > { %v1146_v3 = vpop.permute.xlu1 %1145 }
 0x47d   : > { %v2872_v21 = vpop.eup %2871 }
 0x47e   : > { %v2874_v54 = vpop.eup %2873  ;;  %v1053_v57 = vmul.f32 %v2872_v21, %v2860_v16 }
 0x47f   : > { %v2876_v56 = vpop.eup %2875  ;;  %v1050_v59 = vmul.f32 %v2874_v54, %v3303_v5  ;;  %v1150_v6 = vpop.permute.xlu1 %1149 }
 0x480   : > { %v1052_v39 = vmul.f32 %v2876_v56, %v3298_v1 }
 0x481   : > { %v2878_v38 = vpop.eup %2877 }
 0x482   : > { %v1051_v60 = vmul.f32 %v2878_v38, %v2862_v18  ;;  %v1057_v62 = vpack.c.bf16 %v1053_v57, %v1052_v39 }
 0x484   : > { %v1056_v48 = vpack.c.bf16 %v1051_v60, %v1050_v59 }
 0x486   : > { %2609 = vmatprep.mubr.msk.bf16.mxu0 %vm398_vm0, %v1056_v48 }
 0x487   : > { %2610 = vmatmul.mubr.msk.bf16.gmra.mxu0 %vm398_vm0, %v1057_v62 }
 0x488   : > { %2621 = vmatprep.mubr.msk.bf16.mxu0 %vm868_vm1, %v1144_v63 }
 0x48f   : > { %2622 = vmatmul.mubr.msk.bf16.vlgmr.msra.gmra.mxu0 %vm868_vm1, %v1146_v3 }
 0x490   : > { %2625 = vmatprep.mubr.msk.bf16.mxu0 %vm868_vm1, %v1148_v0 }
 0x497   : > { %2626 = vmatmul.mubr.msk.bf16.gmra.mxu0 %vm868_vm1, %v1150_v6 }
 0x50a   : > { %v3343_v5 = vpop.f32.mrf.mxu0 }
 0x50c   : > { %v3345_v1 = vpop.f32.mrf.mxu0 }
 0x50e   : > { %v3347_v7 = vpop.f32.mrf.mxu0 }
 0x510   : > { %v3349_v9 = vpop.f32.mrf.mxu0 }
 0x547   : > { %v3351_v10 = vpop.f32.mrf.mxu0 }
 0x549   : > { %v3353_v11 = vpop.f32.mrf.mxu0 }
 0x54b   : > { %v3355_v12 = vpop.f32.mrf.mxu0 }
 0x54d   : > { %v3357_v14 = vpop.f32.mrf.mxu0 }
 0x54f   : > { %v2623_v16 = vpop.f32.mrf.mxu0 }
 0x550   : > { %v1254_v13 = vmul.f32 0.25, %v2623_v16 }
 0x551   : > { %v1221_v17 = vpop.f32.mrf.mxu0 }
 0x552   : > { %v1252_v18 = vmul.f32 0.25, %v1221_v17  ;;  %v1266_v26 = vsel %vm398_vm0, %v1254_v13, -inf }
 0x553   : > { %v2624_v8 = vpop.f32.mrf.mxu0 }
 0x554   : > { %v1260_v19 = vsel %vm398_vm0, %v1252_v18, -inf  ;;  %v1255_v25 = vmul.f32 0.25, %v2624_v8 }
 0x555   : > { %1261 = vmax.xlane.f32.xlu0 %v1260_v19  ;;  %v1224_v22 = vpop.f32.mrf.mxu0 }
 0x556   : > { %v1253_v23 = vmul.f32 0.25, %v1224_v22  ;;  %v1269_v36 = vsel %vm398_vm0, %v1255_v25, -inf }
 0x557   : > { %v2627_v24 = vpop.f32.mrf.mxu0 }
 0x558   : > { %v1263_v27 = vsel %vm398_vm0, %v1253_v23, -inf  ;;  %v1258_v34 = vmul.f32 0.25, %v2627_v24 }
 0x559   : > { %1267 = vmax.xlane.f32.xlu0 %v1266_v26  ;;  %1264 = vmax.xlane.f32.xlu1 %v1263_v27  ;;  %v1237_v31 = vpop.f32.mrf.mxu0 }
 0x55a   : > { %v1256_v42 = vmul.f32 0.25, %v1237_v31  ;;  %v1278_v43 = vsel %vm398_vm0, %v1258_v34, -inf }
 0x55b   : > { %v2628_v32 = vpop.f32.mrf.mxu0 }
 0x55c   : > { %v1259_v35 = vmul.f32 0.25, %v2628_v32  ;;  %v1272_v45 = vsel %vm398_vm0, %v1256_v42, -inf }
 0x55d   : > { %1270 = vmax.xlane.f32.xlu0 %v1269_v36  ;;  %v1240_v37 = vpop.f32.mrf.mxu0 }
 0x55e   : > { %v1257_v40 = vmul.f32 0.25, %v1240_v37  ;;  %v1281_v41 = vsel %vm398_vm0, %v1259_v35, -inf }
 0x55f   : > { %1282 = vmax.xlane.f32.xlu1 %v1281_v41 }
 0x560   : > { %v1275_v44 = vsel %vm398_vm0, %v1257_v40, -inf }
 0x561   : > { %1279 = vmax.xlane.f32.xlu0 %v1278_v43 }
 0x563   : > { %1276 = vmax.xlane.f32.xlu1 %v1275_v44 }
 0x565   : > { %1273 = vmax.xlane.f32.xlu0 %v1272_v45 }
 0x574   : > { %1360 = vrot.lane.b32.xlu1 %v3244_v29, %s2991_s27 }
 0x578   : > { %1358 = vrot.lane.b32.xlu1 %v3253_v58, %s2991_s27 }
 0x57b   : > { %1362 = vrot.lane.b32.xlu0 %v3240_v53, %s2991_s27 }
 0x57c   : > { %1356 = vrot.lane.b32.xlu1 %v3257_v61, %s2991_s27 }
 0x5de   : > { %v1262_v46 = vpop.xlane.xlu0 %1261 }
 0x5df   : > { %v1284_v47 = vsub.f32 %v1252_v18, %v1262_v46 }
 0x5e1   : > { %v1292_v52 = vmul.f32 1.442695, %v1284_v47 }
 0x5e2   : > { %v1268_v50 = vpop.xlane.xlu0 %1267  ;;  %v1265_v28 = vpop.xlane.xlu1 %1264 }
 0x5e3   : > { %v1286_v51 = vsub.f32 %v1254_v13, %v1268_v50  ;;  %v1285_v54 = vsub.f32 %v1253_v23, %v1265_v28 }
 0x5e5   : > { %v1296_v21 = vmul.f32 1.442695, %v1286_v51  ;;  %v1294_v59 = vmul.f32 1.442695, %v1285_v54 }
 0x5e6   : > { %v1271_v56 = vpop.xlane.xlu0 %1270 }
 0x5e7   : > { %2879 = vpow2.f32 %v1296_v21  ;;  %v1287_v38 = vsub.f32 %v1255_v25, %v1271_v56 }
 0x5e8   : > { %v1283_v57 = vpop.xlane.xlu1 %1282  ;;  %2881 = vpow2.f32 %v1292_v52 }
 0x5e9   : > { %v1298_v60 = vmul.f32 1.442695, %v1287_v38  ;;  %v1291_v39 = vsub.f32 %v1259_v35, %v1283_v57 }
 0x5ea   : > { %v1280_v48 = vpop.xlane.xlu0 %1279 }
 0x5eb   : > { %2883 = vpow2.f32 %v1298_v60  ;;  %v1290_v62 = vsub.f32 %v1258_v34, %v1280_v48  ;;  %v1306_v3 = vmul.f32 1.442695, %v1291_v39 }
 0x5ec   : > { %v1277_v63 = vpop.xlane.xlu1 %1276  ;;  %2885 = vpow2.f32 %v1294_v59 }
 0x5ed   : > { %v1304_v0 = vmul.f32 1.442695, %v1290_v62  ;;  %v1289_v6 = vsub.f32 %v1257_v40, %v1277_v63 }
 0x5ee   : > { %v1274_v16 = vpop.xlane.xlu0 %1273 }
 0x5ef   : > { %2887 = vpow2.f32 %v1304_v0  ;;  %v1288_v17 = vsub.f32 %v1256_v42, %v1274_v16  ;;  %v1302_v8 = vmul.f32 1.442695, %v1289_v6 }
 0x5f0   : > { %v1361_v18 = vpop.permute.xlu1 %1360  ;;  %2889 = vpow2.f32 %v1306_v3 }
 0x5f1   : > { %v1300_v13 = vmul.f32 1.442695, %v1288_v17 }
 0x5f2   : > { %v1363_v19 = vpop.permute.xlu0 %1362 }
 0x5f3   : > { %2891 = vpow2.f32 %v1300_v13  ;;  %2629 = vmatprep.subr.bf16.mxu1 %v1363_v19 }
 0x5f4   : > { %v3375_v22 = vpop.eup %2879  ;;  %2630 = vmatpush3.bf16.msra.mxu1 %v1363_v19  ;;  %2893 = vpow2.f32 %v1302_v8  ;;  %v1359_v25 = vpop.permute.xlu1 %1358 }
 0x5f5   : > { %2631 = vmatprep.subr.bf16.mxu1 %v1361_v18  ;;  %v1314_v23 = vsel %vm398_vm0, %v3375_v22, 0.0  ;;  %v2882_v24 = vpop.eup %2881 }
 0x5f6   : > { %1315 = vadd.xlane.f32.xlu0 %v1314_v23  ;;  %v1308_v27 = vsel %vm398_vm0, %v2882_v24, 0.0 }
 0x5f8   : > { %v2884_v26 = vpop.eup %2883  ;;  %2632 = vmatpush3.bf16.msra.mxu1 %v1361_v18  ;;  %v1357_v35 = vpop.permute.xlu1 %1356 }
 0x5f9   : > { %2633 = vmatprep.subr.bf16.mxu1 %v1359_v25  ;;  %v1317_v31 = vsel %vm398_vm0, %v2884_v26, 0.0  ;;  %v2886_v32 = vpop.eup %2885 }
 0x5fa   : > { %1309 = vadd.xlane.f32.xlu0 %v1308_v27  ;;  %1318 = vadd.xlane.f32.xlu1 %v1317_v31  ;;  %v1311_v37 = vsel %vm398_vm0, %v2886_v32, 0.0 }
 0x5fc   : > { %v3381_v34 = vpop.eup %2887  ;;  %2634 = vmatpush3.bf16.msra.mxu1 %v1359_v25 }
 0x5fd   : > { %2635 = vmatprep.subr.bf16.mxu1 %v1357_v35  ;;  %v1326_v36 = vsel %vm398_vm0, %v3381_v34, 0.0  ;;  %v2890_v40 = vpop.eup %2889 }
 0x5fe   : > { %1327 = vadd.xlane.f32.xlu0 %v1326_v36  ;;  %1312 = vadd.xlane.f32.xlu1 %v1311_v37  ;;  %v1329_v43 = vsel %vm398_vm0, %v2890_v40, 0.0 }
 0x600   : > { %v2892_v41 = vpop.eup %2891  ;;  %2636 = vmatpush3.bf16.msra.mxu1 %v1357_v35 }
 0x601   : > { %v1320_v42 = vsel %vm398_vm0, %v2892_v41, 0.0  ;;  %v2894_v44 = vpop.eup %2893 }
 0x602   : > { %1321 = vadd.xlane.f32.xlu1 %v1320_v42  ;;  %1330 = vadd.xlane.f32.xlu0 %v1329_v43  ;;  %v1323_v45 = vsel %vm398_vm0, %v2894_v44, 0.0 }
 0x606   : > { %1324 = vadd.xlane.f32.xlu0 %v1323_v45 }
 0x613   : > { %1457 = vrot.lane.b32.xlu1 %v3223_v33, %s2992_s28 }
 0x617   : > { %1455 = vrot.lane.b32.xlu1 %v3231_v20, %s2992_s28 }
 0x61b   : > { %1453 = vrot.lane.b32.xlu1 %v3242_v55, %s2992_s28 }
 0x61c   : > { %1459 = vrot.lane.b32.xlu0 %v3221_v30, %s2992_s28 }
 0x61f   : > { %1447 = vrot.lane.b32.xlu1 %v3271_v2, %s2992_s28 }
 0x620   : > { %1445 = vrot.lane.b32.xlu0 %v3210_v15, %s2992_s28 }
 0x623   : > { %1451 = vrot.lane.b32.xlu1 %v3283_v4, %s2992_s28 }
 0x624   : > { %1449 = vrot.lane.b32.xlu0 %v3273_v49, %s2992_s28 }
 0x67f   : > { %v1316_v46 = vpop.xlane.xlu0 %1315 }
 0x683   : > { %v1310_v47 = vpop.xlane.xlu0 %1309  ;;  %v1319_v50 = vpop.xlane.xlu1 %1318 }
 0x684   : > { %2895 = vrcp.f32 %v1319_v50 }
 0x685   : > { %2897 = vrcp.f32 %v1310_v47 }
 0x686   : > { %2899 = vrcp.f32 %v1316_v46 }
 0x687   : > { %v1328_v28 = vpop.xlane.xlu0 %1327  ;;  %v1313_v51 = vpop.xlane.xlu1 %1312 }
 0x688   : > { %2901 = vrcp.f32 %v1313_v51 }
 0x68b   : > { %v1331_v52 = vpop.xlane.xlu0 %1330  ;;  %v1322_v21 = vpop.xlane.xlu1 %1321 }
 0x68c   : > { %2903 = vrcp.f32 %v1331_v52 }
 0x68d   : > { %2905 = vrcp.f32 %v1322_v21 }
 0x68e   : > { %2907 = vrcp.f32 %v1328_v28 }
 0x68f   : > { %v1325_v54 = vpop.xlane.xlu0 %1324  ;;  %v1458_v13 = vpop.permute.xlu1 %1457 }
 0x690   : > { %2909 = vrcp.f32 %v1325_v54  ;;  %v1480_v27 = vsel %vm868_vm1, %v1458_v13, 0 }
 0x691   : > { %v2896_v56 = vpop.eup %2895 }
 0x692   : > { %v2898_v57 = vpop.eup %2897  ;;  %v1343_v39 = vmul.f32 %v2896_v56, %v2884_v26 }
 0x693   : > { %v1460_v38 = vpop.permute.xlu0 %1459  ;;  %v2900_v59 = vpop.eup %2899  ;;  %v1340_v48 = vmul.f32 %v2898_v57, %v2882_v24 }
 0x694   : > { %2733 = vmatprep.subr.msk.bf16.mxu1 %vm868_vm1, %v1460_v38  ;;  %v1342_v63 = vmul.f32 %v2900_v59, %v3375_v22  ;;  %v1483_v18 = vsel %vm868_vm1, %v1460_v38, 0 }
 0x695   : > { %v2902_v60 = vpop.eup %2901 }
 0x696   : > { %v1341_v62 = vmul.f32 %v2902_v60, %v2886_v32  ;;  %v1349_v6 = vpack.c.bf16 %v1343_v39, %v1342_v63  ;;  %v1456_v32 = vpop.permute.xlu1 %1455 }
 0x697   : > { %v1446_v31 = vpop.permute.xlu0 %1445  ;;  %v1477_v35 = vsel %vm868_vm1, %v1456_v32, 0 }
 0x698   : > { %v1348_v3 = vpack.c.bf16 %v1341_v62, %v1340_v48 }
 0x699   : > { %v2904_v0 = vpop.eup %2903 }
 0x69a   : > { %v2906_v16 = vpop.eup %2905  ;;  %2637 = vmatprep.mubr.msk.bf16.mxu1 %vm398_vm0, %v1348_v3  ;;  %v1347_v24 = vmul.f32 %v2904_v0, %v2890_v40  ;;  %v1454_v36 = vpop.permute.xlu1 %1453 }
 0x69b   : > { %v2908_v17 = vpop.eup %2907  ;;  %2638 = vmatmul.mubr.msk.bf16.vlgmr.msra.gmra.mxu1 %vm398_vm0, %v1349_v6  ;;  %v1344_v19 = vmul.f32 %v2906_v16, %v2892_v41  ;;  %v1450_v40 = vpop.permute.xlu0 %1449 }
 0x69c   : > { %2646 = vmatpush3.bf16.xpose.msra.mxu1 %v1483_v18  ;;  %v1346_v25 = vmul.f32 %v2908_v17, %v3381_v34  ;;  %v1474_v34 = vsel %vm868_vm1, %v1454_v36, 0 }
 0x69d   : > { %v2910_v8 = vpop.eup %2909  ;;  %2734 = vmatprep.subr.msk.bf16.mxu1 %vm868_vm1, %v1458_v13 }
 0x69e   : > { %v1345_v23 = vmul.f32 %v2910_v8, %v2894_v44  ;;  %v1351_v26 = vpack.c.bf16 %v1347_v24, %v1346_v25  ;;  %v1448_v37 = vpop.permute.xlu1 %1447 }
 0x6a0   : > { %v1350_v22 = vpack.c.bf16 %v1345_v23, %v1344_v19 }
 0x6a2   : > { %2641 = vmatprep.mubr.msk.bf16.mxu1 %vm398_vm0, %v1350_v22  ;;  %v1452_v41 = vpop.permute.xlu1 %1451 }
 0x6a3   : > { %2642 = vmatmul.mubr.msk.bf16.gmra.mxu1 %vm398_vm0, %v1351_v26 }
 0x6a4   : > { %2648 = vmatpush3.bf16.xpose.msra.mxu1 %v1480_v27  ;;  %2653 = vmatprep.mubr.msk.bf16.mxu1 %vm868_vm1, %v1446_v31 }
 0x6a5   : > { %2735 = vmatprep.subr.msk.bf16.mxu1 %vm868_vm1, %v1456_v32 }
 0x6ac   : > { %2650 = vmatpush3.bf16.xpose.msra.mxu1 %v1477_v35 }
 0x6ad   : > { %2736 = vmatprep.subr.msk.bf16.mxu1 %vm868_vm1, %v1454_v36 }
 0x6b4   : > { %2652 = vmatpush3.bf16.xpose.msra.mxu1 %v1474_v34 }
 0x6bb   : > { %2654 = vmatmul.mubr.msk.bf16.vlgmr.msra.gmra.mxu1 %vm868_vm1, %v1448_v37 }
 0x6bc   : > { %2657 = vmatprep.mubr.msk.bf16.mxu1 %vm868_vm1, %v1450_v40 }
 0x6c3   : > { %2658 = vmatmul.mubr.msk.bf16.gmra.mxu1 %vm868_vm1, %v1452_v41 }
 0x75b   : > { %v3423_v42 = vpop.f32.mrf.mxu1 }
 0x75d   : > { %v3425_v43 = vpop.f32.mrf.mxu1 }
 0x75f   : > { %v3427_v44 = vpop.f32.mrf.mxu1 }
 0x760   : > { %v2760_v45 = vpack.i.bf16 %v3427_v44, %v3423_v42 }
 0x761   : > { %v3431_v46 = vpop.f32.mrf.mxu1 }
 0x762   : > { %v2755_v47 = vpack.i.bf16 %v3431_v46, %v3425_v43 }
 0x763   : > { %v3435_v50 = vpop.f32.mrf.mxu1 }
 0x765   : > { %v3437_v28 = vpop.f32.mrf.mxu1 }
 0x767   : > { %v3439_v51 = vpop.f32.mrf.mxu1 }
 0x768   : > { %v2780_v52 = vpack.i.bf16 %v3439_v51, %v3435_v50 }
 0x769   : > { %v3443_v21 = vpop.f32.mrf.mxu1 }
 0x76a   : > { %v2775_v54 = vpack.i.bf16 %v3443_v21, %v3437_v28 }
 0x77b   : > { %v2655_v56 = vpop.f32.mrf.mxu1 }
 0x77c   : > { %v1552_v60 = vmul.f32 0.25, %v2655_v56 }
 0x77d   : > { %v1519_v38 = vpop.f32.mrf.mxu1 }
 0x77e   : > { %v1550_v57 = vmul.f32 0.25, %v1519_v38  ;;  %v1564_v0 = vsel %vm398_vm0, %v1552_v60, -inf }
 0x77f   : > { %v2656_v59 = vpop.f32.mrf.mxu1 }
 0x780   : > { %v1558_v39 = vsel %vm398_vm0, %v1550_v57, -inf  ;;  %v1553_v3 = vmul.f32 0.25, %v2656_v59 }
 0x781   : > { %1559 = vmax.xlane.f32.xlu0 %v1558_v39  ;;  %v1522_v48 = vpop.f32.mrf.mxu1 }
 0x782   : > { %v1551_v62 = vmul.f32 0.25, %v1522_v48  ;;  %v1567_v13 = vsel %vm398_vm0, %v1553_v3, -inf }
 0x783   : > { %v2659_v63 = vpop.f32.mrf.mxu1 }
 0x784   : > { %v1561_v6 = vsel %vm398_vm0, %v1551_v62, -inf  ;;  %v1556_v18 = vmul.f32 0.25, %v2659_v63 }
 0x785   : > { %1565 = vmax.xlane.f32.xlu0 %v1564_v0  ;;  %1562 = vmax.xlane.f32.xlu1 %v1561_v6  ;;  %v1535_v16 = vpop.f32.mrf.mxu1 }
 0x786   : > { %v1554_v22 = vmul.f32 0.25, %v1535_v16  ;;  %v1576_v25 = vsel %vm398_vm0, %v1556_v18, -inf }
 0x787   : > { %v2660_v17 = vpop.f32.mrf.mxu1 }
 0x788   : > { %v1557_v8 = vmul.f32 0.25, %v2660_v17  ;;  %v1570_v27 = vsel %vm398_vm0, %v1554_v22, -inf }
 0x789   : > { %1568 = vmax.xlane.f32.xlu0 %v1567_v13  ;;  %v1538_v19 = vpop.f32.mrf.mxu1 }
 0x78a   : > { %v1555_v23 = vmul.f32 0.25, %v1538_v19  ;;  %v1579_v24 = vsel %vm398_vm0, %v1557_v8, -inf }
 0x78b   : > { %1580 = vmax.xlane.f32.xlu1 %v1579_v24 }
 0x78c   : > { %v1573_v26 = vsel %vm398_vm0, %v1555_v23, -inf }
 0x78d   : > { %1577 = vmax.xlane.f32.xlu0 %v1576_v25 }
 0x78f   : > { %1574 = vmax.xlane.f32.xlu1 %v1573_v26 }
 0x791   : > { %1571 = vmax.xlane.f32.xlu0 %v1570_v27 }
 0x7a0   : > { %1654 = vrot.lane.b32.xlu1 %v3244_v29, %s2992_s28 }
 0x7a4   : > { %1652 = vrot.lane.b32.xlu1 %v3253_v58, %s2992_s28 }
 0x7a7   : > { %1656 = vrot.lane.b32.xlu0 %v3240_v53, %s2992_s28 }
 0x7a8   : > { %1650 = vrot.lane.b32.xlu1 %v3257_v61, %s2992_s28 }
 0x80a   : > { %v1560_v31 = vpop.xlane.xlu0 %1559 }
 0x80b   : > { %v1582_v32 = vsub.f32 %v1550_v57, %v1560_v31 }
 0x80d   : > { %v1590_v37 = vmul.f32 1.442695, %v1582_v32 }
 0x80e   : > { %v1566_v35 = vpop.xlane.xlu0 %1565  ;;  %v1563_v36 = vpop.xlane.xlu1 %1562 }
 0x80f   : > { %v1584_v34 = vsub.f32 %v1552_v60, %v1566_v35  ;;  %v1583_v41 = vsub.f32 %v1551_v62, %v1563_v36 }
 0x811   : > { %v1594_v40 = vmul.f32 1.442695, %v1584_v34  ;;  %v1592_v39 = vmul.f32 1.442695, %v1583_v41 }
 0x812   : > { %v1569_v56 = vpop.xlane.xlu0 %1568 }
 0x813   : > { %2911 = vpow2.f32 %v1594_v40  ;;  %v1585_v38 = vsub.f32 %v1553_v3, %v1569_v56 }
 0x814   : > { %v1581_v59 = vpop.xlane.xlu1 %1580  ;;  %2913 = vpow2.f32 %v1590_v37 }
 0x815   : > { %v1596_v48 = vmul.f32 1.442695, %v1585_v38  ;;  %v1589_v63 = vsub.f32 %v1557_v8, %v1581_v59 }
 0x816   : > { %v1578_v0 = vpop.xlane.xlu0 %1577 }
 0x817   : > { %2915 = vpow2.f32 %v1596_v48  ;;  %v1588_v6 = vsub.f32 %v1556_v18, %v1578_v0  ;;  %v1604_v57 = vmul.f32 1.442695, %v1589_v63 }
 0x818   : > { %v1575_v16 = vpop.xlane.xlu1 %1574  ;;  %2917 = vpow2.f32 %v1592_v39 }
 0x819   : > { %v1602_v17 = vmul.f32 1.442695, %v1588_v6  ;;  %v1587_v13 = vsub.f32 %v1555_v23, %v1575_v16 }
 0x81a   : > { %v1572_v60 = vpop.xlane.xlu0 %1571 }
 0x81b   : > { %2919 = vpow2.f32 %v1602_v17  ;;  %v1586_v19 = vsub.f32 %v1554_v22, %v1572_v60  ;;  %v1600_v24 = vmul.f32 1.442695, %v1587_v13 }
 0x81c   : > { %v1655_v62 = vpop.permute.xlu1 %1654  ;;  %2921 = vpow2.f32 %v1604_v57 }
 0x81d   : > { %v1598_v3 = vmul.f32 1.442695, %v1586_v19 }
 0x81e   : > { %v1657_v25 = vpop.permute.xlu0 %1656 }
 0x81f   : > { %2923 = vpow2.f32 %v1598_v3  ;;  %2661 = vmatprep.subr.bf16.mxu0 %v1657_v25 }
 0x820   : > { %v3463_v26 = vpop.eup %2911  ;;  %2662 = vmatpush3.bf16.msra.mxu0 %v1657_v25  ;;  %2925 = vpow2.f32 %v1600_v24  ;;  %v1653_v23 = vpop.permute.xlu1 %1652 }
 0x821   : > { %2663 = vmatprep.subr.bf16.mxu0 %v1655_v62  ;;  %v1612_v18 = vsel %vm398_vm0, %v3463_v26, 0.0  ;;  %v2914_v8 = vpop.eup %2913 }
 0x822   : > { %1613 = vadd.xlane.f32.xlu0 %v1612_v18  ;;  %v1606_v22 = vsel %vm398_vm0, %v2914_v8, 0.0 }
 0x824   : > { %v2916_v27 = vpop.eup %2915  ;;  %2664 = vmatpush3.bf16.msra.mxu0 %v1655_v62  ;;  %v1651_v36 = vpop.permute.xlu1 %1650 }
 0x825   : > { %2665 = vmatprep.subr.bf16.mxu0 %v1653_v23  ;;  %v1615_v31 = vsel %vm398_vm0, %v2916_v27, 0.0  ;;  %v2918_v32 = vpop.eup %2917 }
 0x826   : > { %1607 = vadd.xlane.f32.xlu0 %v1606_v22  ;;  %1616 = vadd.xlane.f32.xlu1 %v1615_v31  ;;  %v1609_v37 = vsel %vm398_vm0, %v2918_v32, 0.0 }
 0x828   : > { %v3469_v35 = vpop.eup %2919  ;;  %2666 = vmatpush3.bf16.msra.mxu0 %v1653_v23 }
 0x829   : > { %2667 = vmatprep.subr.bf16.mxu0 %v1651_v36  ;;  %v1624_v34 = vsel %vm398_vm0, %v3469_v35, 0.0  ;;  %v2922_v40 = vpop.eup %2921 }
 0x82a   : > { %1625 = vadd.xlane.f32.xlu0 %v1624_v34  ;;  %1610 = vadd.xlane.f32.xlu1 %v1609_v37  ;;  %v1627_v38 = vsel %vm398_vm0, %v2922_v40, 0.0 }
 0x82c   : > { %v2924_v41 = vpop.eup %2923  ;;  %2668 = vmatpush3.bf16.msra.mxu0 %v1651_v36 }
 0x82d   : > { %v1618_v56 = vsel %vm398_vm0, %v2924_v41, 0.0  ;;  %v2926_v59 = vpop.eup %2925 }
 0x82e   : > { %1619 = vadd.xlane.f32.xlu1 %v1618_v56  ;;  %1628 = vadd.xlane.f32.xlu0 %v1627_v38  ;;  %v1621_v39 = vsel %vm398_vm0, %v2926_v59, 0.0 }
 0x832   : > { %1622 = vadd.xlane.f32.xlu0 %v1621_v39 }
 0x83f   : > { %1751 = vrot.lane.b32.xlu1 %v3223_v33, %s2993_s29 }
 0x843   : > { %1749 = vrot.lane.b32.xlu1 %v3231_v20, %s2993_s29 }
 0x847   : > { %1747 = vrot.lane.b32.xlu1 %v3242_v55, %s2993_s29 }
 0x848   : > { %1753 = vrot.lane.b32.xlu0 %v3221_v30, %s2993_s29 }
 0x84b   : > { %1741 = vrot.lane.b32.xlu1 %v3271_v2, %s2993_s29 }
 0x84c   : > { %1739 = vrot.lane.b32.xlu0 %v3210_v15, %s2993_s29 }
 0x84f   : > { %1745 = vrot.lane.b32.xlu1 %v3283_v4, %s2993_s29 }
 0x850   : > { %1743 = vrot.lane.b32.xlu0 %v3273_v49, %s2993_s29 }
 0x8ab   : > { %v1614_v33 = vpop.xlane.xlu0 %1613 }
 0x8af   : > { %v1608_v20 = vpop.xlane.xlu0 %1607  ;;  %v1617_v48 = vpop.xlane.xlu1 %1616 }
 0x8b0   : > { %2927 = vrcp.f32 %v1617_v48 }
 0x8b1   : > { %2929 = vrcp.f32 %v1608_v20 }
 0x8b2   : > { %2931 = vrcp.f32 %v1614_v33 }
 0x8b3   : > { %v1626_v55 = vpop.xlane.xlu0 %1625  ;;  %v1611_v63 = vpop.xlane.xlu1 %1610 }
 0x8b4   : > { %2933 = vrcp.f32 %v1611_v63 }
 0x8b7   : > { %v1629_v30 = vpop.xlane.xlu0 %1628  ;;  %v1620_v2 = vpop.xlane.xlu1 %1619 }
 0x8b8   : > { %2935 = vrcp.f32 %v1629_v30 }
 0x8b9   : > { %2937 = vrcp.f32 %v1620_v2 }
 0x8ba   : > { %2939 = vrcp.f32 %v1626_v55 }
 0x8bb   : > { %v1623_v15 = vpop.xlane.xlu0 %1622  ;;  %v1752_v22 = vpop.permute.xlu1 %1751 }
 0x8bc   : > { %2941 = vrcp.f32 %v1623_v15  ;;  %v1774_v34 = vsel %vm868_vm1, %v1752_v22, 0 }
 0x8bd   : > { %v2928_v4 = vpop.eup %2927 }
 0x8be   : > { %v2930_v6 = vpop.eup %2929  ;;  %v1641_v57 = vmul.f32 %v2928_v4, %v2916_v27 }
 0x8bf   : > { %v1754_v0 = vpop.permute.xlu0 %1753  ;;  %v2932_v49 = vpop.eup %2931  ;;  %v1638_v17 = vmul.f32 %v2930_v6, %v2914_v8 }
 0x8c0   : > { %2737 = vmatprep.subr.msk.bf16.mxu0 %vm868_vm1, %v1754_v0  ;;  %v1640_v60 = vmul.f32 %v2932_v49, %v3463_v26  ;;  %v1777_v18 = vsel %vm868_vm1, %v1754_v0, 0  ;;  %v1750_v56 = vpop.permute.xlu1 %1749 }
 0x8c1   : > { %v2934_v16 = vpop.eup %2933 }
 0x8c2   : > { %v1639_v13 = vmul.f32 %v2934_v16, %v2918_v32  ;;  %v1647_v24 = vpack.c.bf16 %v1641_v57, %v1640_v60 }
 0x8c3   : > { %v1740_v37 = vpop.permute.xlu0 %1739 }
 0x8c4   : > { %v1646_v19 = vpack.c.bf16 %v1639_v13, %v1638_v17 }
 0x8c5   : > { %v2936_v62 = vpop.eup %2935 }
 0x8c6   : > { %v2938_v3 = vpop.eup %2937  ;;  %2669 = vmatprep.mubr.msk.bf16.mxu0 %vm398_vm0, %v1646_v19  ;;  %v1645_v31 = vmul.f32 %v2936_v62, %v2922_v40  ;;  %v1748_v40 = vpop.permute.xlu1 %1747 }
 0x8c7   : > { %v2940_v25 = vpop.eup %2939  ;;  %2670 = vmatmul.mubr.msk.bf16.vlgmr.msra.gmra.mxu0 %vm398_vm0, %v1647_v24  ;;  %v1642_v8 = vmul.f32 %v2938_v3, %v2924_v41  ;;  %v1771_v41 = vsel %vm868_vm1, %v1750_v56, 0 }
 0x8c8   : > { %2678 = vmatpush3.bf16.xpose.msra.mxu0 %v1777_v18  ;;  %v1644_v32 = vmul.f32 %v2940_v25, %v3469_v35  ;;  %v1768_v35 = vsel %vm868_vm1, %v1748_v40, 0 }
 0x8c9   : > { %v2942_v23 = vpop.eup %2941  ;;  %2738 = vmatprep.subr.msk.bf16.mxu0 %vm868_vm1, %v1752_v22 }
 0x8ca   : > { %v1643_v27 = vmul.f32 %v2942_v23, %v2926_v59  ;;  %v1649_v36 = vpack.c.bf16 %v1645_v31, %v1644_v32  ;;  %v1742_v38 = vpop.permute.xlu1 %1741  ;;  %v1744_v59 = vpop.permute.xlu0 %1743 }
 0x8cc   : > { %v1648_v26 = vpack.c.bf16 %v1643_v27, %v1642_v8 }
 0x8ce   : > { %2673 = vmatprep.mubr.msk.bf16.mxu0 %vm398_vm0, %v1648_v26  ;;  %v1746_v39 = vpop.permute.xlu1 %1745 }
 0x8cf   : > { %2674 = vmatmul.mubr.msk.bf16.gmra.mxu0 %vm398_vm0, %v1649_v36 }
 0x8d0   : > { %2680 = vmatpush3.bf16.xpose.msra.mxu0 %v1774_v34  ;;  %2685 = vmatprep.mubr.msk.bf16.mxu0 %vm868_vm1, %v1740_v37 }
 0x8d1   : > { %2739 = vmatprep.subr.msk.bf16.mxu0 %vm868_vm1, %v1750_v56 }
 0x8d8   : > { %2682 = vmatpush3.bf16.xpose.msra.mxu0 %v1771_v41 }
 0x8d9   : > { %2740 = vmatprep.subr.msk.bf16.mxu0 %vm868_vm1, %v1748_v40 }
 0x8e0   : > { %2684 = vmatpush3.bf16.xpose.msra.mxu0 %v1768_v35 }
 0x8e7   : > { %2686 = vmatmul.mubr.msk.bf16.vlgmr.msra.gmra.mxu0 %vm868_vm1, %v1742_v38 }
 0x8e8   : > { %2689 = vmatprep.mubr.msk.bf16.mxu0 %vm868_vm1, %v1744_v59 }
 0x8ef   : > { %2690 = vmatmul.mubr.msk.bf16.gmra.mxu0 %vm868_vm1, %v1746_v39 }
 0x987   : > { %v3511_v33 = vpop.f32.mrf.mxu0 }
 0x989   : > { %v3513_v20 = vpop.f32.mrf.mxu0 }
 0x98b   : > { %v3515_v48 = vpop.f32.mrf.mxu0 }
 0x98c   : > { %v2770_v55 = vpack.i.bf16 %v3515_v48, %v3511_v33 }
 0x98d   : > { %v3519_v63 = vpop.f32.mrf.mxu0 }
 0x98e   : > { %v2765_v30 = vpack.i.bf16 %v3519_v63, %v3513_v20 }
 0x98f   : > { %v3523_v2 = vpop.f32.mrf.mxu0 }
 0x991   : > { %v3525_v15 = vpop.f32.mrf.mxu0 }
 0x993   : > { %v3527_v4 = vpop.f32.mrf.mxu0 }
 0x994   : > { %v2800_v0 = vpack.i.bf16 %v3527_v4, %v3523_v2 }
 0x995   : > { %v3531_v6 = vpop.f32.mrf.mxu0 }
 0x996   : > { %v2795_v49 = vpack.i.bf16 %v3531_v6, %v3525_v15 }
 0x9a7   : > { %v2687_v16 = vpop.f32.mrf.mxu0 }
 0x9a8   : > { %v1846_v60 = vmul.f32 0.25, %v2687_v16 }
 0x9a9   : > { %v1813_v57 = vpop.f32.mrf.mxu0 }
 0x9aa   : > { %v1844_v17 = vmul.f32 0.25, %v1813_v57  ;;  %v1858_v18 = vsel %vm398_vm0, %v1846_v60, -inf }
 0x9ab   : > { %v2688_v13 = vpop.f32.mrf.mxu0 }
 0x9ac   : > { %v1852_v19 = vsel %vm398_vm0, %v1844_v17, -inf  ;;  %v1847_v25 = vmul.f32 0.25, %v2688_v13 }
 0x9ad   : > { %1853 = vmax.xlane.f32.xlu0 %v1852_v19  ;;  %v1816_v62 = vpop.f32.mrf.mxu0 }
 0x9ae   : > { %v1845_v24 = vmul.f32 0.25, %v1816_v62  ;;  %v1861_v31 = vsel %vm398_vm0, %v1847_v25, -inf }
 0x9af   : > { %v2691_v3 = vpop.f32.mrf.mxu0 }
 0x9b0   : > { %v1855_v23 = vsel %vm398_vm0, %v1845_v24, -inf  ;;  %v1850_v36 = vmul.f32 0.25, %v2691_v3 }
 0x9b1   : > { %1859 = vmax.xlane.f32.xlu0 %v1858_v18  ;;  %1856 = vmax.xlane.f32.xlu1 %v1855_v23  ;;  %v1829_v22 = vpop.f32.mrf.mxu0 }
 0x9b2   : > { %v1848_v27 = vmul.f32 0.25, %v1829_v22  ;;  %v1870_v41 = vsel %vm398_vm0, %v1850_v36, -inf }
 0x9b3   : > { %v2692_v8 = vpop.f32.mrf.mxu0 }
 0x9b4   : > { %v1851_v34 = vmul.f32 0.25, %v2692_v8  ;;  %v1864_v37 = vsel %vm398_vm0, %v1848_v27, -inf }
 0x9b5   : > { %1862 = vmax.xlane.f32.xlu0 %v1861_v31  ;;  %v1832_v26 = vpop.f32.mrf.mxu0 }
 0x9b6   : > { %v3539_v32 = vmul.f32 0.25, %v1832_v26  ;;  %v1873_v40 = vsel %vm398_vm0, %v1851_v34, -inf }
 0x9b8   : > { %v1867_v56 = vsel %vm398_vm0, %v3539_v32, -inf }
 0x9b9   : > { %1865 = vmax.xlane.f32.xlu0 %v1864_v37  ;;  %1868 = vmax.xlane.f32.xlu1 %v1867_v56 }
 0x9bd   : > { %1871 = vmax.xlane.f32.xlu0 %v1870_v41  ;;  %1874 = vmax.xlane.f32.xlu1 %v1873_v40 }
 0xa36   : > { %v1854_v35 = vpop.xlane.xlu0 %1853 }
 0xa37   : > { %v1876_v38 = vsub.f32 %v1844_v17, %v1854_v35 }
 0xa39   : > { %v1884_v57 = vmul.f32 1.442695, %v1876_v38 }
 0xa3a   : > { %v1860_v59 = vpop.xlane.xlu0 %1859  ;;  %v1857_v39 = vpop.xlane.xlu1 %1856 }
 0xa3b   : > { %v1878_v16 = vsub.f32 %v1846_v60, %v1860_v59  ;;  %v1877_v19 = vsub.f32 %v1845_v24, %v1857_v39 }
 0xa3d   : > { %v1888_v13 = vmul.f32 1.442695, %v1878_v16  ;;  %v1886_v18 = vmul.f32 1.442695, %v1877_v19 }
 0xa3e   : > { %v1863_v62 = vpop.xlane.xlu0 %1862 }
 0xa3f   : > { %2943 = vpow2.f32 %v1888_v13  ;;  %v1879_v3 = vsub.f32 %v1847_v25, %v1863_v62 }
 0xa40   : > { %2945 = vpow2.f32 %v1884_v57 }
 0xa41   : > { %v1890_v23 = vmul.f32 1.442695, %v1879_v3 }
 0xa42   : > { %v1866_v22 = vpop.xlane.xlu0 %1865  ;;  %v1869_v16 = vpop.xlane.xlu1 %1868 }
 0xa43   : > { %2947 = vpow2.f32 %v1890_v23  ;;  %v1880_v8 = vsub.f32 %v1848_v27, %v1866_v22  ;;  %v1881_v19 = vsub.f32 %v3539_v32, %v1869_v16 }
 0xa44   : > { %2949 = vpow2.f32 %v1886_v18 }
 0xa45   : > { %v1892_v37 = vmul.f32 1.442695, %v1880_v8 }
 0xa46   : > { %v1872_v31 = vpop.xlane.xlu0 %1871  ;;  %v1875_v57 = vpop.xlane.xlu1 %1874 }
 0xa47   : > { %v1882_v26 = vsub.f32 %v1850_v36, %v1872_v31  ;;  %v1883_v13 = vsub.f32 %v1851_v34, %v1875_v57 }
 0xa49   : > { %v1896_v17 = vmul.f32 1.442695, %v1882_v26  ;;  %v1898_v62 = vmul.f32 1.442695, %v1883_v13 }
 0xa4b   : > { %2951 = vpow2.f32 %v1896_v17 }
 0xa4c   : > { %v3546_v56 = vpop.eup %2943  ;;  %2953 = vpow2.f32 %v1892_v37 }
 0xa4d   : > { %v1906_v60 = vsel %vm398_vm0, %v3546_v56, 0.0  ;;  %v2946_v24 = vpop.eup %2945  ;;  %2955 = vpow2.f32 %v1898_v62 }
 0xa4e   : > { %1907 = vadd.xlane.f32.xlu0 %v1906_v60  ;;  %v1900_v41 = vsel %vm398_vm0, %v2946_v24, 0.0 }
 0xa50   : > { %v3550_v25 = vpop.eup %2947 }
 0xa51   : > { %v1909_v27 = vsel %vm398_vm0, %v3550_v25, 0.0  ;;  %v2950_v40 = vpop.eup %2949 }
 0xa52   : > { %1901 = vadd.xlane.f32.xlu0 %v1900_v41  ;;  %1910 = vadd.xlane.f32.xlu1 %v1909_v27  ;;  %v1903_v36 = vsel %vm398_vm0, %v2950_v40, 0.0  ;;  %v2828_v27 = vld [vmem:[%s3705_s9 + $0x10] sm:$0xff]  }
 0xa56   : > { %1904 = vadd.xlane.f32.xlu1 %v1903_v36  ;;  %v2830_v36 = vld [vmem:[%s3705_s9] sm:$0xff]  }
 0xa58   : > { %v3556_v35 = vpop.eup %2951 }
 0xa59   : > { %v1918_v38 = vsel %vm398_vm0, %v3556_v35, 0.0  ;;  %v3560_v59 = vpop.eup %2953 }
 0xa5a   : > { %1919 = vadd.xlane.f32.xlu0 %v1918_v38  ;;  %v1912_v39 = vsel %vm398_vm0, %v3560_v59, 0.0 }
 0xa5e   : > { %1913 = vadd.xlane.f32.xlu0 %v1912_v39 }
 0xa67   : > { %1948 = vrot.lane.b32.xlu1 %v3244_v29, %s2993_s29  ;;  %v1894_v29 = vmul.f32 1.442695, %v1881_v19 }
 0xa69   : > { %2957 = vpow2.f32 %v1894_v29 }
 0xa6b   : > { %1946 = vrot.lane.b32.xlu1 %v3253_v58, %s2993_s29 }
 0xa74   : > { %1950 = vrot.lane.b32.xlu0 %v3240_v53, %s2993_s29  ;;  %v2956_v53 = vpop.eup %2955 }
 0xa75   : > { %v1921_v58 = vsel %vm398_vm0, %v2956_v53, 0.0 }
 0xa76   : > { %v2958_v43 = vpop.eup %2957 }
 0xa77   : > { %v1915_v46 = vsel %vm398_vm0, %v2958_v43, 0.0 }
 0xa78   : > { %2756 = vrot.lane.b32.xlu0 %v2755_v47, %s2994_s30 }
 0xa7c   : > { %2766 = vrot.lane.b32.xlu0 %v2765_v30, %s2995_s12 }
 0xa80   : > { %2776 = vrot.lane.b32.xlu0 %v2775_v54, %s2994_s30 }
 0xa8f   : > { %1922 = vadd.xlane.f32.xlu1 %v1921_v58 }
 0xa93   : > { %1916 = vadd.xlane.f32.xlu1 %v1915_v46 }
 0xaa4   : > { %1944 = vrot.lane.b32.xlu1 %v3257_v61, %s2993_s29 }
 0xaa8   : > { %2761 = vrot.lane.b32.xlu1 %v2760_v45, %s2994_s30 }
 0xaac   : > { %2771 = vrot.lane.b32.xlu1 %v2770_v55, %s2995_s12 }
 0xab0   : > { %2781 = vrot.lane.b32.xlu1 %v2780_v52, %s2994_s30  ;;  %s3668_s30 = scalar_lea.vmem %s3707_s11, %s2435_s19 }
 0xad7   : > { %v1908_v47 = vpop.xlane.xlu0 %1907 }
 0xadb   : > { %v1902_v28 = vpop.xlane.xlu0 %1901  ;;  %v1911_v21 = vpop.xlane.xlu1 %1910 }
 0xadc   : > { %2959 = vrcp.f32 %v1902_v28 }
 0xadf   : > { %v1905_v54 = vpop.xlane.xlu1 %1904 }
 0xae0   : > { %2961 = vrcp.f32 %v1905_v54 }
 0xae1   : > { %2963 = vrcp.f32 %v1911_v21 }
 0xae2   : > { %2965 = vrcp.f32 %v1908_v47 }
 0xae3   : > { %v1920_v61 = vpop.xlane.xlu0 %1919  ;;  %v1949_v42 = vpop.permute.xlu1 %1948 }
 0xae7   : > { %v1914_v20 = vpop.xlane.xlu0 %1913  ;;  %v1947_v50 = vpop.permute.xlu1 %1946 }
 0xae9   : > { %v2960_v63 = vpop.eup %2959 }
 0xaea   : > { %v1932_v33 = vmul.f32 %v2960_v63, %v2946_v24 }
 0xaeb   : > { %v1951_v44 = vpop.permute.xlu0 %1950 }
 0xaec   : > { %2693 = vmatprep.subr.bf16.mxu1 %v1951_v44 }
 0xaed   : > { %v2962_v45 = vpop.eup %2961  ;;  %2694 = vmatpush3.bf16.msra.mxu1 %v1951_v44 }
 0xaee   : > { %2695 = vmatprep.subr.bf16.mxu1 %v1949_v42  ;;  %v1933_v48 = vmul.f32 %v2962_v45, %v2950_v40  ;;  %v2964_v52 = vpop.eup %2963  ;;  %v2829_v40 = vld [vmem:[%s3705_s9 + $0x8] sm:$0xff]  }
 0xaef   : > { %v2966_v32 = vpop.eup %2965  ;;  %v1935_v34 = vmul.f32 %v2964_v52, %v3550_v25  ;;  %v2757_v46 = vpop.permute.xlu0 %2756 }
 0xaf0   : > { %v1940_v55 = vpack.c.bf16 %v1933_v48, %v1932_v33  ;;  %v1934_v18 = vmul.f32 %v2966_v32, %v3546_v56  ;;  %v2827_v56 = vld [vmem:[%s3705_s9 + $0x18] sm:$0xff]   ;;  %v2759_v2 = vunpack.i.h.bf16 %v2757_v46  ;;  %v2758_v4 = vunpack.i.l.bf16 %v2757_v46  ;;  %v2432_v46 = vld [vmem:[%s3706_s10] ss:$0 sm:$0xff] }
 0xaf1   : > { %2696 = vmatpush3.bf16.msra.mxu1 %v1949_v42 }
 0xaf2   : > { %2697 = vmatprep.subr.bf16.mxu1 %v1947_v50  ;;  %2701 = vmatprep.mubr.msk.bf16.mxu1 %vm398_vm0, %v1940_v55  ;;  %v1941_v23 = vpack.c.bf16 %v1935_v34, %v1934_v18  ;;  %v2130_v45 = vsel %vm868_vm1, %v3349_v9, %v2759_v2  ;;  %v2129_v33 = vsel %vm868_vm1, %v3345_v1, %v2758_v4  ;;  %v2976_v4 = vld [vmem:[%s3073_s22] sm:$0xff] }
 0xaf3   : > { %v2767_v28 = vpop.permute.xlu0 %2766 }
 0xaf4   : > { %v2769_v6 = vunpack.i.h.bf16 %v2767_v28 }
 0xaf5   : > { %2698 = vmatpush3.bf16.msra.mxu1 %v1947_v50 }
 0xaf6   : > { %v2139_v9 = vsel %vm2137_vm2, %v2130_v45, %v2769_v6 }
 0xb18   : > { %v1923_v51 = vpop.xlane.xlu1 %1922 }
 0xb19   : > { %2967 = vrcp.f32 %v1923_v51 }
 0xb1a   : > { %2969 = vrcp.f32 %v1914_v20 }
 0xb1b   : > { %2971 = vrcp.f32 %v1920_v61 }
 0xb1c   : > { %v1917_v30 = vpop.xlane.xlu1 %1916 }
 0xb1d   : > { %2973 = vrcp.f32 %v1917_v30 }
 0xb20   : > { %v1945_v3 = vpop.permute.xlu1 %1944 }
 0xb21   : > { %2699 = vmatprep.subr.bf16.mxu1 %v1945_v3 }
 0xb22   : > { %2700 = vmatpush3.bf16.msra.mxu1 %v1945_v3 }
 0xb23   : > { %2709 = vmatprep.subr.bf16.mxu1 %v2827_v56 }
 0xb25   : > { %2702 = vmatmul.mubr.msk.bf16.vlgmr.msra.gmra.mxu1 %vm398_vm0, %v1941_v23 }
 0xb26   : > { %v2968_v22 = vpop.eup %2967  ;;  %2710 = vmatpush3.bf16.msra.mxu1 %v2827_v56 }
 0xb27   : > { %v2970_v8 = vpop.eup %2969  ;;  %v1939_v37 = vmul.f32 %v2968_v22, %v2956_v53  ;;  %2711 = vmatprep.subr.bf16.mxu1 %v2828_v27 }
 0xb28   : > { %v2972_v31 = vpop.eup %2971  ;;  %v1936_v17 = vmul.f32 %v2970_v8, %v3560_v59 }
 0xb29   : > { %v1938_v24 = vmul.f32 %v2972_v31, %v3556_v35 }
 0xb2a   : > { %v2974_v26 = vpop.eup %2973  ;;  %2712 = vmatpush3.bf16.msra.mxu1 %v2828_v27 }
 0xb2b   : > { %v1937_v60 = vmul.f32 %v2974_v26, %v2958_v43  ;;  %v1943_v25 = vpack.c.bf16 %v1939_v37, %v1938_v24  ;;  %2713 = vmatprep.subr.bf16.mxu1 %v2829_v40  ;;  %v2762_v43 = vpop.permute.xlu1 %2761 }
 0xb2c   : > { %v2764_v54 = vunpack.i.h.bf16 %v2762_v43  ;;  %v2763_v61 = vunpack.i.l.bf16 %v2762_v43 }
 0xb2d   : > { %v1942_v41 = vpack.c.bf16 %v1937_v60, %v1936_v17 }
 0xb2e   : > { %2714 = vmatpush3.bf16.msra.mxu1 %v2829_v40  ;;  %v2132_v48 = vsel %vm868_vm1, %v3347_v7, %v2764_v54  ;;  %v2131_v55 = vsel %vm868_vm1, %v3343_v5, %v2763_v61 }
 0xb2f   : > { %2705 = vmatprep.mubr.msk.bf16.mxu1 %vm398_vm0, %v1942_v41  ;;  %2715 = vmatprep.subr.bf16.mxu1 %v2830_v36  ;;  %v2772_v47 = vpop.permute.xlu1 %2771 }
 0xb30   : > { %2706 = vmatmul.mubr.msk.bf16.gmra.mxu1 %vm398_vm0, %v1943_v25  ;;  %v2774_v20 = vunpack.i.h.bf16 %v2772_v47  ;;  %v2773_v15 = vunpack.i.l.bf16 %v2772_v47  ;;  %v2975_v47 = vld [vmem:[%s3073_s22 + $0x10] sm:$0xff] }
 0xb32   : > { %2716 = vmatpush3.bf16.msra.mxu1 %v2830_v36  ;;  %v2140_v51 = vsel %vm2137_vm2, %v2131_v55, %v2773_v15  ;;  %v2141_v52 = vsel %vm2137_vm2, %v2132_v48, %v2774_v20  ;;  %v2977_v20 = vld [vmem:[%s3073_s22 + $0x18] sm:$0xff] }
 0xb33   : > { %v2782_v21 = vpop.permute.xlu1 %2781 }
 0xb34   : > { %v2784_v37 = vunpack.i.h.bf16 %v2782_v21  ;;  %v2783_v17 = vunpack.i.l.bf16 %v2782_v21 }
 0xbe5   : > { %v2703_v35 = vpop.f32.mrf.mxu1 }
 0xbe7   : > { %v2002_v38 = vpop.f32.mrf.mxu1 }
 0xbe9   : > { %v2704_v59 = vpop.f32.mrf.mxu1 }
 0xbea   : > { %v2785_v39 = vpack.i.bf16 %v2704_v59, %v2703_v35  ;;  %v2135_v59 = vsel %vm868_vm1, %v3351_v10, %v2783_v17 }
 0xbeb   : > { %v2005_v16 = vpop.f32.mrf.mxu1 }
 0xbec   : > { %v2790_v57 = vpack.i.bf16 %v2005_v16, %v2002_v38  ;;  %2786 = vrot.lane.b32.xlu1 %v2785_v39, %s2996_s25  ;;  %v2136_v38 = vsel %vm868_vm1, %v3355_v12, %v2784_v37 }
 0xbee   : > { %2791 = vrot.lane.b32.xlu0 %v2790_v57, %s2996_s25 }
 0xbf0   : > { %2801 = vrot.lane.b32.xlu1 %v2800_v0, %s2995_s12  ;;  %v2707_v13 = vpop.f32.mrf.mxu1  ;;  %v2777_v0 = vpop.permute.xlu0 %2776 }
 0xbf1   : > { %v2779_v31 = vunpack.i.h.bf16 %v2777_v0  ;;  %v2778_v26 = vunpack.i.l.bf16 %v2777_v0 }
 0xbf2   : > { %2796 = vrot.lane.b32.xlu0 %v2795_v49, %s2995_s12  ;;  %v2018_v19 = vpop.f32.mrf.mxu1  ;;  %v2768_v49 = vunpack.i.l.bf16 %v2767_v28 }
 0xbf3   : > { %v2134_v36 = vsel %vm868_vm1, %v3357_v14, %v2779_v31  ;;  %v2133_v35 = vsel %vm868_vm1, %v3353_v11, %v2778_v26 }
 0xbf4   : > { %v2708_v62 = vpop.f32.mrf.mxu1  ;;  %v2138_v34 = vsel %vm2137_vm2, %v2129_v33, %v2768_v49  ;;  %v2979_v33 = vld [vmem:[%s3073_s22 + $0x30] sm:$0xff] }
 0xbf5   : > { %v2810_v29 = vpack.i.bf16 %v2708_v62, %v2707_v13 }
 0xbf6   : > { %v2021_v53 = vpop.f32.mrf.mxu1 }
 0xbf7   : > { %v2805_v58 = vpack.i.bf16 %v2021_v53, %v2018_v19  ;;  %2811 = vrot.lane.b32.xlu1 %v2810_v29, %s2996_s25 }
 0xbf9   : > { %2806 = vrot.lane.b32.xlu0 %v2805_v58, %s2996_s25 }
 0xc5e   : > { %v2787_v63 = vpop.permute.xlu1 %2786 }
 0xc5f   : > { %v2789_v42 = vunpack.i.h.bf16 %v2787_v63  ;;  %v2788_v44 = vunpack.i.l.bf16 %v2787_v63  ;;  %v2978_v63 = vld [vmem:[%s3073_s22 + $0x8] sm:$0xff] }
 0xc60   : > { %v2792_v50 = vpop.permute.xlu0 %2791 }
 0xc61   : > { %v2794_v30 = vunpack.i.h.bf16 %v2792_v50  ;;  %v2793_v32 = vunpack.i.l.bf16 %v2792_v50  ;;  %v2149_v3 = vsel %vm2146_vm3, %v2140_v51, %v2788_v44  ;;  %v2150_v1 = vsel %vm2146_vm3, %v2141_v52, %v2789_v42  ;;  %v2980_v51 = vld [vmem:[%s3073_s22 + $0x20] sm:$0xff] }
 0xc62   : > { %v2164_v23 = vpack.c.bf16 %v2150_v1, %v2149_v3  ;;  %v2802_v22 = vpop.permute.xlu1 %2801 }
 0xc63   : > { %v2148_v7 = vsel %vm2146_vm3, %v2139_v9, %v2794_v30  ;;  %v2147_v18 = vsel %vm2146_vm3, %v2138_v34, %v2793_v32  ;;  %v2804_v60 = vunpack.i.h.bf16 %v2802_v22  ;;  %v2803_v24 = vunpack.i.l.bf16 %v2802_v22  ;;  %v2981_v34 = vld [vmem:[%s3073_s22 + $0x38] sm:$0xff] }
 0xc64   : > { %v2163_v5 = vpack.c.bf16 %v2148_v7, %v2147_v18  ;;  %v2797_v8 = vpop.permute.xlu0 %2796  ;;  %v2982_v7 = vld [vmem:[%s3073_s22 + $0x28] sm:$0xff] }
 0xc65   : > { %v2799_v41 = vunpack.i.h.bf16 %v2797_v8  ;;  %v2798_v25 = vunpack.i.l.bf16 %v2797_v8  ;;  %v2144_v16 = vsel %vm2137_vm2, %v2135_v59, %v2803_v24  ;;  %v2145_v57 = vsel %vm2137_vm2, %v2136_v38, %v2804_v60 }
 0xc66   : > { %2717 = vmatprep.mubr.msk.bf16.mxu1 %vm398_vm0, %v2163_v5 }
 0xc67   : > { %2718 = vmatmul.mubr.msk.bf16.vlgmr.msra.gmra.mxu1 %vm398_vm0, %v2164_v23  ;;  %v2143_v14 = vsel %vm2137_vm2, %v2134_v36, %v2799_v41  ;;  %v2142_v62 = vsel %vm2137_vm2, %v2133_v35, %v2798_v25 }
 0xc69   : > { %v2812_v56 = vpop.permute.xlu1 %2811 }
 0xc6a   : > { %v2814_v27 = vunpack.i.h.bf16 %v2812_v56  ;;  %v2813_v40 = vunpack.i.l.bf16 %v2812_v56 }
 0xc6b   : > { %v2807_v39 = vpop.permute.xlu0 %2806 }
 0xc6c   : > { %v2809_v13 = vunpack.i.h.bf16 %v2807_v39  ;;  %v2808_v19 = vunpack.i.l.bf16 %v2807_v39  ;;  %v2153_v11 = vsel %vm2146_vm3, %v2144_v16, %v2813_v40  ;;  %v2154_v12 = vsel %vm2146_vm3, %v2145_v57, %v2814_v27 }
 0xc6d   : > { %v2166_v58 = vpack.c.bf16 %v2154_v12, %v2153_v11 }
 0xc6e   : > { %v2152_v10 = vsel %vm2146_vm3, %v2143_v14, %v2809_v13  ;;  %v2151_v29 = vsel %vm2146_vm3, %v2142_v62, %v2808_v19 }
 0xc6f   : > { %v2165_v53 = vpack.c.bf16 %v2152_v10, %v2151_v29 }
 0xc71   : > { %2721 = vmatprep.mubr.msk.bf16.mxu1 %vm398_vm0, %v2165_v53 }
 0xc72   : > { %2722 = vmatmul.mubr.msk.bf16.gmra.mxu1 %vm398_vm0, %v2166_v58 }
 0xd27   : > { %v2719_v43 = vpop.f32.mrf.mxu1 }
 0xd28   : > { %v2270_v28 = vadd.f32 %v2975_v47, %v2719_v43 }
 0xd29   : > { %v2237_v21 = vpop.f32.mrf.mxu1 }
 0xd2a   : > { %v2285_v2 = vadd.f32 %v2432_v46, %v2270_v28  ;;  %v2268_v0 = vadd.f32 %v2976_v4, %v2237_v21 }
 0xd2b   : > { %v2720_v54 = vpop.f32.mrf.mxu1 }
 0xd2c   : > { %2293 = vst.msk [vmem:[%s3668_s30 + $0x10] sm:$0xff] %vm398_vm0, %v2285_v2  ;;  %v2283_v61 = vadd.f32 %v2432_v46, %v2268_v0  ;;  %v2271_v15 = vadd.f32 %v2977_v20, %v2720_v54 }
 0xd2d   : > { %v2240_v6 = vpop.f32.mrf.mxu1 }
 0xd2e   : > { %2291 = vst.msk [vmem:[%s3668_s30] sm:$0xff] %vm398_vm0, %v2283_v61  ;;  %v2286_v49 = vadd.f32 %v2432_v46, %v2271_v15  ;;  %v2269_v42 = vadd.f32 %v2978_v63, %v2240_v6 }
 0xd30   : > { %2294 = vst.msk [vmem:[%s3668_s30 + $0x18] sm:$0xff] %vm398_vm0, %v2286_v49  ;;  %v2284_v44 = vadd.f32 %v2432_v46, %v2269_v42 }
 0xd32   : > { %2292 = vst.msk [vmem:[%s3668_s30 + $0x8] sm:$0xff] %vm398_vm0, %v2284_v44  ;;  %v2723_v45 = vpop.f32.mrf.mxu1 }
 0xd33   : > { %v2274_v48 = vadd.f32 %v2979_v33, %v2723_v45 }
 0xd34   : > { %v2253_v55 = vpop.f32.mrf.mxu1 }
 0xd35   : > { %v2289_v50 = vadd.f32 %v2432_v46, %v2274_v48  ;;  %v2272_v52 = vadd.f32 %v2980_v51, %v2253_v55 }
 0xd36   : > { %v2724_v30 = vpop.f32.mrf.mxu1 }
 0xd37   : > { %2297 = vst.msk [vmem:[%s3668_s30 + $0x30] sm:$0xff] %vm398_vm0, %v2289_v50  ;;  %v2287_v32 = vadd.f32 %v2432_v46, %v2272_v52  ;;  %v2275_v9 = vadd.f32 %v2981_v34, %v2724_v30 }
 0xd38   : > { %v2256_v3 = vpop.f32.mrf.mxu1 }
 0xd39   : > { %2295 = vst.msk [vmem:[%s3668_s30 + $0x20] sm:$0xff] %vm398_vm0, %v2287_v32  ;;  %v2290_v1 = vadd.f32 %v2432_v46, %v2275_v9  ;;  %v2273_v18 = vadd.f32 %v2982_v7, %v2256_v3 }
 0xd3b   : > { %2298 = vst.msk [vmem:[%s3668_s30 + $0x38] sm:$0xff] %vm398_vm0, %v2290_v1  ;;  %v2288_v5 = vadd.f32 %v2432_v46, %v2273_v18 }
 0xd3d   : > { %2296 = vst.msk [vmem:[%s3668_s30 + $0x28] sm:$0xff] %vm398_vm0, %v2288_v5 }
 0xd3e PF: > { %s21_s17 = sadd.s32 1, %s2989_s17  }
 0xd3f   : > { %p18_p4 = scmp.ge.s32.totalorder %s21_s17, 4  }
 0xd41   :  { %20 = sbr.rel (!%p18_p4) target bundleno = 1 (0x1), region = 94 }

// kernel: climax_forward.15
= control target key start
LH: loop header
LB: loop body
LE: loop exit
PB: predicated region body
PF: predicated region fallthrough
CT: control target
= control target key end

     0   :  { %v39_v3 = vlaneseq  ;;  %s180_s0 = inlined_call_operand.vmem [shape: f32[10,256], index: 0, kind: input, shape index: {}]   ;;  %s181_s1 = inlined_call_operand.vmem [shape: f32[10,256], index: 1, kind: input, shape index: {}]   ;;  %s182_s2 = inlined_call_operand.vmem [shape: f32[1,256], index: 2, kind: input, shape index: {}]   ;;  %s183_s3 = inlined_call_operand.hbm [shape: f32[1,1], index: 3, kind: output, shape index: {}]  }
   0x1   :  { %v23_v0 = vld [vmem:[%s180_s0 + $0x10] sm:$0x3]  ;;  %v24_v1 = vld [vmem:[%s180_s0 + $0x18] sm:$0x3]  ;;  %v21_v6 = vld [vmem:[%s180_s0] sm:$0xff] }
   0x2   :  { %v27_v2 = vld [vmem:[%s181_s1 + $0x10] sm:$0x3]  ;;  %v28_v4 = vld [vmem:[%s181_s1 + $0x18] sm:$0x3]  ;;  %v40_v8 = vshrl.u32 %v39_v3, 7  ;;  %v22_v9 = vld [vmem:[%s180_s0 + $0x8] sm:$0xff] }
   0x3   :  { %v31_v5 = vsub.f32 %v23_v0, %v27_v2  ;;  %v32_v7 = vsub.f32 %v24_v1, %v28_v4  ;;  %v25_v10 = vld [vmem:[%s181_s1] sm:$0xff]  ;;  %v26_v11 = vld [vmem:[%s181_s1 + $0x8] sm:$0xff] }
   0x4   :  { %v37_v13 = vld [vmem:[%s182_s2] sm:$0x3]  ;;  %v29_v14 = vsub.f32 %v21_v6, %v25_v10  ;;  %v30_v15 = vsub.f32 %v22_v9, %v26_v11 }
   0x5   :  { %v35_v12 = vmul.f32 %v31_v5, %v31_v5 }
   0x6   :  { %8 = vsyncpa [#allocation3], 0  ;;  %v36_v16 = vmul.f32 %v32_v7, %v32_v7  ;;  %v41_v17 = vsub.s32 0, %v40_v8  ;;  %v45_v18 = vsub.s32 1, %v40_v8  ;;  %v55_v19 = vadd.s32 8, %v40_v8  ;;  %s127_s0 = smov [#allocation2]  }
   0x7   :  { %v33_v22 = vmul.f32 %v29_v14, %v29_v14  ;;  %v34_v23 = vmul.f32 %v30_v15, %v30_v15  ;;  %vm69_vm1 = vcmask 1041408   ;;  %vm19_vm2 = vcmask 0   ;;  %s94_s1 = sshll.u32 %s127_s0, 4  ;;  %s95_s1 = int_to_ptr.vmem [resolvable:$true] %s94_s1 }
   0x8   :  { %v42_v20 = vrot.slane %v37_v13, %v41_v17  ;;  %v46_v21 = vrot.slane %v37_v13, %v45_v18  ;;  %vm61_vm0 = vcmp.lt.s32.totalorder %v55_v19, 10  ;;  %v126_v34 = vmov 0.0   ;;  %s104_s2 = scalar_lea.vmem %s95_s1, 16  ;;  %s108_s30 = scalar_lea.vmem %s95_s1, 32 }
   0x9   :  { %20 = vst.msk [vmem:[#allocation2] sm:$0x1] %vm19_vm2, %v126_v34  ;;  %p105_p0 = scmp.ne.s32.totalorder %s95_s1, %s104_s2  ;;  %p109_p1 = scmp.lt.s32.totalorder %s95_s1, %s95_s1 }
   0xa   :  { %v51_v24 = vmul.f32 %v42_v20, %v35_v12  ;;  %v52_v25 = vmul.f32 %v46_v21, %v36_v16  ;;  %v49_v28 = vmul.f32 %v42_v20, %v33_v22  ;;  %v50_v29 = vmul.f32 %v46_v21, %v34_v23  ;;  %p110_p2 = scmp.lt.s32.totalorder %s108_s30, %s104_s2 }
   0xc   :  { %v64_v26 = vsel %vm61_vm0, %v51_v24, 0.0  ;;  %v65_v27 = vsel %vm61_vm0, %v52_v25, 0.0  ;;  %v66_v33 = vadd.f32 %v50_v29, %v49_v28  ;;  %p111_p3 = por %p110_p2, %p109_p1 }
   0xd   :  { %v70_v30 = vsel %vm69_vm1, %v64_v26, 0.0  ;;  %v71_v31 = vsel %vm69_vm1, %v65_v27, 0.0 }
   0xe   :  { %v72_v32 = vadd.f32 %v71_v31, %v70_v30  ;;  %p112_p4 = pnand %p111_p3, %p105_p0 }
  0x10   :  { %73 = vadd.xlane.f32.xlu0 %v72_v32  ;;  %v83_v45 = vld [vmem:[#allocation2] sm:$0x1] }
  0x14   :  { %67 = vadd.xlane.f32.xlu0 %v66_v33 }
  0x99   :  { %v74_v35 = vpop.xlane.xlu0 %73 }
  0x9a   :  { %v75_v36 = vsel %vm69_vm1, %v74_v35, 0.0 }
  0x9d   :  { %v68_v37 = vpop.xlane.xlu0 %67 }
  0x9e   :  { %v76_v38 = vadd.f32 %v75_v36, %v68_v37 }
  0xa0   :  { %v77_v39 = vrot.slane %v76_v38, 4 }
  0xa2   :  { %v78_v40 = vadd.f32 %v77_v39, %v76_v38 }
  0xa4   :  { %v79_v41 = vrot.slane %v78_v40, 2 }
  0xa6   :  { %v80_v42 = vadd.f32 %v79_v41, %v78_v40 }
  0xa8   :  { %v81_v43 = vrot.slane %v80_v42, 1 }
  0xaa   :  { %v82_v44 = vadd.f32 %v81_v43, %v80_v42 }
  0xac   :  { %v84_v46 = vmul.f32 0.000390625, %v82_v44 }
  0xae   :  { %v85_v47 = vadd.f32 %v84_v46, %v83_v45 }
  0xb0   :  { %87 = vst.msk [vmem:[#allocation2] sm:$0x1] %vm19_vm2, %v85_v47 }
  0xb1   :  { %115 = shalt.err (!%p112_p4)
}
  0xb2   :  { %97 = dma.vmem_to_hbm [thread:$0]  %s95_s1, 16, %s183_s3, [#allocation3]  }
  0xb3   :  { %124 = dma.done.wait [#allocation3], 16  }
  0xb4   :  { %125 = vsyncadd [#allocation3], 4294967280 }
  0xb5   :  { %101 = vsyncpa [#allocation3], 1 }

</bundles_post_ra>
